<compile_context>
chip_gen: v6e
topology: v6e:2x2x1
jax: 0.10.0
libtpu: 0.0.40
codegen_flags: <defaults>
</compile_context>

<pallas_src>
import jax
import jax.numpy as jnp
from jax.experimental import pallas as pl
from jax.experimental.pallas import tpu as pltpu


# ---------------------------------------------------------------------------
# Fused kernel
# ---------------------------------------------------------------------------
# conv2 output column j2 = 2*b + s reads input column w1 = 2*b + s + kw2.
# With stage-1 W stored parity-deinterleaved (par = w1 % 2, q = w1 // 2):
#   (par, kw2) -> (s that uses this plane, q offset)
_TAB = {
    (0, 0): (0, 0), (0, 1): (1, 1), (0, 2): (0, 1),
    (1, 0): (1, 0), (1, 1): (0, 0), (1, 2): (1, 1),
}


def _make_kernel(N):
    HP, WQ = 7, 24          # stage-1 pooled spatial: 7 x 48  (48 = 2 parities x 24)

    def kernel(p1_ref, w1bd_ref, b1_ref, w2g_ref, b2_ref, wfc_hbm,
               bfc_ref, wfc1_ref, bfc1_ref, o_ref,
               y1_ref, wfc_vmem, wfc_sem):
        # ---- overlap the big fc-weight DMA (1.8 MB) with the conv compute ----
        wfc_cp = pltpu.make_async_copy(wfc_hbm, wfc_vmem, wfc_sem)
        wfc_cp.start()

        # ---------------- stage 1: conv1 + maxpool2 + relu --------------------
        # p1 rows ordered (n, hp, wpar, wq); w1bd is block-diagonal over the 4
        # pool phases, so max over the four 64-lane blocks == maxpool(conv1).
        w1bd = w1bd_ref[...]                 # (36, 256) bf16
        b1 = b1_ref[...]                     # (1, 64) f32
        for n in range(N):
            for hp in range(HP):
                r0 = (n * HP + hp) * 48
                rows = p1_ref[r0:r0 + 48, :]                          # (48, 36)
                z = jnp.dot(rows, w1bd,
                            preferred_element_type=jnp.float32)       # (48, 256)
                m = jnp.maximum(jnp.maximum(z[:, 0:64], z[:, 64:128]),
                                jnp.maximum(z[:, 128:192], z[:, 192:256]))
                m = jnp.maximum(m + b1, 0.0)                          # (48, 64)
                y1_ref[n, 0, hp] = m[0:24, :]     # even pooled-W columns
                y1_ref[n, 1, hp] = m[24:48, :]    # odd pooled-W columns

        # ---------------- stage 2: conv2 + maxpool2 + relu --------------------
        # For each (n, parity) plane: dot the full (7*24, 64) activation with a
        # (64, 96) weight group (lane blocks = kh2), then accumulate shifted
        # static slices -- no strided ops, no patch tensor.
        w2g = w2g_ref[...]                   # (3, 64, 96) bf16
        b2 = b2_ref[...]                     # (1, 32) f32
        acc = [[jnp.zeros((5, 23, 32), jnp.float32) for _ in range(2)]
               for _ in range(N)]            # acc[n][s], s = output W parity
        for n in range(N):
            for par in range(2):
                lhs = y1_ref[n, par]                           # (7, 24, 64) f32
                lhs2 = lhs.reshape(HP * WQ, 64).astype(jnp.bfloat16)
                for kw2 in range(3):
                    s, qoff = _TAB[(par, kw2)]
                    R = jnp.dot(lhs2, w2g[kw2],
                                preferred_element_type=jnp.float32)   # (168, 96)
                    R3 = R.reshape(HP, WQ, 96)
                    for kh2 in range(3):
                        acc[n][s] = acc[n][s] + R3[kh2:kh2 + 5,
                                                   qoff:qoff + 23,
                                                   32 * kh2:32 * (kh2 + 1)]

        # pooling (W: max over parity, H: max over row pairs), bias, relu.
        # max(conv + bias) == max(conv) + bias, so bias is added once at the end.
        rc = []
        for n in range(N):
            c2 = jnp.maximum(acc[n][0], acc[n][1])             # (5, 23, 32)
            ra0 = jnp.maximum(jnp.maximum(c2[0], c2[1]) + b2, 0.0)   # (23, 32)
            ra1 = jnp.maximum(jnp.maximum(c2[2], c2[3]) + b2, 0.0)   # (23, 32)
            # lanes ordered (a, c) to match the permuted fc weight
            rc.append(jnp.concatenate([ra0, ra1], axis=-1)
                      .astype(jnp.bfloat16))                   # (23, 64)

        # ---------------- head: fc + relu + fc1 + log_softmax -----------------
        wfc_cp.wait()                        # fc weight is now resident in VMEM
        hacc = jnp.zeros((N, 640), jnp.float32)
        for b in range(23):
            lhs_b = jnp.concatenate([rc[n][b:b + 1, :] for n in range(N)],
                                    axis=0)                    # (N, 64) bf16
            hacc = hacc + jnp.dot(lhs_b, wfc_vmem[b],
                                  preferred_element_type=jnp.float32)
        h = jnp.maximum(hacc + bfc_ref[...], 0.0).astype(jnp.bfloat16)  # (N, 640)
        z = jnp.dot(h, wfc1_ref[...], preferred_element_type=jnp.float32)
        z = z + bfc1_ref[...]
        zmax = jnp.max(z, axis=-1, keepdims=True)
        zs = z - zmax
        lse = jnp.log(jnp.sum(jnp.exp(zs), axis=-1, keepdims=True))
        o_ref[...] = zs - lse

    return kernel


# ---------------------------------------------------------------------------
# pallas_call wrapper (single grid step; everything fits easily in VMEM)
# ---------------------------------------------------------------------------
def _full_spec(shape):
    n = len(shape)
    return pl.BlockSpec(shape, lambda i, _n=n: (0,) * _n)


def fused_net(p1, params, N, num_class):
    inputs = [p1, params["w1bd"], params["b1"], params["w2g"], params["b2"],
              params["wfc"], params["bfc"], params["wfc1"], params["bfc1"]]
    in_specs = []
    for i, a in enumerate(inputs):
        if i == 5:   # wfc stays in HBM; copied manually inside the kernel
            in_specs.append(pl.BlockSpec(memory_space=pl.ANY))
        else:
            in_specs.append(_full_spec(a.shape))
    return pl.pallas_call(
        _make_kernel(N),
        out_shape=jax.ShapeDtypeStruct((N, num_class), jnp.float32),
        grid_spec=pltpu.PrefetchScalarGridSpec(
            num_scalar_prefetch=0,
            grid=(1,),
            in_specs=in_specs,
            out_specs=_full_spec((N, num_class)),
            scratch_shapes=[
                pltpu.VMEM((N, 2, 7, 24, 64), jnp.float32),   # stage-1 activation
                pltpu.VMEM((23, 64, 640), jnp.bfloat16),      # fc weight buffer
                pltpu.SemaphoreType.DMA(()),
            ],
        ),
        compiler_params=pltpu.CompilerParams(
            dimension_semantics=("arbitrary",)),
        cost_estimate=pl.CostEstimate(
            flops=41_000_000, transcendentals=64, bytes_accessed=2_200_000),
    )(*inputs)


# ---------------------------------------------------------------------------
# XLA glue: stage-1 phase-im2col (tiny 48 KB input, fuses into one XLA fusion)
# ---------------------------------------------------------------------------
def build_stage1_patches(x):
    """x: (N, 16, 98) -> (N*7*2*24, 36) patches.

    Row order (n, hp, wpar, wq) [pooled-W parity-deinterleaved]; column order
    (ph, pw, kh, kw), matching the block-diagonal conv1 weight.
    """
    N = x.shape[0]
    cols = []
    for ph in range(2):
        for pw in range(2):
            for kh in range(3):
                for kw in range(3):
                    par_slabs = []
                    for wpar in range(2):
                        r0 = ph + kh
                        c0 = 2 * wpar + pw + kw
                        par_slabs.append(x[:, r0:r0 + 13:2, c0:c0 + 93:4])  # (N,7,24)
                    cols.append(jnp.stack(par_slabs, axis=2))               # (N,7,2,24)
    p = jnp.stack(cols, axis=-1)                                            # (N,7,2,24,36)
    return p.reshape(N * 7 * 2 * 24, 36)


# ---------------------------------------------------------------------------
# Parameters (mirrors torch init; weights pre-arranged for the kernel)
# ---------------------------------------------------------------------------
def conv_w_to_mat(w):
    """(Cout, Cin, KH, KW) -> (KH*KW*Cin, Cout)."""
    return jnp.transpose(w, (2, 3, 1, 0)).reshape(-1, w.shape[0])


def xavier_uniform(key, shape, fan_in, fan_out):
    bound = (6.0 / (fan_in + fan_out)) ** 0.5
    return jax.random.uniform(key, shape, jnp.float32, -bound, bound)


def init_params(key, num_class):
    ks = jax.random.split(key, 8)
    w1 = xavier_uniform(ks[0], (64, 1, 3, 3), 9, 64 * 9)
    b1 = jax.random.uniform(ks[1], (64,), jnp.float32, -9 ** -0.5, 9 ** -0.5)
    w2 = xavier_uniform(ks[2], (32, 64, 3, 3), 64 * 9, 32 * 9)
    b2 = jax.random.uniform(ks[3], (32,), jnp.float32,
                            -(64 * 9) ** -0.5, (64 * 9) ** -0.5)
    wfc = xavier_uniform(ks[4], (640, 1472), 1472, 640)
    bfc = jax.random.uniform(ks[5], (640,), jnp.float32,
                             -1472 ** -0.5, 1472 ** -0.5)
    wfc1 = xavier_uniform(ks[6], (num_class, 640), 640, num_class)
    bfc1 = jax.random.uniform(ks[7], (num_class,), jnp.float32,
                              -640 ** -0.5, 640 ** -0.5)

    # conv1 weight -> block-diagonal over the 4 maxpool phases (36, 256)
    w1mat = conv_w_to_mat(w1)                                   # (9, 64)
    w1bd = jnp.zeros((36, 256), jnp.float32)
    for p in range(4):
        w1bd = w1bd.at[9 * p:9 * (p + 1), 64 * p:64 * (p + 1)].set(w1mat)

    # conv2 weight -> per-kw2 groups, lane blocks indexed by kh2: (3, 64, 96)
    w2g = jnp.stack(
        [jnp.concatenate([w2[:, :, kh2, kw2].T for kh2 in range(3)], axis=1)
         for kw2 in range(3)], axis=0)

    # fc weight: fold torch's NCHW x.view(N,-1) flatten + the kernel's
    # (b, a, c) feature order into a one-time row permutation: (23, 64, 640)
    wfc_k = jnp.transpose(wfc.T.reshape(32, 2, 23, 640),
                          (2, 1, 0, 3)).reshape(23, 64, 640)

    return {
        "w1bd": w1bd.astype(jnp.bfloat16),
        "b1": b1.reshape(1, 64),
        "w2g": w2g.astype(jnp.bfloat16),
        "b2": b2.reshape(1, 32),
        "wfc": wfc_k.astype(jnp.bfloat16),
        "bfc": bfc.reshape(1, 640),
        "wfc1": wfc1.T.astype(jnp.bfloat16),     # (640, num_class)
        "bfc1": bfc1.reshape(1, num_class),
    }


# ---------------------------------------------------------------------------
# Forward pass (mirrors Net.forward)
# ---------------------------------------------------------------------------
def net_forward(x_nchw, params):
    N = x_nchw.shape[0]
    num_class = params["bfc1"].shape[-1]
    x = x_nchw[:, 0, :, :].astype(jnp.bfloat16)          # Cin = 1
    p1 = build_stage1_patches(x)                         # (N*336, 36) bf16
    # TODO(synk): nn.Dropout(0.2) is identity at inference; no RNG mask applied.
    return fused_net(p1, params, N, num_class)


if __name__ == "__main__":
    num_class = 10
    key = jax.random.PRNGKey(0)
    kx, kp = jax.random.split(key)

    # (N=2, C=1, H=16, W=98): flattened feature count is 1472 = 32*2*23,
    # exactly what nn.Linear(1472, 640) requires.
    x = jax.random.normal(kx, (2, 1, 16, 98), dtype=jnp.float32)
    params = init_params(kp, num_class)

    out = jax.jit(net_forward)(x, params)
    out = jax.block_until_ready(out)

    assert out.shape == (2, num_class), out.shape
    assert out.dtype == jnp.float32
    print("KERNEL_OK")
</pallas_src>

<mosaic_0001>
module attributes {stable_mosaic.version = 11 : i64} {
  func.func @kernel(%arg0: i32, %arg1: memref<672x36xbf16, #tpu.memory_space<vmem>>, %arg2: memref<36x256xbf16, #tpu.memory_space<vmem>>, %arg3: memref<1x64xf32, #tpu.memory_space<vmem>>, %arg4: memref<3x64x96xbf16, #tpu.memory_space<vmem>>, %arg5: memref<1x32xf32, #tpu.memory_space<vmem>>, %arg6: memref<23x64x640xbf16, #tpu.memory_space<any>>, %arg7: memref<1x640xf32, #tpu.memory_space<vmem>>, %arg8: memref<640x10xbf16, #tpu.memory_space<vmem>>, %arg9: memref<1x10xf32, #tpu.memory_space<vmem>>, %arg10: memref<2x10xf32, #tpu.memory_space<vmem>>, %arg11: memref<2x2x7x24x64xf32, #tpu.memory_space<vmem>>, %arg12: memref<23x64x640xbf16, #tpu.memory_space<vmem>>, %arg13: memref<!tpu.dma_semaphore, #tpu.memory_space<semaphore_mem>>) attributes {dimension_semantics = [#tpu.dimension_semantics<arbitrary>], iteration_bounds = array<i64: 1>, scalar_prefetch = 0 : i64, scratch_operands = 3 : i64, tpu.core_type = #tpu.core_type<tc>, window_params = [{pipeline_mode = #tpu.pipeline_mode<synchronous>, transform_indices = @transform_0, window_bounds = array<i64: 672, 36>}, {pipeline_mode = #tpu.pipeline_mode<synchronous>, transform_indices = @transform_1, window_bounds = array<i64: 36, 256>}, {pipeline_mode = #tpu.pipeline_mode<synchronous>, transform_indices = @transform_2, window_bounds = array<i64: 1, 64>}, {pipeline_mode = #tpu.pipeline_mode<synchronous>, transform_indices = @transform_3, window_bounds = array<i64: 3, 64, 96>}, {pipeline_mode = #tpu.pipeline_mode<synchronous>, transform_indices = @transform_4, window_bounds = array<i64: 1, 32>}, {}, {pipeline_mode = #tpu.pipeline_mode<synchronous>, transform_indices = @transform_6, window_bounds = array<i64: 1, 640>}, {pipeline_mode = #tpu.pipeline_mode<synchronous>, transform_indices = @transform_7, window_bounds = array<i64: 640, 10>}, {pipeline_mode = #tpu.pipeline_mode<synchronous>, transform_indices = @transform_8, window_bounds = array<i64: 1, 10>}, {pipeline_mode = #tpu.pipeline_mode<synchronous>, transform_indices = @transform_9, window_bounds = array<i64: 2, 10>}]} {
    tpu.enqueue_dma source(%arg6 : memref<23x64x640xbf16, #tpu.memory_space<any>>) target(%arg12 : memref<23x64x640xbf16, #tpu.memory_space<vmem>>) target_semaphore(%arg13 : memref<!tpu.dma_semaphore, #tpu.memory_space<semaphore_mem>>)
    %c0 = arith.constant 0 : index
    %c0_0 = arith.constant 0 : index
    %0 = vector.load %arg2[%c0, %c0_0] : memref<36x256xbf16, #tpu.memory_space<vmem>>, vector<36x256xbf16>
    %c0_1 = arith.constant 0 : index
    %c0_2 = arith.constant 0 : index
    %1 = vector.load %arg3[%c0_1, %c0_2] : memref<1x64xf32, #tpu.memory_space<vmem>>, vector<1x64xf32>
    %c0_3 = arith.constant 0 : index
    %c0_4 = arith.constant 0 : index
    %2 = vector.load %arg1[%c0_3, %c0_4] : memref<672x36xbf16, #tpu.memory_space<vmem>>, vector<48x36xbf16>
    %cst = arith.constant dense<0.000000e+00> : vector<48x256xf32>
    %3 = tpu.matmul %2, %0, %cst {dimension_numbers = #tpu.dot_dimension_numbers<[1], [0], [0], [1], [0, 0, 1, 1], [], []>} : vector<48x36xbf16>, vector<36x256xbf16>, vector<48x256xf32> -> vector<48x256xf32>
    %4 = vector.extract_strided_slice %3 {offsets = [0, 0], sizes = [48, 64], strides = [1, 1]} : vector<48x256xf32> to vector<48x64xf32>
    %5 = vector.extract_strided_slice %3 {offsets = [0, 64], sizes = [48, 64], strides = [1, 1]} : vector<48x256xf32> to vector<48x64xf32>
    %6 = arith.maximumf %4, %5 : vector<48x64xf32>
    %7 = vector.extract_strided_slice %3 {offsets = [0, 128], sizes = [48, 64], strides = [1, 1]} : vector<48x256xf32> to vector<48x64xf32>
    %8 = vector.extract_strided_slice %3 {offsets = [0, 192], sizes = [48, 64], strides = [1, 1]} : vector<48x256xf32> to vector<48x64xf32>
    %9 = arith.maximumf %7, %8 : vector<48x64xf32>
    %10 = arith.maximumf %6, %9 : vector<48x64xf32>
    %11 = vector.broadcast %1 : vector<1x64xf32> to vector<48x64xf32>
    %12 = arith.addf %10, %11 : vector<48x64xf32>
    %cst_5 = arith.constant 0.000000e+00 : f32
    %13 = vector.broadcast %cst_5 : f32 to vector<48x64xf32>
    %14 = arith.maximumf %12, %13 : vector<48x64xf32>
    %15 = vector.extract_strided_slice %14 {offsets = [0, 0], sizes = [24, 64], strides = [1, 1]} : vector<48x64xf32> to vector<24x64xf32>
    %c0_6 = arith.constant 0 : index
    %c0_7 = arith.constant 0 : index
    %c0_8 = arith.constant 0 : index
    %c0_9 = arith.constant 0 : index
    %c0_10 = arith.constant 0 : index
    %16 = vector.load %arg11[%c0_6, %c0_7, %c0_8, %c0_9, %c0_10] : memref<2x2x7x24x64xf32, #tpu.memory_space<vmem>>, vector<1x1x1x24x64xf32>
    %17 = vector.shape_cast %16 : vector<1x1x1x24x64xf32> to vector<24x64xf32>
    %18 = vector.shape_cast %15 : vector<24x64xf32> to vector<1x1x1x24x64xf32>
    tpu.vector_store %arg11[%c0_6, %c0_7, %c0_8, %c0_9, %c0_10], %18 {strides = array<i32>} : memref<2x2x7x24x64xf32, #tpu.memory_space<vmem>>, vector<1x1x1x24x64xf32>,
    %19 = vector.extract_strided_slice %14 {offsets = [24, 0], sizes = [24, 64], strides = [1, 1]} : vector<48x64xf32> to vector<24x64xf32>
    %c0_11 = arith.constant 0 : index
    %c1 = arith.constant 1 : index
    %c0_12 = arith.constant 0 : index
    %c0_13 = arith.constant 0 : index
    %c0_14 = arith.constant 0 : index
    %20 = vector.load %arg11[%c0_11, %c1, %c0_12, %c0_13, %c0_14] : memref<2x2x7x24x64xf32, #tpu.memory_space<vmem>>, vector<1x1x1x24x64xf32>
    %21 = vector.shape_cast %20 : vector<1x1x1x24x64xf32> to vector<24x64xf32>
    %22 = vector.shape_cast %19 : vector<24x64xf32> to vector<1x1x1x24x64xf32>
    tpu.vector_store %arg11[%c0_11, %c1, %c0_12, %c0_13, %c0_14], %22 {strides = array<i32>} : memref<2x2x7x24x64xf32, #tpu.memory_space<vmem>>, vector<1x1x1x24x64xf32>,
    %c48 = arith.constant 48 : index
    %c0_15 = arith.constant 0 : index
    %23 = vector.load %arg1[%c48, %c0_15] : memref<672x36xbf16, #tpu.memory_space<vmem>>, vector<48x36xbf16>
    %cst_16 = arith.constant dense<0.000000e+00> : vector<48x256xf32>
    %24 = tpu.matmul %23, %0, %cst_16 {dimension_numbers = #tpu.dot_dimension_numbers<[1], [0], [0], [1], [0, 0, 1, 1], [], []>} : vector<48x36xbf16>, vector<36x256xbf16>, vector<48x256xf32> -> vector<48x256xf32>
    %25 = vector.extract_strided_slice %24 {offsets = [0, 0], sizes = [48, 64], strides = [1, 1]} : vector<48x256xf32> to vector<48x64xf32>
    %26 = vector.extract_strided_slice %24 {offsets = [0, 64], sizes = [48, 64], strides = [1, 1]} : vector<48x256xf32> to vector<48x64xf32>
    %27 = arith.maximumf %25, %26 : vector<48x64xf32>
    %28 = vector.extract_strided_slice %24 {offsets = [0, 128], sizes = [48, 64], strides = [1, 1]} : vector<48x256xf32> to vector<48x64xf32>
    %29 = vector.extract_strided_slice %24 {offsets = [0, 192], sizes = [48, 64], strides = [1, 1]} : vector<48x256xf32> to vector<48x64xf32>
    %30 = arith.maximumf %28, %29 : vector<48x64xf32>
    %31 = arith.maximumf %27, %30 : vector<48x64xf32>
    %32 = vector.broadcast %1 : vector<1x64xf32> to vector<48x64xf32>
    %33 = arith.addf %31, %32 : vector<48x64xf32>
    %cst_17 = arith.constant 0.000000e+00 : f32
    %34 = vector.broadcast %cst_17 : f32 to vector<48x64xf32>
    %35 = arith.maximumf %33, %34 : vector<48x64xf32>
    %36 = vector.extract_strided_slice %35 {offsets = [0, 0], sizes = [24, 64], strides = [1, 1]} : vector<48x64xf32> to vector<24x64xf32>
    %c0_18 = arith.constant 0 : index
    %c0_19 = arith.constant 0 : index
    %c1_20 = arith.constant 1 : index
    %c0_21 = arith.constant 0 : index
    %c0_22 = arith.constant 0 : index
    %37 = vector.load %arg11[%c0_18, %c0_19, %c1_20, %c0_21, %c0_22] : memref<2x2x7x24x64xf32, #tpu.memory_space<vmem>>, vector<1x1x1x24x64xf32>
    %38 = vector.shape_cast %37 : vector<1x1x1x24x64xf32> to vector<24x64xf32>
    %39 = vector.shape_cast %36 : vector<24x64xf32> to vector<1x1x1x24x64xf32>
    tpu.vector_store %arg11[%c0_18, %c0_19, %c1_20, %c0_21, %c0_22], %39 {strides = array<i32>} : memref<2x2x7x24x64xf32, #tpu.memory_space<vmem>>, vector<1x1x1x24x64xf32>,
    %40 = vector.extract_strided_slice %35 {offsets = [24, 0], sizes = [24, 64], strides = [1, 1]} : vector<48x64xf32> to vector<24x64xf32>
    %c0_23 = arith.constant 0 : index
    %c1_24 = arith.constant 1 : index
    %c1_25 = arith.constant 1 : index
    %c0_26 = arith.constant 0 : index
    %c0_27 = arith.constant 0 : index
    %41 = vector.load %arg11[%c0_23, %c1_24, %c1_25, %c0_26, %c0_27] : memref<2x2x7x24x64xf32, #tpu.memory_space<vmem>>, vector<1x1x1x24x64xf32>
    %42 = vector.shape_cast %41 : vector<1x1x1x24x64xf32> to vector<24x64xf32>
    %43 = vector.shape_cast %40 : vector<24x64xf32> to vector<1x1x1x24x64xf32>
    tpu.vector_store %arg11[%c0_23, %c1_24, %c1_25, %c0_26, %c0_27], %43 {strides = array<i32>} : memref<2x2x7x24x64xf32, #tpu.memory_space<vmem>>, vector<1x1x1x24x64xf32>,
    %c96 = arith.constant 96 : index
    %c0_28 = arith.constant 0 : index
    %44 = vector.load %arg1[%c96, %c0_28] : memref<672x36xbf16, #tpu.memory_space<vmem>>, vector<48x36xbf16>
    %cst_29 = arith.constant dense<0.000000e+00> : vector<48x256xf32>
    %45 = tpu.matmul %44, %0, %cst_29 {dimension_numbers = #tpu.dot_dimension_numbers<[1], [0], [0], [1], [0, 0, 1, 1], [], []>} : vector<48x36xbf16>, vector<36x256xbf16>, vector<48x256xf32> -> vector<48x256xf32>
    %46 = vector.extract_strided_slice %45 {offsets = [0, 0], sizes = [48, 64], strides = [1, 1]} : vector<48x256xf32> to vector<48x64xf32>
    %47 = vector.extract_strided_slice %45 {offsets = [0, 64], sizes = [48, 64], strides = [1, 1]} : vector<48x256xf32> to vector<48x64xf32>
    %48 = arith.maximumf %46, %47 : vector<48x64xf32>
    %49 = vector.extract_strided_slice %45 {offsets = [0, 128], sizes = [48, 64], strides = [1, 1]} : vector<48x256xf32> to vector<48x64xf32>
    %50 = vector.extract_strided_slice %45 {offsets = [0, 192], sizes = [48, 64], strides = [1, 1]} : vector<48x256xf32> to vector<48x64xf32>
    %51 = arith.maximumf %49, %50 : vector<48x64xf32>
    %52 = arith.maximumf %48, %51 : vector<48x64xf32>
    %53 = vector.broadcast %1 : vector<1x64xf32> to vector<48x64xf32>
    %54 = arith.addf %52, %53 : vector<48x64xf32>
    %cst_30 = arith.constant 0.000000e+00 : f32
    %55 = vector.broadcast %cst_30 : f32 to vector<48x64xf32>
    %56 = arith.maximumf %54, %55 : vector<48x64xf32>
    %57 = vector.extract_strided_slice %56 {offsets = [0, 0], sizes = [24, 64], strides = [1, 1]} : vector<48x64xf32> to vector<24x64xf32>
    %c0_31 = arith.constant 0 : index
    %c0_32 = arith.constant 0 : index
    %c2 = arith.constant 2 : index
    %c0_33 = arith.constant 0 : index
    %c0_34 = arith.constant 0 : index
    %58 = vector.load %arg11[%c0_31, %c0_32, %c2, %c0_33, %c0_34] : memref<2x2x7x24x64xf32, #tpu.memory_space<vmem>>, vector<1x1x1x24x64xf32>
    %59 = vector.shape_cast %58 : vector<1x1x1x24x64xf32> to vector<24x64xf32>
    %60 = vector.shape_cast %57 : vector<24x64xf32> to vector<1x1x1x24x64xf32>
    tpu.vector_store %arg11[%c0_31, %c0_32, %c2, %c0_33, %c0_34], %60 {strides = array<i32>} : memref<2x2x7x24x64xf32, #tpu.memory_space<vmem>>, vector<1x1x1x24x64xf32>,
    %61 = vector.extract_strided_slice %56 {offsets = [24, 0], sizes = [24, 64], strides = [1, 1]} : vector<48x64xf32> to vector<24x64xf32>
    %c0_35 = arith.constant 0 : index
    %c1_36 = arith.constant 1 : index
    %c2_37 = arith.constant 2 : index
    %c0_38 = arith.constant 0 : index
    %c0_39 = arith.constant 0 : index
    %62 = vector.load %arg11[%c0_35, %c1_36, %c2_37, %c0_38, %c0_39] : memref<2x2x7x24x64xf32, #tpu.memory_space<vmem>>, vector<1x1x1x24x64xf32>
    %63 = vector.shape_cast %62 : vector<1x1x1x24x64xf32> to vector<24x64xf32>
    %64 = vector.shape_cast %61 : vector<24x64xf32> to vector<1x1x1x24x64xf32>
    tpu.vector_store %arg11[%c0_35, %c1_36, %c2_37, %c0_38, %c0_39], %64 {strides = array<i32>} : memref<2x2x7x24x64xf32, #tpu.memory_space<vmem>>, vector<1x1x1x24x64xf32>,
    %c144 = arith.constant 144 : index
    %c0_40 = arith.constant 0 : index
    %65 = vector.load %arg1[%c144, %c0_40] : memref<672x36xbf16, #tpu.memory_space<vmem>>, vector<48x36xbf16>
    %cst_41 = arith.constant dense<0.000000e+00> : vector<48x256xf32>
    %66 = tpu.matmul %65, %0, %cst_41 {dimension_numbers = #tpu.dot_dimension_numbers<[1], [0], [0], [1], [0, 0, 1, 1], [], []>} : vector<48x36xbf16>, vector<36x256xbf16>, vector<48x256xf32> -> vector<48x256xf32>
    %67 = vector.extract_strided_slice %66 {offsets = [0, 0], sizes = [48, 64], strides = [1, 1]} : vector<48x256xf32> to vector<48x64xf32>
    %68 = vector.extract_strided_slice %66 {offsets = [0, 64], sizes = [48, 64], strides = [1, 1]} : vector<48x256xf32> to vector<48x64xf32>
    %69 = arith.maximumf %67, %68 : vector<48x64xf32>
    %70 = vector.extract_strided_slice %66 {offsets = [0, 128], sizes = [48, 64], strides = [1, 1]} : vector<48x256xf32> to vector<48x64xf32>
    %71 = vector.extract_strided_slice %66 {offsets = [0, 192], sizes = [48, 64], strides = [1, 1]} : vector<48x256xf32> to vector<48x64xf32>
    %72 = arith.maximumf %70, %71 : vector<48x64xf32>
    %73 = arith.maximumf %69, %72 : vector<48x64xf32>
    %74 = vector.broadcast %1 : vector<1x64xf32> to vector<48x64xf32>
    %75 = arith.addf %73, %74 : vector<48x64xf32>
    %cst_42 = arith.constant 0.000000e+00 : f32
    %76 = vector.broadcast %cst_42 : f32 to vector<48x64xf32>
    %77 = arith.maximumf %75, %76 : vector<48x64xf32>
    %78 = vector.extract_strided_slice %77 {offsets = [0, 0], sizes = [24, 64], strides = [1, 1]} : vector<48x64xf32> to vector<24x64xf32>
    %c0_43 = arith.constant 0 : index
    %c0_44 = arith.constant 0 : index
    %c3 = arith.constant 3 : index
    %c0_45 = arith.constant 0 : index
    %c0_46 = arith.constant 0 : index
    %79 = vector.load %arg11[%c0_43, %c0_44, %c3, %c0_45, %c0_46] : memref<2x2x7x24x64xf32, #tpu.memory_space<vmem>>, vector<1x1x1x24x64xf32>
    %80 = vector.shape_cast %79 : vector<1x1x1x24x64xf32> to vector<24x64xf32>
    %81 = vector.shape_cast %78 : vector<24x64xf32> to vector<1x1x1x24x64xf32>
    tpu.vector_store %arg11[%c0_43, %c0_44, %c3, %c0_45, %c0_46], %81 {strides = array<i32>} : memref<2x2x7x24x64xf32, #tpu.memory_space<vmem>>, vector<1x1x1x24x64xf32>,
    %82 = vector.extract_strided_slice %77 {offsets = [24, 0], sizes = [24, 64], strides = [1, 1]} : vector<48x64xf32> to vector<24x64xf32>
    %c0_47 = arith.constant 0 : index
    %c1_48 = arith.constant 1 : index
    %c3_49 = arith.constant 3 : index
    %c0_50 = arith.constant 0 : index
    %c0_51 = arith.constant 0 : index
    %83 = vector.load %arg11[%c0_47, %c1_48, %c3_49, %c0_50, %c0_51] : memref<2x2x7x24x64xf32, #tpu.memory_space<vmem>>, vector<1x1x1x24x64xf32>
    %84 = vector.shape_cast %83 : vector<1x1x1x24x64xf32> to vector<24x64xf32>
    %85 = vector.shape_cast %82 : vector<24x64xf32> to vector<1x1x1x24x64xf32>
    tpu.vector_store %arg11[%c0_47, %c1_48, %c3_49, %c0_50, %c0_51], %85 {strides = array<i32>} : memref<2x2x7x24x64xf32, #tpu.memory_space<vmem>>, vector<1x1x1x24x64xf32>,
    %c192 = arith.constant 192 : index
    %c0_52 = arith.constant 0 : index
    %86 = vector.load %arg1[%c192, %c0_52] : memref<672x36xbf16, #tpu.memory_space<vmem>>, vector<48x36xbf16>
    %cst_53 = arith.constant dense<0.000000e+00> : vector<48x256xf32>
    %87 = tpu.matmul %86, %0, %cst_53 {dimension_numbers = #tpu.dot_dimension_numbers<[1], [0], [0], [1], [0, 0, 1, 1], [], []>} : vector<48x36xbf16>, vector<36x256xbf16>, vector<48x256xf32> -> vector<48x256xf32>
    %88 = vector.extract_strided_slice %87 {offsets = [0, 0], sizes = [48, 64], strides = [1, 1]} : vector<48x256xf32> to vector<48x64xf32>
    %89 = vector.extract_strided_slice %87 {offsets = [0, 64], sizes = [48, 64], strides = [1, 1]} : vector<48x256xf32> to vector<48x64xf32>
    %90 = arith.maximumf %88, %89 : vector<48x64xf32>
    %91 = vector.extract_strided_slice %87 {offsets = [0, 128], sizes = [48, 64], strides = [1, 1]} : vector<48x256xf32> to vector<48x64xf32>
    %92 = vector.extract_strided_slice %87 {offsets = [0, 192], sizes = [48, 64], strides = [1, 1]} : vector<48x256xf32> to vector<48x64xf32>
    %93 = arith.maximumf %91, %92 : vector<48x64xf32>
    %94 = arith.maximumf %90, %93 : vector<48x64xf32>
    %95 = vector.broadcast %1 : vector<1x64xf32> to vector<48x64xf32>
    %96 = arith.addf %94, %95 : vector<48x64xf32>
    %cst_54 = arith.constant 0.000000e+00 : f32
    %97 = vector.broadcast %cst_54 : f32 to vector<48x64xf32>
    %98 = arith.maximumf %96, %97 : vector<48x64xf32>
    %99 = vector.extract_strided_slice %98 {offsets = [0, 0], sizes = [24, 64], strides = [1, 1]} : vector<48x64xf32> to vector<24x64xf32>
    %c0_55 = arith.constant 0 : index
    %c0_56 = arith.constant 0 : index
    %c4 = arith.constant 4 : index
    %c0_57 = arith.constant 0 : index
    %c0_58 = arith.constant 0 : index
    %100 = vector.load %arg11[%c0_55, %c0_56, %c4, %c0_57, %c0_58] : memref<2x2x7x24x64xf32, #tpu.memory_space<vmem>>, vector<1x1x1x24x64xf32>
    %101 = vector.shape_cast %100 : vector<1x1x1x24x64xf32> to vector<24x64xf32>
    %102 = vector.shape_cast %99 : vector<24x64xf32> to vector<1x1x1x24x64xf32>
    tpu.vector_store %arg11[%c0_55, %c0_56, %c4, %c0_57, %c0_58], %102 {strides = array<i32>} : memref<2x2x7x24x64xf32, #tpu.memory_space<vmem>>, vector<1x1x1x24x64xf32>,
    %103 = vector.extract_strided_slice %98 {offsets = [24, 0], sizes = [24, 64], strides = [1, 1]} : vector<48x64xf32> to vector<24x64xf32>
    %c0_59 = arith.constant 0 : index
    %c1_60 = arith.constant 1 : index
    %c4_61 = arith.constant 4 : index
    %c0_62 = arith.constant 0 : index
    %c0_63 = arith.constant 0 : index
    %104 = vector.load %arg11[%c0_59, %c1_60, %c4_61, %c0_62, %c0_63] : memref<2x2x7x24x64xf32, #tpu.memory_space<vmem>>, vector<1x1x1x24x64xf32>
    %105 = vector.shape_cast %104 : vector<1x1x1x24x64xf32> to vector<24x64xf32>
    %106 = vector.shape_cast %103 : vector<24x64xf32> to vector<1x1x1x24x64xf32>
    tpu.vector_store %arg11[%c0_59, %c1_60, %c4_61, %c0_62, %c0_63], %106 {strides = array<i32>} : memref<2x2x7x24x64xf32, #tpu.memory_space<vmem>>, vector<1x1x1x24x64xf32>,
    %c240 = arith.constant 240 : index
    %c0_64 = arith.constant 0 : index
    %107 = vector.load %arg1[%c240, %c0_64] : memref<672x36xbf16, #tpu.memory_space<vmem>>, vector<48x36xbf16>
    %cst_65 = arith.constant dense<0.000000e+00> : vector<48x256xf32>
    %108 = tpu.matmul %107, %0, %cst_65 {dimension_numbers = #tpu.dot_dimension_numbers<[1], [0], [0], [1], [0, 0, 1, 1], [], []>} : vector<48x36xbf16>, vector<36x256xbf16>, vector<48x256xf32> -> vector<48x256xf32>
    %109 = vector.extract_strided_slice %108 {offsets = [0, 0], sizes = [48, 64], strides = [1, 1]} : vector<48x256xf32> to vector<48x64xf32>
    %110 = vector.extract_strided_slice %108 {offsets = [0, 64], sizes = [48, 64], strides = [1, 1]} : vector<48x256xf32> to vector<48x64xf32>
    %111 = arith.maximumf %109, %110 : vector<48x64xf32>
    %112 = vector.extract_strided_slice %108 {offsets = [0, 128], sizes = [48, 64], strides = [1, 1]} : vector<48x256xf32> to vector<48x64xf32>
    %113 = vector.extract_strided_slice %108 {offsets = [0, 192], sizes = [48, 64], strides = [1, 1]} : vector<48x256xf32> to vector<48x64xf32>
    %114 = arith.maximumf %112, %113 : vector<48x64xf32>
    %115 = arith.maximumf %111, %114 : vector<48x64xf32>
    %116 = vector.broadcast %1 : vector<1x64xf32> to vector<48x64xf32>
    %117 = arith.addf %115, %116 : vector<48x64xf32>
    %cst_66 = arith.constant 0.000000e+00 : f32
    %118 = vector.broadcast %cst_66 : f32 to vector<48x64xf32>
    %119 = arith.maximumf %117, %118 : vector<48x64xf32>
    %120 = vector.extract_strided_slice %119 {offsets = [0, 0], sizes = [24, 64], strides = [1, 1]} : vector<48x64xf32> to vector<24x64xf32>
    %c0_67 = arith.constant 0 : index
    %c0_68 = arith.constant 0 : index
    %c5 = arith.constant 5 : index
    %c0_69 = arith.constant 0 : index
    %c0_70 = arith.constant 0 : index
    %121 = vector.load %arg11[%c0_67, %c0_68, %c5, %c0_69, %c0_70] : memref<2x2x7x24x64xf32, #tpu.memory_space<vmem>>, vector<1x1x1x24x64xf32>
    %122 = vector.shape_cast %121 : vector<1x1x1x24x64xf32> to vector<24x64xf32>
    %123 = vector.shape_cast %120 : vector<24x64xf32> to vector<1x1x1x24x64xf32>
    tpu.vector_store %arg11[%c0_67, %c0_68, %c5, %c0_69, %c0_70], %123 {strides = array<i32>} : memref<2x2x7x24x64xf32, #tpu.memory_space<vmem>>, vector<1x1x1x24x64xf32>,
    %124 = vector.extract_strided_slice %119 {offsets = [24, 0], sizes = [24, 64], strides = [1, 1]} : vector<48x64xf32> to vector<24x64xf32>
    %c0_71 = arith.constant 0 : index
    %c1_72 = arith.constant 1 : index
    %c5_73 = arith.constant 5 : index
    %c0_74 = arith.constant 0 : index
    %c0_75 = arith.constant 0 : index
    %125 = vector.load %arg11[%c0_71, %c1_72, %c5_73, %c0_74, %c0_75] : memref<2x2x7x24x64xf32, #tpu.memory_space<vmem>>, vector<1x1x1x24x64xf32>
    %126 = vector.shape_cast %125 : vector<1x1x1x24x64xf32> to vector<24x64xf32>
    %127 = vector.shape_cast %124 : vector<24x64xf32> to vector<1x1x1x24x64xf32>
    tpu.vector_store %arg11[%c0_71, %c1_72, %c5_73, %c0_74, %c0_75], %127 {strides = array<i32>} : memref<2x2x7x24x64xf32, #tpu.memory_space<vmem>>, vector<1x1x1x24x64xf32>,
    %c288 = arith.constant 288 : index
    %c0_76 = arith.constant 0 : index
    %128 = vector.load %arg1[%c288, %c0_76] : memref<672x36xbf16, #tpu.memory_space<vmem>>, vector<48x36xbf16>
    %cst_77 = arith.constant dense<0.000000e+00> : vector<48x256xf32>
    %129 = tpu.matmul %128, %0, %cst_77 {dimension_numbers = #tpu.dot_dimension_numbers<[1], [0], [0], [1], [0, 0, 1, 1], [], []>} : vector<48x36xbf16>, vector<36x256xbf16>, vector<48x256xf32> -> vector<48x256xf32>
    %130 = vector.extract_strided_slice %129 {offsets = [0, 0], sizes = [48, 64], strides = [1, 1]} : vector<48x256xf32> to vector<48x64xf32>
    %131 = vector.extract_strided_slice %129 {offsets = [0, 64], sizes = [48, 64], strides = [1, 1]} : vector<48x256xf32> to vector<48x64xf32>
    %132 = arith.maximumf %130, %131 : vector<48x64xf32>
    %133 = vector.extract_strided_slice %129 {offsets = [0, 128], sizes = [48, 64], strides = [1, 1]} : vector<48x256xf32> to vector<48x64xf32>
    %134 = vector.extract_strided_slice %129 {offsets = [0, 192], sizes = [48, 64], strides = [1, 1]} : vector<48x256xf32> to vector<48x64xf32>
    %135 = arith.maximumf %133, %134 : vector<48x64xf32>
    %136 = arith.maximumf %132, %135 : vector<48x64xf32>
    %137 = vector.broadcast %1 : vector<1x64xf32> to vector<48x64xf32>
    %138 = arith.addf %136, %137 : vector<48x64xf32>
    %cst_78 = arith.constant 0.000000e+00 : f32
    %139 = vector.broadcast %cst_78 : f32 to vector<48x64xf32>
    %140 = arith.maximumf %138, %139 : vector<48x64xf32>
    %141 = vector.extract_strided_slice %140 {offsets = [0, 0], sizes = [24, 64], strides = [1, 1]} : vector<48x64xf32> to vector<24x64xf32>
    %c0_79 = arith.constant 0 : index
    %c0_80 = arith.constant 0 : index
    %c6 = arith.constant 6 : index
    %c0_81 = arith.constant 0 : index
    %c0_82 = arith.constant 0 : index
    %142 = vector.load %arg11[%c0_79, %c0_80, %c6, %c0_81, %c0_82] : memref<2x2x7x24x64xf32, #tpu.memory_space<vmem>>, vector<1x1x1x24x64xf32>
    %143 = vector.shape_cast %142 : vector<1x1x1x24x64xf32> to vector<24x64xf32>
    %144 = vector.shape_cast %141 : vector<24x64xf32> to vector<1x1x1x24x64xf32>
    tpu.vector_store %arg11[%c0_79, %c0_80, %c6, %c0_81, %c0_82], %144 {strides = array<i32>} : memref<2x2x7x24x64xf32, #tpu.memory_space<vmem>>, vector<1x1x1x24x64xf32>,
    %145 = vector.extract_strided_slice %140 {offsets = [24, 0], sizes = [24, 64], strides = [1, 1]} : vector<48x64xf32> to vector<24x64xf32>
    %c0_83 = arith.constant 0 : index
    %c1_84 = arith.constant 1 : index
    %c6_85 = arith.constant 6 : index
    %c0_86 = arith.constant 0 : index
    %c0_87 = arith.constant 0 : index
    %146 = vector.load %arg11[%c0_83, %c1_84, %c6_85, %c0_86, %c0_87] : memref<2x2x7x24x64xf32, #tpu.memory_space<vmem>>, vector<1x1x1x24x64xf32>
    %147 = vector.shape_cast %146 : vector<1x1x1x24x64xf32> to vector<24x64xf32>
    %148 = vector.shape_cast %145 : vector<24x64xf32> to vector<1x1x1x24x64xf32>
    tpu.vector_store %arg11[%c0_83, %c1_84, %c6_85, %c0_86, %c0_87], %148 {strides = array<i32>} : memref<2x2x7x24x64xf32, #tpu.memory_space<vmem>>, vector<1x1x1x24x64xf32>,
    %c336 = arith.constant 336 : index
    %c0_88 = arith.constant 0 : index
    %149 = vector.load %arg1[%c336, %c0_88] : memref<672x36xbf16, #tpu.memory_space<vmem>>, vector<48x36xbf16>
    %cst_89 = arith.constant dense<0.000000e+00> : vector<48x256xf32>
    %150 = tpu.matmul %149, %0, %cst_89 {dimension_numbers = #tpu.dot_dimension_numbers<[1], [0], [0], [1], [0, 0, 1, 1], [], []>} : vector<48x36xbf16>, vector<36x256xbf16>, vector<48x256xf32> -> vector<48x256xf32>
    %151 = vector.extract_strided_slice %150 {offsets = [0, 0], sizes = [48, 64], strides = [1, 1]} : vector<48x256xf32> to vector<48x64xf32>
    %152 = vector.extract_strided_slice %150 {offsets = [0, 64], sizes = [48, 64], strides = [1, 1]} : vector<48x256xf32> to vector<48x64xf32>
    %153 = arith.maximumf %151, %152 : vector<48x64xf32>
    %154 = vector.extract_strided_slice %150 {offsets = [0, 128], sizes = [48, 64], strides = [1, 1]} : vector<48x256xf32> to vector<48x64xf32>
    %155 = vector.extract_strided_slice %150 {offsets = [0, 192], sizes = [48, 64], strides = [1, 1]} : vector<48x256xf32> to vector<48x64xf32>
    %156 = arith.maximumf %154, %155 : vector<48x64xf32>
    %157 = arith.maximumf %153, %156 : vector<48x64xf32>
    %158 = vector.broadcast %1 : vector<1x64xf32> to vector<48x64xf32>
    %159 = arith.addf %157, %158 : vector<48x64xf32>
    %cst_90 = arith.constant 0.000000e+00 : f32
    %160 = vector.broadcast %cst_90 : f32 to vector<48x64xf32>
    %161 = arith.maximumf %159, %160 : vector<48x64xf32>
    %162 = vector.extract_strided_slice %161 {offsets = [0, 0], sizes = [24, 64], strides = [1, 1]} : vector<48x64xf32> to vector<24x64xf32>
    %c1_91 = arith.constant 1 : index
    %c0_92 = arith.constant 0 : index
    %c0_93 = arith.constant 0 : index
    %c0_94 = arith.constant 0 : index
    %c0_95 = arith.constant 0 : index
    %163 = vector.load %arg11[%c1_91, %c0_92, %c0_93, %c0_94, %c0_95] : memref<2x2x7x24x64xf32, #tpu.memory_space<vmem>>, vector<1x1x1x24x64xf32>
    %164 = vector.shape_cast %163 : vector<1x1x1x24x64xf32> to vector<24x64xf32>
    %165 = vector.shape_cast %162 : vector<24x64xf32> to vector<1x1x1x24x64xf32>
    tpu.vector_store %arg11[%c1_91, %c0_92, %c0_93, %c0_94, %c0_95], %165 {strides = array<i32>} : memref<2x2x7x24x64xf32, #tpu.memory_space<vmem>>, vector<1x1x1x24x64xf32>,
    %166 = vector.extract_strided_slice %161 {offsets = [24, 0], sizes = [24, 64], strides = [1, 1]} : vector<48x64xf32> to vector<24x64xf32>
    %c1_96 = arith.constant 1 : index
    %c1_97 = arith.constant 1 : index
    %c0_98 = arith.constant 0 : index
    %c0_99 = arith.constant 0 : index
    %c0_100 = arith.constant 0 : index
    %167 = vector.load %arg11[%c1_96, %c1_97, %c0_98, %c0_99, %c0_100] : memref<2x2x7x24x64xf32, #tpu.memory_space<vmem>>, vector<1x1x1x24x64xf32>
    %168 = vector.shape_cast %167 : vector<1x1x1x24x64xf32> to vector<24x64xf32>
    %169 = vector.shape_cast %166 : vector<24x64xf32> to vector<1x1x1x24x64xf32>
    tpu.vector_store %arg11[%c1_96, %c1_97, %c0_98, %c0_99, %c0_100], %169 {strides = array<i32>} : memref<2x2x7x24x64xf32, #tpu.memory_space<vmem>>, vector<1x1x1x24x64xf32>,
    %c384 = arith.constant 384 : index
    %c0_101 = arith.constant 0 : index
    %170 = vector.load %arg1[%c384, %c0_101] : memref<672x36xbf16, #tpu.memory_space<vmem>>, vector<48x36xbf16>
    %cst_102 = arith.constant dense<0.000000e+00> : vector<48x256xf32>
    %171 = tpu.matmul %170, %0, %cst_102 {dimension_numbers = #tpu.dot_dimension_numbers<[1], [0], [0], [1], [0, 0, 1, 1], [], []>} : vector<48x36xbf16>, vector<36x256xbf16>, vector<48x256xf32> -> vector<48x256xf32>
    %172 = vector.extract_strided_slice %171 {offsets = [0, 0], sizes = [48, 64], strides = [1, 1]} : vector<48x256xf32> to vector<48x64xf32>
    %173 = vector.extract_strided_slice %171 {offsets = [0, 64], sizes = [48, 64], strides = [1, 1]} : vector<48x256xf32> to vector<48x64xf32>
    %174 = arith.maximumf %172, %173 : vector<48x64xf32>
    %175 = vector.extract_strided_slice %171 {offsets = [0, 128], sizes = [48, 64], strides = [1, 1]} : vector<48x256xf32> to vector<48x64xf32>
    %176 = vector.extract_strided_slice %171 {offsets = [0, 192], sizes = [48, 64], strides = [1, 1]} : vector<48x256xf32> to vector<48x64xf32>
    %177 = arith.maximumf %175, %176 : vector<48x64xf32>
    %178 = arith.maximumf %174, %177 : vector<48x64xf32>
    %179 = vector.broadcast %1 : vector<1x64xf32> to vector<48x64xf32>
    %180 = arith.addf %178, %179 : vector<48x64xf32>
    %cst_103 = arith.constant 0.000000e+00 : f32
    %181 = vector.broadcast %cst_103 : f32 to vector<48x64xf32>
    %182 = arith.maximumf %180, %181 : vector<48x64xf32>
    %183 = vector.extract_strided_slice %182 {offsets = [0, 0], sizes = [24, 64], strides = [1, 1]} : vector<48x64xf32> to vector<24x64xf32>
    %c1_104 = arith.constant 1 : index
    %c0_105 = arith.constant 0 : index
    %c1_106 = arith.constant 1 : index
    %c0_107 = arith.constant 0 : index
    %c0_108 = arith.constant 0 : index
    %184 = vector.load %arg11[%c1_104, %c0_105, %c1_106, %c0_107, %c0_108] : memref<2x2x7x24x64xf32, #tpu.memory_space<vmem>>, vector<1x1x1x24x64xf32>
    %185 = vector.shape_cast %184 : vector<1x1x1x24x64xf32> to vector<24x64xf32>
    %186 = vector.shape_cast %183 : vector<24x64xf32> to vector<1x1x1x24x64xf32>
    tpu.vector_store %arg11[%c1_104, %c0_105, %c1_106, %c0_107, %c0_108], %186 {strides = array<i32>} : memref<2x2x7x24x64xf32, #tpu.memory_space<vmem>>, vector<1x1x1x24x64xf32>,
    %187 = vector.extract_strided_slice %182 {offsets = [24, 0], sizes = [24, 64], strides = [1, 1]} : vector<48x64xf32> to vector<24x64xf32>
    %c1_109 = arith.constant 1 : index
    %c1_110 = arith.constant 1 : index
    %c1_111 = arith.constant 1 : index
    %c0_112 = arith.constant 0 : index
    %c0_113 = arith.constant 0 : index
    %188 = vector.load %arg11[%c1_109, %c1_110, %c1_111, %c0_112, %c0_113] : memref<2x2x7x24x64xf32, #tpu.memory_space<vmem>>, vector<1x1x1x24x64xf32>
    %189 = vector.shape_cast %188 : vector<1x1x1x24x64xf32> to vector<24x64xf32>
    %190 = vector.shape_cast %187 : vector<24x64xf32> to vector<1x1x1x24x64xf32>
    tpu.vector_store %arg11[%c1_109, %c1_110, %c1_111, %c0_112, %c0_113], %190 {strides = array<i32>} : memref<2x2x7x24x64xf32, #tpu.memory_space<vmem>>, vector<1x1x1x24x64xf32>,
    %c432 = arith.constant 432 : index
    %c0_114 = arith.constant 0 : index
    %191 = vector.load %arg1[%c432, %c0_114] : memref<672x36xbf16, #tpu.memory_space<vmem>>, vector<48x36xbf16>
    %cst_115 = arith.constant dense<0.000000e+00> : vector<48x256xf32>
    %192 = tpu.matmul %191, %0, %cst_115 {dimension_numbers = #tpu.dot_dimension_numbers<[1], [0], [0], [1], [0, 0, 1, 1], [], []>} : vector<48x36xbf16>, vector<36x256xbf16>, vector<48x256xf32> -> vector<48x256xf32>
    %193 = vector.extract_strided_slice %192 {offsets = [0, 0], sizes = [48, 64], strides = [1, 1]} : vector<48x256xf32> to vector<48x64xf32>
    %194 = vector.extract_strided_slice %192 {offsets = [0, 64], sizes = [48, 64], strides = [1, 1]} : vector<48x256xf32> to vector<48x64xf32>
    %195 = arith.maximumf %193, %194 : vector<48x64xf32>
    %196 = vector.extract_strided_slice %192 {offsets = [0, 128], sizes = [48, 64], strides = [1, 1]} : vector<48x256xf32> to vector<48x64xf32>
    %197 = vector.extract_strided_slice %192 {offsets = [0, 192], sizes = [48, 64], strides = [1, 1]} : vector<48x256xf32> to vector<48x64xf32>
    %198 = arith.maximumf %196, %197 : vector<48x64xf32>
    %199 = arith.maximumf %195, %198 : vector<48x64xf32>
    %200 = vector.broadcast %1 : vector<1x64xf32> to vector<48x64xf32>
    %201 = arith.addf %199, %200 : vector<48x64xf32>
    %cst_116 = arith.constant 0.000000e+00 : f32
    %202 = vector.broadcast %cst_116 : f32 to vector<48x64xf32>
    %203 = arith.maximumf %201, %202 : vector<48x64xf32>
    %204 = vector.extract_strided_slice %203 {offsets = [0, 0], sizes = [24, 64], strides = [1, 1]} : vector<48x64xf32> to vector<24x64xf32>
    %c1_117 = arith.constant 1 : index
    %c0_118 = arith.constant 0 : index
    %c2_119 = arith.constant 2 : index
    %c0_120 = arith.constant 0 : index
    %c0_121 = arith.constant 0 : index
    %205 = vector.load %arg11[%c1_117, %c0_118, %c2_119, %c0_120, %c0_121] : memref<2x2x7x24x64xf32, #tpu.memory_space<vmem>>, vector<1x1x1x24x64xf32>
    %206 = vector.shape_cast %205 : vector<1x1x1x24x64xf32> to vector<24x64xf32>
    %207 = vector.shape_cast %204 : vector<24x64xf32> to vector<1x1x1x24x64xf32>
    tpu.vector_store %arg11[%c1_117, %c0_118, %c2_119, %c0_120, %c0_121], %207 {strides = array<i32>} : memref<2x2x7x24x64xf32, #tpu.memory_space<vmem>>, vector<1x1x1x24x64xf32>,
    %208 = vector.extract_strided_slice %203 {offsets = [24, 0], sizes = [24, 64], strides = [1, 1]} : vector<48x64xf32> to vector<24x64xf32>
    %c1_122 = arith.constant 1 : index
    %c1_123 = arith.constant 1 : index
    %c2_124 = arith.constant 2 : index
    %c0_125 = arith.constant 0 : index
    %c0_126 = arith.constant 0 : index
    %209 = vector.load %arg11[%c1_122, %c1_123, %c2_124, %c0_125, %c0_126] : memref<2x2x7x24x64xf32, #tpu.memory_space<vmem>>, vector<1x1x1x24x64xf32>
    %210 = vector.shape_cast %209 : vector<1x1x1x24x64xf32> to vector<24x64xf32>
    %211 = vector.shape_cast %208 : vector<24x64xf32> to vector<1x1x1x24x64xf32>
    tpu.vector_store %arg11[%c1_122, %c1_123, %c2_124, %c0_125, %c0_126], %211 {strides = array<i32>} : memref<2x2x7x24x64xf32, #tpu.memory_space<vmem>>, vector<1x1x1x24x64xf32>,
    %c480 = arith.constant 480 : index
    %c0_127 = arith.constant 0 : index
    %212 = vector.load %arg1[%c480, %c0_127] : memref<672x36xbf16, #tpu.memory_space<vmem>>, vector<48x36xbf16>
    %cst_128 = arith.constant dense<0.000000e+00> : vector<48x256xf32>
    %213 = tpu.matmul %212, %0, %cst_128 {dimension_numbers = #tpu.dot_dimension_numbers<[1], [0], [0], [1], [0, 0, 1, 1], [], []>} : vector<48x36xbf16>, vector<36x256xbf16>, vector<48x256xf32> -> vector<48x256xf32>
    %214 = vector.extract_strided_slice %213 {offsets = [0, 0], sizes = [48, 64], strides = [1, 1]} : vector<48x256xf32> to vector<48x64xf32>
    %215 = vector.extract_strided_slice %213 {offsets = [0, 64], sizes = [48, 64], strides = [1, 1]} : vector<48x256xf32> to vector<48x64xf32>
    %216 = arith.maximumf %214, %215 : vector<48x64xf32>
    %217 = vector.extract_strided_slice %213 {offsets = [0, 128], sizes = [48, 64], strides = [1, 1]} : vector<48x256xf32> to vector<48x64xf32>
    %218 = vector.extract_strided_slice %213 {offsets = [0, 192], sizes = [48, 64], strides = [1, 1]} : vector<48x256xf32> to vector<48x64xf32>
    %219 = arith.maximumf %217, %218 : vector<48x64xf32>
    %220 = arith.maximumf %216, %219 : vector<48x64xf32>
    %221 = vector.broadcast %1 : vector<1x64xf32> to vector<48x64xf32>
    %222 = arith.addf %220, %221 : vector<48x64xf32>
    %cst_129 = arith.constant 0.000000e+00 : f32
    %223 = vector.broadcast %cst_129 : f32 to vector<48x64xf32>
    %224 = arith.maximumf %222, %223 : vector<48x64xf32>
    %225 = vector.extract_strided_slice %224 {offsets = [0, 0], sizes = [24, 64], strides = [1, 1]} : vector<48x64xf32> to vector<24x64xf32>
    %c1_130 = arith.constant 1 : index
    %c0_131 = arith.constant 0 : index
    %c3_132 = arith.constant 3 : index
    %c0_133 = arith.constant 0 : index
    %c0_134 = arith.constant 0 : index
    %226 = vector.load %arg11[%c1_130, %c0_131, %c3_132, %c0_133, %c0_134] : memref<2x2x7x24x64xf32, #tpu.memory_space<vmem>>, vector<1x1x1x24x64xf32>
    %227 = vector.shape_cast %226 : vector<1x1x1x24x64xf32> to vector<24x64xf32>
    %228 = vector.shape_cast %225 : vector<24x64xf32> to vector<1x1x1x24x64xf32>
    tpu.vector_store %arg11[%c1_130, %c0_131, %c3_132, %c0_133, %c0_134], %228 {strides = array<i32>} : memref<2x2x7x24x64xf32, #tpu.memory_space<vmem>>, vector<1x1x1x24x64xf32>,
    %229 = vector.extract_strided_slice %224 {offsets = [24, 0], sizes = [24, 64], strides = [1, 1]} : vector<48x64xf32> to vector<24x64xf32>
    %c1_135 = arith.constant 1 : index
    %c1_136 = arith.constant 1 : index
    %c3_137 = arith.constant 3 : index
    %c0_138 = arith.constant 0 : index
    %c0_139 = arith.constant 0 : index
    %230 = vector.load %arg11[%c1_135, %c1_136, %c3_137, %c0_138, %c0_139] : memref<2x2x7x24x64xf32, #tpu.memory_space<vmem>>, vector<1x1x1x24x64xf32>
    %231 = vector.shape_cast %230 : vector<1x1x1x24x64xf32> to vector<24x64xf32>
    %232 = vector.shape_cast %229 : vector<24x64xf32> to vector<1x1x1x24x64xf32>
    tpu.vector_store %arg11[%c1_135, %c1_136, %c3_137, %c0_138, %c0_139], %232 {strides = array<i32>} : memref<2x2x7x24x64xf32, #tpu.memory_space<vmem>>, vector<1x1x1x24x64xf32>,
    %c528 = arith.constant 528 : index
    %c0_140 = arith.constant 0 : index
    %233 = vector.load %arg1[%c528, %c0_140] : memref<672x36xbf16, #tpu.memory_space<vmem>>, vector<48x36xbf16>
    %cst_141 = arith.constant dense<0.000000e+00> : vector<48x256xf32>
    %234 = tpu.matmul %233, %0, %cst_141 {dimension_numbers = #tpu.dot_dimension_numbers<[1], [0], [0], [1], [0, 0, 1, 1], [], []>} : vector<48x36xbf16>, vector<36x256xbf16>, vector<48x256xf32> -> vector<48x256xf32>
    %235 = vector.extract_strided_slice %234 {offsets = [0, 0], sizes = [48, 64], strides = [1, 1]} : vector<48x256xf32> to vector<48x64xf32>
    %236 = vector.extract_strided_slice %234 {offsets = [0, 64], sizes = [48, 64], strides = [1, 1]} : vector<48x256xf32> to vector<48x64xf32>
    %237 = arith.maximumf %235, %236 : vector<48x64xf32>
    %238 = vector.extract_strided_slice %234 {offsets = [0, 128], sizes = [48, 64], strides = [1, 1]} : vector<48x256xf32> to vector<48x64xf32>
    %239 = vector.extract_strided_slice %234 {offsets = [0, 192], sizes = [48, 64], strides = [1, 1]} : vector<48x256xf32> to vector<48x64xf32>
    %240 = arith.maximumf %238, %239 : vector<48x64xf32>
    %241 = arith.maximumf %237, %240 : vector<48x64xf32>
    %242 = vector.broadcast %1 : vector<1x64xf32> to vector<48x64xf32>
    %243 = arith.addf %241, %242 : vector<48x64xf32>
    %cst_142 = arith.constant 0.000000e+00 : f32
    %244 = vector.broadcast %cst_142 : f32 to vector<48x64xf32>
    %245 = arith.maximumf %243, %244 : vector<48x64xf32>
    %246 = vector.extract_strided_slice %245 {offsets = [0, 0], sizes = [24, 64], strides = [1, 1]} : vector<48x64xf32> to vector<24x64xf32>
    %c1_143 = arith.constant 1 : index
    %c0_144 = arith.constant 0 : index
    %c4_145 = arith.constant 4 : index
    %c0_146 = arith.constant 0 : index
    %c0_147 = arith.constant 0 : index
    %247 = vector.load %arg11[%c1_143, %c0_144, %c4_145, %c0_146, %c0_147] : memref<2x2x7x24x64xf32, #tpu.memory_space<vmem>>, vector<1x1x1x24x64xf32>
    %248 = vector.shape_cast %247 : vector<1x1x1x24x64xf32> to vector<24x64xf32>
    %249 = vector.shape_cast %246 : vector<24x64xf32> to vector<1x1x1x24x64xf32>
    tpu.vector_store %arg11[%c1_143, %c0_144, %c4_145, %c0_146, %c0_147], %249 {strides = array<i32>} : memref<2x2x7x24x64xf32, #tpu.memory_space<vmem>>, vector<1x1x1x24x64xf32>,
    %250 = vector.extract_strided_slice %245 {offsets = [24, 0], sizes = [24, 64], strides = [1, 1]} : vector<48x64xf32> to vector<24x64xf32>
    %c1_148 = arith.constant 1 : index
    %c1_149 = arith.constant 1 : index
    %c4_150 = arith.constant 4 : index
    %c0_151 = arith.constant 0 : index
    %c0_152 = arith.constant 0 : index
    %251 = vector.load %arg11[%c1_148, %c1_149, %c4_150, %c0_151, %c0_152] : memref<2x2x7x24x64xf32, #tpu.memory_space<vmem>>, vector<1x1x1x24x64xf32>
    %252 = vector.shape_cast %251 : vector<1x1x1x24x64xf32> to vector<24x64xf32>
    %253 = vector.shape_cast %250 : vector<24x64xf32> to vector<1x1x1x24x64xf32>
    tpu.vector_store %arg11[%c1_148, %c1_149, %c4_150, %c0_151, %c0_152], %253 {strides = array<i32>} : memref<2x2x7x24x64xf32, #tpu.memory_space<vmem>>, vector<1x1x1x24x64xf32>,
    %c576 = arith.constant 576 : index
    %c0_153 = arith.constant 0 : index
    %254 = vector.load %arg1[%c576, %c0_153] : memref<672x36xbf16, #tpu.memory_space<vmem>>, vector<48x36xbf16>
    %cst_154 = arith.constant dense<0.000000e+00> : vector<48x256xf32>
    %255 = tpu.matmul %254, %0, %cst_154 {dimension_numbers = #tpu.dot_dimension_numbers<[1], [0], [0], [1], [0, 0, 1, 1], [], []>} : vector<48x36xbf16>, vector<36x256xbf16>, vector<48x256xf32> -> vector<48x256xf32>
    %256 = vector.extract_strided_slice %255 {offsets = [0, 0], sizes = [48, 64], strides = [1, 1]} : vector<48x256xf32> to vector<48x64xf32>
    %257 = vector.extract_strided_slice %255 {offsets = [0, 64], sizes = [48, 64], strides = [1, 1]} : vector<48x256xf32> to vector<48x64xf32>
    %258 = arith.maximumf %256, %257 : vector<48x64xf32>
    %259 = vector.extract_strided_slice %255 {offsets = [0, 128], sizes = [48, 64], strides = [1, 1]} : vector<48x256xf32> to vector<48x64xf32>
    %260 = vector.extract_strided_slice %255 {offsets = [0, 192], sizes = [48, 64], strides = [1, 1]} : vector<48x256xf32> to vector<48x64xf32>
    %261 = arith.maximumf %259, %260 : vector<48x64xf32>
    %262 = arith.maximumf %258, %261 : vector<48x64xf32>
    %263 = vector.broadcast %1 : vector<1x64xf32> to vector<48x64xf32>
    %264 = arith.addf %262, %263 : vector<48x64xf32>
    %cst_155 = arith.constant 0.000000e+00 : f32
    %265 = vector.broadcast %cst_155 : f32 to vector<48x64xf32>
    %266 = arith.maximumf %264, %265 : vector<48x64xf32>
    %267 = vector.extract_strided_slice %266 {offsets = [0, 0], sizes = [24, 64], strides = [1, 1]} : vector<48x64xf32> to vector<24x64xf32>
    %c1_156 = arith.constant 1 : index
    %c0_157 = arith.constant 0 : index
    %c5_158 = arith.constant 5 : index
    %c0_159 = arith.constant 0 : index
    %c0_160 = arith.constant 0 : index
    %268 = vector.load %arg11[%c1_156, %c0_157, %c5_158, %c0_159, %c0_160] : memref<2x2x7x24x64xf32, #tpu.memory_space<vmem>>, vector<1x1x1x24x64xf32>
    %269 = vector.shape_cast %268 : vector<1x1x1x24x64xf32> to vector<24x64xf32>
    %270 = vector.shape_cast %267 : vector<24x64xf32> to vector<1x1x1x24x64xf32>
    tpu.vector_store %arg11[%c1_156, %c0_157, %c5_158, %c0_159, %c0_160], %270 {strides = array<i32>} : memref<2x2x7x24x64xf32, #tpu.memory_space<vmem>>, vector<1x1x1x24x64xf32>,
    %271 = vector.extract_strided_slice %266 {offsets = [24, 0], sizes = [24, 64], strides = [1, 1]} : vector<48x64xf32> to vector<24x64xf32>
    %c1_161 = arith.constant 1 : index
    %c1_162 = arith.constant 1 : index
    %c5_163 = arith.constant 5 : index
    %c0_164 = arith.constant 0 : index
    %c0_165 = arith.constant 0 : index
    %272 = vector.load %arg11[%c1_161, %c1_162, %c5_163, %c0_164, %c0_165] : memref<2x2x7x24x64xf32, #tpu.memory_space<vmem>>, vector<1x1x1x24x64xf32>
    %273 = vector.shape_cast %272 : vector<1x1x1x24x64xf32> to vector<24x64xf32>
    %274 = vector.shape_cast %271 : vector<24x64xf32> to vector<1x1x1x24x64xf32>
    tpu.vector_store %arg11[%c1_161, %c1_162, %c5_163, %c0_164, %c0_165], %274 {strides = array<i32>} : memref<2x2x7x24x64xf32, #tpu.memory_space<vmem>>, vector<1x1x1x24x64xf32>,
    %c624 = arith.constant 624 : index
    %c0_166 = arith.constant 0 : index
    %275 = vector.load %arg1[%c624, %c0_166] : memref<672x36xbf16, #tpu.memory_space<vmem>>, vector<48x36xbf16>
    %cst_167 = arith.constant dense<0.000000e+00> : vector<48x256xf32>
    %276 = tpu.matmul %275, %0, %cst_167 {dimension_numbers = #tpu.dot_dimension_numbers<[1], [0], [0], [1], [0, 0, 1, 1], [], []>} : vector<48x36xbf16>, vector<36x256xbf16>, vector<48x256xf32> -> vector<48x256xf32>
    %277 = vector.extract_strided_slice %276 {offsets = [0, 0], sizes = [48, 64], strides = [1, 1]} : vector<48x256xf32> to vector<48x64xf32>
    %278 = vector.extract_strided_slice %276 {offsets = [0, 64], sizes = [48, 64], strides = [1, 1]} : vector<48x256xf32> to vector<48x64xf32>
    %279 = arith.maximumf %277, %278 : vector<48x64xf32>
    %280 = vector.extract_strided_slice %276 {offsets = [0, 128], sizes = [48, 64], strides = [1, 1]} : vector<48x256xf32> to vector<48x64xf32>
    %281 = vector.extract_strided_slice %276 {offsets = [0, 192], sizes = [48, 64], strides = [1, 1]} : vector<48x256xf32> to vector<48x64xf32>
    %282 = arith.maximumf %280, %281 : vector<48x64xf32>
    %283 = arith.maximumf %279, %282 : vector<48x64xf32>
    %284 = vector.broadcast %1 : vector<1x64xf32> to vector<48x64xf32>
    %285 = arith.addf %283, %284 : vector<48x64xf32>
    %cst_168 = arith.constant 0.000000e+00 : f32
    %286 = vector.broadcast %cst_168 : f32 to vector<48x64xf32>
    %287 = arith.maximumf %285, %286 : vector<48x64xf32>
    %288 = vector.extract_strided_slice %287 {offsets = [0, 0], sizes = [24, 64], strides = [1, 1]} : vector<48x64xf32> to vector<24x64xf32>
    %c1_169 = arith.constant 1 : index
    %c0_170 = arith.constant 0 : index
    %c6_171 = arith.constant 6 : index
    %c0_172 = arith.constant 0 : index
    %c0_173 = arith.constant 0 : index
    %289 = vector.load %arg11[%c1_169, %c0_170, %c6_171, %c0_172, %c0_173] : memref<2x2x7x24x64xf32, #tpu.memory_space<vmem>>, vector<1x1x1x24x64xf32>
    %290 = vector.shape_cast %289 : vector<1x1x1x24x64xf32> to vector<24x64xf32>
    %291 = vector.shape_cast %288 : vector<24x64xf32> to vector<1x1x1x24x64xf32>
    tpu.vector_store %arg11[%c1_169, %c0_170, %c6_171, %c0_172, %c0_173], %291 {strides = array<i32>} : memref<2x2x7x24x64xf32, #tpu.memory_space<vmem>>, vector<1x1x1x24x64xf32>,
    %292 = vector.extract_strided_slice %287 {offsets = [24, 0], sizes = [24, 64], strides = [1, 1]} : vector<48x64xf32> to vector<24x64xf32>
    %c1_174 = arith.constant 1 : index
    %c1_175 = arith.constant 1 : index
    %c6_176 = arith.constant 6 : index
    %c0_177 = arith.constant 0 : index
    %c0_178 = arith.constant 0 : index
    %293 = vector.load %arg11[%c1_174, %c1_175, %c6_176, %c0_177, %c0_178] : memref<2x2x7x24x64xf32, #tpu.memory_space<vmem>>, vector<1x1x1x24x64xf32>
    %294 = vector.shape_cast %293 : vector<1x1x1x24x64xf32> to vector<24x64xf32>
    %295 = vector.shape_cast %292 : vector<24x64xf32> to vector<1x1x1x24x64xf32>
    tpu.vector_store %arg11[%c1_174, %c1_175, %c6_176, %c0_177, %c0_178], %295 {strides = array<i32>} : memref<2x2x7x24x64xf32, #tpu.memory_space<vmem>>, vector<1x1x1x24x64xf32>,
    %c0_179 = arith.constant 0 : index
    %c0_180 = arith.constant 0 : index
    %c0_181 = arith.constant 0 : index
    %296 = vector.load %arg4[%c0_179, %c0_180, %c0_181] : memref<3x64x96xbf16, #tpu.memory_space<vmem>>, vector<3x64x96xbf16>
    %c0_182 = arith.constant 0 : index
    %c0_183 = arith.constant 0 : index
    %297 = vector.load %arg5[%c0_182, %c0_183] : memref<1x32xf32, #tpu.memory_space<vmem>>, vector<1x32xf32>
    %cst_184 = arith.constant 0.000000e+00 : f32
    %298 = vector.broadcast %cst_184 : f32 to vector<5x23x32xf32>
    %cst_185 = arith.constant 0.000000e+00 : f32
    %299 = vector.broadcast %cst_185 : f32 to vector<5x23x32xf32>
    %cst_186 = arith.constant 0.000000e+00 : f32
    %300 = vector.broadcast %cst_186 : f32 to vector<5x23x32xf32>
    %cst_187 = arith.constant 0.000000e+00 : f32
    %301 = vector.broadcast %cst_187 : f32 to vector<5x23x32xf32>
    %c0_188 = arith.constant 0 : index
    %c0_189 = arith.constant 0 : index
    %c0_190 = arith.constant 0 : index
    %c0_191 = arith.constant 0 : index
    %c0_192 = arith.constant 0 : index
    %302 = vector.load %arg11[%c0_188, %c0_189, %c0_190, %c0_191, %c0_192] : memref<2x2x7x24x64xf32, #tpu.memory_space<vmem>>, vector<1x1x7x24x64xf32>
    %303 = vector.shape_cast %302 : vector<1x1x7x24x64xf32> to vector<7x24x64xf32>
    %304 = vector.shape_cast %303 : vector<7x24x64xf32> to vector<168x64xf32>
    %305 = arith.truncf %304 : vector<168x64xf32> to vector<168x64xbf16>
    %306 = vector.extract_strided_slice %296 {offsets = [0, 0, 0], sizes = [1, 64, 96], strides = [1, 1, 1]} : vector<3x64x96xbf16> to vector<1x64x96xbf16>
    %307 = vector.shape_cast %306 : vector<1x64x96xbf16> to vector<64x96xbf16>
    %cst_193 = arith.constant dense<0.000000e+00> : vector<168x96xf32>
    %308 = tpu.matmul %305, %307, %cst_193 {dimension_numbers = #tpu.dot_dimension_numbers<[1], [0], [0], [1], [0, 0, 1, 1], [], []>} : vector<168x64xbf16>, vector<64x96xbf16>, vector<168x96xf32> -> vector<168x96xf32>
    %309 = vector.shape_cast %308 : vector<168x96xf32> to vector<7x24x96xf32>
    %310 = vector.extract_strided_slice %309 {offsets = [0, 0, 0], sizes = [5, 23, 32], strides = [1, 1, 1]} : vector<7x24x96xf32> to vector<5x23x32xf32>
    %311 = arith.addf %298, %310 : vector<5x23x32xf32>
    %312 = vector.extract_strided_slice %309 {offsets = [1, 0, 32], sizes = [5, 23, 32], strides = [1, 1, 1]} : vector<7x24x96xf32> to vector<5x23x32xf32>
    %313 = arith.addf %311, %312 : vector<5x23x32xf32>
    %314 = vector.extract_strided_slice %309 {offsets = [2, 0, 64], sizes = [5, 23, 32], strides = [1, 1, 1]} : vector<7x24x96xf32> to vector<5x23x32xf32>
    %315 = arith.addf %313, %314 : vector<5x23x32xf32>
    %316 = vector.extract_strided_slice %296 {offsets = [1, 0, 0], sizes = [1, 64, 96], strides = [1, 1, 1]} : vector<3x64x96xbf16> to vector<1x64x96xbf16>
    %317 = vector.shape_cast %316 : vector<1x64x96xbf16> to vector<64x96xbf16>
    %cst_194 = arith.constant dense<0.000000e+00> : vector<168x96xf32>
    %318 = tpu.matmul %305, %317, %cst_194 {dimension_numbers = #tpu.dot_dimension_numbers<[1], [0], [0], [1], [0, 0, 1, 1], [], []>} : vector<168x64xbf16>, vector<64x96xbf16>, vector<168x96xf32> -> vector<168x96xf32>
    %319 = vector.shape_cast %318 : vector<168x96xf32> to vector<7x24x96xf32>
    %320 = vector.extract_strided_slice %319 {offsets = [0, 1, 0], sizes = [5, 23, 32], strides = [1, 1, 1]} : vector<7x24x96xf32> to vector<5x23x32xf32>
    %321 = arith.addf %299, %320 : vector<5x23x32xf32>
    %322 = vector.extract_strided_slice %319 {offsets = [1, 1, 32], sizes = [5, 23, 32], strides = [1, 1, 1]} : vector<7x24x96xf32> to vector<5x23x32xf32>
    %323 = arith.addf %321, %322 : vector<5x23x32xf32>
    %324 = vector.extract_strided_slice %319 {offsets = [2, 1, 64], sizes = [5, 23, 32], strides = [1, 1, 1]} : vector<7x24x96xf32> to vector<5x23x32xf32>
    %325 = arith.addf %323, %324 : vector<5x23x32xf32>
    %326 = vector.extract_strided_slice %296 {offsets = [2, 0, 0], sizes = [1, 64, 96], strides = [1, 1, 1]} : vector<3x64x96xbf16> to vector<1x64x96xbf16>
    %327 = vector.shape_cast %326 : vector<1x64x96xbf16> to vector<64x96xbf16>
    %cst_195 = arith.constant dense<0.000000e+00> : vector<168x96xf32>
    %328 = tpu.matmul %305, %327, %cst_195 {dimension_numbers = #tpu.dot_dimension_numbers<[1], [0], [0], [1], [0, 0, 1, 1], [], []>} : vector<168x64xbf16>, vector<64x96xbf16>, vector<168x96xf32> -> vector<168x96xf32>
    %329 = vector.shape_cast %328 : vector<168x96xf32> to vector<7x24x96xf32>
    %330 = vector.extract_strided_slice %329 {offsets = [0, 1, 0], sizes = [5, 23, 32], strides = [1, 1, 1]} : vector<7x24x96xf32> to vector<5x23x32xf32>
    %331 = arith.addf %315, %330 : vector<5x23x32xf32>
    %332 = vector.extract_strided_slice %329 {offsets = [1, 1, 32], sizes = [5, 23, 32], strides = [1, 1, 1]} : vector<7x24x96xf32> to vector<5x23x32xf32>
    %333 = arith.addf %331, %332 : vector<5x23x32xf32>
    %334 = vector.extract_strided_slice %329 {offsets = [2, 1, 64], sizes = [5, 23, 32], strides = [1, 1, 1]} : vector<7x24x96xf32> to vector<5x23x32xf32>
    %335 = arith.addf %333, %334 : vector<5x23x32xf32>
    %c0_196 = arith.constant 0 : index
    %c1_197 = arith.constant 1 : index
    %c0_198 = arith.constant 0 : index
    %c0_199 = arith.constant 0 : index
    %c0_200 = arith.constant 0 : index
    %336 = vector.load %arg11[%c0_196, %c1_197, %c0_198, %c0_199, %c0_200] : memref<2x2x7x24x64xf32, #tpu.memory_space<vmem>>, vector<1x1x7x24x64xf32>
    %337 = vector.shape_cast %336 : vector<1x1x7x24x64xf32> to vector<7x24x64xf32>
    %338 = vector.shape_cast %337 : vector<7x24x64xf32> to vector<168x64xf32>
    %339 = arith.truncf %338 : vector<168x64xf32> to vector<168x64xbf16>
    %340 = vector.extract_strided_slice %296 {offsets = [0, 0, 0], sizes = [1, 64, 96], strides = [1, 1, 1]} : vector<3x64x96xbf16> to vector<1x64x96xbf16>
    %341 = vector.shape_cast %340 : vector<1x64x96xbf16> to vector<64x96xbf16>
    %cst_201 = arith.constant dense<0.000000e+00> : vector<168x96xf32>
    %342 = tpu.matmul %339, %341, %cst_201 {dimension_numbers = #tpu.dot_dimension_numbers<[1], [0], [0], [1], [0, 0, 1, 1], [], []>} : vector<168x64xbf16>, vector<64x96xbf16>, vector<168x96xf32> -> vector<168x96xf32>
    %343 = vector.shape_cast %342 : vector<168x96xf32> to vector<7x24x96xf32>
    %344 = vector.extract_strided_slice %343 {offsets = [0, 0, 0], sizes = [5, 23, 32], strides = [1, 1, 1]} : vector<7x24x96xf32> to vector<5x23x32xf32>
    %345 = arith.addf %325, %344 : vector<5x23x32xf32>
    %346 = vector.extract_strided_slice %343 {offsets = [1, 0, 32], sizes = [5, 23, 32], strides = [1, 1, 1]} : vector<7x24x96xf32> to vector<5x23x32xf32>
    %347 = arith.addf %345, %346 : vector<5x23x32xf32>
    %348 = vector.extract_strided_slice %343 {offsets = [2, 0, 64], sizes = [5, 23, 32], strides = [1, 1, 1]} : vector<7x24x96xf32> to vector<5x23x32xf32>
    %349 = arith.addf %347, %348 : vector<5x23x32xf32>
    %350 = vector.extract_strided_slice %296 {offsets = [1, 0, 0], sizes = [1, 64, 96], strides = [1, 1, 1]} : vector<3x64x96xbf16> to vector<1x64x96xbf16>
    %351 = vector.shape_cast %350 : vector<1x64x96xbf16> to vector<64x96xbf16>
    %cst_202 = arith.constant dense<0.000000e+00> : vector<168x96xf32>
    %352 = tpu.matmul %339, %351, %cst_202 {dimension_numbers = #tpu.dot_dimension_numbers<[1], [0], [0], [1], [0, 0, 1, 1], [], []>} : vector<168x64xbf16>, vector<64x96xbf16>, vector<168x96xf32> -> vector<168x96xf32>
    %353 = vector.shape_cast %352 : vector<168x96xf32> to vector<7x24x96xf32>
    %354 = vector.extract_strided_slice %353 {offsets = [0, 0, 0], sizes = [5, 23, 32], strides = [1, 1, 1]} : vector<7x24x96xf32> to vector<5x23x32xf32>
    %355 = arith.addf %335, %354 : vector<5x23x32xf32>
    %356 = vector.extract_strided_slice %353 {offsets = [1, 0, 32], sizes = [5, 23, 32], strides = [1, 1, 1]} : vector<7x24x96xf32> to vector<5x23x32xf32>
    %357 = arith.addf %355, %356 : vector<5x23x32xf32>
    %358 = vector.extract_strided_slice %353 {offsets = [2, 0, 64], sizes = [5, 23, 32], strides = [1, 1, 1]} : vector<7x24x96xf32> to vector<5x23x32xf32>
    %359 = arith.addf %357, %358 : vector<5x23x32xf32>
    %360 = vector.extract_strided_slice %296 {offsets = [2, 0, 0], sizes = [1, 64, 96], strides = [1, 1, 1]} : vector<3x64x96xbf16> to vector<1x64x96xbf16>
    %361 = vector.shape_cast %360 : vector<1x64x96xbf16> to vector<64x96xbf16>
    %cst_203 = arith.constant dense<0.000000e+00> : vector<168x96xf32>
    %362 = tpu.matmul %339, %361, %cst_203 {dimension_numbers = #tpu.dot_dimension_numbers<[1], [0], [0], [1], [0, 0, 1, 1], [], []>} : vector<168x64xbf16>, vector<64x96xbf16>, vector<168x96xf32> -> vector<168x96xf32>
    %363 = vector.shape_cast %362 : vector<168x96xf32> to vector<7x24x96xf32>
    %364 = vector.extract_strided_slice %363 {offsets = [0, 1, 0], sizes = [5, 23, 32], strides = [1, 1, 1]} : vector<7x24x96xf32> to vector<5x23x32xf32>
    %365 = arith.addf %349, %364 : vector<5x23x32xf32>
    %366 = vector.extract_strided_slice %363 {offsets = [1, 1, 32], sizes = [5, 23, 32], strides = [1, 1, 1]} : vector<7x24x96xf32> to vector<5x23x32xf32>
    %367 = arith.addf %365, %366 : vector<5x23x32xf32>
    %368 = vector.extract_strided_slice %363 {offsets = [2, 1, 64], sizes = [5, 23, 32], strides = [1, 1, 1]} : vector<7x24x96xf32> to vector<5x23x32xf32>
    %369 = arith.addf %367, %368 : vector<5x23x32xf32>
    %c1_204 = arith.constant 1 : index
    %c0_205 = arith.constant 0 : index
    %c0_206 = arith.constant 0 : index
    %c0_207 = arith.constant 0 : index
    %c0_208 = arith.constant 0 : index
    %370 = vector.load %arg11[%c1_204, %c0_205, %c0_206, %c0_207, %c0_208] : memref<2x2x7x24x64xf32, #tpu.memory_space<vmem>>, vector<1x1x7x24x64xf32>
    %371 = vector.shape_cast %370 : vector<1x1x7x24x64xf32> to vector<7x24x64xf32>
    %372 = vector.shape_cast %371 : vector<7x24x64xf32> to vector<168x64xf32>
    %373 = arith.truncf %372 : vector<168x64xf32> to vector<168x64xbf16>
    %374 = vector.extract_strided_slice %296 {offsets = [0, 0, 0], sizes = [1, 64, 96], strides = [1, 1, 1]} : vector<3x64x96xbf16> to vector<1x64x96xbf16>
    %375 = vector.shape_cast %374 : vector<1x64x96xbf16> to vector<64x96xbf16>
    %cst_209 = arith.constant dense<0.000000e+00> : vector<168x96xf32>
    %376 = tpu.matmul %373, %375, %cst_209 {dimension_numbers = #tpu.dot_dimension_numbers<[1], [0], [0], [1], [0, 0, 1, 1], [], []>} : vector<168x64xbf16>, vector<64x96xbf16>, vector<168x96xf32> -> vector<168x96xf32>
    %377 = vector.shape_cast %376 : vector<168x96xf32> to vector<7x24x96xf32>
    %378 = vector.extract_strided_slice %377 {offsets = [0, 0, 0], sizes = [5, 23, 32], strides = [1, 1, 1]} : vector<7x24x96xf32> to vector<5x23x32xf32>
    %379 = arith.addf %300, %378 : vector<5x23x32xf32>
    %380 = vector.extract_strided_slice %377 {offsets = [1, 0, 32], sizes = [5, 23, 32], strides = [1, 1, 1]} : vector<7x24x96xf32> to vector<5x23x32xf32>
    %381 = arith.addf %379, %380 : vector<5x23x32xf32>
    %382 = vector.extract_strided_slice %377 {offsets = [2, 0, 64], sizes = [5, 23, 32], strides = [1, 1, 1]} : vector<7x24x96xf32> to vector<5x23x32xf32>
    %383 = arith.addf %381, %382 : vector<5x23x32xf32>
    %384 = vector.extract_strided_slice %296 {offsets = [1, 0, 0], sizes = [1, 64, 96], strides = [1, 1, 1]} : vector<3x64x96xbf16> to vector<1x64x96xbf16>
    %385 = vector.shape_cast %384 : vector<1x64x96xbf16> to vector<64x96xbf16>
    %cst_210 = arith.constant dense<0.000000e+00> : vector<168x96xf32>
    %386 = tpu.matmul %373, %385, %cst_210 {dimension_numbers = #tpu.dot_dimension_numbers<[1], [0], [0], [1], [0, 0, 1, 1], [], []>} : vector<168x64xbf16>, vector<64x96xbf16>, vector<168x96xf32> -> vector<168x96xf32>
    %387 = vector.shape_cast %386 : vector<168x96xf32> to vector<7x24x96xf32>
    %388 = vector.extract_strided_slice %387 {offsets = [0, 1, 0], sizes = [5, 23, 32], strides = [1, 1, 1]} : vector<7x24x96xf32> to vector<5x23x32xf32>
    %389 = arith.addf %301, %388 : vector<5x23x32xf32>
    %390 = vector.extract_strided_slice %387 {offsets = [1, 1, 32], sizes = [5, 23, 32], strides = [1, 1, 1]} : vector<7x24x96xf32> to vector<5x23x32xf32>
    %391 = arith.addf %389, %390 : vector<5x23x32xf32>
    %392 = vector.extract_strided_slice %387 {offsets = [2, 1, 64], sizes = [5, 23, 32], strides = [1, 1, 1]} : vector<7x24x96xf32> to vector<5x23x32xf32>
    %393 = arith.addf %391, %392 : vector<5x23x32xf32>
    %394 = vector.extract_strided_slice %296 {offsets = [2, 0, 0], sizes = [1, 64, 96], strides = [1, 1, 1]} : vector<3x64x96xbf16> to vector<1x64x96xbf16>
    %395 = vector.shape_cast %394 : vector<1x64x96xbf16> to vector<64x96xbf16>
    %cst_211 = arith.constant dense<0.000000e+00> : vector<168x96xf32>
    %396 = tpu.matmul %373, %395, %cst_211 {dimension_numbers = #tpu.dot_dimension_numbers<[1], [0], [0], [1], [0, 0, 1, 1], [], []>} : vector<168x64xbf16>, vector<64x96xbf16>, vector<168x96xf32> -> vector<168x96xf32>
    %397 = vector.shape_cast %396 : vector<168x96xf32> to vector<7x24x96xf32>
    %398 = vector.extract_strided_slice %397 {offsets = [0, 1, 0], sizes = [5, 23, 32], strides = [1, 1, 1]} : vector<7x24x96xf32> to vector<5x23x32xf32>
    %399 = arith.addf %383, %398 : vector<5x23x32xf32>
    %400 = vector.extract_strided_slice %397 {offsets = [1, 1, 32], sizes = [5, 23, 32], strides = [1, 1, 1]} : vector<7x24x96xf32> to vector<5x23x32xf32>
    %401 = arith.addf %399, %400 : vector<5x23x32xf32>
    %402 = vector.extract_strided_slice %397 {offsets = [2, 1, 64], sizes = [5, 23, 32], strides = [1, 1, 1]} : vector<7x24x96xf32> to vector<5x23x32xf32>
    %403 = arith.addf %401, %402 : vector<5x23x32xf32>
    %c1_212 = arith.constant 1 : index
    %c1_213 = arith.constant 1 : index
    %c0_214 = arith.constant 0 : index
    %c0_215 = arith.constant 0 : index
    %c0_216 = arith.constant 0 : index
    %404 = vector.load %arg11[%c1_212, %c1_213, %c0_214, %c0_215, %c0_216] : memref<2x2x7x24x64xf32, #tpu.memory_space<vmem>>, vector<1x1x7x24x64xf32>
    %405 = vector.shape_cast %404 : vector<1x1x7x24x64xf32> to vector<7x24x64xf32>
    %406 = vector.shape_cast %405 : vector<7x24x64xf32> to vector<168x64xf32>
    %407 = arith.truncf %406 : vector<168x64xf32> to vector<168x64xbf16>
    %408 = vector.extract_strided_slice %296 {offsets = [0, 0, 0], sizes = [1, 64, 96], strides = [1, 1, 1]} : vector<3x64x96xbf16> to vector<1x64x96xbf16>
    %409 = vector.shape_cast %408 : vector<1x64x96xbf16> to vector<64x96xbf16>
    %cst_217 = arith.constant dense<0.000000e+00> : vector<168x96xf32>
    %410 = tpu.matmul %407, %409, %cst_217 {dimension_numbers = #tpu.dot_dimension_numbers<[1], [0], [0], [1], [0, 0, 1, 1], [], []>} : vector<168x64xbf16>, vector<64x96xbf16>, vector<168x96xf32> -> vector<168x96xf32>
    %411 = vector.shape_cast %410 : vector<168x96xf32> to vector<7x24x96xf32>
    %412 = vector.extract_strided_slice %411 {offsets = [0, 0, 0], sizes = [5, 23, 32], strides = [1, 1, 1]} : vector<7x24x96xf32> to vector<5x23x32xf32>
    %413 = arith.addf %393, %412 : vector<5x23x32xf32>
    %414 = vector.extract_strided_slice %411 {offsets = [1, 0, 32], sizes = [5, 23, 32], strides = [1, 1, 1]} : vector<7x24x96xf32> to vector<5x23x32xf32>
    %415 = arith.addf %413, %414 : vector<5x23x32xf32>
    %416 = vector.extract_strided_slice %411 {offsets = [2, 0, 64], sizes = [5, 23, 32], strides = [1, 1, 1]} : vector<7x24x96xf32> to vector<5x23x32xf32>
    %417 = arith.addf %415, %416 : vector<5x23x32xf32>
    %418 = vector.extract_strided_slice %296 {offsets = [1, 0, 0], sizes = [1, 64, 96], strides = [1, 1, 1]} : vector<3x64x96xbf16> to vector<1x64x96xbf16>
    %419 = vector.shape_cast %418 : vector<1x64x96xbf16> to vector<64x96xbf16>
    %cst_218 = arith.constant dense<0.000000e+00> : vector<168x96xf32>
    %420 = tpu.matmul %407, %419, %cst_218 {dimension_numbers = #tpu.dot_dimension_numbers<[1], [0], [0], [1], [0, 0, 1, 1], [], []>} : vector<168x64xbf16>, vector<64x96xbf16>, vector<168x96xf32> -> vector<168x96xf32>
    %421 = vector.shape_cast %420 : vector<168x96xf32> to vector<7x24x96xf32>
    %422 = vector.extract_strided_slice %421 {offsets = [0, 0, 0], sizes = [5, 23, 32], strides = [1, 1, 1]} : vector<7x24x96xf32> to vector<5x23x32xf32>
    %423 = arith.addf %403, %422 : vector<5x23x32xf32>
    %424 = vector.extract_strided_slice %421 {offsets = [1, 0, 32], sizes = [5, 23, 32], strides = [1, 1, 1]} : vector<7x24x96xf32> to vector<5x23x32xf32>
    %425 = arith.addf %423, %424 : vector<5x23x32xf32>
    %426 = vector.extract_strided_slice %421 {offsets = [2, 0, 64], sizes = [5, 23, 32], strides = [1, 1, 1]} : vector<7x24x96xf32> to vector<5x23x32xf32>
    %427 = arith.addf %425, %426 : vector<5x23x32xf32>
    %428 = vector.extract_strided_slice %296 {offsets = [2, 0, 0], sizes = [1, 64, 96], strides = [1, 1, 1]} : vector<3x64x96xbf16> to vector<1x64x96xbf16>
    %429 = vector.shape_cast %428 : vector<1x64x96xbf16> to vector<64x96xbf16>
    %cst_219 = arith.constant dense<0.000000e+00> : vector<168x96xf32>
    %430 = tpu.matmul %407, %429, %cst_219 {dimension_numbers = #tpu.dot_dimension_numbers<[1], [0], [0], [1], [0, 0, 1, 1], [], []>} : vector<168x64xbf16>, vector<64x96xbf16>, vector<168x96xf32> -> vector<168x96xf32>
    %431 = vector.shape_cast %430 : vector<168x96xf32> to vector<7x24x96xf32>
    %432 = vector.extract_strided_slice %431 {offsets = [0, 1, 0], sizes = [5, 23, 32], strides = [1, 1, 1]} : vector<7x24x96xf32> to vector<5x23x32xf32>
    %433 = arith.addf %417, %432 : vector<5x23x32xf32>
    %434 = vector.extract_strided_slice %431 {offsets = [1, 1, 32], sizes = [5, 23, 32], strides = [1, 1, 1]} : vector<7x24x96xf32> to vector<5x23x32xf32>
    %435 = arith.addf %433, %434 : vector<5x23x32xf32>
    %436 = vector.extract_strided_slice %431 {offsets = [2, 1, 64], sizes = [5, 23, 32], strides = [1, 1, 1]} : vector<7x24x96xf32> to vector<5x23x32xf32>
    %437 = arith.addf %435, %436 : vector<5x23x32xf32>
    %438 = arith.maximumf %359, %369 : vector<5x23x32xf32>
    %439 = vector.extract_strided_slice %438 {offsets = [0, 0, 0], sizes = [1, 23, 32], strides = [1, 1, 1]} : vector<5x23x32xf32> to vector<1x23x32xf32>
    %440 = vector.shape_cast %439 : vector<1x23x32xf32> to vector<23x32xf32>
    %441 = vector.extract_strided_slice %438 {offsets = [1, 0, 0], sizes = [1, 23, 32], strides = [1, 1, 1]} : vector<5x23x32xf32> to vector<1x23x32xf32>
    %442 = vector.shape_cast %441 : vector<1x23x32xf32> to vector<23x32xf32>
    %443 = arith.maximumf %440, %442 : vector<23x32xf32>
    %444 = vector.broadcast %297 : vector<1x32xf32> to vector<23x32xf32>
    %445 = arith.addf %443, %444 : vector<23x32xf32>
    %cst_220 = arith.constant 0.000000e+00 : f32
    %446 = vector.broadcast %cst_220 : f32 to vector<23x32xf32>
    %447 = arith.maximumf %445, %446 : vector<23x32xf32>
    %448 = vector.extract_strided_slice %438 {offsets = [2, 0, 0], sizes = [1, 23, 32], strides = [1, 1, 1]} : vector<5x23x32xf32> to vector<1x23x32xf32>
    %449 = vector.shape_cast %448 : vector<1x23x32xf32> to vector<23x32xf32>
    %450 = vector.extract_strided_slice %438 {offsets = [3, 0, 0], sizes = [1, 23, 32], strides = [1, 1, 1]} : vector<5x23x32xf32> to vector<1x23x32xf32>
    %451 = vector.shape_cast %450 : vector<1x23x32xf32> to vector<23x32xf32>
    %452 = arith.maximumf %449, %451 : vector<23x32xf32>
    %453 = vector.broadcast %297 : vector<1x32xf32> to vector<23x32xf32>
    %454 = arith.addf %452, %453 : vector<23x32xf32>
    %cst_221 = arith.constant 0.000000e+00 : f32
    %455 = vector.broadcast %cst_221 : f32 to vector<23x32xf32>
    %456 = arith.maximumf %454, %455 : vector<23x32xf32>
    %457 = tpu.concatenate %447, %456 in 1 : vector<23x32xf32>, vector<23x32xf32> -> vector<23x64xf32>
    %458 = arith.truncf %457 : vector<23x64xf32> to vector<23x64xbf16>
    %459 = arith.maximumf %427, %437 : vector<5x23x32xf32>
    %460 = vector.extract_strided_slice %459 {offsets = [0, 0, 0], sizes = [1, 23, 32], strides = [1, 1, 1]} : vector<5x23x32xf32> to vector<1x23x32xf32>
    %461 = vector.shape_cast %460 : vector<1x23x32xf32> to vector<23x32xf32>
    %462 = vector.extract_strided_slice %459 {offsets = [1, 0, 0], sizes = [1, 23, 32], strides = [1, 1, 1]} : vector<5x23x32xf32> to vector<1x23x32xf32>
    %463 = vector.shape_cast %462 : vector<1x23x32xf32> to vector<23x32xf32>
    %464 = arith.maximumf %461, %463 : vector<23x32xf32>
    %465 = vector.broadcast %297 : vector<1x32xf32> to vector<23x32xf32>
    %466 = arith.addf %464, %465 : vector<23x32xf32>
    %cst_222 = arith.constant 0.000000e+00 : f32
    %467 = vector.broadcast %cst_222 : f32 to vector<23x32xf32>
    %468 = arith.maximumf %466, %467 : vector<23x32xf32>
    %469 = vector.extract_strided_slice %459 {offsets = [2, 0, 0], sizes = [1, 23, 32], strides = [1, 1, 1]} : vector<5x23x32xf32> to vector<1x23x32xf32>
    %470 = vector.shape_cast %469 : vector<1x23x32xf32> to vector<23x32xf32>
    %471 = vector.extract_strided_slice %459 {offsets = [3, 0, 0], sizes = [1, 23, 32], strides = [1, 1, 1]} : vector<5x23x32xf32> to vector<1x23x32xf32>
    %472 = vector.shape_cast %471 : vector<1x23x32xf32> to vector<23x32xf32>
    %473 = arith.maximumf %470, %472 : vector<23x32xf32>
    %474 = vector.broadcast %297 : vector<1x32xf32> to vector<23x32xf32>
    %475 = arith.addf %473, %474 : vector<23x32xf32>
    %cst_223 = arith.constant 0.000000e+00 : f32
    %476 = vector.broadcast %cst_223 : f32 to vector<23x32xf32>
    %477 = arith.maximumf %475, %476 : vector<23x32xf32>
    %478 = tpu.concatenate %468, %477 in 1 : vector<23x32xf32>, vector<23x32xf32> -> vector<23x64xf32>
    %479 = arith.truncf %478 : vector<23x64xf32> to vector<23x64xbf16>
    tpu.wait_dma2 semaphore(%arg13 : memref<!tpu.dma_semaphore, #tpu.memory_space<semaphore_mem>>) src(%arg6 : memref<23x64x640xbf16, #tpu.memory_space<any>>) dst(%arg12 : memref<23x64x640xbf16, #tpu.memory_space<vmem>>)
    %cst_224 = arith.constant 0.000000e+00 : f32
    %480 = vector.broadcast %cst_224 : f32 to vector<2x640xf32>
    %481 = vector.extract_strided_slice %458 {offsets = [0, 0], sizes = [1, 64], strides = [1, 1]} : vector<23x64xbf16> to vector<1x64xbf16>
    %482 = vector.extract_strided_slice %479 {offsets = [0, 0], sizes = [1, 64], strides = [1, 1]} : vector<23x64xbf16> to vector<1x64xbf16>
    %483 = tpu.concatenate %481, %482 in 0 : vector<1x64xbf16>, vector<1x64xbf16> -> vector<2x64xbf16>
    %c0_225 = arith.constant 0 : index
    %c0_226 = arith.constant 0 : index
    %c0_227 = arith.constant 0 : index
    %484 = vector.load %arg12[%c0_225, %c0_226, %c0_227] : memref<23x64x640xbf16, #tpu.memory_space<vmem>>, vector<1x64x640xbf16>
    %485 = vector.shape_cast %484 : vector<1x64x640xbf16> to vector<64x640xbf16>
    %cst_228 = arith.constant dense<0.000000e+00> : vector<2x640xf32>
    %486 = tpu.matmul %483, %485, %cst_228 {dimension_numbers = #tpu.dot_dimension_numbers<[1], [0], [0], [1], [0, 0, 1, 1], [], []>} : vector<2x64xbf16>, vector<64x640xbf16>, vector<2x640xf32> -> vector<2x640xf32>
    %487 = arith.addf %480, %486 : vector<2x640xf32>
    %488 = vector.extract_strided_slice %458 {offsets = [1, 0], sizes = [1, 64], strides = [1, 1]} : vector<23x64xbf16> to vector<1x64xbf16>
    %489 = vector.extract_strided_slice %479 {offsets = [1, 0], sizes = [1, 64], strides = [1, 1]} : vector<23x64xbf16> to vector<1x64xbf16>
    %490 = tpu.concatenate %488, %489 in 0 : vector<1x64xbf16>, vector<1x64xbf16> -> vector<2x64xbf16>
    %c1_229 = arith.constant 1 : index
    %c0_230 = arith.constant 0 : index
    %c0_231 = arith.constant 0 : index
    %491 = vector.load %arg12[%c1_229, %c0_230, %c0_231] : memref<23x64x640xbf16, #tpu.memory_space<vmem>>, vector<1x64x640xbf16>
    %492 = vector.shape_cast %491 : vector<1x64x640xbf16> to vector<64x640xbf16>
    %cst_232 = arith.constant dense<0.000000e+00> : vector<2x640xf32>
    %493 = tpu.matmul %490, %492, %cst_232 {dimension_numbers = #tpu.dot_dimension_numbers<[1], [0], [0], [1], [0, 0, 1, 1], [], []>} : vector<2x64xbf16>, vector<64x640xbf16>, vector<2x640xf32> -> vector<2x640xf32>
    %494 = arith.addf %487, %493 : vector<2x640xf32>
    %495 = vector.extract_strided_slice %458 {offsets = [2, 0], sizes = [1, 64], strides = [1, 1]} : vector<23x64xbf16> to vector<1x64xbf16>
    %496 = vector.extract_strided_slice %479 {offsets = [2, 0], sizes = [1, 64], strides = [1, 1]} : vector<23x64xbf16> to vector<1x64xbf16>
    %497 = tpu.concatenate %495, %496 in 0 : vector<1x64xbf16>, vector<1x64xbf16> -> vector<2x64xbf16>
    %c2_233 = arith.constant 2 : index
    %c0_234 = arith.constant 0 : index
    %c0_235 = arith.constant 0 : index
    %498 = vector.load %arg12[%c2_233, %c0_234, %c0_235] : memref<23x64x640xbf16, #tpu.memory_space<vmem>>, vector<1x64x640xbf16>
    %499 = vector.shape_cast %498 : vector<1x64x640xbf16> to vector<64x640xbf16>
    %cst_236 = arith.constant dense<0.000000e+00> : vector<2x640xf32>
    %500 = tpu.matmul %497, %499, %cst_236 {dimension_numbers = #tpu.dot_dimension_numbers<[1], [0], [0], [1], [0, 0, 1, 1], [], []>} : vector<2x64xbf16>, vector<64x640xbf16>, vector<2x640xf32> -> vector<2x640xf32>
    %501 = arith.addf %494, %500 : vector<2x640xf32>
    %502 = vector.extract_strided_slice %458 {offsets = [3, 0], sizes = [1, 64], strides = [1, 1]} : vector<23x64xbf16> to vector<1x64xbf16>
    %503 = vector.extract_strided_slice %479 {offsets = [3, 0], sizes = [1, 64], strides = [1, 1]} : vector<23x64xbf16> to vector<1x64xbf16>
    %504 = tpu.concatenate %502, %503 in 0 : vector<1x64xbf16>, vector<1x64xbf16> -> vector<2x64xbf16>
    %c3_237 = arith.constant 3 : index
    %c0_238 = arith.constant 0 : index
    %c0_239 = arith.constant 0 : index
    %505 = vector.load %arg12[%c3_237, %c0_238, %c0_239] : memref<23x64x640xbf16, #tpu.memory_space<vmem>>, vector<1x64x640xbf16>
    %506 = vector.shape_cast %505 : vector<1x64x640xbf16> to vector<64x640xbf16>
    %cst_240 = arith.constant dense<0.000000e+00> : vector<2x640xf32>
    %507 = tpu.matmul %504, %506, %cst_240 {dimension_numbers = #tpu.dot_dimension_numbers<[1], [0], [0], [1], [0, 0, 1, 1], [], []>} : vector<2x64xbf16>, vector<64x640xbf16>, vector<2x640xf32> -> vector<2x640xf32>
    %508 = arith.addf %501, %507 : vector<2x640xf32>
    %509 = vector.extract_strided_slice %458 {offsets = [4, 0], sizes = [1, 64], strides = [1, 1]} : vector<23x64xbf16> to vector<1x64xbf16>
    %510 = vector.extract_strided_slice %479 {offsets = [4, 0], sizes = [1, 64], strides = [1, 1]} : vector<23x64xbf16> to vector<1x64xbf16>
    %511 = tpu.concatenate %509, %510 in 0 : vector<1x64xbf16>, vector<1x64xbf16> -> vector<2x64xbf16>
    %c4_241 = arith.constant 4 : index
    %c0_242 = arith.constant 0 : index
    %c0_243 = arith.constant 0 : index
    %512 = vector.load %arg12[%c4_241, %c0_242, %c0_243] : memref<23x64x640xbf16, #tpu.memory_space<vmem>>, vector<1x64x640xbf16>
    %513 = vector.shape_cast %512 : vector<1x64x640xbf16> to vector<64x640xbf16>
    %cst_244 = arith.constant dense<0.000000e+00> : vector<2x640xf32>
    %514 = tpu.matmul %511, %513, %cst_244 {dimension_numbers = #tpu.dot_dimension_numbers<[1], [0], [0], [1], [0, 0, 1, 1], [], []>} : vector<2x64xbf16>, vector<64x640xbf16>, vector<2x640xf32> -> vector<2x640xf32>
    %515 = arith.addf %508, %514 : vector<2x640xf32>
    %516 = vector.extract_strided_slice %458 {offsets = [5, 0], sizes = [1, 64], strides = [1, 1]} : vector<23x64xbf16> to vector<1x64xbf16>
    %517 = vector.extract_strided_slice %479 {offsets = [5, 0], sizes = [1, 64], strides = [1, 1]} : vector<23x64xbf16> to vector<1x64xbf16>
    %518 = tpu.concatenate %516, %517 in 0 : vector<1x64xbf16>, vector<1x64xbf16> -> vector<2x64xbf16>
    %c5_245 = arith.constant 5 : index
    %c0_246 = arith.constant 0 : index
    %c0_247 = arith.constant 0 : index
    %519 = vector.load %arg12[%c5_245, %c0_246, %c0_247] : memref<23x64x640xbf16, #tpu.memory_space<vmem>>, vector<1x64x640xbf16>
    %520 = vector.shape_cast %519 : vector<1x64x640xbf16> to vector<64x640xbf16>
    %cst_248 = arith.constant dense<0.000000e+00> : vector<2x640xf32>
    %521 = tpu.matmul %518, %520, %cst_248 {dimension_numbers = #tpu.dot_dimension_numbers<[1], [0], [0], [1], [0, 0, 1, 1], [], []>} : vector<2x64xbf16>, vector<64x640xbf16>, vector<2x640xf32> -> vector<2x640xf32>
    %522 = arith.addf %515, %521 : vector<2x640xf32>
    %523 = vector.extract_strided_slice %458 {offsets = [6, 0], sizes = [1, 64], strides = [1, 1]} : vector<23x64xbf16> to vector<1x64xbf16>
    %524 = vector.extract_strided_slice %479 {offsets = [6, 0], sizes = [1, 64], strides = [1, 1]} : vector<23x64xbf16> to vector<1x64xbf16>
    %525 = tpu.concatenate %523, %524 in 0 : vector<1x64xbf16>, vector<1x64xbf16> -> vector<2x64xbf16>
    %c6_249 = arith.constant 6 : index
    %c0_250 = arith.constant 0 : index
    %c0_251 = arith.constant 0 : index
    %526 = vector.load %arg12[%c6_249, %c0_250, %c0_251] : memref<23x64x640xbf16, #tpu.memory_space<vmem>>, vector<1x64x640xbf16>
    %527 = vector.shape_cast %526 : vector<1x64x640xbf16> to vector<64x640xbf16>
    %cst_252 = arith.constant dense<0.000000e+00> : vector<2x640xf32>
    %528 = tpu.matmul %525, %527, %cst_252 {dimension_numbers = #tpu.dot_dimension_numbers<[1], [0], [0], [1], [0, 0, 1, 1], [], []>} : vector<2x64xbf16>, vector<64x640xbf16>, vector<2x640xf32> -> vector<2x640xf32>
    %529 = arith.addf %522, %528 : vector<2x640xf32>
    %530 = vector.extract_strided_slice %458 {offsets = [7, 0], sizes = [1, 64], strides = [1, 1]} : vector<23x64xbf16> to vector<1x64xbf16>
    %531 = vector.extract_strided_slice %479 {offsets = [7, 0], sizes = [1, 64], strides = [1, 1]} : vector<23x64xbf16> to vector<1x64xbf16>
    %532 = tpu.concatenate %530, %531 in 0 : vector<1x64xbf16>, vector<1x64xbf16> -> vector<2x64xbf16>
    %c7 = arith.constant 7 : index
    %c0_253 = arith.constant 0 : index
    %c0_254 = arith.constant 0 : index
    %533 = vector.load %arg12[%c7, %c0_253, %c0_254] : memref<23x64x640xbf16, #tpu.memory_space<vmem>>, vector<1x64x640xbf16>
    %534 = vector.shape_cast %533 : vector<1x64x640xbf16> to vector<64x640xbf16>
    %cst_255 = arith.constant dense<0.000000e+00> : vector<2x640xf32>
    %535 = tpu.matmul %532, %534, %cst_255 {dimension_numbers = #tpu.dot_dimension_numbers<[1], [0], [0], [1], [0, 0, 1, 1], [], []>} : vector<2x64xbf16>, vector<64x640xbf16>, vector<2x640xf32> -> vector<2x640xf32>
    %536 = arith.addf %529, %535 : vector<2x640xf32>
    %537 = vector.extract_strided_slice %458 {offsets = [8, 0], sizes = [1, 64], strides = [1, 1]} : vector<23x64xbf16> to vector<1x64xbf16>
    %538 = vector.extract_strided_slice %479 {offsets = [8, 0], sizes = [1, 64], strides = [1, 1]} : vector<23x64xbf16> to vector<1x64xbf16>
    %539 = tpu.concatenate %537, %538 in 0 : vector<1x64xbf16>, vector<1x64xbf16> -> vector<2x64xbf16>
    %c8 = arith.constant 8 : index
    %c0_256 = arith.constant 0 : index
    %c0_257 = arith.constant 0 : index
    %540 = vector.load %arg12[%c8, %c0_256, %c0_257] : memref<23x64x640xbf16, #tpu.memory_space<vmem>>, vector<1x64x640xbf16>
    %541 = vector.shape_cast %540 : vector<1x64x640xbf16> to vector<64x640xbf16>
    %cst_258 = arith.constant dense<0.000000e+00> : vector<2x640xf32>
    %542 = tpu.matmul %539, %541, %cst_258 {dimension_numbers = #tpu.dot_dimension_numbers<[1], [0], [0], [1], [0, 0, 1, 1], [], []>} : vector<2x64xbf16>, vector<64x640xbf16>, vector<2x640xf32> -> vector<2x640xf32>
    %543 = arith.addf %536, %542 : vector<2x640xf32>
    %544 = vector.extract_strided_slice %458 {offsets = [9, 0], sizes = [1, 64], strides = [1, 1]} : vector<23x64xbf16> to vector<1x64xbf16>
    %545 = vector.extract_strided_slice %479 {offsets = [9, 0], sizes = [1, 64], strides = [1, 1]} : vector<23x64xbf16> to vector<1x64xbf16>
    %546 = tpu.concatenate %544, %545 in 0 : vector<1x64xbf16>, vector<1x64xbf16> -> vector<2x64xbf16>
    %c9 = arith.constant 9 : index
    %c0_259 = arith.constant 0 : index
    %c0_260 = arith.constant 0 : index
    %547 = vector.load %arg12[%c9, %c0_259, %c0_260] : memref<23x64x640xbf16, #tpu.memory_space<vmem>>, vector<1x64x640xbf16>
    %548 = vector.shape_cast %547 : vector<1x64x640xbf16> to vector<64x640xbf16>
    %cst_261 = arith.constant dense<0.000000e+00> : vector<2x640xf32>
    %549 = tpu.matmul %546, %548, %cst_261 {dimension_numbers = #tpu.dot_dimension_numbers<[1], [0], [0], [1], [0, 0, 1, 1], [], []>} : vector<2x64xbf16>, vector<64x640xbf16>, vector<2x640xf32> -> vector<2x640xf32>
    %550 = arith.addf %543, %549 : vector<2x640xf32>
    %551 = vector.extract_strided_slice %458 {offsets = [10, 0], sizes = [1, 64], strides = [1, 1]} : vector<23x64xbf16> to vector<1x64xbf16>
    %552 = vector.extract_strided_slice %479 {offsets = [10, 0], sizes = [1, 64], strides = [1, 1]} : vector<23x64xbf16> to vector<1x64xbf16>
    %553 = tpu.concatenate %551, %552 in 0 : vector<1x64xbf16>, vector<1x64xbf16> -> vector<2x64xbf16>
    %c10 = arith.constant 10 : index
    %c0_262 = arith.constant 0 : index
    %c0_263 = arith.constant 0 : index
    %554 = vector.load %arg12[%c10, %c0_262, %c0_263] : memref<23x64x640xbf16, #tpu.memory_space<vmem>>, vector<1x64x640xbf16>
    %555 = vector.shape_cast %554 : vector<1x64x640xbf16> to vector<64x640xbf16>
    %cst_264 = arith.constant dense<0.000000e+00> : vector<2x640xf32>
    %556 = tpu.matmul %553, %555, %cst_264 {dimension_numbers = #tpu.dot_dimension_numbers<[1], [0], [0], [1], [0, 0, 1, 1], [], []>} : vector<2x64xbf16>, vector<64x640xbf16>, vector<2x640xf32> -> vector<2x640xf32>
    %557 = arith.addf %550, %556 : vector<2x640xf32>
    %558 = vector.extract_strided_slice %458 {offsets = [11, 0], sizes = [1, 64], strides = [1, 1]} : vector<23x64xbf16> to vector<1x64xbf16>
    %559 = vector.extract_strided_slice %479 {offsets = [11, 0], sizes = [1, 64], strides = [1, 1]} : vector<23x64xbf16> to vector<1x64xbf16>
    %560 = tpu.concatenate %558, %559 in 0 : vector<1x64xbf16>, vector<1x64xbf16> -> vector<2x64xbf16>
    %c11 = arith.constant 11 : index
    %c0_265 = arith.constant 0 : index
    %c0_266 = arith.constant 0 : index
    %561 = vector.load %arg12[%c11, %c0_265, %c0_266] : memref<23x64x640xbf16, #tpu.memory_space<vmem>>, vector<1x64x640xbf16>
    %562 = vector.shape_cast %561 : vector<1x64x640xbf16> to vector<64x640xbf16>
    %cst_267 = arith.constant dense<0.000000e+00> : vector<2x640xf32>
    %563 = tpu.matmul %560, %562, %cst_267 {dimension_numbers = #tpu.dot_dimension_numbers<[1], [0], [0], [1], [0, 0, 1, 1], [], []>} : vector<2x64xbf16>, vector<64x640xbf16>, vector<2x640xf32> -> vector<2x640xf32>
    %564 = arith.addf %557, %563 : vector<2x640xf32>
    %565 = vector.extract_strided_slice %458 {offsets = [12, 0], sizes = [1, 64], strides = [1, 1]} : vector<23x64xbf16> to vector<1x64xbf16>
    %566 = vector.extract_strided_slice %479 {offsets = [12, 0], sizes = [1, 64], strides = [1, 1]} : vector<23x64xbf16> to vector<1x64xbf16>
    %567 = tpu.concatenate %565, %566 in 0 : vector<1x64xbf16>, vector<1x64xbf16> -> vector<2x64xbf16>
    %c12 = arith.constant 12 : index
    %c0_268 = arith.constant 0 : index
    %c0_269 = arith.constant 0 : index
    %568 = vector.load %arg12[%c12, %c0_268, %c0_269] : memref<23x64x640xbf16, #tpu.memory_space<vmem>>, vector<1x64x640xbf16>
    %569 = vector.shape_cast %568 : vector<1x64x640xbf16> to vector<64x640xbf16>
    %cst_270 = arith.constant dense<0.000000e+00> : vector<2x640xf32>
    %570 = tpu.matmul %567, %569, %cst_270 {dimension_numbers = #tpu.dot_dimension_numbers<[1], [0], [0], [1], [0, 0, 1, 1], [], []>} : vector<2x64xbf16>, vector<64x640xbf16>, vector<2x640xf32> -> vector<2x640xf32>
    %571 = arith.addf %564, %570 : vector<2x640xf32>
    %572 = vector.extract_strided_slice %458 {offsets = [13, 0], sizes = [1, 64], strides = [1, 1]} : vector<23x64xbf16> to vector<1x64xbf16>
    %573 = vector.extract_strided_slice %479 {offsets = [13, 0], sizes = [1, 64], strides = [1, 1]} : vector<23x64xbf16> to vector<1x64xbf16>
    %574 = tpu.concatenate %572, %573 in 0 : vector<1x64xbf16>, vector<1x64xbf16> -> vector<2x64xbf16>
    %c13 = arith.constant 13 : index
    %c0_271 = arith.constant 0 : index
    %c0_272 = arith.constant 0 : index
    %575 = vector.load %arg12[%c13, %c0_271, %c0_272] : memref<23x64x640xbf16, #tpu.memory_space<vmem>>, vector<1x64x640xbf16>
    %576 = vector.shape_cast %575 : vector<1x64x640xbf16> to vector<64x640xbf16>
    %cst_273 = arith.constant dense<0.000000e+00> : vector<2x640xf32>
    %577 = tpu.matmul %574, %576, %cst_273 {dimension_numbers = #tpu.dot_dimension_numbers<[1], [0], [0], [1], [0, 0, 1, 1], [], []>} : vector<2x64xbf16>, vector<64x640xbf16>, vector<2x640xf32> -> vector<2x640xf32>
    %578 = arith.addf %571, %577 : vector<2x640xf32>
    %579 = vector.extract_strided_slice %458 {offsets = [14, 0], sizes = [1, 64], strides = [1, 1]} : vector<23x64xbf16> to vector<1x64xbf16>
    %580 = vector.extract_strided_slice %479 {offsets = [14, 0], sizes = [1, 64], strides = [1, 1]} : vector<23x64xbf16> to vector<1x64xbf16>
    %581 = tpu.concatenate %579, %580 in 0 : vector<1x64xbf16>, vector<1x64xbf16> -> vector<2x64xbf16>
    %c14 = arith.constant 14 : index
    %c0_274 = arith.constant 0 : index
    %c0_275 = arith.constant 0 : index
    %582 = vector.load %arg12[%c14, %c0_274, %c0_275] : memref<23x64x640xbf16, #tpu.memory_space<vmem>>, vector<1x64x640xbf16>
    %583 = vector.shape_cast %582 : vector<1x64x640xbf16> to vector<64x640xbf16>
    %cst_276 = arith.constant dense<0.000000e+00> : vector<2x640xf32>
    %584 = tpu.matmul %581, %583, %cst_276 {dimension_numbers = #tpu.dot_dimension_numbers<[1], [0], [0], [1], [0, 0, 1, 1], [], []>} : vector<2x64xbf16>, vector<64x640xbf16>, vector<2x640xf32> -> vector<2x640xf32>
    %585 = arith.addf %578, %584 : vector<2x640xf32>
    %586 = vector.extract_strided_slice %458 {offsets = [15, 0], sizes = [1, 64], strides = [1, 1]} : vector<23x64xbf16> to vector<1x64xbf16>
    %587 = vector.extract_strided_slice %479 {offsets = [15, 0], sizes = [1, 64], strides = [1, 1]} : vector<23x64xbf16> to vector<1x64xbf16>
    %588 = tpu.concatenate %586, %587 in 0 : vector<1x64xbf16>, vector<1x64xbf16> -> vector<2x64xbf16>
    %c15 = arith.constant 15 : index
    %c0_277 = arith.constant 0 : index
    %c0_278 = arith.constant 0 : index
    %589 = vector.load %arg12[%c15, %c0_277, %c0_278] : memref<23x64x640xbf16, #tpu.memory_space<vmem>>, vector<1x64x640xbf16>
    %590 = vector.shape_cast %589 : vector<1x64x640xbf16> to vector<64x640xbf16>
    %cst_279 = arith.constant dense<0.000000e+00> : vector<2x640xf32>
    %591 = tpu.matmul %588, %590, %cst_279 {dimension_numbers = #tpu.dot_dimension_numbers<[1], [0], [0], [1], [0, 0, 1, 1], [], []>} : vector<2x64xbf16>, vector<64x640xbf16>, vector<2x640xf32> -> vector<2x640xf32>
    %592 = arith.addf %585, %591 : vector<2x640xf32>
    %593 = vector.extract_strided_slice %458 {offsets = [16, 0], sizes = [1, 64], strides = [1, 1]} : vector<23x64xbf16> to vector<1x64xbf16>
    %594 = vector.extract_strided_slice %479 {offsets = [16, 0], sizes = [1, 64], strides = [1, 1]} : vector<23x64xbf16> to vector<1x64xbf16>
    %595 = tpu.concatenate %593, %594 in 0 : vector<1x64xbf16>, vector<1x64xbf16> -> vector<2x64xbf16>
    %c16 = arith.constant 16 : index
    %c0_280 = arith.constant 0 : index
    %c0_281 = arith.constant 0 : index
    %596 = vector.load %arg12[%c16, %c0_280, %c0_281] : memref<23x64x640xbf16, #tpu.memory_space<vmem>>, vector<1x64x640xbf16>
    %597 = vector.shape_cast %596 : vector<1x64x640xbf16> to vector<64x640xbf16>
    %cst_282 = arith.constant dense<0.000000e+00> : vector<2x640xf32>
    %598 = tpu.matmul %595, %597, %cst_282 {dimension_numbers = #tpu.dot_dimension_numbers<[1], [0], [0], [1], [0, 0, 1, 1], [], []>} : vector<2x64xbf16>, vector<64x640xbf16>, vector<2x640xf32> -> vector<2x640xf32>
    %599 = arith.addf %592, %598 : vector<2x640xf32>
    %600 = vector.extract_strided_slice %458 {offsets = [17, 0], sizes = [1, 64], strides = [1, 1]} : vector<23x64xbf16> to vector<1x64xbf16>
    %601 = vector.extract_strided_slice %479 {offsets = [17, 0], sizes = [1, 64], strides = [1, 1]} : vector<23x64xbf16> to vector<1x64xbf16>
    %602 = tpu.concatenate %600, %601 in 0 : vector<1x64xbf16>, vector<1x64xbf16> -> vector<2x64xbf16>
    %c17 = arith.constant 17 : index
    %c0_283 = arith.constant 0 : index
    %c0_284 = arith.constant 0 : index
    %603 = vector.load %arg12[%c17, %c0_283, %c0_284] : memref<23x64x640xbf16, #tpu.memory_space<vmem>>, vector<1x64x640xbf16>
    %604 = vector.shape_cast %603 : vector<1x64x640xbf16> to vector<64x640xbf16>
    %cst_285 = arith.constant dense<0.000000e+00> : vector<2x640xf32>
    %605 = tpu.matmul %602, %604, %cst_285 {dimension_numbers = #tpu.dot_dimension_numbers<[1], [0], [0], [1], [0, 0, 1, 1], [], []>} : vector<2x64xbf16>, vector<64x640xbf16>, vector<2x640xf32> -> vector<2x640xf32>
    %606 = arith.addf %599, %605 : vector<2x640xf32>
    %607 = vector.extract_strided_slice %458 {offsets = [18, 0], sizes = [1, 64], strides = [1, 1]} : vector<23x64xbf16> to vector<1x64xbf16>
    %608 = vector.extract_strided_slice %479 {offsets = [18, 0], sizes = [1, 64], strides = [1, 1]} : vector<23x64xbf16> to vector<1x64xbf16>
    %609 = tpu.concatenate %607, %608 in 0 : vector<1x64xbf16>, vector<1x64xbf16> -> vector<2x64xbf16>
    %c18 = arith.constant 18 : index
    %c0_286 = arith.constant 0 : index
    %c0_287 = arith.constant 0 : index
    %610 = vector.load %arg12[%c18, %c0_286, %c0_287] : memref<23x64x640xbf16, #tpu.memory_space<vmem>>, vector<1x64x640xbf16>
    %611 = vector.shape_cast %610 : vector<1x64x640xbf16> to vector<64x640xbf16>
    %cst_288 = arith.constant dense<0.000000e+00> : vector<2x640xf32>
    %612 = tpu.matmul %609, %611, %cst_288 {dimension_numbers = #tpu.dot_dimension_numbers<[1], [0], [0], [1], [0, 0, 1, 1], [], []>} : vector<2x64xbf16>, vector<64x640xbf16>, vector<2x640xf32> -> vector<2x640xf32>
    %613 = arith.addf %606, %612 : vector<2x640xf32>
    %614 = vector.extract_strided_slice %458 {offsets = [19, 0], sizes = [1, 64], strides = [1, 1]} : vector<23x64xbf16> to vector<1x64xbf16>
    %615 = vector.extract_strided_slice %479 {offsets = [19, 0], sizes = [1, 64], strides = [1, 1]} : vector<23x64xbf16> to vector<1x64xbf16>
    %616 = tpu.concatenate %614, %615 in 0 : vector<1x64xbf16>, vector<1x64xbf16> -> vector<2x64xbf16>
    %c19 = arith.constant 19 : index
    %c0_289 = arith.constant 0 : index
    %c0_290 = arith.constant 0 : index
    %617 = vector.load %arg12[%c19, %c0_289, %c0_290] : memref<23x64x640xbf16, #tpu.memory_space<vmem>>, vector<1x64x640xbf16>
    %618 = vector.shape_cast %617 : vector<1x64x640xbf16> to vector<64x640xbf16>
    %cst_291 = arith.constant dense<0.000000e+00> : vector<2x640xf32>
    %619 = tpu.matmul %616, %618, %cst_291 {dimension_numbers = #tpu.dot_dimension_numbers<[1], [0], [0], [1], [0, 0, 1, 1], [], []>} : vector<2x64xbf16>, vector<64x640xbf16>, vector<2x640xf32> -> vector<2x640xf32>
    %620 = arith.addf %613, %619 : vector<2x640xf32>
    %621 = vector.extract_strided_slice %458 {offsets = [20, 0], sizes = [1, 64], strides = [1, 1]} : vector<23x64xbf16> to vector<1x64xbf16>
    %622 = vector.extract_strided_slice %479 {offsets = [20, 0], sizes = [1, 64], strides = [1, 1]} : vector<23x64xbf16> to vector<1x64xbf16>
    %623 = tpu.concatenate %621, %622 in 0 : vector<1x64xbf16>, vector<1x64xbf16> -> vector<2x64xbf16>
    %c20 = arith.constant 20 : index
    %c0_292 = arith.constant 0 : index
    %c0_293 = arith.constant 0 : index
    %624 = vector.load %arg12[%c20, %c0_292, %c0_293] : memref<23x64x640xbf16, #tpu.memory_space<vmem>>, vector<1x64x640xbf16>
    %625 = vector.shape_cast %624 : vector<1x64x640xbf16> to vector<64x640xbf16>
    %cst_294 = arith.constant dense<0.000000e+00> : vector<2x640xf32>
    %626 = tpu.matmul %623, %625, %cst_294 {dimension_numbers = #tpu.dot_dimension_numbers<[1], [0], [0], [1], [0, 0, 1, 1], [], []>} : vector<2x64xbf16>, vector<64x640xbf16>, vector<2x640xf32> -> vector<2x640xf32>
    %627 = arith.addf %620, %626 : vector<2x640xf32>
    %628 = vector.extract_strided_slice %458 {offsets = [21, 0], sizes = [1, 64], strides = [1, 1]} : vector<23x64xbf16> to vector<1x64xbf16>
    %629 = vector.extract_strided_slice %479 {offsets = [21, 0], sizes = [1, 64], strides = [1, 1]} : vector<23x64xbf16> to vector<1x64xbf16>
    %630 = tpu.concatenate %628, %629 in 0 : vector<1x64xbf16>, vector<1x64xbf16> -> vector<2x64xbf16>
    %c21 = arith.constant 21 : index
    %c0_295 = arith.constant 0 : index
    %c0_296 = arith.constant 0 : index
    %631 = vector.load %arg12[%c21, %c0_295, %c0_296] : memref<23x64x640xbf16, #tpu.memory_space<vmem>>, vector<1x64x640xbf16>
    %632 = vector.shape_cast %631 : vector<1x64x640xbf16> to vector<64x640xbf16>
    %cst_297 = arith.constant dense<0.000000e+00> : vector<2x640xf32>
    %633 = tpu.matmul %630, %632, %cst_297 {dimension_numbers = #tpu.dot_dimension_numbers<[1], [0], [0], [1], [0, 0, 1, 1], [], []>} : vector<2x64xbf16>, vector<64x640xbf16>, vector<2x640xf32> -> vector<2x640xf32>
    %634 = arith.addf %627, %633 : vector<2x640xf32>
    %635 = vector.extract_strided_slice %458 {offsets = [22, 0], sizes = [1, 64], strides = [1, 1]} : vector<23x64xbf16> to vector<1x64xbf16>
    %636 = vector.extract_strided_slice %479 {offsets = [22, 0], sizes = [1, 64], strides = [1, 1]} : vector<23x64xbf16> to vector<1x64xbf16>
    %637 = tpu.concatenate %635, %636 in 0 : vector<1x64xbf16>, vector<1x64xbf16> -> vector<2x64xbf16>
    %c22 = arith.constant 22 : index
    %c0_298 = arith.constant 0 : index
    %c0_299 = arith.constant 0 : index
    %638 = vector.load %arg12[%c22, %c0_298, %c0_299] : memref<23x64x640xbf16, #tpu.memory_space<vmem>>, vector<1x64x640xbf16>
    %639 = vector.shape_cast %638 : vector<1x64x640xbf16> to vector<64x640xbf16>
    %cst_300 = arith.constant dense<0.000000e+00> : vector<2x640xf32>
    %640 = tpu.matmul %637, %639, %cst_300 {dimension_numbers = #tpu.dot_dimension_numbers<[1], [0], [0], [1], [0, 0, 1, 1], [], []>} : vector<2x64xbf16>, vector<64x640xbf16>, vector<2x640xf32> -> vector<2x640xf32>
    %641 = arith.addf %634, %640 : vector<2x640xf32>
    %c0_301 = arith.constant 0 : index
    %c0_302 = arith.constant 0 : index
    %642 = vector.load %arg7[%c0_301, %c0_302] : memref<1x640xf32, #tpu.memory_space<vmem>>, vector<1x640xf32>
    %643 = vector.broadcast %642 : vector<1x640xf32> to vector<2x640xf32>
    %644 = arith.addf %641, %643 : vector<2x640xf32>
    %cst_303 = arith.constant 0.000000e+00 : f32
    %645 = vector.broadcast %cst_303 : f32 to vector<2x640xf32>
    %646 = arith.maximumf %644, %645 : vector<2x640xf32>
    %647 = arith.truncf %646 : vector<2x640xf32> to vector<2x640xbf16>
    %c0_304 = arith.constant 0 : index
    %c0_305 = arith.constant 0 : index
    %648 = vector.load %arg8[%c0_304, %c0_305] : memref<640x10xbf16, #tpu.memory_space<vmem>>, vector<640x10xbf16>
    %cst_306 = arith.constant dense<0.000000e+00> : vector<2x10xf32>
    %649 = tpu.matmul %647, %648, %cst_306 {dimension_numbers = #tpu.dot_dimension_numbers<[1], [0], [0], [1], [0, 0, 1, 1], [], []>} : vector<2x640xbf16>, vector<640x10xbf16>, vector<2x10xf32> -> vector<2x10xf32>
    %c0_307 = arith.constant 0 : index
    %c0_308 = arith.constant 0 : index
    %650 = vector.load %arg9[%c0_307, %c0_308] : memref<1x10xf32, #tpu.memory_space<vmem>>, vector<1x10xf32>
    %651 = vector.broadcast %650 : vector<1x10xf32> to vector<2x10xf32>
    %652 = arith.addf %649, %651 : vector<2x10xf32>
    %cst_309 = arith.constant dense<0xFF800000> : vector<2xf32>
    %653 = vector.multi_reduction <maximumf>, %652, %cst_309 [1] : vector<2x10xf32> to vector<2xf32>
    %654 = vector.shape_cast %653 : vector<2xf32> to vector<2x1xf32>
    %655 = vector.broadcast %654 : vector<2x1xf32> to vector<2x10xf32>
    %656 = arith.subf %652, %655 : vector<2x10xf32>
    %657 = math.exp %656 : vector<2x10xf32>
    %cst_310 = arith.constant dense<0.000000e+00> : vector<2xf32>
    %658 = vector.multi_reduction <add>, %657, %cst_310 [1] : vector<2x10xf32> to vector<2xf32>
    %659 = vector.shape_cast %658 : vector<2xf32> to vector<2x1xf32>
    %660 = math.log %659 : vector<2x1xf32>
    %661 = vector.broadcast %660 : vector<2x1xf32> to vector<2x10xf32>
    %662 = arith.subf %656, %661 : vector<2x10xf32>
    %c0_311 = arith.constant 0 : index
    %c0_312 = arith.constant 0 : index
    %663 = vector.load %arg10[%c0_311, %c0_312] : memref<2x10xf32, #tpu.memory_space<vmem>>, vector<2x10xf32>
    tpu.vector_store %arg10[%c0_311, %c0_312], %662 {strides = array<i32>} : memref<2x10xf32, #tpu.memory_space<vmem>>, vector<2x10xf32>,
    return
  }
  func.func @transform_0(%arg0: i32) -> (i32, i32) {
    %c0_i32 = arith.constant 0 : i32
    %c0_i32_0 = arith.constant 0 : i32
    %c0_i32_1 = arith.constant 0 : i32
    return %c0_i32, %c0_i32_0 : i32, i32
  }
  func.func @transform_1(%arg0: i32) -> (i32, i32) {
    %c0_i32 = arith.constant 0 : i32
    %c0_i32_0 = arith.constant 0 : i32
    %c0_i32_1 = arith.constant 0 : i32
    return %c0_i32, %c0_i32_0 : i32, i32
  }
  func.func @transform_2(%arg0: i32) -> (i32, i32) {
    %c0_i32 = arith.constant 0 : i32
    %c0_i32_0 = arith.constant 0 : i32
    %c0_i32_1 = arith.constant 0 : i32
    return %c0_i32, %c0_i32_0 : i32, i32
  }
  func.func @transform_3(%arg0: i32) -> (i32, i32, i32) {
    %c0_i32 = arith.constant 0 : i32
    %c0_i32_0 = arith.constant 0 : i32
    %c0_i32_1 = arith.constant 0 : i32
    %c0_i32_2 = arith.constant 0 : i32
    return %c0_i32, %c0_i32_0, %c0_i32_1 : i32, i32, i32
  }
  func.func @transform_4(%arg0: i32) -> (i32, i32) {
    %c0_i32 = arith.constant 0 : i32
    %c0_i32_0 = arith.constant 0 : i32
    %c0_i32_1 = arith.constant 0 : i32
    return %c0_i32, %c0_i32_0 : i32, i32
  }
  func.func @transform_6(%arg0: i32) -> (i32, i32) {
    %c0_i32 = arith.constant 0 : i32
    %c0_i32_0 = arith.constant 0 : i32
    %c0_i32_1 = arith.constant 0 : i32
    return %c0_i32, %c0_i32_0 : i32, i32
  }
  func.func @transform_7(%arg0: i32) -> (i32, i32) {
    %c0_i32 = arith.constant 0 : i32
    %c0_i32_0 = arith.constant 0 : i32
    %c0_i32_1 = arith.constant 0 : i32
    return %c0_i32, %c0_i32_0 : i32, i32
  }
  func.func @transform_8(%arg0: i32) -> (i32, i32) {
    %c0_i32 = arith.constant 0 : i32
    %c0_i32_0 = arith.constant 0 : i32
    %c0_i32_1 = arith.constant 0 : i32
    return %c0_i32, %c0_i32_0 : i32, i32
  }
  func.func @transform_9(%arg0: i32) -> (i32, i32) {
    %c0_i32 = arith.constant 0 : i32
    %c0_i32_0 = arith.constant 0 : i32
    %c0_i32_1 = arith.constant 0 : i32
    return %c0_i32, %c0_i32_0 : i32, i32
  }
}

</mosaic_0001>

<bundles_post_ra>
// kernel: net_forward.1
= control target key start
LH: loop header
LB: loop body
LE: loop exit
PB: predicated region body
PF: predicated region fallthrough
CT: control target
= control target key end

     0   :  { %14 = vsyncpa [#allocation6], 0  ;;  %s20710_s0 = inlined_call_operand.vmem [shape: bf16[672,36], index: 0, kind: input, shape index: {}]   ;;  %s20711_s1 = inlined_call_operand.hbm [shape: bf16[36,256], index: 1, kind: input, shape index: {}]   ;;  %s20712_s2 = inlined_call_operand.hbm [shape: f32[1,64], index: 2, kind: input, shape index: {}]   ;;  %s20713_s3 = inlined_call_operand.hbm [shape: bf16[3,64,96], index: 3, kind: input, shape index: {}]   ;;  %s20714_s4 = inlined_call_operand.hbm [shape: f32[1,32], index: 4, kind: input, shape index: {}]   ;;  %s20715_s5 = inlined_call_operand.hbm [shape: bf16[23,64,640], index: 5, kind: input, shape index: {}]   ;;  %s20716_s6 = inlined_call_operand.hbm [shape: f32[1,640], index: 6, kind: input, shape index: {}]   ;;  %s20717_s7 = inlined_call_operand.vmem [shape: bf16[640,10], index: 7, kind: input, shape index: {}]   ;;  %s20718_s8 = inlined_call_operand.hbm [shape: f32[1,10], index: 8, kind: input, shape index: {}]   ;;  %s20719_s9 = inlined_call_operand.hbm [shape: f32[2,10], index: 9, kind: output, shape index: {}]  }
   0x1   :  { %15 = vsyncpa [#allocation9], 0 }
   0x2   :  { %16 = vsyncpa [#allocation12], 0 }
   0x3   :  { %17 = vsyncpa [#allocation15], 0 }
   0x4   :  { %18 = vsyncpa [#allocation7], 0  ;;  %s15948_s30 = smov [#allocation8]   ;;  %s15949_s11 = smov [#allocation11]  }
   0x5   :  { %s39_s10 = sshll.u32 %s15948_s30, 4  ;;  %s61_s12 = sshll.u32 %s15949_s11, 4  ;;  %s40_s10 = int_to_ptr.vmem [resolvable:$true] %s39_s10  ;;  %s62_s12 = int_to_ptr.vmem [resolvable:$true] %s61_s12 }
   0x6   :  { %s15784_s13 = scalar_lea.vmem %s40_s10, 16  ;;  %s15788_s14 = scalar_lea.vmem %s40_s10, 32 }
   0x7   :  { %p15785_p0 = scmp.ne.s32.totalorder %s40_s10, %s15784_s13  ;;  %p15789_p1 = scmp.lt.s32.totalorder %s40_s10, %s40_s10 }
   0x8   :  { %p15790_p2 = scmp.lt.s32.totalorder %s15788_s14, %s15784_s13 }
   0xa   :  { %p15791_p3 = por %p15790_p2, %p15789_p1 }
   0xc   :  { %p15792_p4 = pnand %p15791_p3, %p15785_p0 }
   0xe   :  { %15795 = shalt.err (!%p15792_p4)
}
   0xf   :  { %42 = dma.hbm_to_vmem [thread:$0]  %s20712_s2, 16, %s40_s10, [#allocation9]  }
  0x10   :  { %s15804_s17 = scalar_lea.vmem %s62_s12, 16  ;;  %s15808_s18 = scalar_lea.vmem %s62_s12, 32 }
  0x11   :  { %p15805_p5 = scmp.ne.s32.totalorder %s62_s12, %s15804_s17  ;;  %p15809_p6 = scmp.lt.s32.totalorder %s62_s12, %s62_s12 }
  0x12   :  { %p15810_p7 = scmp.lt.s32.totalorder %s15808_s18, %s15804_s17 }
  0x14   :  { %p15811_p8 = por %p15810_p7, %p15809_p6 }
  0x16   :  { %p15812_p9 = pnand %p15811_p8, %p15805_p5 }
  0x18   :  { %15815 = shalt.err (!%p15812_p9)
}
  0x19   :  { %64 = dma.hbm_to_vmem [thread:$0]  %s20714_s4, 16, %s62_s12, [#allocation12]  }
  0x1a   :  { %s15950_s21 = smov [#allocation5]  }
  0x1b   :  { %s26_s22 = sshll.u32 %s15950_s21, 4  ;;  %s27_s22 = int_to_ptr.vmem [resolvable:$true] %s26_s22 }
  0x1c   :  { %s15824_s23 = scalar_lea.vmem %s27_s22, 640  ;;  %p15829_p11 = scmp.lt.s32.totalorder %s27_s22, %s27_s22 }
  0x1d   :  { %p15825_p10 = scmp.ne.s32.totalorder %s27_s22, %s15824_s23  ;;  %p15830_p12 = scmp.lt.s32.totalorder %s15824_s23, %s15824_s23 }
  0x1f   :  { %p15831_p13 = por %p15830_p12, %p15829_p11 }
  0x21   :  { %p15832_p0 = pnand %p15831_p13, %p15825_p10 }
  0x23   :  { %15835 = shalt.err (!%p15832_p0)
}
  0x24   :  { %s15951_s2 = smov 128   ;;  %s15952_s24 = smov 8  }
  0x25   :  { %32 = dma.hbm_to_vmem [thread:$0]  %s20711_s1, 640, %s27_s22, [#allocation6], %s15951_s2, %s15951_s2, %s15952_s24  }
  0x26   :  { %s15953_s27 = smov [#allocation10]  }
  0x27   :  { %s48_s28 = sshll.u32 %s15953_s27, 4  ;;  %s49_s28 = int_to_ptr.vmem [resolvable:$true] %s48_s28 }
  0x28   :  { %s15844_s4 = scalar_lea.vmem %s49_s28, 1536  ;;  %p15849_p2 = scmp.lt.s32.totalorder %s49_s28, %s49_s28 }
  0x29   :  { %p15845_p1 = scmp.ne.s32.totalorder %s49_s28, %s15844_s4  ;;  %p15850_p3 = scmp.lt.s32.totalorder %s15844_s4, %s15844_s4 }
  0x2b   :  { %p15851_p4 = por %p15850_p3, %p15849_p2 }
  0x2d   :  { %p15852_p5 = pnand %p15851_p4, %p15845_p1 }
  0x2f   :  { %15855 = shalt.err (!%p15852_p5)
}
  0x30   :  { %s15954_s29 = smov 64   ;;  %s15955_s30 = smov 4  }
  0x31   :  { %54 = dma.hbm_to_vmem [thread:$0]  %s20713_s3, 1536, %s49_s28, [#allocation9], %s15954_s29, %s15954_s29, %s15955_s30  }
  0x32   :  { %s15956_s12 = smov [#allocation13]   ;;  %s15957_s13 = smov [#allocation14]  }
  0x33   :  { %s71_s1 = sshll.u32 %s15956_s12, 4  ;;  %s83_s14 = sshll.u32 %s15957_s13, 4  ;;  %s72_s1 = int_to_ptr.vmem [resolvable:$true] %s71_s1  ;;  %s84_s14 = int_to_ptr.vmem [resolvable:$true] %s83_s14 }
  0x34   :  { %s15864_s15 = scalar_lea.vmem %s72_s1, 80  ;;  %s15868_s16 = scalar_lea.vmem %s72_s1, 96 }
  0x35   :  { %p15865_p6 = scmp.ne.s32.totalorder %s72_s1, %s15864_s15  ;;  %p15869_p7 = scmp.lt.s32.totalorder %s72_s1, %s72_s1 }
  0x36   :  { %p15870_p8 = scmp.lt.s32.totalorder %s15868_s16, %s15864_s15 }
  0x38   :  { %p15871_p9 = por %p15870_p8, %p15869_p7 }
  0x3a   :  { %p15872_p10 = pnand %p15871_p9, %p15865_p6 }
  0x3c   :  { %15875 = shalt.err (!%p15872_p10)
}
  0x3d   :  { %74 = dma.hbm_to_vmem [thread:$0]  %s20716_s6, 80, %s72_s1, [#allocation12]  }
  0x3e   :  { %s15884_s19 = scalar_lea.vmem %s84_s14, 16  ;;  %s15888_s3 = scalar_lea.vmem %s84_s14, 32 }
  0x3f   :  { %p15885_p11 = scmp.ne.s32.totalorder %s84_s14, %s15884_s19  ;;  %p15889_p12 = scmp.lt.s32.totalorder %s84_s14, %s84_s14 }
  0x40   :  { %p15890_p13 = scmp.lt.s32.totalorder %s15888_s3, %s15884_s19 }
  0x42   :  { %p15891_p0 = por %p15890_p13, %p15889_p12 }
  0x44   :  { %p15892_p1 = pnand %p15891_p0, %p15885_p11 }
  0x46   :  { %15895 = shalt.err (!%p15892_p1)
}
  0x47   :  { %86 = dma.hbm_to_vmem [thread:$0]  %s20718_s8, 16, %s84_s14, [#allocation15]  }
  0x48   :  { %15936 = dma.done.wait [#allocation6], 640  }
  0x49   :  { %15937 = vsyncadd [#allocation6], 4294966656 }
  0x4a   :  { %15938 = dma.done.wait [#allocation9], 1552  }
  0x4b   :  { %15939 = vsyncadd [#allocation9], 4294965744 }
  0x4c   :  { %15940 = dma.done.wait [#allocation12], 96  }
  0x4d   :  { %15941 = vsyncadd [#allocation12], 4294967200 }
  0x4e   :  { %15942 = dma.done.wait [#allocation15], 16  }
  0x4f   :  { %15943 = vsyncadd [#allocation15], 4294967280  ;;  %v20720_v0 = vmov 0   ;;  %v121_v1 = vld [vmem:[#allocation5 + $0x20] sm:$0x33]  ;;  %vm179_vm0 = vcmask 1041408  }
  0x50   :  { %218 = vmatprep.mubr.bf16.mxu0 %v20720_v0  ;;  %413 = vmatprep.mubr.bf16.mxu1 %v20720_v0  ;;  %v16037_v2 = vcombine.high %v121_v1, %v121_v1  ;;  %v12883_v3 = vcombine.low %v121_v1, %v121_v1  ;;  %v16039_v4 = vld [vmem:[#allocation5 + $0x14] ss:$8 sps:$4 sm:$0xff]   ;;  %v16050_v6 = vld [vmem:[#allocation5 + $0x10] ss:$8 sps:$4 sm:$0xff]   ;;  %v16054_v7 = vld [vmem:[#allocation5 + $0x4] ss:$8 sps:$4 sm:$0xff]  }
  0x51   :  { %v16058_v8 = vld [vmem:[#allocation5] ss:$8 sps:$4 sm:$0xff]   ;;  %vm169_vm1 = vcmask 293888   ;;  %v15015_v13 = vld [vmem:[%s20710_s0 + $0x10] sm:$0xff]   ;;  %v15017_v15 = vld [vmem:[%s20710_s0 + $0x18] sm:$0xff]   ;;  %v20722_v56 = vmov 0.0  }
  0x52   :  { %12885 = vmatprep.subr.msk.bf16.mxu0 %vm179_vm0, %v16037_v2  ;;  %14965 = vmatprep.subr.msk.bf16.mxu1 %vm179_vm0, %v16037_v2  ;;  %v16046_v5 = vsel %vm179_vm0, %v12883_v3, 0  ;;  %v15011_v9 = vld [vmem:[%s20710_s0] sm:$0xff]   ;;  %v15013_v11 = vld [vmem:[%s20710_s0 + $0x8] sm:$0xff]   ;;  %v15018_v16 = vld [vmem:[%s20710_s0 + $0x50] sm:$0xff]   ;;  %vm15960_vm2 = vmmov 0   ;;  %vm333_vm3 = vcmask 523264  }
  0x53   :  { %197 = vmatpush1.bf16.msra.mxu0 %v16046_v5  ;;  %14968 = vmatpush1.bf16.msra.mxu1 %v16046_v5  ;;  %v15012_v10 = vld [vmem:[%s20710_s0 + $0x20] sm:$0xff]   ;;  %v15014_v12 = vld [vmem:[%s20710_s0 + $0x28] sm:$0xff]   ;;  %v15019_v17 = vld [vmem:[%s20710_s0 + $0x58] sm:$0xff]   ;;  %vm3790_vm4 = vcmask 1040384   ;;  %vm3439_vm5 = vcmask 1046528   ;;  %s15962_s25 = smov 32  }
  0x54   :  { %198 = vmatprep.subr.bf16.mxu0 %v16039_v4  ;;  %14966 = vmatprep.subr.bf16.mxu1 %v16039_v4  ;;  %v15016_v14 = vld [vmem:[%s20710_s0 + $0x48] sm:$0xff]   ;;  %v15020_v18 = vld [vmem:[%s20710_s0 + $0x30] sm:$0xff]   ;;  %v15021_v19 = vld [vmem:[%s20710_s0 + $0x78] sm:$0xff]  }
  0x55   :  { %v15022_v20 = vld [vmem:[%s20710_s0 + $0x38] sm:$0xff]   ;;  %v15023_v21 = vld [vmem:[%s20710_s0 + $0x80] sm:$0xff]   ;;  %v15025_v23 = vld [vmem:[%s20710_s0 + $0x88] sm:$0xff]  }
  0x56   :  { %v15024_v22 = vld [vmem:[%s20710_s0 + $0x40] sm:$0xff]   ;;  %v15031_v25 = vld [vmem:[%s20710_s0 + $0xa8] sm:$0xff]   ;;  %v15032_v27 = vld [vmem:[%s20710_s0 + $0xb0] sm:$0xff]  }
  0x57   :  { %199 = vmatpush1.bf16.msra.mxu0 %v16050_v6  ;;  %14969 = vmatpush1.bf16.msra.mxu1 %v16050_v6  ;;  %v15026_v24 = vld [vmem:[%s20710_s0 + $0x60] sm:$0xff]   ;;  %v15027_v26 = vld [vmem:[%s20710_s0 + $0x68] sm:$0xff]   ;;  %v15028_v28 = vld [vmem:[%s20710_s0 + $0x70] sm:$0xff]  }
  0x58   :  { %200 = vmatprep.subr.bf16.mxu0 %v16054_v7  ;;  %14967 = vmatprep.subr.bf16.mxu1 %v16054_v7  ;;  %v15033_v29 = vld [vmem:[%s20710_s0 + $0xb8] sm:$0xff]   ;;  %v15029_v30 = vld [vmem:[%s20710_s0 + $0x90] sm:$0xff]   ;;  %v15035_v33 = vld [vmem:[%s20710_s0 + $0xe0] sm:$0xff]  }
  0x59   :  { %v15034_v31 = vld [vmem:[%s20710_s0 + $0xd8] sm:$0xff]   ;;  %v15036_v34 = vld [vmem:[%s20710_s0 + $0xa0] sm:$0xff]   ;;  %v15037_v35 = vld [vmem:[%s20710_s0 + $0xe8] sm:$0xff]  }
  0x5a   :  { %v15030_v32 = vld [vmem:[%s20710_s0 + $0x98] sm:$0xff]   ;;  %v15038_v36 = vld [vmem:[%s20710_s0 + $0xc0] sm:$0xff]   ;;  %v15039_v37 = vld [vmem:[%s20710_s0 + $0x108] sm:$0xff]  }
  0x5b   :  { %201 = vmatpush1.bf16.msra.mxu0 %v16058_v8  ;;  %14970 = vmatpush1.bf16.msra.mxu1 %v16058_v8  ;;  %v15040_v38 = vld [vmem:[%s20710_s0 + $0xc8] sm:$0xff]   ;;  %v15041_v39 = vld [vmem:[%s20710_s0 + $0x110] sm:$0xff]   ;;  %v15043_v41 = vld [vmem:[%s20710_s0 + $0x118] sm:$0xff]  }
  0x5c   :  { %12907 = vmatprep.subr.msk.bf16.mxu1 %vm179_vm0, %v16037_v2  ;;  %12893 = vmatprep.subr.msk.bf16.mxu0 %vm179_vm0, %v16037_v2  ;;  %v15042_v40 = vld [vmem:[%s20710_s0 + $0xd0] sm:$0xff]   ;;  %v15045_v43 = vld [vmem:[%s20710_s0 + $0x138] sm:$0xff]   ;;  %v15047_v45 = vld [vmem:[%s20710_s0 + $0x140] sm:$0xff]  }
  0x5d   :  { %v15044_v42 = vld [vmem:[%s20710_s0 + $0xf0] sm:$0xff]   ;;  %v15046_v44 = vld [vmem:[%s20710_s0 + $0xf8] sm:$0xff]   ;;  %v15048_v46 = vld [vmem:[%s20710_s0 + $0x100] sm:$0xff]  }
  0x5e   :  { %12886 = vmatmul.mubr.msk.bf16.vlgmr.msra.gmra.mxu0 %vm169_vm1, %v15011_v9  ;;  %12895 = vmatmul.mubr.msk.bf16.vlgmr.msra.gmra.mxu1 %vm169_vm1, %v15012_v10  ;;  %v15049_v47 = vld [vmem:[%s20710_s0 + $0x148] sm:$0xff]   ;;  %v15050_v48 = vld [vmem:[%s20710_s0 + $0x120] sm:$0xff]   ;;  %v15054_v58 = vld [vmem:[%s20710_s0 + $0x130] sm:$0xff]  }
  0x5f   :  { %228 = vmatprep.mubr.bf16.mxu0 %v20720_v0  ;;  %423 = vmatprep.mubr.bf16.mxu1 %v20720_v0  ;;  %v15051_v49 = vld [vmem:[%s20710_s0 + $0x128] sm:$0xff]   ;;  %v16385_v59 = vld [vmem:[#allocation10 + $0x10] sm:$0xff]   ;;  %v16401_v1 = vld [vmem:[#allocation10 + $0x8] sm:$0xff]   ;;  %s15961_s0 = smov 96  }
  0x60   :  { %740 = vmatpush1.bf16.msra.mxu1 %v16046_v5  ;;  %382 = vmatpush1.bf16.msra.mxu0 %v16046_v5  ;;  %v16367_v52 = vld [vmem:[#allocation10 + $0x18] sm:$0xff]   ;;  %v15056_v60 = vld [vmem:[#allocation10 + $0x30] sm:$0xff]  }
  0x61   :  { %741 = vmatprep.subr.bf16.mxu1 %v16039_v4  ;;  %383 = vmatprep.subr.bf16.mxu0 %v16039_v4  ;;  %v15053_v53 = vld [vmem:[#allocation10 + $0x38] sm:$0xff]  }
  0x64   :  { %742 = vmatpush1.bf16.msra.mxu1 %v16050_v6  ;;  %384 = vmatpush1.bf16.msra.mxu0 %v16050_v6 }
  0x65   :  { %743 = vmatprep.subr.bf16.mxu1 %v16054_v7  ;;  %385 = vmatprep.subr.bf16.mxu0 %v16054_v7 }
  0x66   :  { %12887 = vmatmul.mubr.msk.bf16.gmra.mxu0 %vm169_vm1, %v15013_v11  ;;  %12896 = vmatmul.mubr.msk.bf16.gmra.mxu1 %vm169_vm1, %v15014_v12 }
  0x67   :  { %238 = vmatprep.mubr.bf16.mxu0 %v20720_v0  ;;  %761 = vmatprep.mubr.bf16.mxu1 %v20720_v0 }
  0x68   :  { %744 = vmatpush1.bf16.msra.mxu1 %v16058_v8  ;;  %386 = vmatpush1.bf16.msra.mxu0 %v16058_v8 }
  0x69   :  { %12900 = vmatprep.subr.msk.bf16.mxu0 %vm179_vm0, %v16037_v2  ;;  %12921 = vmatprep.subr.msk.bf16.mxu1 %vm179_vm0, %v16037_v2 }
  0x6e   :  { %12888 = vmatmul.mubr.msk.bf16.gmra.mxu0 %vm169_vm1, %v15015_v13  ;;  %12908 = vmatmul.mubr.msk.bf16.vlgmr.msra.gmra.mxu1 %vm169_vm1, %v15016_v14 }
  0x6f   :  { %403 = vmatprep.mubr.bf16.mxu0 %v20720_v0  ;;  %771 = vmatprep.mubr.bf16.mxu1 %v20720_v0 }
  0x70   :  { %1098 = vmatpush1.bf16.msra.mxu1 %v16046_v5 }
  0x71   :  { %1099 = vmatprep.subr.bf16.mxu1 %v16039_v4 }
  0x74   :  { %1100 = vmatpush1.bf16.msra.mxu1 %v16050_v6 }
  0x75   :  { %1101 = vmatprep.subr.bf16.mxu1 %v16054_v7 }
  0x76   :  { %12894 = vmatmul.mubr.msk.bf16.vlgmr.msra.gmra.mxu0 %vm169_vm1, %v15017_v15  ;;  %12909 = vmatmul.mubr.msk.bf16.gmra.mxu1 %vm169_vm1, %v15018_v16 }
  0x77   :  { %561 = vmatpush1.bf16.msra.mxu0 %v16046_v5  ;;  %781 = vmatprep.mubr.bf16.mxu1 %v20720_v0 }
  0x78   :  { %562 = vmatprep.subr.bf16.mxu0 %v16039_v4  ;;  %582 = vmatprep.mubr.bf16.mxu0 %v20720_v0 }
  0x79   :  { %1102 = vmatpush1.bf16.msra.mxu1 %v16058_v8 }
  0x7a   :  { %12935 = vmatprep.subr.msk.bf16.mxu1 %vm179_vm0, %v16037_v2 }
  0x7b   :  { %563 = vmatpush1.bf16.msra.mxu0 %v16050_v6 }
  0x7c   :  { %564 = vmatprep.subr.bf16.mxu0 %v16054_v7 }
  0x7e   :  { %12910 = vmatmul.mubr.msk.bf16.gmra.mxu1 %vm169_vm1, %v15019_v17 }
  0x7f   :  { %565 = vmatpush1.bf16.msra.mxu0 %v16058_v8  ;;  %1119 = vmatprep.mubr.bf16.mxu1 %v20720_v0 }
  0x80   :  { %12914 = vmatprep.subr.msk.bf16.mxu0 %vm179_vm0, %v16037_v2 }
  0x82   :  { %12901 = vmatmul.mubr.msk.bf16.vlgmr.msra.gmra.mxu0 %vm169_vm1, %v15020_v18 }
  0x83   :  { %592 = vmatprep.mubr.bf16.mxu0 %v20720_v0  ;;  %919 = vmatpush1.bf16.msra.mxu0 %v16046_v5 }
  0x84   :  { %920 = vmatprep.subr.bf16.mxu0 %v16039_v4 }
  0x86   :  { %12922 = vmatmul.mubr.msk.bf16.vlgmr.msra.gmra.mxu1 %vm169_vm1, %v15021_v19 }
  0x87   :  { %1129 = vmatprep.mubr.bf16.mxu1 %v20720_v0  ;;  %921 = vmatpush1.bf16.msra.mxu0 %v16050_v6 }
  0x88   :  { %922 = vmatprep.subr.bf16.mxu0 %v16054_v7  ;;  %1456 = vmatpush1.bf16.msra.mxu1 %v16046_v5 }
  0x89   :  { %1457 = vmatprep.subr.bf16.mxu1 %v16039_v4 }
  0x8a   :  { %12902 = vmatmul.mubr.msk.bf16.gmra.mxu0 %vm169_vm1, %v15022_v20 }
  0x8b   :  { %602 = vmatprep.mubr.bf16.mxu0 %v20720_v0  ;;  %923 = vmatpush1.bf16.msra.mxu0 %v16058_v8 }
  0x8c   :  { %12928 = vmatprep.subr.msk.bf16.mxu0 %vm179_vm0, %v16037_v2  ;;  %1458 = vmatpush1.bf16.msra.mxu1 %v16050_v6 }
  0x8d   :  { %1459 = vmatprep.subr.bf16.mxu1 %v16054_v7 }
  0x8e   :  { %12923 = vmatmul.mubr.msk.bf16.gmra.mxu1 %vm169_vm1, %v15023_v21 }
  0x8f   :  { %1139 = vmatprep.mubr.bf16.mxu1 %v20720_v0 }
  0x90   :  { %1460 = vmatpush1.bf16.msra.mxu1 %v16058_v8 }
  0x91   :  { %12949 = vmatprep.subr.msk.bf16.mxu1 %vm179_vm0, %v16037_v2 }
  0x92   :  { %12903 = vmatmul.mubr.msk.bf16.gmra.mxu0 %vm169_vm1, %v15024_v22 }
  0x93   :  { %940 = vmatprep.mubr.bf16.mxu0 %v20720_v0 }
  0x96   :  { %12924 = vmatmul.mubr.msk.bf16.gmra.mxu1 %vm169_vm1, %v15025_v23 }
  0x97   :  { %1477 = vmatprep.mubr.bf16.mxu1 %v20720_v0 }
  0x9a   :  { %12915 = vmatmul.mubr.msk.bf16.vlgmr.msra.gmra.mxu0 %vm169_vm1, %v15026_v24 }
  0x9b   :  { %1277 = vmatpush1.bf16.msra.mxu0 %v16046_v5  ;;  %950 = vmatprep.mubr.bf16.mxu0 %v20720_v0 }
  0x9c   :  { %1278 = vmatprep.subr.bf16.mxu0 %v16039_v4 }
  0x9e   :  { %12936 = vmatmul.mubr.msk.bf16.vlgmr.msra.gmra.mxu1 %vm169_vm1, %v15031_v25 }
  0x9f   :  { %1279 = vmatpush1.bf16.msra.mxu0 %v16050_v6  ;;  %1487 = vmatprep.mubr.bf16.mxu1 %v20720_v0 }
  0xa0   :  { %1280 = vmatprep.subr.bf16.mxu0 %v16054_v7  ;;  %1814 = vmatpush1.bf16.msra.mxu1 %v16046_v5 }
  0xa1   :  { %1815 = vmatprep.subr.bf16.mxu1 %v16039_v4 }
  0xa2   :  { %12916 = vmatmul.mubr.msk.bf16.gmra.mxu0 %vm169_vm1, %v15027_v26 }
  0xa3   :  { %960 = vmatprep.mubr.bf16.mxu0 %v20720_v0  ;;  %1281 = vmatpush1.bf16.msra.mxu0 %v16058_v8 }
  0xa4   :  { %1816 = vmatpush1.bf16.msra.mxu1 %v16050_v6  ;;  %12942 = vmatprep.subr.msk.bf16.mxu0 %vm179_vm0, %v16037_v2 }
  0xa5   :  { %1817 = vmatprep.subr.bf16.mxu1 %v16054_v7 }
  0xa6   :  { %12937 = vmatmul.mubr.msk.bf16.gmra.mxu1 %vm169_vm1, %v15032_v27 }
  0xa7   :  { %1497 = vmatprep.mubr.bf16.mxu1 %v20720_v0 }
  0xa8   :  { %1818 = vmatpush1.bf16.msra.mxu1 %v16058_v8 }
  0xa9   :  { %12963 = vmatprep.subr.msk.bf16.mxu1 %vm179_vm0, %v16037_v2 }
  0xaa   :  { %12917 = vmatmul.mubr.msk.bf16.gmra.mxu0 %vm169_vm1, %v15028_v28 }
  0xab   :  { %1298 = vmatprep.mubr.bf16.mxu0 %v20720_v0 }
  0xae   :  { %12938 = vmatmul.mubr.msk.bf16.gmra.mxu1 %vm169_vm1, %v15033_v29 }
  0xaf   :  { %1835 = vmatprep.mubr.bf16.mxu1 %v20720_v0 }
  0xb2   :  { %12929 = vmatmul.mubr.msk.bf16.vlgmr.msra.gmra.mxu0 %vm169_vm1, %v15029_v30 }
  0xb3   :  { %1308 = vmatprep.mubr.bf16.mxu0 %v20720_v0  ;;  %1635 = vmatpush1.bf16.msra.mxu0 %v16046_v5 }
  0xb4   :  { %1636 = vmatprep.subr.bf16.mxu0 %v16039_v4 }
  0xb6   :  { %12950 = vmatmul.mubr.msk.bf16.vlgmr.msra.gmra.mxu1 %vm169_vm1, %v15034_v31 }
  0xb7   :  { %1845 = vmatprep.mubr.bf16.mxu1 %v20720_v0  ;;  %1637 = vmatpush1.bf16.msra.mxu0 %v16050_v6 }
  0xb8   :  { %1638 = vmatprep.subr.bf16.mxu0 %v16054_v7  ;;  %2172 = vmatpush1.bf16.msra.mxu1 %v16046_v5 }
  0xb9   :  { %2173 = vmatprep.subr.bf16.mxu1 %v16039_v4 }
  0xba   :  { %12930 = vmatmul.mubr.msk.bf16.gmra.mxu0 %vm169_vm1, %v15030_v32 }
  0xbb   :  { %1318 = vmatprep.mubr.bf16.mxu0 %v20720_v0  ;;  %1639 = vmatpush1.bf16.msra.mxu0 %v16058_v8 }
  0xbc   :  { %2174 = vmatpush1.bf16.msra.mxu1 %v16050_v6  ;;  %12956 = vmatprep.subr.msk.bf16.mxu0 %vm179_vm0, %v16037_v2 }
  0xbd   :  { %2175 = vmatprep.subr.bf16.mxu1 %v16054_v7 }
  0xbe   :  { %12951 = vmatmul.mubr.msk.bf16.gmra.mxu1 %vm169_vm1, %v15035_v33 }
  0xbf   :  { %1855 = vmatprep.mubr.bf16.mxu1 %v20720_v0 }
  0xc0   :  { %2176 = vmatpush1.bf16.msra.mxu1 %v16058_v8 }
  0xc1   :  { %12977 = vmatprep.subr.msk.bf16.mxu1 %vm179_vm0, %v16037_v2 }
  0xc2   :  { %12931 = vmatmul.mubr.msk.bf16.gmra.mxu0 %vm169_vm1, %v15036_v34 }
  0xc3   :  { %1656 = vmatprep.mubr.bf16.mxu0 %v20720_v0 }
  0xc6   :  { %12952 = vmatmul.mubr.msk.bf16.gmra.mxu1 %vm169_vm1, %v15037_v35 }
  0xc7   :  { %2193 = vmatprep.mubr.bf16.mxu1 %v20720_v0 }
  0xca   :  { %12943 = vmatmul.mubr.msk.bf16.vlgmr.msra.gmra.mxu0 %vm169_vm1, %v15038_v36 }
  0xcb   :  { %1666 = vmatprep.mubr.bf16.mxu0 %v20720_v0  ;;  %1993 = vmatpush1.bf16.msra.mxu0 %v16046_v5 }
  0xcc   :  { %1994 = vmatprep.subr.bf16.mxu0 %v16039_v4 }
  0xce   :  { %12964 = vmatmul.mubr.msk.bf16.vlgmr.msra.gmra.mxu1 %vm169_vm1, %v15039_v37 }
  0xcf   :  { %2203 = vmatprep.mubr.bf16.mxu1 %v20720_v0  ;;  %1995 = vmatpush1.bf16.msra.mxu0 %v16050_v6 }
  0xd0   :  { %1996 = vmatprep.subr.bf16.mxu0 %v16054_v7  ;;  %2530 = vmatpush1.bf16.msra.mxu1 %v16046_v5 }
  0xd1   :  { %2531 = vmatprep.subr.bf16.mxu1 %v16039_v4 }
  0xd2   :  { %12944 = vmatmul.mubr.msk.bf16.gmra.mxu0 %vm169_vm1, %v15040_v38 }
  0xd3   :  { %1676 = vmatprep.mubr.bf16.mxu0 %v20720_v0  ;;  %1997 = vmatpush1.bf16.msra.mxu0 %v16058_v8 }
  0xd4   :  { %2532 = vmatpush1.bf16.msra.mxu1 %v16050_v6  ;;  %12970 = vmatprep.subr.msk.bf16.mxu0 %vm179_vm0, %v16037_v2  ;;  %v15058_v2 = vld [vmem:[#allocation10 + $0x28] sm:$0xff]  }
  0xd5   :  { %2533 = vmatprep.subr.bf16.mxu1 %v16054_v7 }
  0xd6   :  { %12965 = vmatmul.mubr.msk.bf16.gmra.mxu1 %vm169_vm1, %v15041_v39 }
  0xd7   :  { %2213 = vmatprep.mubr.bf16.mxu1 %v20720_v0 }
  0xd8   :  { %2534 = vmatpush1.bf16.msra.mxu1 %v16058_v8 }
  0xd9   :  { %14097 = vmatprep.subr.bf16.mxu1 %v20722_v56 }
  0xda   :  { %12945 = vmatmul.mubr.msk.bf16.gmra.mxu0 %vm169_vm1, %v15042_v40 }
  0xdb   :  { %2014 = vmatprep.mubr.bf16.mxu0 %v20720_v0 }
  0xde   :  { %12966 = vmatmul.mubr.msk.bf16.gmra.mxu1 %vm169_vm1, %v15043_v41 }
  0xdf   :  { %2551 = vmatprep.mubr.bf16.mxu1 %v20720_v0 }
  0xe2   :  { %12957 = vmatmul.mubr.msk.bf16.vlgmr.msra.gmra.mxu0 %vm169_vm1, %v15044_v42 }
  0xe3   :  { %2024 = vmatprep.mubr.bf16.mxu0 %v20720_v0  ;;  %2351 = vmatpush1.bf16.msra.mxu0 %v16046_v5 }
  0xe4   :  { %2352 = vmatprep.subr.bf16.mxu0 %v16039_v4 }
  0xe6   :  { %12978 = vmatmul.mubr.msk.bf16.vlgmr.msra.gmra.mxu1 %vm169_vm1, %v15045_v43 }
  0xe7   :  { %2353 = vmatpush1.bf16.msra.mxu0 %v16050_v6  ;;  %2561 = vmatprep.mubr.bf16.mxu1 %v20720_v0  ;;  %v16416_v6 = vld [vmem:[#allocation10] sm:$0xff]  }
  0xe8   :  { %2354 = vmatprep.subr.bf16.mxu0 %v16054_v7  ;;  %14098 = vmatpush3.bf16.msra.mxu1 %v15053_v53  ;;  %v15060_v7 = vld [vmem:[#allocation10 + $0x20] sm:$0xff]  }
  0xe9   :  { %14099 = vmatprep.subr.bf16.mxu1 %v20722_v56 }
  0xea   :  { %12958 = vmatmul.mubr.msk.bf16.gmra.mxu0 %vm169_vm1, %v15046_v44 }
  0xeb   :  { %2355 = vmatpush1.bf16.msra.mxu0 %v16058_v8  ;;  %2034 = vmatprep.mubr.bf16.mxu0 %v20720_v0 }
  0xec   :  { %14045 = vmatprep.subr.bf16.mxu0 %v20722_v56  ;;  %14100 = vmatpush3.bf16.msra.mxu1 %v15056_v60 }
  0xed   :  { %14101 = vmatprep.subr.bf16.mxu1 %v20722_v56 }
  0xee   :  { %12979 = vmatmul.mubr.msk.bf16.gmra.mxu1 %vm169_vm1, %v15047_v45 }
  0xef   :  { %2571 = vmatprep.mubr.bf16.mxu1 %v20720_v0 }
  0xf0   :  { %14102 = vmatpush3.bf16.msra.mxu1 %v15058_v2 }
  0xf1   :  { %14103 = vmatprep.subr.bf16.mxu1 %v20722_v56 }
  0xf2   :  { %12959 = vmatmul.mubr.msk.bf16.gmra.mxu0 %vm169_vm1, %v15048_v46 }
  0xf3   :  { %2372 = vmatprep.mubr.bf16.mxu0 %v20720_v0 }
  0xf4   :  { %14104 = vmatpush3.bf16.msra.mxu1 %v15060_v7 }
  0xf5   :  { %14201 = vmatprep.subr.bf16.mxu1 %v20722_v56 }
  0xf6   :  { %12980 = vmatmul.mubr.msk.bf16.gmra.mxu1 %vm169_vm1, %v15049_v47 }
  0xf7   :  { %14105 = vmatprep.mubr.msk.bf16.mxu1 %vm15960_vm2, %v20722_v56 }
  0xfa   :  { %12971 = vmatmul.mubr.msk.bf16.vlgmr.msra.gmra.mxu0 %vm169_vm1, %v15050_v48 }
  0xfb   :  { %2382 = vmatprep.mubr.bf16.mxu0 %v20720_v0  ;;  %14046 = vmatpush3.bf16.msra.mxu0 %v16367_v52 }
  0xfc   :  { %14047 = vmatprep.subr.bf16.mxu0 %v20722_v56 }
  0xff   :  { %14048 = vmatpush3.bf16.msra.mxu0 %v16385_v59 }
 0x100   :  { %14049 = vmatprep.subr.bf16.mxu0 %v20722_v56 }
 0x102   :  { %12972 = vmatmul.mubr.msk.bf16.gmra.mxu0 %vm169_vm1, %v15051_v49 }
 0x103   :  { %2392 = vmatprep.mubr.bf16.mxu0 %v20720_v0  ;;  %14050 = vmatpush3.bf16.msra.mxu0 %v16401_v1 }
 0x104   :  { %14051 = vmatprep.subr.bf16.mxu0 %v20722_v56 }
 0x107   :  { %14052 = vmatpush3.bf16.msra.mxu0 %v16416_v6 }
 0x108   :  { %14149 = vmatprep.subr.bf16.mxu0 %v20722_v56 }
 0x10a   :  { %12973 = vmatmul.mubr.msk.bf16.gmra.mxu0 %vm169_vm1, %v15054_v58 }
 0x10b   :  { %14053 = vmatprep.mubr.msk.bf16.mxu0 %vm15960_vm2, %v20722_v56 }
 0x11e   :  { %v16359_v50 = vpop.f32.mrf.mxu0  ;;  %v16361_v51 = vpop.f32.mrf.mxu1 }
 0x11f   :  { %444 = vrot.lane.b32.xlu1 %v16361_v51, %s15954_s29  ;;  %255 = vrot.lane.b32.xlu0 %v16359_v50, %s15954_s29 }
 0x120   :  { %v16369_v54 = vpop.f32.mrf.mxu0  ;;  %v16371_v55 = vpop.f32.mrf.mxu1 }
 0x122   :  { %v16376_v57 = vpop.f32.mrf.mxu0  ;;  %v16387_v61 = vpop.f32.mrf.mxu1 }
 0x123   :  { %285 = vrot.lane.b32.xlu0 %v16369_v54, %s15954_s29 }
 0x124   :  { %v16389_v62 = vpop.f32.mrf.mxu0  ;;  %v16403_v3 = vpop.f32.mrf.mxu1 }
 0x125   :  { %287 = vrot.lane.b32.xlu1 %v16389_v62, %s15954_s29 }
 0x126   :  { %v16395_v63 = vpop.f32.mrf.mxu0  ;;  %v16430_v10 = vpop.f32.mrf.mxu1 }
 0x127   :  { %474 = vrot.lane.b32.xlu0 %v16371_v55, %s15954_s29 }
 0x128   :  { %v16405_v4 = vpop.f32.mrf.mxu0  ;;  %v16443_v13 = vpop.f32.mrf.mxu1 }
 0x129   :  { %476 = vrot.lane.b32.xlu1 %v16403_v3, %s15954_s29 }
 0x12a   :  { %v16410_v5 = vpop.f32.mrf.mxu0  ;;  %v16453_v16 = vpop.f32.mrf.mxu1 }
 0x12b   :  { %257 = vrot.lane.b32.xlu0 %v16376_v57, %s15954_s29 }
 0x12c   :  { %v16418_v8 = vpop.f32.mrf.mxu0  ;;  %v16461_v18 = vpop.f32.mrf.mxu1 }
 0x12d   :  { %259 = vrot.lane.b32.xlu1 %v16395_v63, %s15954_s29 }
 0x12e   :  { %v16423_v9 = vpop.f32.mrf.mxu0  ;;  %v16467_v20 = vpop.f32.mrf.mxu1 }
 0x12f   :  { %446 = vrot.lane.b32.xlu0 %v16387_v61, %s15954_s29 }
 0x130   :  { %v16432_v11 = vpop.f32.mrf.mxu0  ;;  %v16475_v22 = vpop.f32.mrf.mxu1 }
 0x131   :  { %448 = vrot.lane.b32.xlu1 %v16430_v10, %s15954_s29 }
 0x132   :  { %v16439_v12 = vpop.f32.mrf.mxu0  ;;  %v16483_v24 = vpop.f32.mrf.mxu1 }
 0x133   :  { %289 = vrot.lane.b32.xlu0 %v16405_v4, %s15954_s29 }
 0x134   :  { %v16445_v14 = vpop.f32.mrf.mxu0  ;;  %v16491_v26 = vpop.f32.mrf.mxu1 }
 0x135   :  { %261 = vrot.lane.b32.xlu1 %v16410_v5, %s15954_s29 }
 0x136   :  { %v16449_v15 = vpop.f32.mrf.mxu0  ;;  %v16497_v28 = vpop.f32.mrf.mxu1 }
 0x137   :  { %478 = vrot.lane.b32.xlu0 %v16443_v13, %s15954_s29 }
 0x138   :  { %v16455_v17 = vpop.f32.mrf.mxu0  ;;  %v16505_v30 = vpop.f32.mrf.mxu1 }
 0x139   :  { %291 = vrot.lane.b32.xlu1 %v16418_v8, %s15954_s29 }
 0x13a   :  { %v16463_v19 = vpop.f32.mrf.mxu0  ;;  %v16513_v32 = vpop.f32.mrf.mxu1 }
 0x13b   :  { %450 = vrot.lane.b32.xlu0 %v16453_v16, %s15954_s29 }
 0x13c   :  { %v16471_v21 = vpop.f32.mrf.mxu0  ;;  %v16521_v34 = vpop.f32.mrf.mxu1 }
 0x13d   :  { %480 = vrot.lane.b32.xlu1 %v16461_v18, %s15954_s29 }
 0x13e   :  { %v16527_v36 = vpop.f32.mrf.mxu1 }
 0x13f   :  { %263 = vrot.lane.b32.xlu0 %v16423_v9, %s15954_s29 }
 0x140   :  { %v16535_v38 = vpop.f32.mrf.mxu1 }
 0x141   :  { %798 = vrot.lane.b32.xlu1 %v16467_v20, %s15954_s29 }
 0x142   :  { %v16477_v23 = vpop.f32.mrf.mxu0  ;;  %v16543_v40 = vpop.f32.mrf.mxu1 }
 0x143   :  { %293 = vrot.lane.b32.xlu0 %v16432_v11, %s15954_s29  ;;  %20909 = vst [vmem:[#allocation32_spill] sm:$0xff] %v16543_v40 }
 0x144   :  { %v16485_v25 = vpop.f32.mrf.mxu0  ;;  %v16555_v43 = vpop.f32.mrf.mxu1 }
 0x145   :  { %265 = vrot.lane.b32.xlu1 %v16439_v12, %s15954_s29  ;;  %20912 = vst [vmem:[#allocation35_spill] sm:$0xff] %v16555_v43 }
 0x146   :  { %v16493_v27 = vpop.f32.mrf.mxu0  ;;  %v16559_v44 = vpop.f32.mrf.mxu1 }
 0x147   :  { %828 = vrot.lane.b32.xlu0 %v16475_v22, %s15954_s29  ;;  %20913 = vst [vmem:[#allocation36_spill] sm:$0xff] %v16559_v44 }
 0x148   :  { %v16501_v29 = vpop.f32.mrf.mxu0  ;;  %v16567_v46 = vpop.f32.mrf.mxu1 }
 0x149   :  { %800 = vrot.lane.b32.xlu1 %v16483_v24, %s15954_s29  ;;  %20915 = vst [vmem:[#allocation38_spill] sm:$0xff] %v16567_v46 }
 0x14a   :  { %v16507_v31 = vpop.f32.mrf.mxu0  ;;  %v16579_v49 = vpop.f32.mrf.mxu1 }
 0x14b   :  { %440 = vrot.lane.b32.xlu0 %v16449_v15, %s15954_s29  ;;  %20904 = vst [vmem:[#allocation27_spill] sm:$0xff] %v16507_v31  ;;  %20918 = vst [vmem:[#allocation41_spill] sm:$0xff] %v16579_v49 }
 0x14c   :  { %v16515_v33 = vpop.f32.mrf.mxu0  ;;  %v16587_v58 = vpop.f32.mrf.mxu1 }
 0x14d   :  { %295 = vrot.lane.b32.xlu1 %v16445_v14, %s15954_s29  ;;  %20905 = vst [vmem:[#allocation28_spill] sm:$0xff] %v16515_v33  ;;  %20920 = vst [vmem:[#allocation43_spill] sm:$0xff] %v16587_v58 }
 0x14e   :  { %v16523_v35 = vpop.f32.mrf.mxu0  ;;  %v16591_v60 = vpop.f32.mrf.mxu1 }
 0x14f   :  { %802 = vrot.lane.b32.xlu0 %v16497_v28, %s15954_s29  ;;  %20906 = vst [vmem:[#allocation29_spill] sm:$0xff] %v16523_v35  ;;  %20921 = vst [vmem:[#allocation44_spill] sm:$0xff] %v16591_v60 }
 0x150   :  { %v16531_v37 = vpop.f32.mrf.mxu0  ;;  %v16599_v7 = vpop.f32.mrf.mxu1 }
 0x151   :  { %830 = vrot.lane.b32.xlu1 %v16491_v26, %s15954_s29  ;;  %20907 = vst [vmem:[#allocation30_spill] sm:$0xff] %v16531_v37  ;;  %20923 = vst [vmem:[#allocation46_spill] sm:$0xff] %v16599_v7 }
 0x152   :  { %v16537_v39 = vpop.f32.mrf.mxu0  ;;  %v16607_v56 = vpop.f32.mrf.mxu1 }
 0x153   :  { %832 = vrot.lane.b32.xlu0 %v16505_v30, %s15954_s29  ;;  %20908 = vst [vmem:[#allocation31_spill] sm:$0xff] %v16537_v39  ;;  %20925 = vst [vmem:[#allocation48_spill] sm:$0xff] %v16607_v56 }
 0x154   :  { %v16545_v41 = vpop.f32.mrf.mxu0 }
 0x155   :  { %470 = vrot.lane.b32.xlu1 %v16455_v17, %s15954_s29  ;;  %20910 = vst [vmem:[#allocation33_spill] sm:$0xff] %v16545_v41 }
 0x156   :  { %v16551_v42 = vpop.f32.mrf.mxu0 }
 0x157   :  { %442 = vrot.lane.b32.xlu0 %v16463_v19, %s15954_s29  ;;  %20911 = vst [vmem:[#allocation34_spill] sm:$0xff] %v16551_v42 }
 0x158   :  { %v16561_v45 = vpop.f32.mrf.mxu0 }
 0x159   :  { %472 = vrot.lane.b32.xlu1 %v16471_v21, %s15954_s29  ;;  %20914 = vst [vmem:[#allocation37_spill] sm:$0xff] %v16561_v45 }
 0x15a   :  { %v16569_v47 = vpop.f32.mrf.mxu0 }
 0x15b   :  { %804 = vrot.lane.b32.xlu0 %v16513_v32, %s15954_s29  ;;  %20916 = vst [vmem:[#allocation39_spill] sm:$0xff] %v16569_v47 }
 0x15c   :  { %v16575_v48 = vpop.f32.mrf.mxu0 }
 0x15d   :  { %834 = vrot.lane.b32.xlu1 %v16521_v34, %s15954_s29  ;;  %20917 = vst [vmem:[#allocation40_spill] sm:$0xff] %v16575_v48 }
 0x15e   :  { %v16583_v53 = vpop.f32.mrf.mxu0 }
 0x15f   :  { %836 = vrot.lane.b32.xlu0 %v16535_v38, %s15954_s29  ;;  %20919 = vst [vmem:[#allocation42_spill] sm:$0xff] %v16583_v53 }
 0x160   :  { %v16593_v2 = vpop.f32.mrf.mxu0 }
 0x161   :  { %806 = vrot.lane.b32.xlu1 %v16527_v36, %s15954_s29  ;;  %20922 = vst [vmem:[#allocation45_spill] sm:$0xff] %v16593_v2 }
 0x162   :  { %v16601_v0 = vpop.f32.mrf.mxu0 }
 0x163   :  { %808 = vrot.lane.b32.xlu0 %v16543_v40, %s15954_s29  ;;  %20924 = vst [vmem:[#allocation47_spill] sm:$0xff] %v16601_v0 }
 0x165   :  { %619 = vrot.lane.b32.xlu1 %v16477_v23, %s15954_s29 }
 0x167   :  { %621 = vrot.lane.b32.xlu0 %v16493_v27, %s15954_s29 }
 0x169   :  { %649 = vrot.lane.b32.xlu1 %v16485_v25, %s15954_s29 }
 0x16b   :  { %651 = vrot.lane.b32.xlu0 %v16501_v29, %s15954_s29 }
 0x16d   :  { %838 = vrot.lane.b32.xlu1 %v16555_v43, %s15954_s29 }
 0x16f   :  { %1186 = vrot.lane.b32.xlu0 %v16567_v46, %s15954_s29 }
 0x171   :  { %1156 = vrot.lane.b32.xlu1 %v16559_v44, %s15954_s29  ;;  %v16651_v44 = vld [vmem:[#allocation8] ss:$0 sm:$0xff] }
 0x173   :  { %653 = vrot.lane.b32.xlu0 %v16515_v33, %s15954_s29 }
 0x175   :  { %623 = vrot.lane.b32.xlu1 %v16507_v31, %s15954_s29 }
 0x177   :  { %625 = vrot.lane.b32.xlu0 %v16523_v35, %s15954_s29  ;;  %v16609_v35 = vpop.f32.mrf.mxu0 }
 0x178   :  { %20926 = vst [vmem:[#allocation49_spill] sm:$0xff] %v16609_v35 }
 0x179   :  { %1158 = vrot.lane.b32.xlu1 %v16579_v49, %s15954_s29 }
 0x17b   :  { %1160 = vrot.lane.b32.xlu0 %v16591_v60, %s15954_s29  ;;  %v16615_v60 = vpop.f32.mrf.mxu1 }
 0x17d   :  { %1188 = vrot.lane.b32.xlu1 %v16587_v58, %s15954_s29  ;;  %v16617_v58 = vpop.f32.mrf.mxu0 }
 0x17f   :  { %1190 = vrot.lane.b32.xlu0 %v16599_v7, %s15954_s29  ;;  %v16621_v7 = vpop.f32.mrf.mxu1 }
 0x180   :  { %20927 = vst [vmem:[#allocation50_spill] sm:$0xff] %v16621_v7 }
 0x181   :  { %655 = vrot.lane.b32.xlu1 %v16531_v37, %s15954_s29  ;;  %v16625_v37 = vpop.f32.mrf.mxu0 }
 0x183   :  { %1162 = vrot.lane.b32.xlu0 %v16607_v56, %s15954_s29  ;;  %v16631_v56 = vpop.f32.mrf.mxu0 }
 0x185   :  { %627 = vrot.lane.b32.xlu1 %v16537_v39, %s15954_s29  ;;  %v16635_v39 = vpop.f32.mrf.mxu1 }
 0x187   :  { %657 = vrot.lane.b32.xlu0 %v16545_v41, %s15954_s29 }
 0x189   :  { %1164 = vrot.lane.b32.xlu1 %v16621_v7, %s15954_s29  ;;  %v16639_v7 = vpop.f32.mrf.mxu0 }
 0x18b   :  { %629 = vrot.lane.b32.xlu0 %v16551_v42, %s15954_s29  ;;  %v16643_v42 = vpop.f32.mrf.mxu1  ;;  %v16649_v33 = vpop.f32.mrf.mxu0 }
 0x18d   :  { %659 = vrot.lane.b32.xlu1 %v16561_v45, %s15954_s29  ;;  %v16655_v46 = vpop.f32.mrf.mxu1 }
 0x18f   :  { %979 = vrot.lane.b32.xlu0 %v16583_v53, %s15954_s29 }
 0x191   :  { %v256_v41 = vpop.permute.xlu0 %255  ;;  %977 = vrot.lane.b32.xlu1 %v16569_v47, %s15954_s29  ;;  %v445_v49 = vpop.permute.xlu1 %444 }
 0x192   :  { %v273_v53 = vmax.f32 %v16359_v50, %v256_v41  ;;  %v16662_v41 = vpop.f32.mrf.mxu0 }
 0x193   :  { %1009 = vrot.lane.b32.xlu0 %v16593_v2, %s15954_s29 }
 0x195   :  { %v286_v45 = vpop.permute.xlu0 %285  ;;  %1007 = vrot.lane.b32.xlu1 %v16575_v48, %s15954_s29  ;;  %v460_v48 = vmax.f32 %v16361_v51, %v445_v49  ;;  %v16674_v49 = vpop.f32.mrf.mxu0 }
 0x196   :  { %v303_v31 = vmax.f32 %v16369_v54, %v286_v45  ;;  %v16664_v45 = vpop.f32.mrf.mxu1  ;;  %20928 = vst [vmem:[#allocation51_spill] sm:$0xff] %v16674_v49 }
 0x197   :  { %v288_v47 = vpop.permute.xlu1 %287  ;;  %1011 = vrot.lane.b32.xlu0 %v16609_v35, %s15954_s29 }
 0x198   :  { %v309_v2 = vmax.f32 %v273_v53, %v303_v31  ;;  %v304_v51 = vmax.f32 %v16389_v62, %v288_v47 }
 0x199   :  { %v475_v43 = vpop.permute.xlu0 %474  ;;  %981 = vrot.lane.b32.xlu1 %v16601_v0, %s15954_s29 }
 0x19a   :  { %v321_v50 = vadd.f32 %v16651_v44, %v309_v2  ;;  %v490_v54 = vmax.f32 %v16371_v55, %v475_v43  ;;  %v16676_v2 = vpop.f32.mrf.mxu1 }
 0x19b   :  { %v477_v40 = vpop.permute.xlu1 %476  ;;  %983 = vrot.lane.b32.xlu0 %v16617_v58, %s15954_s29 }
 0x19c   :  { %v327_v31 = vmax.f32 %v321_v50, 0.0  ;;  %v496_v53 = vmax.f32 %v460_v48, %v490_v54  ;;  %v491_v62 = vmax.f32 %v16403_v3, %v477_v40 }
 0x19d   :  { %v258_v35 = vpop.permute.xlu0 %257  ;;  %1013 = vrot.lane.b32.xlu1 %v16625_v37, %s15954_s29 }
 0x19e   :  { %334 = vst.msk [vmem:[#allocation2] sm:$0xff] %vm333_vm3, %v327_v31  ;;  %v502_v55 = vadd.f32 %v16651_v44, %v496_v53  ;;  %v274_v43 = vmax.f32 %v16376_v57, %v258_v35  ;;  %v16685_v35 = vpop.f32.mrf.mxu0  ;;  %v16688_v31 = vpop.f32.mrf.mxu1 }
 0x19f   :  { %v260_v0 = vpop.permute.xlu1 %259  ;;  %1015 = vrot.lane.b32.xlu0 %v16639_v7, %s15954_s29 }
 0x1a0   :  { %v508_v48 = vmax.f32 %v502_v55, 0.0  ;;  %v310_v50 = vmax.f32 %v274_v43, %v304_v51  ;;  %v275_v3 = vmax.f32 %v16395_v63, %v260_v0 }
 0x1a1   :  { %v447_v54 = vpop.permute.xlu0 %446  ;;  %985 = vrot.lane.b32.xlu1 %v16631_v56, %s15954_s29 }
 0x1a2   :  { %515 = vst.msk [vmem:[#allocation2 + $0x28] sm:$0xff] %vm333_vm3, %v508_v48  ;;  %v322_v57 = vadd.f32 %v16651_v44, %v310_v50  ;;  %v461_v47 = vmax.f32 %v16387_v61, %v447_v54  ;;  %v16697_v48 = vpop.f32.mrf.mxu0  ;;  %v16700_v50 = vpop.f32.mrf.mxu1 }
 0x1a3   :  { %v449_v53 = vpop.permute.xlu1 %448  ;;  %987 = vrot.lane.b32.xlu0 %v16649_v33, %s15954_s29 }
 0x1a4   :  { %v328_v51 = vmax.f32 %v322_v57, 0.0  ;;  %v497_v55 = vmax.f32 %v461_v47, %v491_v62  ;;  %v462_v0 = vmax.f32 %v16430_v10, %v449_v53  ;;  %v16708_v63 = vpop.f32.mrf.mxu0 }
 0x1a5   :  { %v290_v43 = vpop.permute.xlu0 %289  ;;  %1017 = vrot.lane.b32.xlu1 %v16662_v41, %s15954_s29  ;;  %20929 = vst [vmem:[#allocation52_spill] sm:$0xff] %v16708_v63  ;;  %v2693_v10 = vld [vmem:[#allocation2] sm:$0xff] }
 0x1a6   :  { %335 = vst.msk [vmem:[#allocation2 + $0x8] sm:$0xff] %vm333_vm3, %v328_v51  ;;  %v503_v40 = vadd.f32 %v16651_v44, %v497_v55  ;;  %v305_v61 = vmax.f32 %v16405_v4, %v290_v43  ;;  %v16712_v55 = vpop.f32.mrf.mxu1 }
 0x1a7   :  { %v262_v54 = vpop.permute.xlu1 %261  ;;  %1337 = vrot.lane.b32.xlu0 %v16697_v48, %s15954_s29 }
 0x1a8   :  { %v509_v62 = vmax.f32 %v503_v40, 0.0  ;;  %v311_v57 = vmax.f32 %v275_v3, %v305_v61  ;;  %v276_v40 = vmax.f32 %v16410_v5, %v262_v54 }
 0x1a9   :  { %v479_v47 = vpop.permute.xlu0 %478  ;;  %1335 = vrot.lane.b32.xlu1 %v16674_v49, %s15954_s29 }
 0x1aa   :  { %517 = vst.msk [vmem:[#allocation2 + $0xc0] sm:$0xff] %vm333_vm3, %v509_v62  ;;  %v323_v4 = vadd.f32 %v16651_v44, %v311_v57  ;;  %v492_v51 = vmax.f32 %v16443_v13, %v479_v47  ;;  %v16722_v47 = vpop.f32.mrf.mxu0 }
 0x1ab   :  { %v292_v43 = vpop.permute.xlu1 %291  ;;  %1367 = vrot.lane.b32.xlu0 %v16708_v63, %s15954_s29 }
 0x1ac   :  { %v329_v3 = vmax.f32 %v323_v4, 0.0  ;;  %v498_v61 = vmax.f32 %v462_v0, %v492_v51  ;;  %v306_v62 = vmax.f32 %v16418_v8, %v292_v43  ;;  %v16726_v4 = vpop.f32.mrf.mxu1  ;;  %v15061_v8 = vld [vmem:[#allocation10 + $0x58] sm:$0xff]  }
 0x1ad   :  { %v451_v49 = vpop.permute.xlu0 %450  ;;  %1365 = vrot.lane.b32.xlu1 %v16685_v35, %s15954_s29  ;;  %v2694_v53 = vld [vmem:[#allocation2 + $0x8] sm:$0xff] }
 0x1ae   :  { %336 = vst.msk [vmem:[#allocation2 + $0x10] sm:$0xff] %vm333_vm3, %v329_v3  ;;  %v504_v13 = vadd.f32 %v16651_v44, %v498_v61  ;;  %v312_v57 = vmax.f32 %v276_v40, %v306_v62  ;;  %v16724_v63 = vpack.c.bf16 %v2694_v53, %v2693_v10  ;;  %v463_v51 = vmax.f32 %v16453_v16, %v451_v49  ;;  %v16742_v62 = vpop.f32.mrf.mxu0  ;;  %v15062_v10 = vld [vmem:[#allocation10 + $0x50] sm:$0xff]  }
 0x1af   :  { %v481_v5 = vpop.permute.xlu1 %480  ;;  %1166 = vrot.lane.b32.xlu0 %v16643_v42, %s15954_s29  ;;  %v20930_v40 = vmov 0.0  }
 0x1b0   :  { %v510_v54 = vmax.f32 %v504_v13, 0.0  ;;  %v324_v0 = vadd.f32 %v16651_v44, %v312_v57  ;;  %v493_v43 = vmax.f32 %v16461_v18, %v481_v5  ;;  %14054 = vmatmul.mubr.msk.bf16.vlgmr.msra.gmra.mxu0 %vm333_vm3, %v16724_v63  ;;  %14106 = vmatmul.mubr.msk.bf16.vlgmr.msra.gmra.mxu1 %vm333_vm3, %v16724_v63  ;;  %v16744_v18 = vpop.f32.mrf.mxu1 }
 0x1b1   :  { %v264_v3 = vpop.permute.xlu0 %263  ;;  %1192 = vrot.lane.b32.xlu1 %v16615_v60, %s15954_s29  ;;  %14057 = vmatprep.mubr.msk.bf16.mxu0 %vm15960_vm2, %v20930_v40 }
 0x1b2   :  { %518 = vst.msk [vmem:[#allocation2 + $0xc8] sm:$0xff] %vm333_vm3, %v510_v54  ;;  %v330_v61 = vmax.f32 %v324_v0, 0.0  ;;  %v499_v16 = vmax.f32 %v463_v51, %v493_v43  ;;  %14109 = vmatprep.mubr.msk.bf16.mxu1 %vm15960_vm2, %v20930_v40  ;;  %14202 = vmatpush3.bf16.msra.mxu1 %v16367_v52  ;;  %v277_v52 = vmax.f32 %v16423_v9, %v264_v3  ;;  %v16759_v54 = vpop.f32.mrf.mxu1  ;;  %v15063_v0 = vld [vmem:[#allocation10 + $0x48] sm:$0xff]  }
 0x1b3   :  { %v799_v49 = vpop.permute.xlu1 %798  ;;  %1369 = vrot.lane.b32.xlu0 %v16742_v62, %s15954_s29  ;;  %14150 = vmatpush3.bf16.msra.mxu0 %v15061_v8 }
 0x1b4   :  { %338 = vst.msk [vmem:[#allocation2 + $0xa8] sm:$0xff] %vm333_vm3, %v330_v61  ;;  %v505_v53 = vadd.f32 %v16651_v44, %v499_v16  ;;  %14203 = vmatprep.subr.bf16.mxu1 %v20930_v40  ;;  %14151 = vmatprep.subr.bf16.mxu0 %v20930_v40  ;;  %v16772_v3 = vpop.f32.mrf.mxu1  ;;  %v15064_v16 = vld [vmem:[#allocation10 + $0x40] sm:$0xff]  }
 0x1b5   :  { %v294_v13 = vpop.permute.xlu0 %293  ;;  %1339 = vrot.lane.b32.xlu1 %v16722_v47, %s15954_s29 }
 0x1b6   :  { %v511_v57 = vmax.f32 %v505_v53, 0.0  ;;  %v307_v5 = vmax.f32 %v16432_v11, %v294_v13  ;;  %14204 = vmatpush3.bf16.msra.mxu1 %v16385_v59  ;;  %v816_v11 = vmax.f32 %v16467_v20, %v799_v49 }
 0x1b7   :  { %v266_v8 = vpop.permute.xlu1 %265  ;;  %1194 = vrot.lane.b32.xlu0 %v16635_v39, %s15954_s29  ;;  %14152 = vmatpush3.bf16.msra.mxu0 %v15062_v10 }
 0x1b8   :  { %519 = vst.msk [vmem:[#allocation2 + $0xd0] sm:$0xff] %vm333_vm3, %v511_v57  ;;  %v313_v51 = vmax.f32 %v277_v52, %v307_v5  ;;  %14205 = vmatprep.subr.bf16.mxu1 %v20930_v40  ;;  %14153 = vmatprep.subr.bf16.mxu0 %v20930_v40  ;;  %v278_v13 = vmax.f32 %v16439_v12, %v266_v8 }
 0x1b9   :  { %v829_v9 = vpop.permute.xlu0 %828  ;;  %1196 = vrot.lane.b32.xlu1 %v16655_v46, %s15954_s29 }
 0x1ba   :  { %v325_v59 = vadd.f32 %v16651_v44, %v313_v51  ;;  %v846_v43 = vmax.f32 %v16475_v22, %v829_v9  ;;  %14206 = vmatpush3.bf16.msra.mxu1 %v16401_v1  ;;  %v16783_v22 = vpop.f32.mrf.mxu1 }
 0x1bb   :  { %v801_v61 = vpop.permute.xlu1 %800  ;;  %1514 = vrot.lane.b32.xlu0 %v16664_v45, %s15954_s29  ;;  %14154 = vmatpush3.bf16.msra.mxu0 %v15063_v0 }
 0x1bc   :  { %v331_v10 = vmax.f32 %v325_v59, 0.0  ;;  %v852_v53 = vmax.f32 %v816_v11, %v846_v43  ;;  %14207 = vmatprep.subr.bf16.mxu1 %v20930_v40  ;;  %14155 = vmatprep.subr.bf16.mxu0 %v20930_v40  ;;  %v16795_v0 = vpop.f32.mrf.mxu1  ;;  %v817_v12 = vmax.f32 %v16483_v24, %v801_v61 }
 0x1bd   :  { %v441_v20 = vpop.permute.xlu0 %440  ;;  %1516 = vrot.lane.b32.xlu1 %v16688_v31, %s15954_s29 }
 0x1be   :  { %339 = vst.msk [vmem:[#allocation2 + $0xb0] sm:$0xff] %vm333_vm3, %v331_v10  ;;  %v858_v1 = vadd.f32 %v16651_v44, %v852_v53  ;;  %14208 = vmatpush3.bf16.msra.mxu1 %v16416_v6  ;;  %v16806_v10 = vpop.f32.mrf.mxu1  ;;  %v458_v24 = vmax.f32 %v16449_v15, %v441_v20 }
 0x1bf   :  { %v296_v49 = vpop.permute.xlu1 %295  ;;  %1518 = vrot.lane.b32.xlu0 %v16712_v55, %s15954_s29  ;;  %14156 = vmatpush3.bf16.msra.mxu0 %v15064_v16 }
 0x1c0   :  { %v864_v57 = vmax.f32 %v858_v1, 0.0  ;;  %v308_v52 = vmax.f32 %v16445_v14, %v296_v49  ;;  %14305 = vmatprep.subr.bf16.mxu1 %v20930_v40  ;;  %14253 = vmatprep.subr.bf16.mxu0 %v20930_v40 }
 0x1c1   :  { %v803_v5 = vpop.permute.xlu0 %802  ;;  %1520 = vrot.lane.b32.xlu1 %v16744_v18, %s15954_s29 }
 0x1c2   :  { %871 = vst.msk [vmem:[#allocation2 + $0x48] sm:$0xff] %vm333_vm3, %v864_v57  ;;  %v314_v6 = vmax.f32 %v278_v13, %v308_v52  ;;  %v818_v59 = vmax.f32 %v16497_v28, %v803_v5  ;;  %v16817_v57 = vpop.f32.mrf.mxu1 }
 0x1c3   :  { %v831_v51 = vpop.permute.xlu1 %830  ;;  %1522 = vrot.lane.b32.xlu0 %v16772_v3, %s15954_s29 }
 0x1c4   :  { %v326_v14 = vadd.f32 %v16651_v44, %v314_v6  ;;  %v847_v8 = vmax.f32 %v16491_v26, %v831_v51 }
 0x1c5   :  { %v833_v9 = vpop.permute.xlu0 %832  ;;  %1524 = vrot.lane.b32.xlu1 %v16795_v0, %s15954_s29 }
 0x1c6   :  { %v332_v11 = vmax.f32 %v326_v14, 0.0  ;;  %v853_v43 = vmax.f32 %v817_v12, %v847_v8  ;;  %v848_v16 = vmax.f32 %v16505_v30, %v833_v9  ;;  %v16828_v14 = vpop.f32.mrf.mxu1 }
 0x1c7   :  { %v471_v53 = vpop.permute.xlu1 %470  ;;  %1544 = vrot.lane.b32.xlu0 %v16676_v2, %s15954_s29 }
 0x1c8   :  { %340 = vst.msk [vmem:[#allocation2 + $0xb8] sm:$0xff] %vm333_vm3, %v332_v11  ;;  %v859_v26 = vadd.f32 %v16651_v44, %v853_v43  ;;  %v854_v61 = vmax.f32 %v818_v59, %v848_v16  ;;  %v488_v1 = vmax.f32 %v16455_v17, %v471_v53  ;;  %v16838_v16 = vpop.f32.mrf.mxu1 }
 0x1c9   :  { %v443_v49 = vpop.permute.xlu0 %442  ;;  %1546 = vrot.lane.b32.xlu1 %v16700_v50, %s15954_s29 }
 0x1ca   :  { %v865_v28 = vmax.f32 %v859_v26, 0.0  ;;  %v860_v30 = vadd.f32 %v16651_v44, %v854_v61  ;;  %v494_v13 = vmax.f32 %v458_v24, %v488_v1  ;;  %v459_v17 = vmax.f32 %v16463_v19, %v443_v49  ;;  %v16848_v49 = vpop.f32.mrf.mxu1 }
 0x1cb   :  { %v473_v52 = vpop.permute.xlu1 %472  ;;  %1548 = vrot.lane.b32.xlu0 %v16726_v4, %s15954_s29 }
 0x1cc   :  { %872 = vst.msk [vmem:[#allocation2 + $0x50] sm:$0xff] %vm333_vm3, %v865_v28  ;;  %v866_v15 = vmax.f32 %v860_v30, 0.0  ;;  %v500_v20 = vadd.f32 %v16651_v44, %v494_v13  ;;  %v489_v5 = vmax.f32 %v16471_v21, %v473_v52  ;;  %v2695_v30 = vld [vmem:[#allocation2 + $0x10] sm:$0xff]  ;;  %v16852_v52 = vpop.f32.mrf.mxu0 }
 0x1cd   :  { %v805_v6 = vpop.permute.xlu0 %804  ;;  %1550 = vrot.lane.b32.xlu1 %v16759_v54, %s15954_s29 }
 0x1ce   :  { %873 = vst.msk [vmem:[#allocation2 + $0x58] sm:$0xff] %vm333_vm3, %v866_v15  ;;  %v506_v51 = vmax.f32 %v500_v20, 0.0  ;;  %v495_v12 = vmax.f32 %v459_v17, %v489_v5  ;;  %v819_v21 = vmax.f32 %v16513_v32, %v805_v6  ;;  %v16868_v5 = vpop.f32.mrf.mxu0 }
 0x1cf   :  { %v835_v8 = vpop.permute.xlu1 %834  ;;  %1552 = vrot.lane.b32.xlu0 %v16783_v22, %s15954_s29 }
 0x1d0   :  { %513 = vst.msk [vmem:[#allocation2 + $0x18] sm:$0xff] %vm333_vm3, %v506_v51  ;;  %v501_v19 = vadd.f32 %v16651_v44, %v495_v12  ;;  %v849_v9 = vmax.f32 %v16521_v34, %v835_v8  ;;  %v16873_v12 = vpop.f32.mrf.mxu1 }
 0x1d1   :  { %v837_v11 = vpop.permute.xlu0 %836  ;;  %1554 = vrot.lane.b32.xlu1 %v16806_v10, %s15954_s29 }
 0x1d2   :  { %v507_v59 = vmax.f32 %v501_v19, 0.0  ;;  %v855_v43 = vmax.f32 %v819_v21, %v849_v9  ;;  %v850_v32 = vmax.f32 %v16535_v38, %v837_v11 }
 0x1d3   :  { %v807_v53 = vpop.permute.xlu1 %806  ;;  %1872 = vrot.lane.b32.xlu0 %v16817_v57, %s15954_s29 }
 0x1d4   :  { %514 = vst.msk [vmem:[#allocation2 + $0x20] sm:$0xff] %vm333_vm3, %v507_v59  ;;  %v861_v24 = vadd.f32 %v16651_v44, %v855_v43  ;;  %v820_v34 = vmax.f32 %v16527_v36, %v807_v53  ;;  %v16881_v59 = vpop.f32.mrf.mxu0 }
 0x1d5   :  { %v809_v26 = vpop.permute.xlu0 %808  ;;  %1874 = vrot.lane.b32.xlu1 %v16838_v16, %s15954_s29 }
 0x1d6   :  { %v867_v61 = vmax.f32 %v861_v24, 0.0  ;;  %v856_v1 = vmax.f32 %v820_v34, %v850_v32  ;;  %v2698_v24 = vld [vmem:[#allocation2 + $0x28] sm:$0xff] }
 0x1d7   :  { %v620_v28 = vpop.permute.xlu1 %619  ;;  %1902 = vrot.lane.b32.xlu0 %v16828_v14, %s15954_s29  ;;  %v2696_v13 = vld [vmem:[#allocation2 + $0x18] sm:$0xff] }
 0x1d8   :  { %875 = vst.msk [vmem:[#allocation2 + $0xf0] sm:$0xff] %vm333_vm3, %v867_v61  ;;  %v862_v36 = vadd.f32 %v16651_v44, %v856_v1  ;;  %v16856_v38 = vpack.c.bf16 %v2696_v13, %v2695_v30  ;;  %v637_v6 = vmax.f32 %v16477_v23, %v620_v28  ;;  %v16883_v23 = vpop.f32.mrf.mxu1  ;;  %v20932_v61 = vld [vmem:[#allocation35_spill] sm:$0xff] }
 0x1d9   :  { %v622_v15 = vpop.permute.xlu0 %621  ;;  %1904 = vrot.lane.b32.xlu1 %v16848_v49, %s15954_s29 }
 0x1da   :  { %v868_v20 = vmax.f32 %v862_v36, 0.0  ;;  %14058 = vmatmul.mubr.msk.bf16.gmra.mxu0 %vm333_vm3, %v16856_v38  ;;  %14110 = vmatmul.mubr.msk.bf16.gmra.mxu1 %vm333_vm3, %v16856_v38  ;;  %v638_v21 = vmax.f32 %v16493_v27, %v622_v15  ;;  %v16899_v13 = vpop.f32.mrf.mxu1 }
 0x1db   :  { %v650_v17 = vpop.permute.xlu1 %649  ;;  %1341 = vrot.lane.b32.xlu0 %v16852_v52, %s15954_s29  ;;  %14061 = vmatprep.mubr.msk.bf16.mxu0 %vm15960_vm2, %v20930_v40  ;;  %v2697_v19 = vld [vmem:[#allocation2 + $0x20] sm:$0xff] }
 0x1dc   :  { %876 = vst.msk [vmem:[#allocation2 + $0xf8] sm:$0xff] %vm333_vm3, %v868_v20  ;;  %v667_v51 = vmax.f32 %v16485_v25, %v650_v17  ;;  %14113 = vmatprep.mubr.msk.bf16.mxu1 %vm15960_vm2, %v20930_v40  ;;  %v20931_v25 = vld [vmem:[#allocation32_spill] sm:$0xff]  ;;  %v16890_v27 = vpack.c.bf16 %v2698_v24, %v2697_v19  ;;  %v20934_v17 = vld [vmem:[#allocation38_spill] sm:$0xff]  ;;  %v16909_v19 = vpop.f32.mrf.mxu0 }
 0x1dd   :  { %v652_v8 = vpop.permute.xlu0 %651  ;;  %1371 = vrot.lane.b32.xlu1 %v16868_v5, %s15954_s29  ;;  %v821_v43 = vmax.f32 %v20931_v25, %v809_v26  ;;  %20933 = vst [vmem:[#allocation32_spill] sm:$0xff] %v16899_v13 }
 0x1de   :  { %v673_v9 = vmax.f32 %v637_v6, %v667_v51  ;;  %v668_v11 = vmax.f32 %v16501_v29, %v652_v8  ;;  %v20935_v51 = vld [vmem:[#allocation36_spill] sm:$0xff] }
 0x1df   :  { %v839_v53 = vpop.permute.xlu1 %838  ;;  %1876 = vrot.lane.b32.xlu0 %v16873_v12, %s15954_s29 }
 0x1e0   :  { %v679_v32 = vadd.f32 %v16651_v44, %v673_v9  ;;  %v674_v34 = vmax.f32 %v638_v21, %v668_v11  ;;  %v851_v1 = vmax.f32 %v20932_v61, %v839_v53  ;;  %v16911_v21 = vpop.f32.mrf.mxu1 }
 0x1e1   :  { %v1187_v28 = vpop.permute.xlu0 %1186  ;;  %1343 = vrot.lane.b32.xlu1 %v16881_v59, %s15954_s29  ;;  %20936 = vst [vmem:[#allocation35_spill] sm:$0xff] %v16911_v21 }
 0x1e2   :  { %v685_v29 = vmax.f32 %v679_v32, 0.0  ;;  %v680_v30 = vadd.f32 %v16651_v44, %v674_v34  ;;  %v857_v26 = vmax.f32 %v821_v43, %v851_v1  ;;  %14062 = vmatmul.mubr.msk.bf16.gmra.mxu0 %vm333_vm3, %v16890_v27  ;;  %14114 = vmatmul.mubr.msk.bf16.gmra.mxu1 %vm333_vm3, %v16890_v27  ;;  %v1204_v6 = vmax.f32 %v20934_v17, %v1187_v28  ;;  %v16918_v43 = vpop.f32.mrf.mxu0  ;;  %v16920_v53 = vpop.f32.mrf.mxu1  ;;  %v20939_v34 = vld [vmem:[#allocation28_spill] sm:$0xff]  ;;  %v20940_v1 = vld [vmem:[#allocation27_spill] sm:$0xff] }
 0x1e3   :  { %v1157_v36 = vpop.permute.xlu1 %1156  ;;  %1906 = vrot.lane.b32.xlu0 %v16883_v23, %s15954_s29  ;;  %14065 = vmatprep.mubr.msk.bf16.mxu0 %vm15960_vm2, %v20930_v40  ;;  %20937 = vst [vmem:[#allocation38_spill] sm:$0xff] %v16918_v43  ;;  %20938 = vst [vmem:[#allocation36_spill] sm:$0xff] %v16920_v53 }
 0x1e4   :  { %692 = vst.msk [vmem:[#allocation2 + $0x30] sm:$0xff] %vm333_vm3, %v685_v29  ;;  %v686_v15 = vmax.f32 %v680_v30, 0.0  ;;  %v863_v20 = vadd.f32 %v16651_v44, %v857_v26  ;;  %v1174_v8 = vmax.f32 %v20935_v51, %v1157_v36  ;;  %14117 = vmatprep.mubr.msk.bf16.mxu1 %vm15960_vm2, %v20930_v40  ;;  %v16930_v36 = vpop.f32.mrf.mxu0 }
 0x1e5   :  { %v654_v9 = vpop.permute.xlu0 %653  ;;  %1878 = vrot.lane.b32.xlu1 %v16899_v13, %s15954_s29  ;;  %20941 = vst [vmem:[#allocation28_spill] sm:$0xff] %v16930_v36 }
 0x1e6   :  { %693 = vst.msk [vmem:[#allocation2 + $0x38] sm:$0xff] %vm333_vm3, %v686_v15  ;;  %v869_v11 = vmax.f32 %v863_v20, 0.0  ;;  %v1210_v25 = vmax.f32 %v1174_v8, %v1204_v6  ;;  %v669_v61 = vmax.f32 %v20939_v34, %v654_v9  ;;  %v16932_v15 = vpop.f32.mrf.mxu1  ;;  %v20945_v34 = vld [vmem:[#allocation41_spill] sm:$0xff] }
 0x1e7   :  { %v624_v24 = vpop.permute.xlu1 %623  ;;  %1373 = vrot.lane.b32.xlu0 %v16909_v19, %s15954_s29  ;;  %20942 = vst [vmem:[#allocation27_spill] sm:$0xff] %v16932_v15 }
 0x1e8   :  { %877 = vst.msk [vmem:[#allocation2 + $0x100] sm:$0xff] %vm333_vm3, %v869_v11  ;;  %v1216_v32 = vadd.f32 %v16651_v44, %v1210_v25  ;;  %v639_v28 = vmax.f32 %v20940_v1, %v624_v24  ;;  %v16940_v11 = vpop.f32.mrf.mxu1  ;;  %v16944_v24 = vpop.f32.mrf.mxu0  ;;  %v20946_v1 = vld [vmem:[#allocation43_spill] sm:$0xff] }
 0x1e9   :  { %v626_v29 = vpop.permute.xlu0 %625  ;;  %1908 = vrot.lane.b32.xlu1 %v16911_v21, %s15954_s29  ;;  %20943 = vst [vmem:[#allocation53_spill] sm:$0xff] %v16940_v11  ;;  %20944 = vst [vmem:[#allocation54_spill] sm:$0xff] %v16944_v24 }
 0x1ea   :  { %v1222_v30 = vmax.f32 %v1216_v32, 0.0  ;;  %v675_v26 = vmax.f32 %v639_v28, %v669_v61 }
 0x1eb   :  { %v1159_v20 = vpop.permute.xlu1 %1158  ;;  %1345 = vrot.lane.b32.xlu0 %v16918_v43, %s15954_s29  ;;  %v2699_v51 = vld [vmem:[#allocation2 + $0x30] sm:$0xff] }
 0x1ec   :  { %1229 = vst.msk [vmem:[#allocation2 + $0x78] sm:$0xff] %vm333_vm3, %v1222_v30  ;;  %v681_v17 = vadd.f32 %v16651_v44, %v675_v26  ;;  %v1175_v61 = vmax.f32 %v20945_v34, %v1159_v20  ;;  %v20947_v26 = vld [vmem:[#allocation44_spill] sm:$0xff] }
 0x1ed   :  { %v1161_v6 = vpop.permute.xlu0 %1160  ;;  %1375 = vrot.lane.b32.xlu1 %v16930_v36, %s15954_s29  ;;  %v2700_v8 = vld [vmem:[#allocation2 + $0x38] sm:$0xff] }
 0x1ee   :  { %v687_v9 = vmax.f32 %v681_v17, 0.0  ;;  %v16942_v25 = vpack.c.bf16 %v2700_v8, %v2699_v51  ;;  %v1176_v17 = vmax.f32 %v20947_v26, %v1161_v6  ;;  %v20948_v8 = vld [vmem:[#allocation46_spill] sm:$0xff] }
 0x1ef   :  { %v1189_v32 = vpop.permute.xlu1 %1188  ;;  %1880 = vrot.lane.b32.xlu0 %v16920_v53, %s15954_s29  ;;  %v20952_v6 = vld [vmem:[#allocation30_spill] sm:$0xff] }
 0x1f0   :  { %694 = vst.msk [vmem:[#allocation2 + $0x40] sm:$0xff] %vm333_vm3, %v687_v9  ;;  %v1205_v28 = vmax.f32 %v20946_v1, %v1189_v32  ;;  %14066 = vmatmul.mubr.msk.bf16.gmra.mxu0 %vm333_vm3, %v16942_v25  ;;  %14118 = vmatmul.mubr.msk.bf16.gmra.mxu1 %vm333_vm3, %v16942_v25  ;;  %v16961_v9 = vpop.f32.mrf.mxu1  ;;  %v16963_v32 = vpop.f32.mrf.mxu0  ;;  %v20951_v1 = vld [vmem:[#allocation29_spill] sm:$0xff] }
 0x1f1   :  { %v1191_v30 = vpop.permute.xlu0 %1190  ;;  %1882 = vrot.lane.b32.xlu1 %v16940_v11, %s15954_s29  ;;  %14069 = vmatprep.mubr.msk.bf16.mxu0 %vm15960_vm2, %v20930_v40  ;;  %20949 = vst [vmem:[#allocation41_spill] sm:$0xff] %v16961_v9  ;;  %20950 = vst [vmem:[#allocation43_spill] sm:$0xff] %v16963_v32  ;;  %v640_v11 = vmax.f32 %v20951_v1, %v626_v29 }
 0x1f2   :  { %v1211_v51 = vmax.f32 %v1175_v61, %v1205_v28  ;;  %v1206_v20 = vmax.f32 %v20948_v8, %v1191_v30  ;;  %14121 = vmatprep.mubr.msk.bf16.mxu1 %vm15960_vm2, %v20930_v40  ;;  %v16977_v43 = vpop.f32.mrf.mxu0  ;;  %v16979_v21 = vpop.f32.mrf.mxu1 }
 0x1f3   :  { %v656_v34 = vpop.permute.xlu1 %655  ;;  %1910 = vrot.lane.b32.xlu0 %v16932_v15, %s15954_s29  ;;  %20953 = vst [vmem:[#allocation44_spill] sm:$0xff] %v16977_v43  ;;  %20954 = vst [vmem:[#allocation46_spill] sm:$0xff] %v16979_v21 }
 0x1f4   :  { %v1217_v53 = vadd.f32 %v16651_v44, %v1211_v51  ;;  %v1212_v36 = vmax.f32 %v1176_v17, %v1206_v20  ;;  %v670_v61 = vmax.f32 %v20952_v6, %v656_v34  ;;  %v2702_v17 = vld [vmem:[#allocation2 + $0x48] sm:$0xff] }
 0x1f5   :  { %v16972_v28 = vpop.permute.xlu0 %1162  ;;  %1912 = vrot.lane.b32.xlu1 %v16961_v9, %s15954_s29  ;;  %v20957_v6 = vld [vmem:[#allocation33_spill] sm:$0xff] }
 0x1f6   :  { %v1223_v30 = vmax.f32 %v1217_v53, 0.0  ;;  %v1218_v26 = vadd.f32 %v16651_v44, %v1212_v36  ;;  %v676_v8 = vmax.f32 %v640_v11, %v670_v61  ;;  %v20956_v11 = vld [vmem:[#allocation31_spill] sm:$0xff] }
 0x1f7   :  { %v628_v15 = vpop.permute.xlu1 %627  ;;  %1693 = vrot.lane.b32.xlu0 %v16944_v24, %s15954_s29  ;;  %v2701_v29 = vld [vmem:[#allocation2 + $0x40] sm:$0xff] }
 0x1f8   :  { %1230 = vst.msk [vmem:[#allocation2 + $0x80] sm:$0xff] %vm333_vm3, %v1223_v30  ;;  %v1224_v51 = vmax.f32 %v1218_v26, 0.0  ;;  %v682_v20 = vadd.f32 %v16651_v44, %v676_v8  ;;  %v16985_v34 = vpack.c.bf16 %v2702_v17, %v2701_v29  ;;  %v641_v1 = vmax.f32 %v20956_v11, %v628_v15  ;;  %v16996_v30 = vpop.f32.mrf.mxu0  ;;  %v16998_v26 = vpop.f32.mrf.mxu1  ;;  %v2704_v17 = vld [vmem:[#allocation2 + $0x58] sm:$0xff] }
 0x1f9   :  { %v658_v53 = vpop.permute.xlu0 %657  ;;  %1695 = vrot.lane.b32.xlu1 %v16977_v43, %s15954_s29  ;;  %20958 = vst [vmem:[#allocation30_spill] sm:$0xff] %v16996_v30  ;;  %20959 = vst [vmem:[#allocation31_spill] sm:$0xff] %v16998_v26  ;;  %v20962_v43 = vld [vmem:[#allocation37_spill] sm:$0xff] }
 0x1fa   :  { %20955 = vst [vmem:[#allocation29_spill] sm:$0xff] %v16985_v34  ;;  %1231 = vst.msk [vmem:[#allocation2 + $0x88] sm:$0xff] %vm333_vm3, %v1224_v51  ;;  %v688_v36 = vmax.f32 %v682_v20, 0.0  ;;  %v671_v61 = vmax.f32 %v20957_v6, %v658_v53  ;;  %14070 = vmatmul.mubr.msk.bf16.gmra.mxu0 %vm333_vm3, %v16985_v34  ;;  %14122 = vmatmul.mubr.msk.bf16.gmra.mxu1 %vm333_vm3, %v16985_v34  ;;  %v17012_v20 = vpop.f32.mrf.mxu1  ;;  %v17014_v53 = vpop.f32.mrf.mxu0  ;;  %v20961_v6 = vld [vmem:[#allocation34_spill] sm:$0xff]  ;;  %v20970_v34 = vld [vmem:[#allocation40_spill] sm:$0xff] }
 0x1fb   :  { %v17000_v8 = vpop.permute.xlu1 %1164  ;;  %1723 = vrot.lane.b32.xlu0 %v16963_v32, %s15954_s29  ;;  %14073 = vmatprep.mubr.msk.bf16.mxu0 %vm15960_vm2, %v20930_v40  ;;  %20960 = vst [vmem:[#allocation33_spill] sm:$0xff] %v17012_v20 }
 0x1fc   :  { %696 = vst.msk [vmem:[#allocation2 + $0xd8] sm:$0xff] %vm333_vm3, %v688_v36  ;;  %v677_v15 = vmax.f32 %v641_v1, %v671_v61  ;;  %14125 = vmatprep.mubr.msk.bf16.mxu1 %vm15960_vm2, %v20930_v40  ;;  %v2703_v36 = vld [vmem:[#allocation2 + $0x50] sm:$0xff] }
 0x1fd   :  { %v630_v29 = vpop.permute.xlu0 %629  ;;  %1725 = vrot.lane.b32.xlu1 %v16996_v30, %s15954_s29  ;;  %v17020_v24 = vpack.c.bf16 %v2704_v17, %v2703_v36  ;;  %v20966_v36 = vld [vmem:[#allocation42_spill] sm:$0xff] }
 0x1fe   :  { %v683_v51 = vadd.f32 %v16651_v44, %v677_v15  ;;  %v642_v61 = vmax.f32 %v20961_v6, %v630_v29  ;;  %v17031_v29 = vpop.f32.mrf.mxu0  ;;  %v20967_v6 = vld [vmem:[#allocation45_spill] sm:$0xff] }
 0x1ff   :  { %v660_v11 = vpop.permute.xlu1 %659  ;;  %2230 = vrot.lane.b32.xlu0 %v16979_v21, %s15954_s29  ;;  %20963 = vst [vmem:[#allocation34_spill] sm:$0xff] %v17020_v24  ;;  %20965 = vst [vmem:[#allocation55_spill] sm:$0xff] %v17031_v29 }
 0x200   :  { %v689_v1 = vmax.f32 %v683_v51, 0.0  ;;  %v672_v32 = vmax.f32 %v20962_v43, %v660_v11  ;;  %v17029_v51 = vpop.f32.mrf.mxu1 }
 0x201   :  { %v980_v30 = vpop.permute.xlu0 %979  ;;  %2232 = vrot.lane.b32.xlu1 %v17012_v20, %s15954_s29  ;;  %20964 = vst [vmem:[#allocation37_spill] sm:$0xff] %v17029_v51  ;;  %v17044_v20 = vpop.f32.mrf.mxu0 }
 0x202   :  { %697 = vst.msk [vmem:[#allocation2 + $0xe0] sm:$0xff] %vm333_vm3, %v689_v1  ;;  %v678_v15 = vmax.f32 %v642_v61, %v672_v32  ;;  %14074 = vmatmul.mubr.msk.bf16.gmra.mxu0 %vm333_vm3, %v17020_v24  ;;  %14126 = vmatmul.mubr.msk.bf16.gmra.mxu1 %vm333_vm3, %v17020_v24  ;;  %v996_v1 = vmax.f32 %v20966_v36, %v980_v30  ;;  %20968 = vst [vmem:[#allocation42_spill] sm:$0xff] %v17044_v20 }
 0x203   :  { %v978_v43 = vpop.permute.xlu1 %977  ;;  %2260 = vrot.lane.b32.xlu0 %v16998_v26, %s15954_s29  ;;  %14077 = vmatprep.mubr.msk.bf16.mxu0 %vm15960_vm2, %v20930_v40  ;;  %v17046_v26 = vpop.f32.mrf.mxu1 }
 0x204   :  { %v684_v17 = vadd.f32 %v16651_v44, %v678_v15  ;;  %14129 = vmatprep.mubr.msk.bf16.mxu1 %vm15960_vm2, %v20930_v40  ;;  %v20969_v15 = vld [vmem:[#allocation39_spill] sm:$0xff]  ;;  %v17056_v36 = vpop.f32.mrf.mxu0 }
 0x205   :  { %v1010_v32 = vpop.permute.xlu0 %1009  ;;  %2262 = vrot.lane.b32.xlu1 %v17029_v51, %s15954_s29  ;;  %v995_v24 = vmax.f32 %v20969_v15, %v978_v43 }
 0x206   :  { %v690_v11 = vmax.f32 %v684_v17, 0.0  ;;  %v1026_v61 = vmax.f32 %v20967_v6, %v1010_v32  ;;  %v17058_v6 = vpop.f32.mrf.mxu1 }
 0x207   :  { %v1008_v21 = vpop.permute.xlu1 %1007  ;;  %1697 = vrot.lane.b32.xlu0 %v17014_v53, %s15954_s29 }
 0x208   :  { %698 = vst.msk [vmem:[#allocation2 + $0xe8] sm:$0xff] %vm333_vm3, %v690_v11  ;;  %v1032_v9 = vmax.f32 %v996_v1, %v1026_v61  ;;  %v1025_v51 = vmax.f32 %v20970_v34, %v1008_v21  ;;  %v20971_v1 = vld [vmem:[#allocation49_spill] sm:$0xff]  ;;  %v20972_v34 = vld [vmem:[#allocation47_spill] sm:$0xff] }
 0x209   :  { %v1012_v17 = vpop.permute.xlu0 %1011  ;;  %1699 = vrot.lane.b32.xlu1 %v17044_v20, %s15954_s29  ;;  %v17070_v20 = vpop.f32.mrf.mxu0 }
 0x20a   :  { %v1038_v30 = vadd.f32 %v16651_v44, %v1032_v9  ;;  %v1031_v32 = vmax.f32 %v995_v24, %v1025_v51  ;;  %v1027_v21 = vmax.f32 %v20971_v1, %v1012_v17  ;;  %v17068_v51 = vpop.f32.mrf.mxu1  ;;  %20973 = vst [vmem:[#allocation45_spill] sm:$0xff] %v17070_v20 }
 0x20b   :  { %v982_v13 = vpop.permute.xlu1 %981  ;;  %1727 = vrot.lane.b32.xlu0 %v17031_v29, %s15954_s29 }
 0x20c   :  { %v1044_v11 = vmax.f32 %v1038_v30, 0.0  ;;  %v1037_v43 = vadd.f32 %v16651_v44, %v1031_v32  ;;  %v997_v61 = vmax.f32 %v20972_v34, %v982_v13  ;;  %v17080_v1 = vpop.f32.mrf.mxu1 }
 0x20d   :  { %v984_v15 = vpop.permute.xlu0 %983  ;;  %1729 = vrot.lane.b32.xlu1 %v17056_v36, %s15954_s29  ;;  %20974 = vst [vmem:[#allocation39_spill] sm:$0xff] %v17080_v1 }
 0x20e   :  { %1051 = vst.msk [vmem:[#allocation2 + $0x68] sm:$0xff] %vm333_vm3, %v1044_v11  ;;  %v1043_v24 = vmax.f32 %v1037_v43, 0.0  ;;  %v1033_v9 = vmax.f32 %v997_v61, %v1027_v21  ;;  %v998_v17 = vmax.f32 %v16617_v58, %v984_v15  ;;  %v17082_v21 = vpop.f32.mrf.mxu0 }
 0x20f   :  { %v1014_v29 = vpop.permute.xlu1 %1013  ;;  %2234 = vrot.lane.b32.xlu0 %v17046_v26, %s15954_s29  ;;  %20975 = vst [vmem:[#allocation40_spill] sm:$0xff] %v17082_v21 }
 0x210   :  { %1050 = vst.msk [vmem:[#allocation2 + $0x60] sm:$0xff] %vm333_vm3, %v1043_v24  ;;  %v1039_v13 = vadd.f32 %v16651_v44, %v1033_v9  ;;  %v1028_v30 = vmax.f32 %v16625_v37, %v1014_v29  ;;  %v17092_v9 = vpop.f32.mrf.mxu0 }
 0x211   :  { %v1016_v32 = vpop.permute.xlu0 %1015  ;;  %2236 = vrot.lane.b32.xlu1 %v17068_v51, %s15954_s29  ;;  %20976 = vst [vmem:[#allocation49_spill] sm:$0xff] %v17092_v9 }
 0x212   :  { %v1045_v11 = vmax.f32 %v1039_v13, 0.0  ;;  %v1034_v43 = vmax.f32 %v998_v17, %v1028_v30  ;;  %v1029_v37 = vmax.f32 %v16639_v7, %v1016_v32  ;;  %v17094_v13 = vpop.f32.mrf.mxu1 }
 0x213   :  { %v986_v34 = vpop.permute.xlu1 %985  ;;  %2264 = vrot.lane.b32.xlu0 %v17058_v6, %s15954_s29 }
 0x214   :  { %1052 = vst.msk [vmem:[#allocation2 + $0x70] sm:$0xff] %vm333_vm3, %v1045_v11  ;;  %v1040_v58 = vadd.f32 %v16651_v44, %v1034_v43  ;;  %v999_v29 = vmax.f32 %v16631_v56, %v986_v34  ;;  %v17104_v34 = vpop.f32.mrf.mxu0 }
 0x215   :  { %v988_v61 = vpop.permute.xlu0 %987  ;;  %2266 = vrot.lane.b32.xlu1 %v17080_v1, %s15954_s29  ;;  %v2706_v11 = vld [vmem:[#allocation2 + $0x68] sm:$0xff]  ;;  %20977 = vst [vmem:[#allocation47_spill] sm:$0xff] %v17104_v34 }
 0x216   :  { %v1046_v15 = vmax.f32 %v1040_v58, 0.0  ;;  %v1035_v24 = vmax.f32 %v999_v29, %v1029_v37  ;;  %v1000_v7 = vmax.f32 %v16649_v33, %v988_v61  ;;  %v17114_v33 = vpop.f32.mrf.mxu0 }
 0x217   :  { %v1018_v17 = vpop.permute.xlu1 %1017  ;;  %1701 = vrot.lane.b32.xlu0 %v17070_v20, %s15954_s29  ;;  %v2705_v30 = vld [vmem:[#allocation2 + $0x60] sm:$0xff]  ;;  %20979 = vst [vmem:[#allocation57_spill] sm:$0xff] %v17114_v33 }
 0x218   :  { %1054 = vst.msk [vmem:[#allocation2 + $0x108] sm:$0xff] %vm333_vm3, %v1046_v15  ;;  %v1041_v56 = vadd.f32 %v16651_v44, %v1035_v24  ;;  %v1030_v32 = vmax.f32 %v16662_v41, %v1018_v17  ;;  %v17102_v43 = vpack.c.bf16 %v2706_v11, %v2705_v30  ;;  %v17112_v15 = vpop.f32.mrf.mxu1 }
 0x219   :  { %v1338_v58 = vpop.permute.xlu0 %1337  ;;  %1703 = vrot.lane.b32.xlu1 %v17092_v9, %s15954_s29  ;;  %20978 = vst [vmem:[#allocation56_spill] sm:$0xff] %v17112_v15  ;;  %v17130_v9 = vpop.f32.mrf.mxu0 }
 0x21a   :  { %v1047_v37 = vmax.f32 %v1041_v56, 0.0  ;;  %v1036_v29 = vmax.f32 %v1000_v7, %v1030_v32  ;;  %14078 = vmatmul.mubr.msk.bf16.gmra.mxu0 %vm333_vm3, %v17102_v43  ;;  %14130 = vmatmul.mubr.msk.bf16.gmra.mxu1 %vm333_vm3, %v17102_v43  ;;  %v1354_v11 = vmax.f32 %v16697_v48, %v1338_v58  ;;  %v20980_v56 = vld [vmem:[#allocation52_spill] sm:$0xff]  ;;  %v17128_v32 = vpop.f32.mrf.mxu1 }
 0x21b   :  { %v1336_v41 = vpop.permute.xlu1 %1335  ;;  %1731 = vrot.lane.b32.xlu0 %v17082_v21, %s15954_s29  ;;  %14081 = vmatprep.mubr.msk.bf16.mxu0 %vm15960_vm2, %v20930_v40  ;;  %v2707_v17 = vld [vmem:[#allocation2 + $0x70] sm:$0xff]  ;;  %20981 = vst [vmem:[#allocation52_spill] sm:$0xff] %v17128_v32 }
 0x21c   :  { %1055 = vst.msk [vmem:[#allocation2 + $0x110] sm:$0xff] %vm333_vm3, %v1047_v37  ;;  %v1042_v61 = vadd.f32 %v16651_v44, %v1036_v29  ;;  %14133 = vmatprep.mubr.msk.bf16.mxu1 %vm15960_vm2, %v20930_v40  ;;  %v2708_v29 = vld [vmem:[#allocation2 + $0x78] sm:$0xff] }
 0x21d   :  { %v1368_v24 = vpop.permute.xlu0 %1367  ;;  %1733 = vrot.lane.b32.xlu1 %v17104_v34, %s15954_s29  ;;  %v20982_v21 = vld [vmem:[#allocation51_spill] sm:$0xff]  ;;  %v17137_v1 = vpack.c.bf16 %v2708_v29, %v2707_v17 }
 0x21e   :  { %v1048_v30 = vmax.f32 %v1042_v61, 0.0  ;;  %v1384_v7 = vmax.f32 %v20980_v56, %v1368_v24  ;;  %v1353_v20 = vmax.f32 %v20982_v21, %v1336_v41  ;;  %v17148_v21 = vpop.f32.mrf.mxu0 }
 0x21f   :  { %v1366_v37 = vpop.permute.xlu1 %1365  ;;  %2238 = vrot.lane.b32.xlu0 %v17094_v13, %s15954_s29 }
 0x220   :  { %1056 = vst.msk [vmem:[#allocation2 + $0x118] sm:$0xff] %vm333_vm3, %v1048_v30  ;;  %v1390_v34 = vmax.f32 %v1354_v11, %v1384_v7  ;;  %v1383_v61 = vmax.f32 %v16685_v35, %v1366_v37  ;;  %v17146_v30 = vpop.f32.mrf.mxu1  ;;  %v17160_v56 = vpop.f32.mrf.mxu0  ;;  %v2710_v37 = vld [vmem:[#allocation2 + $0x88] sm:$0xff] }
 0x221   :  { %v1167_v48 = vpop.permute.xlu0 %1166  ;;  %2240 = vrot.lane.b32.xlu1 %v17128_v32, %s15954_s29  ;;  %20983 = vst [vmem:[#allocation51_spill] sm:$0xff] %v17146_v30 }
 0x222   :  { %v1396_v58 = vadd.f32 %v16651_v44, %v1390_v34  ;;  %v1389_v24 = vmax.f32 %v1353_v20, %v1383_v61  ;;  %14082 = vmatmul.mubr.msk.bf16.gmra.mxu0 %vm333_vm3, %v17137_v1  ;;  %14134 = vmatmul.mubr.msk.bf16.gmra.mxu1 %vm333_vm3, %v17137_v1  ;;  %v20984_v34 = vld [vmem:[#allocation48_spill] sm:$0xff] }
 0x223   :  { %v1193_v35 = vpop.permute.xlu1 %1192  ;;  %2268 = vrot.lane.b32.xlu0 %v17112_v15, %s15954_s29  ;;  %14085 = vmatprep.mubr.msk.bf16.mxu0 %vm15960_vm2, %v20930_v40  ;;  %v1177_v20 = vmax.f32 %v20984_v34, %v16972_v28  ;;  %v17165_v28 = vpop.f32.mrf.mxu1 }
 0x224   :  { %v1402_v41 = vmax.f32 %v1396_v58, 0.0  ;;  %v1395_v17 = vadd.f32 %v16651_v44, %v1389_v24  ;;  %v1207_v11 = vmax.f32 %v16615_v60, %v1193_v35  ;;  %14137 = vmatprep.mubr.msk.bf16.mxu1 %vm15960_vm2, %v20930_v40  ;;  %20985 = vst [vmem:[#allocation48_spill] sm:$0xff] %v17165_v28  ;;  %v17167_v58 = vpop.f32.mrf.mxu0  ;;  %v2709_v60 = vld [vmem:[#allocation2 + $0x80] sm:$0xff] }
 0x225   :  { %v1370_v7 = vpop.permute.xlu0 %1369  ;;  %2270 = vrot.lane.b32.xlu1 %v17146_v30, %s15954_s29  ;;  %20986 = vst [vmem:[#allocation58_spill] sm:$0xff] %v17167_v58 }
 0x226   :  { %1409 = vst.msk [vmem:[#allocation2 + $0x98] sm:$0xff] %vm333_vm3, %v1402_v41  ;;  %v1401_v29 = vmax.f32 %v1395_v17, 0.0  ;;  %v1213_v61 = vmax.f32 %v1177_v20, %v1207_v11  ;;  %v1385_v34 = vmax.f32 %v16742_v62, %v1370_v7  ;;  %v17175_v41 = vpack.c.bf16 %v2710_v37, %v2709_v60  ;;  %v20987_v17 = vld [vmem:[#allocation50_spill] sm:$0xff] }
 0x227   :  { %v1340_v24 = vpop.permute.xlu1 %1339  ;;  %2051 = vrot.lane.b32.xlu0 %v17114_v33, %s15954_s29  ;;  %v1178_v11 = vmax.f32 %v20987_v17, %v17000_v8  ;;  %v1179_v8 = vmax.f32 %v16643_v42, %v1167_v48 }
 0x228   :  { %1408 = vst.msk [vmem:[#allocation2 + $0x90] sm:$0xff] %vm333_vm3, %v1401_v29  ;;  %v1219_v35 = vadd.f32 %v16651_v44, %v1213_v61  ;;  %v1355_v30 = vmax.f32 %v16722_v47, %v1340_v24  ;;  %v17186_v44 = vpop.f32.mrf.mxu1  ;;  %v17188_v47 = vpop.f32.mrf.mxu0 }
 0x229   :  { %v1195_v20 = vpop.permute.xlu0 %1194  ;;  %2053 = vrot.lane.b32.xlu1 %v17148_v21, %s15954_s29  ;;  %20988 = vst [vmem:[#allocation50_spill] sm:$0xff] %v17186_v44  ;;  %20989 = vst [vmem:[#allocation59_spill] sm:$0xff] %v17188_v47 }
 0x22a   :  { %v1225_v32 = vmax.f32 %v1219_v35, 0.0  ;;  %v1391_v33 = vmax.f32 %v1355_v30, %v1385_v34  ;;  %v1208_v15 = vmax.f32 %v16635_v39, %v1195_v20  ;;  %14086 = vmatmul.mubr.msk.bf16.gmra.mxu0 %vm333_vm3, %v17175_v41  ;;  %14138 = vmatmul.mubr.msk.bf16.gmra.mxu1 %vm333_vm3, %v17175_v41  ;;  %v17196_v39 = vld [vmem:[#allocation8] ss:$0 sm:$0xff]  ;;  %v17205_v48 = vpop.f32.mrf.mxu1 }
 0x22b   :  { %v1197_v62 = vpop.permute.xlu1 %1196  ;;  %2081 = vrot.lane.b32.xlu0 %v17130_v9, %s15954_s29  ;;  %14089 = vmatprep.mubr.msk.bf16.mxu0 %vm15960_vm2, %v20930_v40  ;;  %20990 = vst [vmem:[#allocation60_spill] sm:$0xff] %v17205_v48 }
 0x22c   :  { %1233 = vst.msk [vmem:[#allocation2 + $0x120] sm:$0xff] %vm333_vm3, %v1225_v32  ;;  %v1397_v30 = vadd.f32 %v17196_v39, %v1391_v33  ;;  %v1214_v7 = vmax.f32 %v1178_v11, %v1208_v15  ;;  %v1209_v37 = vmax.f32 %v16655_v46, %v1197_v62  ;;  %14141 = vmatprep.mubr.msk.bf16.mxu1 %vm15960_vm2, %v20930_v40  ;;  %v17207_v32 = vpop.f32.mrf.mxu0  ;;  %v17224_v62 = vpop.f32.mrf.mxu1 }
 0x22d   :  { %v1515_v29 = vpop.permute.xlu0 %1514  ;;  %2083 = vrot.lane.b32.xlu1 %v17160_v56, %s15954_s29  ;;  %20991 = vst [vmem:[#allocation61_spill] sm:$0xff] %v17207_v32  ;;  %v2712_v15 = vld [vmem:[#allocation2 + $0x98] sm:$0xff]  ;;  %20993 = vst [vmem:[#allocation63_spill] sm:$0xff] %v17224_v62 }
 0x22e   :  { %v1403_v61 = vmax.f32 %v1397_v30, 0.0  ;;  %v1220_v24 = vadd.f32 %v17196_v39, %v1214_v7  ;;  %v1215_v42 = vmax.f32 %v1179_v8, %v1209_v37  ;;  %v17215_v20 = vpop.f32.mrf.mxu0  ;;  %v17239_v37 = vpop.f32.mrf.mxu1 }
 0x22f   :  { %v1517_v60 = vpop.permute.xlu1 %1516  ;;  %2588 = vrot.lane.b32.xlu0 %v17165_v28, %s15954_s29  ;;  %v2711_v46 = vld [vmem:[#allocation2 + $0x90] sm:$0xff]  ;;  %20992 = vst [vmem:[#allocation62_spill] sm:$0xff] %v17215_v20 }
 0x230   :  { %1410 = vst.msk [vmem:[#allocation2 + $0xa0] sm:$0xff] %vm333_vm3, %v1403_v61  ;;  %v1226_v33 = vmax.f32 %v1220_v24, 0.0  ;;  %v1221_v35 = vadd.f32 %v17196_v39, %v1215_v42  ;;  %v17213_v34 = vpack.c.bf16 %v2712_v15, %v2711_v46  ;;  %v17226_v8 = vpop.f32.mrf.mxu0 }
 0x231   :  { %v1519_v17 = vpop.permute.xlu0 %1518  ;;  %2590 = vrot.lane.b32.xlu1 %v17205_v48, %s15954_s29 }
 0x232   :  { %1234 = vst.msk [vmem:[#allocation2 + $0x128] sm:$0xff] %vm333_vm3, %v1226_v33  ;;  %v1227_v11 = vmax.f32 %v1221_v35, 0.0  ;;  %14090 = vmatmul.mubr.msk.bf16.gmra.mxu0 %vm333_vm3, %v17213_v34  ;;  %14142 = vmatmul.mubr.msk.bf16.gmra.mxu1 %vm333_vm3, %v17213_v34  ;;  %v17241_v61 = vpop.f32.mrf.mxu0  ;;  %v1532_v33 = vmax.f32 %v16664_v45, %v1515_v29  ;;  %v1533_v45 = vmax.f32 %v16688_v31, %v1517_v60 }
 0x233   :  { %v1521_v30 = vpop.permute.xlu1 %1520  ;;  %2618 = vrot.lane.b32.xlu0 %v17186_v44, %s15954_s29  ;;  %14093 = vmatprep.mubr.msk.bf16.mxu0 %vm15960_vm2, %v20930_v40 }
 0x234   :  { %1235 = vst.msk [vmem:[#allocation2 + $0x130] sm:$0xff] %vm333_vm3, %v1227_v11  ;;  %14145 = vmatprep.mubr.msk.bf16.mxu1 %vm15960_vm2, %v20930_v40  ;;  %v17257_v11 = vpop.f32.mrf.mxu1 }
 0x235   :  { %v17235_v7 = vpop.permute.xlu0 %1522  ;;  %2620 = vrot.lane.b32.xlu1 %v17224_v62, %s15954_s29 }
 0x236   :  { %v17276_v60 = vpop.f32.mrf.mxu1 }
 0x237   :  { %v17243_v24 = vpop.permute.xlu1 %1524  ;;  %2055 = vrot.lane.b32.xlu0 %v17167_v58, %s15954_s29  ;;  %v2713_v42 = vld [vmem:[#allocation2 + $0xa0] sm:$0xff]  ;;  %v17259_v58 = vpop.f32.mrf.mxu0 }
 0x238   :  { %v17247_v46 = vpack.c.bf16 %v2713_v42, %v2713_v42 }
 0x239   :  { %v1545_v15 = vpop.permute.xlu0 %1544  ;;  %2057 = vrot.lane.b32.xlu1 %v17207_v32, %s15954_s29  ;;  %v17269_v32 = vpop.f32.mrf.mxu0 }
 0x23a   :  { %v1562_v35 = vmax.f32 %v16676_v2, %v1545_v15  ;;  %14094 = vmatmul.mubr.msk.bf16.gmra.mxu0 %vm333_vm3, %v17247_v46  ;;  %14146 = vmatmul.mubr.msk.bf16.gmra.mxu1 %vm333_vm3, %v17247_v46  ;;  %v3597_v15 = vld [vmem:[#allocation2 + $0xb0] sm:$0xff] }
 0x23b   :  { %v1547_v42 = vpop.permute.xlu1 %1546  ;;  %2085 = vrot.lane.b32.xlu0 %v17188_v47, %s15954_s29  ;;  %14157 = vmatprep.mubr.msk.bf16.mxu0 %vm15960_vm2, %v20930_v40  ;;  %v1534_v47 = vmax.f32 %v16712_v55, %v1519_v17 }
 0x23c   :  { %v1568_v2 = vmax.f32 %v1532_v33, %v1562_v35  ;;  %v1563_v29 = vmax.f32 %v16700_v50, %v1547_v42  ;;  %14209 = vmatprep.mubr.msk.bf16.mxu1 %vm15960_vm2, %v20930_v40  ;;  %v3596_v50 = vld [vmem:[#allocation2 + $0xa8] sm:$0xff]  ;;  %v17278_v33 = vpop.f32.mrf.mxu0  ;;  %v1535_v35 = vmax.f32 %v16744_v18, %v1521_v30 }
 0x23d   :  { %v1549_v62 = vpop.permute.xlu0 %1548  ;;  %2087 = vrot.lane.b32.xlu1 %v17215_v20, %s15954_s29  ;;  %v17283_v28 = vpack.c.bf16 %v3597_v15, %v3596_v50  ;;  %v17309_v15 = vld [vmem:[#allocation10 + $0x38] sm:$0xff]  }
 0x23e   :  { %v1574_v48 = vadd.f32 %v17196_v39, %v1568_v2  ;;  %v1569_v44 = vmax.f32 %v1533_v45, %v1563_v29  ;;  %v1564_v31 = vmax.f32 %v16726_v4, %v1549_v62  ;;  %v1536_v4 = vmax.f32 %v16772_v3, %v17235_v7  ;;  %v17300_v3 = vpop.f32.mrf.mxu0 }
 0x23f   :  { %v1551_v42 = vpop.permute.xlu1 %1550  ;;  %2592 = vrot.lane.b32.xlu0 %v17239_v37, %s15954_s29 }
 0x240   :  { %v1580_v20 = vmax.f32 %v1574_v48, 0.0  ;;  %v1575_v55 = vadd.f32 %v17196_v39, %v1569_v44  ;;  %v1570_v17 = vmax.f32 %v1534_v47, %v1564_v31  ;;  %v1565_v45 = vmax.f32 %v16759_v54, %v1551_v42  ;;  %v17298_v54 = vpop.f32.mrf.mxu1  ;;  %v15066_v47 = vld [vmem:[#allocation10 + $0x58] sm:$0xff]   ;;  %v17323_v42 = vpop.f32.mrf.mxu0 }
 0x241   :  { %v1553_v62 = vpop.permute.xlu0 %1552  ;;  %2594 = vrot.lane.b32.xlu1 %v17276_v60, %s15954_s29  ;;  %v1537_v44 = vmax.f32 %v16795_v0, %v17243_v24  ;;  %v3598_v24 = vld [vmem:[#allocation2 + $0xb8] sm:$0xff] }
 0x242   :  { %1587 = vst.msk [vmem:[#allocation2 + $0x150] sm:$0xff] %vm333_vm3, %v1580_v20  ;;  %v1581_v18 = vmax.f32 %v1575_v55, 0.0  ;;  %v1576_v30 = vadd.f32 %v17196_v39, %v1570_v17  ;;  %v1571_v2 = vmax.f32 %v1535_v35, %v1565_v45  ;;  %v1566_v48 = vmax.f32 %v16783_v22, %v1553_v62  ;;  %14158 = vmatmul.mubr.msk.bf16.vlgmr.msra.gmra.mxu0 %vm333_vm3, %v16724_v63  ;;  %v17320_v35 = vpop.f32.mrf.mxu1  ;;  %v3599_v17 = vld [vmem:[#allocation2 + $0xc0] sm:$0xff] }
 0x243   :  { %14210 = vmatmul.mubr.msk.bf16.vlgmr.msra.gmra.mxu1 %vm333_vm3, %v17283_v28  ;;  %v1555_v20 = vpop.permute.xlu1 %1554  ;;  %2622 = vrot.lane.b32.xlu0 %v17257_v11, %s15954_s29  ;;  %v15068_v45 = vld [vmem:[#allocation10 + $0x50] sm:$0xff]  }
 0x244   :  { %14306 = vmatpush3.bf16.msra.mxu1 %v15066_v47  ;;  %1588 = vst.msk [vmem:[#allocation2 + $0x158] sm:$0xff] %vm333_vm3, %v1581_v18  ;;  %v1582_v22 = vmax.f32 %v1576_v30, 0.0  ;;  %v1577_v63 = vadd.f32 %v17196_v39, %v1571_v2  ;;  %v1572_v7 = vmax.f32 %v1536_v4, %v1566_v48  ;;  %v1567_v29 = vmax.f32 %v16806_v10, %v1555_v20  ;;  %v17332_v30 = vld [vmem:[#allocation10 + $0x30] sm:$0xff]   ;;  %v17346_v20 = vpop.f32.mrf.mxu1 }
 0x245   :  { %14254 = vmatpush3.bf16.msra.mxu0 %v17309_v15  ;;  %14161 = vmatprep.mubr.msk.bf16.mxu0 %vm15960_vm2, %v20930_v40  ;;  %v1873_v0 = vpop.permute.xlu0 %1872  ;;  %v17330_v18 = vpack.c.bf16 %v3599_v17, %v3598_v24  ;;  %v17361_v24 = vld [vmem:[#allocation10 + $0x28] sm:$0xff]  }
 0x246   :  { %2624 = vrot.lane.b32.xlu1 %v17298_v54, %s15954_s29  ;;  %14213 = vmatprep.mubr.msk.bf16.mxu1 %vm15960_vm2, %v20930_v40  ;;  %1589 = vst.msk [vmem:[#allocation2 + $0x160] sm:$0xff] %vm333_vm3, %v1582_v22  ;;  %v1583_v31 = vmax.f32 %v1577_v63, 0.0  ;;  %v1578_v10 = vadd.f32 %v17196_v39, %v1572_v7  ;;  %v1573_v50 = vmax.f32 %v1537_v44, %v1567_v29  ;;  %v17348_v22 = vpop.f32.mrf.mxu0  ;;  %v3601_v7 = vld [vmem:[#allocation2 + $0xd0] sm:$0xff] }
 0x247   :  { %14307 = vmatprep.subr.bf16.mxu1 %v20930_v40  ;;  %14255 = vmatprep.subr.bf16.mxu0 %v20930_v40  ;;  %v1875_v55 = vpop.permute.xlu1 %1874  ;;  %v1890_v44 = vmax.f32 %v16817_v57, %v1873_v0  ;;  %v15070_v29 = vld [vmem:[#allocation10 + $0x48] sm:$0xff]  }
 0x248   :  { %2059 = vrot.lane.b32.xlu0 %v17226_v8, %s15954_s29  ;;  %14308 = vmatpush3.bf16.msra.mxu1 %v15068_v45  ;;  %1591 = vst.msk [vmem:[#allocation2 + $0x1f8] sm:$0xff] %vm333_vm3, %v1583_v31  ;;  %v1584_v4 = vmax.f32 %v1578_v10, 0.0  ;;  %v1579_v62 = vadd.f32 %v17196_v39, %v1573_v50  ;;  %v1891_v57 = vmax.f32 %v16838_v16, %v1875_v55  ;;  %v17365_v10 = vpop.f32.mrf.mxu1  ;;  %v17367_v50 = vpop.f32.mrf.mxu0 }
 0x249   :  { %14256 = vmatpush3.bf16.msra.mxu0 %v17332_v30  ;;  %14309 = vmatprep.subr.bf16.mxu1 %v20930_v40  ;;  %v1903_v2 = vpop.permute.xlu0 %1902  ;;  %20994 = vst [vmem:[#allocation64_spill] sm:$0xff] %v17367_v50 }
 0x24a   :  { %2061 = vrot.lane.b32.xlu1 %v17259_v58, %s15954_s29  ;;  %14257 = vmatprep.subr.bf16.mxu0 %v20930_v40  ;;  %1592 = vst.msk [vmem:[#allocation2 + $0x200] sm:$0xff] %vm333_vm3, %v1584_v4  ;;  %v1585_v48 = vmax.f32 %v1579_v62, 0.0  ;;  %v1920_v47 = vmax.f32 %v16828_v14, %v1903_v2 }
 0x24b   :  { %14162 = vmatmul.mubr.msk.bf16.gmra.mxu0 %vm333_vm3, %v16856_v38  ;;  %14214 = vmatmul.mubr.msk.bf16.gmra.mxu1 %vm333_vm3, %v17330_v18  ;;  %v1905_v63 = vpop.permute.xlu1 %1904 }
 0x24c   :  { %2089 = vrot.lane.b32.xlu0 %v17241_v61, %s15954_s29  ;;  %14165 = vmatprep.mubr.msk.bf16.mxu0 %vm15960_vm2, %v20930_v40  ;;  %1593 = vst.msk [vmem:[#allocation2 + $0x208] sm:$0xff] %vm333_vm3, %v1585_v48  ;;  %v1926_v14 = vmax.f32 %v1890_v44, %v1920_v47  ;;  %v1921_v38 = vmax.f32 %v16848_v49, %v1905_v63  ;;  %v3600_v49 = vld [vmem:[#allocation2 + $0xc8] sm:$0xff] }
 0x24d   :  { %14217 = vmatprep.mubr.msk.bf16.mxu1 %vm15960_vm2, %v20930_v40  ;;  %14310 = vmatpush3.bf16.msra.mxu1 %v15070_v29  ;;  %v1342_v0 = vpop.permute.xlu0 %1341  ;;  %v17373_v17 = vpack.c.bf16 %v3601_v7, %v3600_v49  ;;  %v15072_v48 = vld [vmem:[#allocation10 + $0x40] sm:$0xff]   ;;  %v3603_v7 = vld [vmem:[#allocation2 + $0xe0] sm:$0xff] }
 0x24e   :  { %2091 = vrot.lane.b32.xlu1 %v17269_v32, %s15954_s29  ;;  %14258 = vmatpush3.bf16.msra.mxu0 %v17361_v24  ;;  %v1932_v31 = vadd.f32 %v17196_v39, %v1926_v14  ;;  %v1927_v16 = vmax.f32 %v1891_v57, %v1921_v38  ;;  %v1356_v62 = vmax.f32 %v16852_v52, %v1342_v0  ;;  %v17380_v47 = vld [vmem:[#allocation10 + $0x20] sm:$0xff]   ;;  %v17388_v52 = vpop.f32.mrf.mxu1 }
 0x24f   :  { %14311 = vmatprep.subr.bf16.mxu1 %v20930_v40  ;;  %14259 = vmatprep.subr.bf16.mxu0 %v20930_v40  ;;  %v1372_v55 = vpop.permute.xlu1 %1371 }
 0x250   :  { %2596 = vrot.lane.b32.xlu0 %v17320_v35, %s15954_s29  ;;  %v1938_v45 = vmax.f32 %v1932_v31, 0.0  ;;  %v1933_v4 = vadd.f32 %v17196_v39, %v1927_v16  ;;  %v1386_v2 = vmax.f32 %v16868_v5, %v1372_v55  ;;  %v17390_v5 = vpop.f32.mrf.mxu0  ;;  %v3602_v55 = vld [vmem:[#allocation2 + $0xd8] sm:$0xff] }
 0x251   :  { %14312 = vmatpush3.bf16.msra.mxu1 %v15072_v48  ;;  %v1877_v44 = vpop.permute.xlu0 %1876  ;;  %20995 = vst [vmem:[#allocation65_spill] sm:$0xff] %v17390_v5 }
 0x252   :  { %2598 = vrot.lane.b32.xlu1 %v17365_v10, %s15954_s29  ;;  %14260 = vmatpush3.bf16.msra.mxu0 %v17380_v47  ;;  %1945 = vst.msk [vmem:[#allocation2 + $0x180] sm:$0xff] %vm333_vm3, %v1938_v45  ;;  %v1939_v63 = vmax.f32 %v1933_v4, 0.0  ;;  %v1392_v57 = vmax.f32 %v1356_v62, %v1386_v2  ;;  %v1892_v0 = vmax.f32 %v16873_v12, %v1877_v44  ;;  %v17406_v16 = vpop.f32.mrf.mxu0 }
 0x253   :  { %14166 = vmatmul.mubr.msk.bf16.gmra.mxu0 %vm333_vm3, %v16890_v27  ;;  %14218 = vmatmul.mubr.msk.bf16.gmra.mxu1 %vm333_vm3, %v17373_v17  ;;  %v1344_v14 = vpop.permute.xlu1 %1343  ;;  %20996 = vst [vmem:[#allocation66_spill] sm:$0xff] %v17406_v16  ;;  %v17411_v4 = vpack.c.bf16 %v3603_v7, %v3602_v55 }
 0x254   :  { %2626 = vrot.lane.b32.xlu0 %v17346_v20, %s15954_s29  ;;  %14169 = vmatprep.mubr.msk.bf16.mxu0 %vm15960_vm2, %v20930_v40  ;;  %1946 = vst.msk [vmem:[#allocation2 + $0x188] sm:$0xff] %vm333_vm3, %v1939_v63  ;;  %v1398_v38 = vadd.f32 %v17196_v39, %v1392_v57  ;;  %v1357_v12 = vmax.f32 %v16881_v59, %v1344_v14  ;;  %v17422_v48 = vpop.f32.mrf.mxu0  ;;  %v20998_v63 = vld [vmem:[#allocation32_spill] sm:$0xff] }
 0x255   :  { %14221 = vmatprep.mubr.msk.bf16.mxu1 %vm15960_vm2, %v20930_v40  ;;  %14409 = vmatprep.subr.bf16.mxu1 %v20930_v40  ;;  %v1907_v27 = vpop.permute.xlu0 %1906  ;;  %20997 = vst [vmem:[#allocation67_spill] sm:$0xff] %v17422_v48 }
 0x256   :  { %2628 = vrot.lane.b32.xlu1 %v17388_v52, %s15954_s29  ;;  %14357 = vmatprep.subr.bf16.mxu0 %v20930_v40  ;;  %v1404_v29 = vmax.f32 %v1398_v38, 0.0  ;;  %v1922_v31 = vmax.f32 %v16883_v23, %v1907_v27 }
 0x257   :  { %v1879_v49 = vpop.permute.xlu1 %1878 }
 0x258   :  { %2409 = vrot.lane.b32.xlu0 %v17278_v33, %s15954_s29  ;;  %1412 = vst.msk [vmem:[#allocation2 + $0x138] sm:$0xff] %vm333_vm3, %v1404_v29  ;;  %v1928_v45 = vmax.f32 %v1892_v0, %v1922_v31  ;;  %v1893_v57 = vmax.f32 %v20998_v63, %v1879_v49  ;;  %v3605_v0 = vld [vmem:[#allocation2 + $0xf0] sm:$0xff]  ;;  %v17436_v31 = vpop.f32.mrf.mxu0 }
 0x259   :  { %v1374_v62 = vpop.permute.xlu0 %1373  ;;  %21000 = vst [vmem:[#allocation32_spill] sm:$0xff] %v17436_v31 }
 0x25a   :  { %2411 = vrot.lane.b32.xlu1 %v17323_v42, %s15954_s29  ;;  %v1934_v23 = vadd.f32 %v17196_v39, %v1928_v45  ;;  %v1387_v2 = vmax.f32 %v16909_v19, %v1374_v62  ;;  %v20999_v19 = vld [vmem:[#allocation35_spill] sm:$0xff] }
 0x25b   :  { %14170 = vmatmul.mubr.msk.bf16.gmra.mxu0 %vm333_vm3, %v16942_v25  ;;  %14222 = vmatmul.mubr.msk.bf16.gmra.mxu1 %vm333_vm3, %v17411_v4  ;;  %v1909_v44 = vpop.permute.xlu1 %1908  ;;  %v3604_v25 = vld [vmem:[#allocation2 + $0xe8] sm:$0xff] }
 0x25c   :  { %2439 = vrot.lane.b32.xlu0 %v17300_v3, %s15954_s29  ;;  %14173 = vmatprep.mubr.msk.bf16.mxu0 %vm15960_vm2, %v20930_v40  ;;  %v1940_v59 = vmax.f32 %v1934_v23, 0.0  ;;  %v1393_v14 = vmax.f32 %v1357_v12, %v1387_v2  ;;  %v1923_v38 = vmax.f32 %v20999_v19, %v1909_v44  ;;  %v17440_v55 = vpack.c.bf16 %v3605_v0, %v3604_v25  ;;  %v21001_v12 = vld [vmem:[#allocation38_spill] sm:$0xff]  ;;  %v21002_v2 = vld [vmem:[#allocation28_spill] sm:$0xff]  ;;  %v17452_v19 = vpop.f32.mrf.mxu0 }
 0x25d   :  { %14225 = vmatprep.mubr.msk.bf16.mxu1 %vm15960_vm2, %v20930_v40  ;;  %v1346_v27 = vpop.permute.xlu0 %1345  ;;  %21004 = vst [vmem:[#allocation35_spill] sm:$0xff] %v17452_v19  ;;  %v21005_v0 = vld [vmem:[#allocation36_spill] sm:$0xff] }
 0x25e   :  { %2441 = vrot.lane.b32.xlu1 %v17348_v22, %s15954_s29  ;;  %1947 = vst.msk [vmem:[#allocation2 + $0x190] sm:$0xff] %vm333_vm3, %v1940_v59  ;;  %v1399_v7 = vadd.f32 %v17196_v39, %v1393_v14  ;;  %v1929_v29 = vmax.f32 %v1893_v57, %v1923_v38  ;;  %v1358_v23 = vmax.f32 %v21001_v12, %v1346_v27  ;;  %v21003_v14 = vld [vmem:[#allocation29_spill] sm:$0xff]  ;;  %v17466_v12 = vpop.f32.mrf.mxu0 }
 0x25f   :  { %v1376_v49 = vpop.permute.xlu1 %1375  ;;  %21007 = vst [vmem:[#allocation38_spill] sm:$0xff] %v17466_v12 }
 0x260   :  { %2413 = vrot.lane.b32.xlu0 %v17367_v50, %s15954_s29  ;;  %v1405_v45 = vmax.f32 %v1399_v7, 0.0  ;;  %v1935_v62 = vadd.f32 %v17196_v39, %v1929_v29  ;;  %v1388_v44 = vmax.f32 %v21002_v2, %v1376_v49  ;;  %v3607_v7 = vld [vmem:[#allocation2 + $0x100] sm:$0xff]  ;;  %v3606_v2 = vld [vmem:[#allocation2 + $0xf8] sm:$0xff] }
 0x261   :  { %v1881_v59 = vpop.permute.xlu0 %1880 }
 0x262   :  { %2415 = vrot.lane.b32.xlu1 %v17406_v16, %s15954_s29  ;;  %1413 = vst.msk [vmem:[#allocation2 + $0x140] sm:$0xff] %vm333_vm3, %v1405_v45  ;;  %v1941_v63 = vmax.f32 %v1935_v62, 0.0  ;;  %v1394_v57 = vmax.f32 %v1358_v23, %v1388_v44  ;;  %v1894_v49 = vmax.f32 %v21005_v0, %v1881_v59  ;;  %v21006_v45 = vld [vmem:[#allocation27_spill] sm:$0xff]  ;;  %v21008_v44 = vld [vmem:[#allocation53_spill] sm:$0xff]  ;;  %v17473_v16 = vpack.c.bf16 %v3607_v7, %v3606_v2  ;;  %v21010_v0 = vld [vmem:[#allocation34_spill] sm:$0xff] }
 0x263   :  { %14174 = vmatmul.mubr.msk.bf16.gmra.mxu0 %vm333_vm3, %v21003_v14  ;;  %14226 = vmatmul.mubr.msk.bf16.gmra.mxu1 %vm333_vm3, %v17440_v55  ;;  %v1883_v38 = vpop.permute.xlu1 %1882  ;;  %v21009_v14 = vld [vmem:[#allocation41_spill] sm:$0xff] }
 0x264   :  { %2443 = vrot.lane.b32.xlu0 %v17390_v5, %s15954_s29  ;;  %14177 = vmatprep.mubr.msk.bf16.mxu0 %vm15960_vm2, %v20930_v40  ;;  %1949 = vst.msk [vmem:[#allocation2 + $0x228] sm:$0xff] %vm333_vm3, %v1941_v63  ;;  %v1400_v25 = vadd.f32 %v17196_v39, %v1394_v57  ;;  %v1895_v63 = vmax.f32 %v21008_v44, %v1883_v38  ;;  %v21013_v44 = vld [vmem:[#allocation43_spill] sm:$0xff] }
 0x265   :  { %14229 = vmatprep.mubr.msk.bf16.mxu1 %vm15960_vm2, %v20930_v40  ;;  %v1911_v27 = vpop.permute.xlu0 %1910 }
 0x266   :  { %2445 = vrot.lane.b32.xlu1 %v17422_v48, %s15954_s29  ;;  %v1406_v29 = vmax.f32 %v1400_v25, 0.0  ;;  %v1924_v62 = vmax.f32 %v21006_v45, %v1911_v27  ;;  %v3609_v45 = vld [vmem:[#allocation2 + $0x110] sm:$0xff] }
 0x267   :  { %v1913_v23 = vpop.permute.xlu1 %1912 }
 0x268   :  { %2417 = vrot.lane.b32.xlu0 %v17436_v31, %s15954_s29  ;;  %1414 = vst.msk [vmem:[#allocation2 + $0x148] sm:$0xff] %vm333_vm3, %v1406_v29  ;;  %v1930_v57 = vmax.f32 %v1894_v49, %v1924_v62  ;;  %v1925_v48 = vmax.f32 %v21009_v14, %v1913_v23  ;;  %v17482_v29 = vpop.f32.mrf.mxu0  ;;  %v21012_v23 = vld [vmem:[#allocation54_spill] sm:$0xff] }
 0x269   :  { %v1694_v25 = vpop.permute.xlu0 %1693  ;;  %21011 = vst [vmem:[#allocation28_spill] sm:$0xff] %v17482_v29  ;;  %v3608_v14 = vld [vmem:[#allocation2 + $0x108] sm:$0xff] }
 0x26a   :  { %2419 = vrot.lane.b32.xlu1 %v17466_v12, %s15954_s29  ;;  %v1936_v59 = vadd.f32 %v17196_v39, %v1930_v57  ;;  %v1931_v27 = vmax.f32 %v1895_v63, %v1925_v48  ;;  %v1711_v2 = vmax.f32 %v21012_v23, %v1694_v25  ;;  %v21015_v12 = vld [vmem:[#allocation30_spill] sm:$0xff]  ;;  %v17503_v5 = vpack.c.bf16 %v3609_v45, %v3608_v14  ;;  %v21021_v14 = vld [vmem:[#allocation31_spill] sm:$0xff] }
 0x26b   :  { %14178 = vmatmul.mubr.msk.bf16.gmra.mxu0 %vm333_vm3, %v21010_v0  ;;  %14230 = vmatmul.mubr.msk.bf16.gmra.mxu1 %vm333_vm3, %v17473_v16  ;;  %v1696_v38 = vpop.permute.xlu1 %1695 }
 0x26c   :  { %2447 = vrot.lane.b32.xlu0 %v17452_v19, %s15954_s29  ;;  %14181 = vmatprep.mubr.msk.bf16.mxu0 %vm15960_vm2, %v20930_v40  ;;  %v1942_v7 = vmax.f32 %v1936_v59, 0.0  ;;  %v1937_v49 = vadd.f32 %v17196_v39, %v1931_v27  ;;  %v21014_v59 = vld [vmem:[#allocation44_spill] sm:$0xff] }
 0x26d   :  { %14233 = vmatprep.mubr.msk.bf16.mxu1 %vm15960_vm2, %v20930_v40  ;;  %v1724_v48 = vpop.permute.xlu0 %1723  ;;  %v1712_v27 = vmax.f32 %v21014_v59, %v1696_v38 }
 0x26e   :  { %2449 = vrot.lane.b32.xlu1 %v17482_v29, %s15954_s29  ;;  %1950 = vst.msk [vmem:[#allocation2 + $0x230] sm:$0xff] %vm333_vm3, %v1942_v7  ;;  %v1943_v62 = vmax.f32 %v1937_v49, 0.0  ;;  %v1741_v63 = vmax.f32 %v21013_v44, %v1724_v48  ;;  %v3611_v44 = vld [vmem:[#allocation2 + $0x120] sm:$0xff] }
 0x26f   :  { %v1726_v57 = vpop.permute.xlu1 %1725 }
 0x270   :  { %1951 = vst.msk [vmem:[#allocation2 + $0x238] sm:$0xff] %vm333_vm3, %v1943_v62  ;;  %v1747_v0 = vmax.f32 %v1711_v2, %v1741_v63  ;;  %v1742_v19 = vmax.f32 %v21015_v12, %v1726_v57  ;;  %v17499_v31 = vpop.f32.mrf.mxu0  ;;  %v17501_v29 = vpop.f32.mrf.mxu1  ;;  %v21020_v63 = vld [vmem:[#allocation46_spill] sm:$0xff] }
 0x271   :  { %21016 = vst [vmem:[#allocation29_spill] sm:$0xff] %v17499_v31  ;;  %21017 = vst [vmem:[#allocation36_spill] sm:$0xff] %v17501_v29  ;;  %v2231_v7 = vpop.permute.xlu0 %2230  ;;  %v21023_v31 = vld [vmem:[#allocation37_spill] sm:$0xff] }
 0x272   :  { %v1753_v25 = vadd.f32 %v17196_v39, %v1747_v0  ;;  %v1748_v49 = vmax.f32 %v1712_v27, %v1742_v19  ;;  %v14055_v48 = vpop.f32.mrf.mxu0  ;;  %v14107_v23 = vpop.f32.mrf.mxu1  ;;  %v2248_v57 = vmax.f32 %v21020_v63, %v2231_v7 }
 0x273   :  { %14182 = vmatmul.mubr.msk.bf16.gmra.mxu0 %vm333_vm3, %v17102_v43  ;;  %14234 = vmatmul.mubr.msk.bf16.gmra.mxu1 %vm333_vm3, %v17503_v5  ;;  %v2233_v38 = vpop.permute.xlu1 %2232  ;;  %v3610_v23 = vld [vmem:[#allocation2 + $0x118] sm:$0xff] }
 0x274   :  { %14185 = vmatprep.mubr.msk.bf16.mxu0 %vm15960_vm2, %v20930_v40  ;;  %14237 = vmatprep.mubr.msk.bf16.mxu1 %vm15960_vm2, %v20930_v40  ;;  %v1759_v12 = vmax.f32 %v1753_v25, 0.0  ;;  %v1754_v45 = vadd.f32 %v17196_v39, %v1748_v49  ;;  %v17515_v62 = vpop.f32.mrf.mxu0  ;;  %v17517_v19 = vpop.f32.mrf.mxu1  ;;  %v21022_v25 = vld [vmem:[#allocation33_spill] sm:$0xff]  ;;  %v17525_v29 = vpack.c.bf16 %v3611_v44, %v3610_v23  ;;  %v3613_v44 = vld [vmem:[#allocation2 + $0x130] sm:$0xff] }
 0x275   :  { %21018 = vst [vmem:[#allocation27_spill] sm:$0xff] %v17515_v62  ;;  %21019 = vst [vmem:[#allocation53_spill] sm:$0xff] %v17517_v19  ;;  %v2261_v2 = vpop.permute.xlu0 %2260  ;;  %v2249_v49 = vmax.f32 %v21022_v25, %v2233_v38 }
 0x276   :  { %1766 = vst.msk [vmem:[#allocation2 + $0x168] sm:$0xff] %vm333_vm3, %v1759_v12  ;;  %v1760_v43 = vmax.f32 %v1754_v45, 0.0  ;;  %v2278_v59 = vmax.f32 %v21021_v14, %v2261_v2  ;;  %v14056_v27 = vpop.f32.mrf.mxu0  ;;  %v14108_v0 = vpop.f32.mrf.mxu1  ;;  %v21025_v14 = vld [vmem:[#allocation42_spill] sm:$0xff] }
 0x277   :  { %v2263_v48 = vpop.permute.xlu1 %2262 }
 0x278   :  { %1767 = vst.msk [vmem:[#allocation2 + $0x170] sm:$0xff] %vm333_vm3, %v1760_v43  ;;  %v2284_v62 = vmax.f32 %v2248_v57, %v2278_v59  ;;  %v2279_v19 = vmax.f32 %v21023_v31, %v2263_v48  ;;  %v3612_v57 = vld [vmem:[#allocation2 + $0x128] sm:$0xff] }
 0x279   :  { %v1698_v50 = vpop.permute.xlu0 %1697  ;;  %v17543_v48 = vpack.c.bf16 %v3613_v44, %v3612_v57 }
 0x27a   :  { %v2290_v12 = vadd.f32 %v17196_v39, %v2284_v62  ;;  %v2285_v45 = vmax.f32 %v2249_v49, %v2279_v19  ;;  %v21024_v19 = vld [vmem:[#allocation55_spill] sm:$0xff] }
 0x27b   :  { %14186 = vmatmul.mubr.msk.bf16.gmra.mxu0 %vm333_vm3, %v17137_v1  ;;  %14238 = vmatmul.mubr.msk.bf16.gmra.mxu1 %vm333_vm3, %v17525_v29  ;;  %v1700_v7 = vpop.permute.xlu1 %1699  ;;  %v1713_v1 = vmax.f32 %v17014_v53, %v1698_v50 }
 0x27c   :  { %14189 = vmatprep.mubr.msk.bf16.mxu0 %vm15960_vm2, %v20930_v40  ;;  %14241 = vmatprep.mubr.msk.bf16.mxu1 %vm15960_vm2, %v20930_v40  ;;  %v2296_v31 = vmax.f32 %v2290_v12, 0.0  ;;  %v2291_v38 = vadd.f32 %v17196_v39, %v2285_v45  ;;  %v1714_v59 = vmax.f32 %v21025_v14, %v1700_v7  ;;  %v3615_v45 = vld [vmem:[#allocation2 + $0x140] sm:$0xff] }
 0x27d   :  { %v1728_v2 = vpop.permute.xlu0 %1727 }
 0x27e   :  { %2303 = vst.msk [vmem:[#allocation2 + $0x1b0] sm:$0xff] %vm333_vm3, %v2296_v31  ;;  %v2297_v62 = vmax.f32 %v2291_v38, 0.0  ;;  %v1743_v43 = vmax.f32 %v21024_v19, %v1728_v2  ;;  %v3614_v2 = vld [vmem:[#allocation2 + $0x138] sm:$0xff] }
 0x27f   :  { %v1730_v63 = vpop.permute.xlu1 %1729 }
 0x280   :  { %2304 = vst.msk [vmem:[#allocation2 + $0x1b8] sm:$0xff] %vm333_vm3, %v2297_v62  ;;  %v1749_v27 = vmax.f32 %v1713_v1, %v1743_v43  ;;  %v1744_v0 = vmax.f32 %v17056_v36, %v1730_v63  ;;  %v21026_v1 = vld [vmem:[#allocation39_spill] sm:$0xff]  ;;  %v17561_v43 = vpack.c.bf16 %v3615_v45, %v3614_v2 }
 0x281   :  { %v2235_v23 = vpop.permute.xlu0 %2234  ;;  %v21030_v45 = vld [vmem:[#allocation47_spill] sm:$0xff] }
 0x282   :  { %v1755_v25 = vadd.f32 %v17196_v39, %v1749_v27  ;;  %v1750_v49 = vmax.f32 %v1714_v59, %v1744_v0  ;;  %v3616_v27 = vld [vmem:[#allocation2 + $0x148] sm:$0xff] }
 0x283   :  { %14190 = vmatmul.mubr.msk.bf16.gmra.mxu0 %vm333_vm3, %v17175_v41  ;;  %14242 = vmatmul.mubr.msk.bf16.gmra.mxu1 %vm333_vm3, %v17543_v48  ;;  %v2237_v53 = vpop.permute.xlu1 %2236  ;;  %v2250_v41 = vmax.f32 %v17046_v26, %v2235_v23  ;;  %v21027_v23 = vld [vmem:[#allocation45_spill] sm:$0xff] }
 0x284   :  { %14193 = vmatprep.mubr.msk.bf16.mxu0 %vm15960_vm2, %v20930_v40  ;;  %14245 = vmatprep.mubr.msk.bf16.mxu1 %vm15960_vm2, %v20930_v40  ;;  %v1761_v36 = vmax.f32 %v1755_v25, 0.0  ;;  %v1756_v50 = vadd.f32 %v17196_v39, %v1750_v49  ;;  %v2251_v44 = vmax.f32 %v17068_v51, %v2237_v53  ;;  %v21028_v25 = vld [vmem:[#allocation40_spill] sm:$0xff] }
 0x285   :  { %v2265_v12 = vpop.permute.xlu0 %2264 }
 0x286   :  { %1768 = vst.msk [vmem:[#allocation2 + $0x178] sm:$0xff] %vm333_vm3, %v1761_v36  ;;  %v1762_v7 = vmax.f32 %v1756_v50, 0.0  ;;  %v2280_v31 = vmax.f32 %v17058_v6, %v2265_v12  ;;  %v21029_v36 = vld [vmem:[#allocation49_spill] sm:$0xff] }
 0x287   :  { %v2267_v38 = vpop.permute.xlu1 %2266 }
 0x288   :  { %1770 = vst.msk [vmem:[#allocation2 + $0x210] sm:$0xff] %vm333_vm3, %v1762_v7  ;;  %v2286_v62 = vmax.f32 %v2250_v41, %v2280_v31  ;;  %v2281_v19 = vmax.f32 %v21026_v1, %v2267_v38  ;;  %v17579_v41 = vpack.c.bf16 %v3616_v27, %v3616_v27  ;;  %v21033_v27 = vld [vmem:[#allocation51_spill] sm:$0xff] }
 0x289   :  { %v1702_v63 = vpop.permute.xlu0 %1701 }
 0x28a   :  { %v2292_v57 = vadd.f32 %v17196_v39, %v2286_v62  ;;  %v2287_v14 = vmax.f32 %v2251_v44, %v2281_v19 }
 0x28b   :  { %14194 = vmatmul.mubr.msk.bf16.gmra.mxu0 %vm333_vm3, %v17213_v34  ;;  %14246 = vmatmul.mubr.msk.bf16.gmra.mxu1 %vm333_vm3, %v17561_v43  ;;  %v1704_v26 = vpop.permute.xlu1 %1703  ;;  %v1715_v34 = vmax.f32 %v21027_v23, %v1702_v63 }
 0x28c   :  { %14197 = vmatprep.mubr.msk.bf16.mxu0 %vm15960_vm2, %v20930_v40  ;;  %14249 = vmatprep.mubr.msk.bf16.mxu1 %vm15960_vm2, %v20930_v40  ;;  %v2298_v6 = vmax.f32 %v2292_v57, 0.0  ;;  %v2293_v51 = vadd.f32 %v17196_v39, %v2287_v14  ;;  %v1716_v50 = vmax.f32 %v21029_v36, %v1704_v26  ;;  %v17607_v36 = vld [vmem:[#allocation10 + $0x18] sm:$0xff]  }
 0x28d   :  { %v1732_v59 = vpop.permute.xlu0 %1731 }
 0x28e   :  { %2305 = vst.msk [vmem:[#allocation2 + $0x1c0] sm:$0xff] %vm333_vm3, %v2298_v6  ;;  %v2299_v0 = vmax.f32 %v2293_v51, 0.0  ;;  %v1745_v49 = vmax.f32 %v21028_v25, %v1732_v59  ;;  %v21032_v6 = vld [vmem:[#allocation52_spill] sm:$0xff] }
 0x28f   :  { %v1734_v53 = vpop.permute.xlu1 %1733 }
 0x290   :  { %2307 = vst.msk [vmem:[#allocation2 + $0x258] sm:$0xff] %vm333_vm3, %v2299_v0  ;;  %v1751_v12 = vmax.f32 %v1715_v34, %v1745_v49  ;;  %v1746_v7 = vmax.f32 %v21030_v45, %v1734_v53 }
 0x291   :  { %v2239_v31 = vpop.permute.xlu0 %2238 }
 0x292   :  { %v1757_v38 = vadd.f32 %v17196_v39, %v1751_v12  ;;  %v1752_v2 = vmax.f32 %v1716_v50, %v1746_v7  ;;  %v2252_v57 = vmax.f32 %v17094_v13, %v2239_v31 }
 0x293   :  { %14198 = vmatmul.mubr.msk.bf16.gmra.mxu0 %vm333_vm3, %v17247_v46  ;;  %14250 = vmatmul.mubr.msk.bf16.gmra.mxu1 %vm333_vm3, %v17579_v41  ;;  %v2241_v44 = vpop.permute.xlu1 %2240  ;;  %v21031_v46 = vld [vmem:[#allocation56_spill] sm:$0xff] }
 0x294   :  { %14261 = vmatprep.mubr.msk.bf16.mxu0 %vm15960_vm2, %v20930_v40  ;;  %14313 = vmatprep.mubr.msk.bf16.mxu1 %vm15960_vm2, %v20930_v40  ;;  %v1763_v62 = vmax.f32 %v1757_v38, 0.0  ;;  %v1758_v1 = vadd.f32 %v17196_v39, %v1752_v2  ;;  %v2253_v51 = vmax.f32 %v21032_v6, %v2241_v44 }
 0x295   :  { %v2269_v19 = vpop.permute.xlu0 %2268 }
 0x296   :  { %1771 = vst.msk [vmem:[#allocation2 + $0x218] sm:$0xff] %vm333_vm3, %v1763_v62  ;;  %v1764_v63 = vmax.f32 %v1758_v1, 0.0  ;;  %v2282_v14 = vmax.f32 %v21031_v46, %v2269_v19 }
 0x297   :  { %v2271_v26 = vpop.permute.xlu1 %2270 }
 0x298   :  { %1772 = vst.msk [vmem:[#allocation2 + $0x220] sm:$0xff] %vm333_vm3, %v1764_v63  ;;  %v2288_v59 = vmax.f32 %v2252_v57, %v2282_v14  ;;  %v2283_v0 = vmax.f32 %v21033_v27, %v2271_v26  ;;  %v17630_v14 = vld [vmem:[#allocation10 + $0x10] sm:$0xff]  }
 0x299   :  { %v2052_v23 = vpop.permute.xlu0 %2051 }
 0x29a   :  { %v2294_v34 = vadd.f32 %v17196_v39, %v2288_v59  ;;  %v2289_v25 = vmax.f32 %v2253_v51, %v2283_v0  ;;  %v17598_v49 = vpop.f32.mrf.mxu0  ;;  %v17600_v53 = vpop.f32.mrf.mxu1 }
 0x29b   :  { %14262 = vmatmul.mubr.msk.bf16.vlgmr.msra.gmra.mxu0 %vm333_vm3, %v17283_v28  ;;  %14314 = vmatmul.mubr.msk.bf16.vlgmr.msra.gmra.mxu1 %vm333_vm3, %v17283_v28  ;;  %v2054_v13 = vpop.permute.xlu1 %2053 }
 0x29c   :  { %14410 = vmatpush3.bf16.msra.mxu1 %v17309_v15  ;;  %14358 = vmatpush3.bf16.msra.mxu0 %v17607_v36  ;;  %v2300_v50 = vmax.f32 %v2294_v34, 0.0  ;;  %v2295_v12 = vadd.f32 %v17196_v39, %v2289_v25  ;;  %v14059_v45 = vpop.f32.mrf.mxu0  ;;  %v14111_v7 = vpop.f32.mrf.mxu1  ;;  %v21034_v15 = vld [vmem:[#allocation57_spill] sm:$0xff]  ;;  %v2070_v19 = vmax.f32 %v17148_v21, %v2054_v13  ;;  %v21039_v13 = vld [vmem:[#allocation48_spill] sm:$0xff] }
 0x29d   :  { %14317 = vmatprep.mubr.msk.bf16.mxu1 %vm15960_vm2, %v20930_v40  ;;  %14265 = vmatprep.mubr.msk.bf16.mxu0 %vm15960_vm2, %v20930_v40  ;;  %v2082_v31 = vpop.permute.xlu0 %2081  ;;  %v2069_v38 = vmax.f32 %v21034_v15, %v2052_v23 }
 0x29e   :  { %14411 = vmatprep.subr.bf16.mxu1 %v20930_v40  ;;  %14359 = vmatprep.subr.bf16.mxu0 %v20930_v40  ;;  %2308 = vst.msk [vmem:[#allocation2 + $0x260] sm:$0xff] %vm333_vm3, %v2300_v50  ;;  %v2301_v28 = vmax.f32 %v2295_v12, 0.0  ;;  %v2099_v2 = vmax.f32 %v17130_v9, %v2082_v31  ;;  %v17620_v44 = vpop.f32.mrf.mxu0  ;;  %v17622_v62 = vpop.f32.mrf.mxu1  ;;  %v21040_v12 = vld [vmem:[#allocation50_spill] sm:$0xff] }
 0x29f   :  { %21035 = vst [vmem:[#allocation41_spill] sm:$0xff] %v17620_v44  ;;  %21036 = vst [vmem:[#allocation34_spill] sm:$0xff] %v17622_v62  ;;  %v2084_v1 = vpop.permute.xlu1 %2083  ;;  %2923 = vrot.lane.b32.xlu0 %v17620_v44, %s15961_s0 }
 0x2a0   :  { %14412 = vmatpush3.bf16.msra.mxu1 %v17332_v30  ;;  %2309 = vst.msk [vmem:[#allocation2 + $0x268] sm:$0xff] %vm333_vm3, %v2301_v28  ;;  %v2105_v63 = vmax.f32 %v2069_v38, %v2099_v2  ;;  %v2100_v57 = vmax.f32 %v17160_v56, %v2084_v1  ;;  %v14060_v46 = vpop.f32.mrf.mxu0  ;;  %v14112_v9 = vpop.f32.mrf.mxu1  ;;  %14360 = vmatpush3.bf16.msra.mxu0 %v17630_v14  ;;  %v21043_v28 = vld [vmem:[#allocation60_spill] sm:$0xff]  ;;  %v21044_v2 = vld [vmem:[#allocation63_spill] sm:$0xff] }
 0x2a1   :  { %14413 = vmatprep.subr.bf16.mxu1 %v20930_v40  ;;  %v2589_v26 = vpop.permute.xlu0 %2588  ;;  %14361 = vmatprep.subr.bf16.mxu0 %v20930_v40  ;;  %v17674_v46 = vld [vmem:[#allocation10] sm:$0xff]  }
 0x2a2   :  { %v2111_v30 = vadd.f32 %v17196_v39, %v2105_v63  ;;  %v2106_v6 = vmax.f32 %v2070_v19, %v2100_v57  ;;  %v17636_v51 = vpop.f32.mrf.mxu0  ;;  %v17638_v21 = vpop.f32.mrf.mxu1  ;;  %v2606_v50 = vmax.f32 %v21039_v13, %v2589_v26 }
 0x2a3   :  { %21037 = vst [vmem:[#allocation54_spill] sm:$0xff] %v17636_v51  ;;  %21038 = vst [vmem:[#allocation43_spill] sm:$0xff] %v17638_v21  ;;  %14266 = vmatmul.mubr.msk.bf16.gmra.mxu0 %vm333_vm3, %v17330_v18  ;;  %14318 = vmatmul.mubr.msk.bf16.gmra.mxu1 %vm333_vm3, %v17330_v18  ;;  %v2591_v56 = vpop.permute.xlu1 %2590  ;;  %v17654_v18 = vld [vmem:[#allocation10 + $0x8] sm:$0xff]  }
 0x2a4   :  { %3187 = vrot.lane.b32.xlu0 %v17622_v62, %s15961_s0  ;;  %2925 = vrot.lane.b32.xlu1 %v17636_v51, %s15961_s0  ;;  %v2117_v59 = vmax.f32 %v2111_v30, 0.0  ;;  %v2112_v27 = vadd.f32 %v17196_v39, %v2106_v6  ;;  %v14063_v0 = vpop.f32.mrf.mxu0  ;;  %v14115_v23 = vpop.f32.mrf.mxu1  ;;  %v2607_v15 = vmax.f32 %v21043_v28, %v2591_v56 }
 0x2a5   :  { %14321 = vmatprep.mubr.msk.bf16.mxu1 %vm15960_vm2, %v20930_v40  ;;  %14269 = vmatprep.mubr.msk.bf16.mxu0 %vm15960_vm2, %v20930_v40  ;;  %v2619_v34 = vpop.permute.xlu0 %2618  ;;  %v21046_v0 = vld [vmem:[#allocation59_spill] sm:$0xff] }
 0x2a6   :  { %14414 = vmatpush3.bf16.msra.mxu1 %v17361_v24  ;;  %14362 = vmatpush3.bf16.msra.mxu0 %v17654_v18  ;;  %2124 = vst.msk [vmem:[#allocation2 + $0x198] sm:$0xff] %vm333_vm3, %v2117_v59  ;;  %v2118_v25 = vmax.f32 %v2112_v27, 0.0  ;;  %v2636_v45 = vmax.f32 %v21040_v12, %v2619_v34  ;;  %v17660_v7 = vpop.f32.mrf.mxu0  ;;  %v17662_v31 = vpop.f32.mrf.mxu1  ;;  %v21045_v59 = vld [vmem:[#allocation58_spill] sm:$0xff] }
 0x2a7   :  { %21041 = vst [vmem:[#allocation44_spill] sm:$0xff] %v17660_v7  ;;  %21042 = vst [vmem:[#allocation30_spill] sm:$0xff] %v17662_v31  ;;  %14415 = vmatprep.subr.bf16.mxu1 %v20930_v40  ;;  %14363 = vmatprep.subr.bf16.mxu0 %v20930_v40  ;;  %v2621_v24 = vpop.permute.xlu1 %2620  ;;  %v21048_v12 = vld [vmem:[#allocation62_spill] sm:$0xff] }
 0x2a8   :  { %3189 = vrot.lane.b32.xlu1 %v17638_v21, %s15961_s0  ;;  %2927 = vrot.lane.b32.xlu0 %v17660_v7, %s15961_s0  ;;  %2125 = vst.msk [vmem:[#allocation2 + $0x1a0] sm:$0xff] %vm333_vm3, %v2118_v25  ;;  %v2642_v38 = vmax.f32 %v2606_v50, %v2636_v45  ;;  %v2637_v1 = vmax.f32 %v21044_v2, %v2621_v24  ;;  %v14064_v19 = vpop.f32.mrf.mxu0  ;;  %v14116_v63 = vpop.f32.mrf.mxu1  ;;  %v21047_v25 = vld [vmem:[#allocation61_spill] sm:$0xff] }
 0x2a9   :  { %v2056_v57 = vpop.permute.xlu0 %2055 }
 0x2aa   :  { %14416 = vmatpush3.bf16.msra.mxu1 %v17380_v47  ;;  %14364 = vmatpush3.bf16.msra.mxu0 %v17674_v46  ;;  %v2648_v9 = vadd.f32 %v17196_v39, %v2642_v38  ;;  %v2643_v26 = vmax.f32 %v2607_v15, %v2637_v1  ;;  %v2071_v27 = vmax.f32 %v21045_v59, %v2056_v57 }
 0x2ab   :  { %14270 = vmatmul.mubr.msk.bf16.gmra.mxu0 %vm333_vm3, %v17373_v17  ;;  %14322 = vmatmul.mubr.msk.bf16.gmra.mxu1 %vm333_vm3, %v17373_v17  ;;  %v2058_v30 = vpop.permute.xlu1 %2057 }
 0x2ac   :  { %3191 = vrot.lane.b32.xlu0 %v17662_v31, %s15961_s0  ;;  %14325 = vmatprep.mubr.msk.bf16.mxu1 %vm15960_vm2, %v20930_v40  ;;  %v2654_v47 = vmax.f32 %v2648_v9, 0.0  ;;  %v2649_v6 = vadd.f32 %v17196_v39, %v2643_v26  ;;  %v2072_v13 = vmax.f32 %v21047_v25, %v2058_v30 }
 0x2ad   :  { %14273 = vmatprep.mubr.msk.bf16.mxu0 %vm15960_vm2, %v20930_v40  ;;  %14513 = vmatprep.subr.bf16.mxu1 %v20930_v40  ;;  %v2086_v56 = vpop.permute.xlu0 %2085 }
 0x2ae   :  { %14461 = vmatprep.subr.bf16.mxu0 %v20930_v40  ;;  %2661 = vst.msk [vmem:[#allocation2 + $0x1e0] sm:$0xff] %vm333_vm3, %v2654_v47  ;;  %v2655_v17 = vmax.f32 %v2649_v6, 0.0  ;;  %v2101_v23 = vmax.f32 %v21046_v0, %v2086_v56 }
 0x2af   :  { %v2088_v34 = vpop.permute.xlu1 %2087 }
 0x2b0   :  { %2662 = vst.msk [vmem:[#allocation2 + $0x1e8] sm:$0xff] %vm333_vm3, %v2655_v17  ;;  %v2107_v50 = vmax.f32 %v2071_v27, %v2101_v23  ;;  %v2102_v45 = vmax.f32 %v21048_v12, %v2088_v34  ;;  %v17697_v24 = vpop.f32.mrf.mxu0  ;;  %v17699_v28 = vpop.f32.mrf.mxu1 }
 0x2b1   :  { %21049 = vst [vmem:[#allocation46_spill] sm:$0xff] %v17697_v24  ;;  %21050 = vst [vmem:[#allocation31_spill] sm:$0xff] %v17699_v28  ;;  %v2593_v15 = vpop.permute.xlu0 %2592  ;;  %2974 = vrot.lane.b32.xlu0 %v17697_v24, %s15954_s29  ;;  %2929 = vrot.lane.b32.xlu1 %v17697_v24, %s15961_s0 }
 0x2b2   :  { %v2113_v38 = vadd.f32 %v17196_v39, %v2107_v50  ;;  %v2108_v2 = vmax.f32 %v2072_v13, %v2102_v45  ;;  %v14067_v1 = vpop.f32.mrf.mxu0  ;;  %v14119_v19 = vpop.f32.mrf.mxu1  ;;  %v2608_v6 = vmax.f32 %v17239_v37, %v2593_v15  ;;  %v17733_v37 = vld [vmem:[#allocation8] ss:$0 sm:$0xff] }
 0x2b3   :  { %14274 = vmatmul.mubr.msk.bf16.gmra.mxu0 %vm333_vm3, %v17411_v4  ;;  %14326 = vmatmul.mubr.msk.bf16.gmra.mxu1 %vm333_vm3, %v17411_v4  ;;  %v2595_v63 = vpop.permute.xlu1 %2594 }
 0x2b4   :  { %14329 = vmatprep.mubr.msk.bf16.mxu1 %vm15960_vm2, %v20930_v40  ;;  %14277 = vmatprep.mubr.msk.bf16.mxu0 %vm15960_vm2, %v20930_v40  ;;  %v2119_v57 = vmax.f32 %v2113_v38, 0.0  ;;  %v2114_v9 = vadd.f32 %v17196_v39, %v2108_v2  ;;  %v17715_v26 = vpop.f32.mrf.mxu0  ;;  %v17717_v30 = vpop.f32.mrf.mxu1  ;;  %v2609_v27 = vmax.f32 %v17276_v60, %v2595_v63 }
 0x2b5   :  { %21051 = vst [vmem:[#allocation33_spill] sm:$0xff] %v17715_v26  ;;  %21052 = vst [vmem:[#allocation37_spill] sm:$0xff] %v17717_v30  ;;  %v2623_v47 = vpop.permute.xlu0 %2622  ;;  %3238 = vrot.lane.b32.xlu0 %v17699_v28, %s15954_s29  ;;  %3193 = vrot.lane.b32.xlu1 %v17699_v28, %s15961_s0 }
 0x2b6   :  { %2126 = vst.msk [vmem:[#allocation2 + $0x1a8] sm:$0xff] %vm333_vm3, %v2119_v57  ;;  %v2120_v4 = vmax.f32 %v2114_v9, 0.0  ;;  %v2638_v56 = vmax.f32 %v17257_v11, %v2623_v47  ;;  %v14068_v17 = vpop.f32.mrf.mxu0  ;;  %v14120_v39 = vpop.f32.mrf.mxu1 }
 0x2b8   :  { %v2625_v59 = vpop.permute.xlu1 %2624  ;;  %2128 = vst.msk [vmem:[#allocation2 + $0x240] sm:$0xff] %vm333_vm3, %v2120_v4  ;;  %v2644_v0 = vmax.f32 %v2608_v6, %v2638_v56 }
 0x2b9   :  { %v2639_v23 = vmax.f32 %v17298_v54, %v2625_v59  ;;  %2976 = vrot.lane.b32.xlu1 %v17715_v26, %s15954_s29  ;;  %2931 = vrot.lane.b32.xlu0 %v17715_v26, %s15961_s0 }
 0x2ba   :  { %v2060_v34 = vpop.permute.xlu0 %2059  ;;  %v2650_v11 = vadd.f32 %v17733_v37, %v2644_v0  ;;  %v17736_v13 = vpop.f32.mrf.mxu0 }
 0x2bb   :  { %v2645_v25 = vmax.f32 %v2609_v27, %v2639_v23  ;;  %21053 = vst [vmem:[#allocation55_spill] sm:$0xff] %v17736_v13  ;;  %v17738_v50 = vpop.f32.mrf.mxu1  ;;  %14278 = vmatmul.mubr.msk.bf16.gmra.mxu0 %vm333_vm3, %v17440_v55  ;;  %14330 = vmatmul.mubr.msk.bf16.gmra.mxu1 %vm333_vm3, %v17440_v55  ;;  %v2073_v2 = vmax.f32 %v17226_v8, %v2060_v34 }
 0x2bc   :  { %21054 = vst [vmem:[#allocation42_spill] sm:$0xff] %v17738_v50  ;;  %v2062_v60 = vpop.permute.xlu1 %2061  ;;  %14333 = vmatprep.mubr.msk.bf16.mxu1 %vm15960_vm2, %v20930_v40  ;;  %14281 = vmatprep.mubr.msk.bf16.mxu0 %vm15960_vm2, %v20930_v40  ;;  %v2656_v54 = vmax.f32 %v2650_v11, 0.0  ;;  %v14071_v45 = vpop.f32.mrf.mxu0 }
 0x2bd   :  { %v2651_v12 = vadd.f32 %v17733_v37, %v2645_v25  ;;  %v14123_v15 = vpop.f32.mrf.mxu1  ;;  %3240 = vrot.lane.b32.xlu1 %v17717_v30, %s15954_s29  ;;  %3195 = vrot.lane.b32.xlu0 %v17717_v30, %s15961_s0  ;;  %v2074_v9 = vmax.f32 %v17259_v58, %v2062_v60 }
 0x2be   :  { %v2090_v38 = vpop.permute.xlu0 %2089  ;;  %2663 = vst.msk [vmem:[#allocation2 + $0x1f0] sm:$0xff] %vm333_vm3, %v2656_v54  ;;  %v17756_v19 = vpop.f32.mrf.mxu0 }
 0x2bf   :  { %v2657_v55 = vmax.f32 %v2651_v12, 0.0  ;;  %v2103_v1 = vmax.f32 %v17241_v61, %v2090_v38  ;;  %21055 = vst [vmem:[#allocation39_spill] sm:$0xff] %v17756_v19  ;;  %v17758_v63 = vpop.f32.mrf.mxu1 }
 0x2c0   :  { %21056 = vst [vmem:[#allocation45_spill] sm:$0xff] %v17758_v63  ;;  %v2092_v57 = vpop.permute.xlu1 %2091  ;;  %v14072_v6 = vpop.f32.mrf.mxu0 }
 0x2c1   :  { %2665 = vst.msk [vmem:[#allocation2 + $0x288] sm:$0xff] %vm333_vm3, %v2657_v55  ;;  %v2109_v47 = vmax.f32 %v2073_v2, %v2103_v1  ;;  %v2104_v4 = vmax.f32 %v17269_v32, %v2092_v57  ;;  %v14124_v56 = vpop.f32.mrf.mxu1  ;;  %2978 = vrot.lane.b32.xlu0 %v17736_v13, %s15954_s29  ;;  %2933 = vrot.lane.b32.xlu1 %v17736_v13, %s15961_s0 }
 0x2c2   :  { %v2597_v17 = vpop.permute.xlu0 %2596  ;;  %v17768_v39 = vpop.f32.mrf.mxu0 }
 0x2c3   :  { %v2115_v8 = vadd.f32 %v17733_v37, %v2109_v47  ;;  %v2110_v61 = vmax.f32 %v2074_v9, %v2104_v4  ;;  %21057 = vst [vmem:[#allocation40_spill] sm:$0xff] %v17768_v39  ;;  %v17770_v59 = vpop.f32.mrf.mxu1  ;;  %14282 = vmatmul.mubr.msk.bf16.gmra.mxu0 %vm333_vm3, %v17473_v16  ;;  %14334 = vmatmul.mubr.msk.bf16.gmra.mxu1 %vm333_vm3, %v17473_v16 }
 0x2c4   :  { %21058 = vst [vmem:[#allocation49_spill] sm:$0xff] %v17770_v59  ;;  %v2599_v58 = vpop.permute.xlu1 %2598  ;;  %14337 = vmatprep.mubr.msk.bf16.mxu1 %vm15960_vm2, %v20930_v40  ;;  %14285 = vmatprep.mubr.msk.bf16.mxu0 %vm15960_vm2, %v20930_v40  ;;  %v14075_v0 = vpop.f32.mrf.mxu0  ;;  %v2610_v11 = vmax.f32 %v17320_v35, %v2597_v17 }
 0x2c5   :  { %v2121_v32 = vmax.f32 %v2115_v8, 0.0  ;;  %v2116_v27 = vadd.f32 %v17733_v37, %v2110_v61  ;;  %v14127_v23 = vpop.f32.mrf.mxu1  ;;  %3242 = vrot.lane.b32.xlu0 %v17738_v50, %s15954_s29  ;;  %3197 = vrot.lane.b32.xlu1 %v17738_v50, %s15961_s0  ;;  %v2611_v45 = vmax.f32 %v17365_v10, %v2599_v58 }
 0x2c6   :  { %v2627_v34 = vpop.permute.xlu0 %2626  ;;  %v17788_v60 = vpop.f32.mrf.mxu0  ;;  %v21062_v23 = vld [vmem:[#allocation65_spill] sm:$0xff] }
 0x2c7   :  { %2129 = vst.msk [vmem:[#allocation2 + $0x248] sm:$0xff] %vm333_vm3, %v2121_v32  ;;  %v2122_v16 = vmax.f32 %v2116_v27, 0.0  ;;  %v2640_v25 = vmax.f32 %v17346_v20, %v2627_v34  ;;  %21059 = vst [vmem:[#allocation47_spill] sm:$0xff] %v17788_v60  ;;  %v17790_v54 = vpop.f32.mrf.mxu1  ;;  %v21061_v27 = vld [vmem:[#allocation64_spill] sm:$0xff] }
 0x2c8   :  { %21060 = vst [vmem:[#allocation56_spill] sm:$0xff] %v17790_v54  ;;  %v2629_v12 = vpop.permute.xlu1 %2628  ;;  %v14076_v55 = vpop.f32.mrf.mxu0 }
 0x2c9   :  { %2130 = vst.msk [vmem:[#allocation2 + $0x250] sm:$0xff] %vm333_vm3, %v2122_v16  ;;  %v2646_v15 = vmax.f32 %v2610_v11, %v2640_v25  ;;  %v2641_v38 = vmax.f32 %v17388_v52, %v2629_v12  ;;  %v14128_v2 = vpop.f32.mrf.mxu1  ;;  %2980 = vrot.lane.b32.xlu1 %v17756_v19, %s15954_s29  ;;  %2935 = vrot.lane.b32.xlu0 %v17756_v19, %s15961_s0  ;;  %v21063_v11 = vld [vmem:[#allocation66_spill] sm:$0xff] }
 0x2ca   :  { %v2410_v1 = vpop.permute.xlu0 %2409 }
 0x2cb   :  { %v2652_v35 = vadd.f32 %v17733_v37, %v2646_v15  ;;  %v2647_v20 = vmax.f32 %v2611_v45, %v2641_v38  ;;  %14286 = vmatmul.mubr.msk.bf16.gmra.mxu0 %vm333_vm3, %v17503_v5  ;;  %14338 = vmatmul.mubr.msk.bf16.gmra.mxu1 %vm333_vm3, %v17503_v5  ;;  %v2427_v47 = vmax.f32 %v17278_v33, %v2410_v1  ;;  %v21064_v45 = vld [vmem:[#allocation67_spill] sm:$0xff] }
 0x2cc   :  { %v2412_v10 = vpop.permute.xlu1 %2411  ;;  %14341 = vmatprep.mubr.msk.bf16.mxu1 %vm15960_vm2, %v20930_v40  ;;  %14289 = vmatprep.mubr.msk.bf16.mxu0 %vm15960_vm2, %v20930_v40 }
 0x2cd   :  { %v2658_v52 = vmax.f32 %v2652_v35, 0.0  ;;  %v2653_v57 = vadd.f32 %v17733_v37, %v2647_v20  ;;  %3244 = vrot.lane.b32.xlu1 %v17758_v63, %s15954_s29  ;;  %3199 = vrot.lane.b32.xlu0 %v17758_v63, %s15961_s0  ;;  %v2428_v56 = vmax.f32 %v17323_v42, %v2412_v10 }
 0x2ce   :  { %v2440_v9 = vpop.permute.xlu0 %2439 }
 0x2cf   :  { %2666 = vst.msk [vmem:[#allocation2 + $0x290] sm:$0xff] %vm333_vm3, %v2658_v52  ;;  %v2659_v5 = vmax.f32 %v2653_v57, 0.0  ;;  %v2457_v4 = vmax.f32 %v17300_v3, %v2440_v9 }
 0x2d0   :  { %v2442_v6 = vpop.permute.xlu1 %2441 }
 0x2d1   :  { %2667 = vst.msk [vmem:[#allocation2 + $0x298] sm:$0xff] %vm333_vm3, %v2659_v5  ;;  %v2463_v17 = vmax.f32 %v2427_v47, %v2457_v4  ;;  %v2458_v8 = vmax.f32 %v17348_v22, %v2442_v6  ;;  %2982 = vrot.lane.b32.xlu0 %v17768_v39, %s15954_s29  ;;  %2937 = vrot.lane.b32.xlu1 %v17768_v39, %s15961_s0  ;;  %v21065_v47 = vld [vmem:[#allocation32_spill] sm:$0xff]  ;;  %v21066_v6 = vld [vmem:[#allocation35_spill] sm:$0xff] }
 0x2d2   :  { %v2414_v61 = vpop.permute.xlu0 %2413 }
 0x2d3   :  { %v2469_v58 = vadd.f32 %v17733_v37, %v2463_v17  ;;  %v2464_v33 = vmax.f32 %v2428_v56, %v2458_v8  ;;  %14290 = vmatmul.mubr.msk.bf16.gmra.mxu0 %vm333_vm3, %v17525_v29  ;;  %14342 = vmatmul.mubr.msk.bf16.gmra.mxu1 %vm333_vm3, %v17525_v29  ;;  %v2429_v0 = vmax.f32 %v21061_v27, %v2414_v61 }
 0x2d4   :  { %v2416_v3 = vpop.permute.xlu1 %2415  ;;  %14345 = vmatprep.mubr.msk.bf16.mxu1 %vm15960_vm2, %v20930_v40  ;;  %14293 = vmatprep.mubr.msk.bf16.mxu0 %vm15960_vm2, %v20930_v40 }
 0x2d5   :  { %v2475_v42 = vmax.f32 %v2469_v58, 0.0  ;;  %v2470_v22 = vadd.f32 %v17733_v37, %v2464_v33  ;;  %3246 = vrot.lane.b32.xlu0 %v17770_v59, %s15954_s29  ;;  %3201 = vrot.lane.b32.xlu1 %v17770_v59, %s15961_s0  ;;  %v2430_v25 = vmax.f32 %v21063_v11, %v2416_v3  ;;  %v21067_v58 = vld [vmem:[#allocation38_spill] sm:$0xff] }
 0x2d6   :  { %v2444_v32 = vpop.permute.xlu0 %2443 }
 0x2d7   :  { %2482 = vst.msk [vmem:[#allocation2 + $0x1c8] sm:$0xff] %vm333_vm3, %v2475_v42  ;;  %v2476_v29 = vmax.f32 %v2470_v22, 0.0  ;;  %v2459_v34 = vmax.f32 %v21062_v23, %v2444_v32  ;;  %v21068_v42 = vld [vmem:[#allocation28_spill] sm:$0xff] }
 0x2d8   :  { %v2446_v16 = vpop.permute.xlu1 %2445 }
 0x2d9   :  { %2483 = vst.msk [vmem:[#allocation2 + $0x1d0] sm:$0xff] %vm333_vm3, %v2476_v29  ;;  %v2465_v12 = vmax.f32 %v2429_v0, %v2459_v34  ;;  %v2460_v15 = vmax.f32 %v21064_v45, %v2446_v16  ;;  %2984 = vrot.lane.b32.xlu1 %v17788_v60, %s15954_s29  ;;  %2939 = vrot.lane.b32.xlu0 %v17788_v60, %s15961_s0  ;;  %v4441_v60 = vld [vmem:[#allocation2 + $0x1c0] sm:$0xff] }
 0x2da   :  { %v2418_v38 = vpop.permute.xlu0 %2417  ;;  %v2864_v1 = vpop.f32.mrf.mxu0 }
 0x2db   :  { %v2471_v55 = vadd.f32 %v17733_v37, %v2465_v12  ;;  %v2466_v2 = vmax.f32 %v2430_v25, %v2460_v15  ;;  %v3128_v35 = vpop.f32.mrf.mxu1  ;;  %14294 = vmatmul.mubr.msk.bf16.gmra.mxu0 %vm333_vm3, %v17543_v48  ;;  %14346 = vmatmul.mubr.msk.bf16.gmra.mxu1 %vm333_vm3, %v17543_v48  ;;  %v2431_v4 = vmax.f32 %v21065_v47, %v2418_v38 }
 0x2dc   :  { %v2420_v20 = vpop.permute.xlu1 %2419  ;;  %14297 = vmatprep.mubr.msk.bf16.mxu0 %vm15960_vm2, %v20930_v40  ;;  %14349 = vmatprep.mubr.msk.bf16.mxu1 %vm15960_vm2, %v20930_v40  ;;  %v14079_v57 = vpop.f32.mrf.mxu0 }
 0x2dd   :  { %v2477_v10 = vmax.f32 %v2471_v55, 0.0  ;;  %v2472_v52 = vadd.f32 %v17733_v37, %v2466_v2  ;;  %v14131_v9 = vpop.f32.mrf.mxu1  ;;  %3248 = vrot.lane.b32.xlu1 %v17790_v54, %s15954_s29  ;;  %3203 = vrot.lane.b32.xlu0 %v17790_v54, %s15961_s0  ;;  %v2432_v33 = vmax.f32 %v21067_v58, %v2420_v20  ;;  %v4428_v20 = vld [vmem:[#allocation2 + $0x158] sm:$0xff]  ;;  %v4427_v57 = vld [vmem:[#allocation2 + $0x150] sm:$0xff] }
 0x2de   :  { %v2448_v5 = vpop.permute.xlu0 %2447  ;;  %v2867_v17 = vpop.f32.mrf.mxu0  ;;  %v17920_v58 = vld [vmem:[#allocation10 + $0x50] sm:$0xff]  }
 0x2df   :  { %2484 = vst.msk [vmem:[#allocation2 + $0x1d8] sm:$0xff] %vm333_vm3, %v2477_v10  ;;  %v2478_v48 = vmax.f32 %v2472_v52, 0.0  ;;  %v2461_v56 = vmax.f32 %v21066_v6, %v2448_v5  ;;  %v3131_v8 = vpop.f32.mrf.mxu1 }
 0x2e0   :  { %v2450_v61 = vpop.permute.xlu1 %2449  ;;  %v14080_v32 = vpop.f32.mrf.mxu0 }
 0x2e1   :  { %2486 = vst.msk [vmem:[#allocation2 + $0x270] sm:$0xff] %vm333_vm3, %v2478_v48  ;;  %v2467_v3 = vmax.f32 %v2431_v4, %v2461_v56  ;;  %v2462_v22 = vmax.f32 %v21068_v42, %v2450_v61  ;;  %v14132_v29 = vpop.f32.mrf.mxu1  ;;  %2986 = vrot.lane.b32.xlu0 %v2864_v1, %s15954_s29  ;;  %2941 = vrot.lane.b32.xlu1 %v2864_v1, %s15961_s0  ;;  %v17908_v4 = vld [vmem:[#allocation10 + $0x58] sm:$0xff]  }
 0x2e2   :  { %v2872_v23 = vpop.f32.mrf.mxu0 }
 0x2e3   :  { %v2473_v27 = vadd.f32 %v17733_v37, %v2467_v3  ;;  %v2468_v0 = vmax.f32 %v2432_v33, %v2462_v22  ;;  %v3136_v34 = vpop.f32.mrf.mxu1  ;;  %14298 = vmatmul.mubr.msk.bf16.gmra.mxu0 %vm333_vm3, %v17561_v43  ;;  %14350 = vmatmul.mubr.msk.bf16.gmra.mxu1 %vm333_vm3, %v17561_v43 }
 0x2e4   :  { %14301 = vmatprep.mubr.msk.bf16.mxu0 %vm15960_vm2, %v20930_v40  ;;  %14353 = vmatprep.mubr.msk.bf16.mxu1 %vm15960_vm2, %v20930_v40  ;;  %v14083_v25 = vpop.f32.mrf.mxu0 }
 0x2e5   :  { %v2479_v16 = vmax.f32 %v2473_v27, 0.0  ;;  %v2474_v11 = vadd.f32 %v17733_v37, %v2468_v0  ;;  %v14135_v12 = vpop.f32.mrf.mxu1  ;;  %3250 = vrot.lane.b32.xlu0 %v3128_v35, %s15954_s29  ;;  %3205 = vrot.lane.b32.xlu1 %v3128_v35, %s15961_s0  ;;  %v17938_v27 = vld [vmem:[#allocation10 + $0x48] sm:$0xff]  }
 0x2e6   :  { %v2875_v15 = vpop.f32.mrf.mxu0  ;;  %v4432_v0 = vld [vmem:[#allocation2 + $0x178] sm:$0xff]  ;;  %v17949_v12 = vld [vmem:[#allocation10 + $0x40] sm:$0xff]  }
 0x2e7   :  { %2487 = vst.msk [vmem:[#allocation2 + $0x278] sm:$0xff] %vm333_vm3, %v2479_v16  ;;  %v2480_v45 = vmax.f32 %v2474_v11, 0.0  ;;  %v17882_v43 = vpop.f32.mrf.mxu1  ;;  %v4431_v16 = vld [vmem:[#allocation2 + $0x170] sm:$0xff] }
 0x2e8   :  { %v14084_v38 = vpop.f32.mrf.mxu0 }
 0x2e9   :  { %2488 = vst.msk [vmem:[#allocation2 + $0x280] sm:$0xff] %vm333_vm3, %v2480_v45  ;;  %v14136_v55 = vpop.f32.mrf.mxu1  ;;  %2988 = vrot.lane.b32.xlu1 %v2867_v17, %s15954_s29  ;;  %2943 = vrot.lane.b32.xlu0 %v2867_v17, %s15961_s0  ;;  %v4430_v17 = vld [vmem:[#allocation2 + $0x168] sm:$0xff] }
 0x2ea   :  { %v2880_v37 = vpop.f32.mrf.mxu0  ;;  %v4434_v38 = vld [vmem:[#allocation2 + $0x188] sm:$0xff] }
 0x2eb   :  { %v3144_v2 = vpop.f32.mrf.mxu1  ;;  %14302 = vmatmul.mubr.msk.bf16.gmra.mxu0 %vm333_vm3, %v17579_v41  ;;  %14354 = vmatmul.mubr.msk.bf16.gmra.mxu1 %vm333_vm3, %v17579_v41  ;;  %v17899_v41 = vpack.c.bf16 %v4428_v20, %v4427_v57 }
 0x2ec   :  { %14365 = vmatprep.mubr.msk.bf16.mxu0 %vm15960_vm2, %v20930_v40  ;;  %14417 = vmatprep.mubr.msk.bf16.mxu1 %vm15960_vm2, %v20930_v40  ;;  %v14087_v1 = vpop.f32.mrf.mxu0 }
 0x2ed   :  { %v14139_v35 = vpop.f32.mrf.mxu1  ;;  %3252 = vrot.lane.b32.xlu1 %v3131_v8, %s15954_s29  ;;  %3207 = vrot.lane.b32.xlu0 %v3131_v8, %s15961_s0 }
 0x2ee   :  { %v2883_v10 = vpop.f32.mrf.mxu0 }
 0x2ef   :  { %v17897_v52 = vpop.f32.mrf.mxu1 }
 0x2f0   :  { %v14088_v9 = vpop.f32.mrf.mxu0 }
 0x2f1   :  { %v14140_v5 = vpop.f32.mrf.mxu1  ;;  %2990 = vrot.lane.b32.xlu0 %v2872_v23, %s15954_s29  ;;  %2945 = vrot.lane.b32.xlu1 %v2872_v23, %s15961_s0 }
 0x2f2   :  { %v2888_v48 = vpop.f32.mrf.mxu0 }
 0x2f3   :  { %v3152_v47 = vpop.f32.mrf.mxu1  ;;  %14366 = vmatmul.mubr.msk.bf16.vlgmr.msra.gmra.mxu0 %vm333_vm3, %v17899_v41  ;;  %14418 = vmatmul.mubr.msk.bf16.vlgmr.msra.gmra.mxu1 %vm333_vm3, %v17899_v41 }
 0x2f4   :  { %14514 = vmatpush3.bf16.msra.mxu1 %v17607_v36  ;;  %14462 = vmatpush3.bf16.msra.mxu0 %v17908_v4  ;;  %v14091_v6 = vpop.f32.mrf.mxu0  ;;  %v4429_v36 = vld [vmem:[#allocation2 + $0x160] sm:$0xff] }
 0x2f5   :  { %v14143_v56 = vpop.f32.mrf.mxu1  ;;  %14369 = vmatprep.mubr.msk.bf16.mxu0 %vm15960_vm2, %v20930_v40  ;;  %14421 = vmatprep.mubr.msk.bf16.mxu1 %vm15960_vm2, %v20930_v40  ;;  %v17923_v42 = vpack.c.bf16 %v4430_v17, %v4429_v36  ;;  %v4436_v36 = vld [vmem:[#allocation2 + $0x198] sm:$0xff] }
 0x2f6   :  { %3254 = vrot.lane.b32.xlu0 %v3136_v34, %s15954_s29  ;;  %3209 = vrot.lane.b32.xlu1 %v3136_v34, %s15961_s0  ;;  %v2890_v8 = vpop.f32.mrf.mxu0 }
 0x2f7   :  { %v3154_v61 = vpop.f32.mrf.mxu1  ;;  %14515 = vmatprep.subr.bf16.mxu1 %v20930_v40  ;;  %14463 = vmatprep.subr.bf16.mxu0 %v20930_v40 }
 0x2f8   :  { %14516 = vmatpush3.bf16.msra.mxu1 %v17630_v14  ;;  %14464 = vmatpush3.bf16.msra.mxu0 %v17920_v58  ;;  %v14092_v33 = vpop.f32.mrf.mxu0 }
 0x2f9   :  { %v14144_v3 = vpop.f32.mrf.mxu1  ;;  %14517 = vmatprep.subr.bf16.mxu1 %v20930_v40  ;;  %14465 = vmatprep.subr.bf16.mxu0 %v20930_v40 }
 0x2fa   :  { %2992 = vrot.lane.b32.xlu1 %v2875_v15, %s15954_s29  ;;  %2994 = vrot.lane.b32.xlu0 %v2880_v37, %s15954_s29  ;;  %v2894_v22 = vpop.f32.mrf.mxu0 }
 0x2fb   :  { %v3158_v32 = vpop.f32.mrf.mxu1  ;;  %14370 = vmatmul.mubr.msk.bf16.gmra.mxu0 %vm333_vm3, %v17923_v42  ;;  %14422 = vmatmul.mubr.msk.bf16.gmra.mxu1 %vm333_vm3, %v17923_v42 }
 0x2fc   :  { %14373 = vmatprep.mubr.msk.bf16.mxu0 %vm15960_vm2, %v20930_v40  ;;  %14425 = vmatprep.mubr.msk.bf16.mxu1 %vm15960_vm2, %v20930_v40  ;;  %v14095_v14 = vpop.f32.mrf.mxu0 }
 0x2fd   :  { %v14147_v29 = vpop.f32.mrf.mxu1  ;;  %14518 = vmatpush3.bf16.msra.mxu1 %v17654_v18  ;;  %14466 = vmatpush3.bf16.msra.mxu0 %v17938_v27  ;;  %v17946_v18 = vpack.c.bf16 %v4432_v0, %v4431_v16 }
 0x2fe   :  { %3256 = vrot.lane.b32.xlu1 %v17882_v43, %s15954_s29  ;;  %3258 = vrot.lane.b32.xlu0 %v3144_v2, %s15954_s29  ;;  %v2896_v23 = vpop.f32.mrf.mxu0  ;;  %v4435_v29 = vld [vmem:[#allocation2 + $0x190] sm:$0xff] }
 0x2ff   :  { %v3160_v34 = vpop.f32.mrf.mxu1  ;;  %14519 = vmatprep.subr.bf16.mxu1 %v20930_v40  ;;  %14467 = vmatprep.subr.bf16.mxu0 %v20930_v40 }
 0x300   :  { %v14096_v11 = vpop.f32.mrf.mxu0  ;;  %v17999_v34 = vpack.c.bf16 %v4436_v36, %v4435_v29 }
 0x301   :  { %v14148_v25 = vpop.f32.mrf.mxu1  ;;  %14520 = vmatpush3.bf16.msra.mxu1 %v17674_v46  ;;  %14468 = vmatpush3.bf16.msra.mxu0 %v17949_v12 }
 0x302   :  { %2996 = vrot.lane.b32.xlu1 %v2883_v10, %s15954_s29  ;;  %14617 = vmatprep.subr.bf16.mxu1 %v20930_v40  ;;  %v3344_v45 = vpop.f32.mrf.mxu0  ;;  %v4433_v10 = vld [vmem:[#allocation2 + $0x180] sm:$0xff] }
 0x303   :  { %v17954_v15 = vpop.f32.mrf.mxu1  ;;  %14374 = vmatmul.mubr.msk.bf16.gmra.mxu0 %vm333_vm3, %v17946_v18  ;;  %14426 = vmatmul.mubr.msk.bf16.gmra.mxu1 %vm333_vm3, %v17946_v18  ;;  %v3440_v2 = vrot.slane %v3344_v45, 1  ;;  %v17968_v5 = vpack.c.bf16 %v4434_v38, %v4433_v10 }
 0x304   :  { %14377 = vmatprep.mubr.msk.bf16.mxu0 %vm15960_vm2, %v20930_v40  ;;  %14429 = vmatprep.mubr.msk.bf16.mxu1 %vm15960_vm2, %v20930_v40  ;;  %v14159_v46 = vpop.f32.mrf.mxu0  ;;  %v20796_v1 = vrot.slane %v17954_v15, 7 }
 0x305   :  { %v14211_v43 = vpop.f32.mrf.mxu1  ;;  %14565 = vmatprep.subr.bf16.mxu0 %v20930_v40 }
 0x306   :  { %3260 = vrot.lane.b32.xlu1 %v17897_v52, %s15954_s29  ;;  %v3347_v55 = vpop.f32.mrf.mxu0 }
 0x307   :  { %v3698_v37 = vpop.f32.mrf.mxu1  ;;  %v3441_v35 = vrot.slane %v3347_v55, 1 }
 0x308   :  { %v3792_v20 = vrot.slane %v3698_v37, 7  ;;  %v14160_v57 = vpop.f32.mrf.mxu0 }
 0x309   :  { %v14212_v9 = vpop.f32.mrf.mxu1  ;;  %v17976_v52 = vsel %vm3439_vm5, %v3440_v2, %v3441_v35 }
 0x30a   :  { %v17973_v48 = vsel %vm3790_vm4, %v20796_v1, %v3792_v20 }
 0x30b   :  { %v17978_v47 = vpop.f32.mrf.mxu0  ;;  %v3703_v6 = vpop.f32.mrf.mxu1  ;;  %14378 = vmatmul.mubr.msk.bf16.gmra.mxu0 %vm333_vm3, %v17968_v5  ;;  %14430 = vmatmul.mubr.msk.bf16.gmra.mxu1 %vm333_vm3, %v17968_v5 }
 0x30c   :  { %v20795_v56 = vrot.slane %v17978_v47, 1  ;;  %v3794_v17 = vrot.slane %v3703_v6, 7  ;;  %14433 = vmatprep.mubr.msk.bf16.mxu1 %vm15960_vm2, %v20930_v40  ;;  %14381 = vmatprep.mubr.msk.bf16.mxu0 %vm15960_vm2, %v20930_v40  ;;  %v4437_v6 = vld [vmem:[#allocation2 + $0x1a0] sm:$0xff] }
 0x30d   :  { %v14163_v8 = vpop.f32.mrf.mxu0  ;;  %v14215_v61 = vpop.f32.mrf.mxu1 }
 0x30e   :  { %v17992_v33 = vsel %vm3439_vm5, %v3441_v35, %v20795_v56  ;;  %v17995_v3 = vsel %vm3790_vm4, %v3792_v20, %v3794_v17  ;;  %v4438_v20 = vld [vmem:[#allocation2 + $0x1a8] sm:$0xff] }
 0x30f   :  { %v3355_v22 = vpop.f32.mrf.mxu0  ;;  %v3706_v32 = vpop.f32.mrf.mxu1  ;;  %v18028_v61 = vpack.c.bf16 %v4438_v20, %v4437_v6 }
 0x310   :  { %v17997_v14 = vrot.slane %v3706_v32, 7  ;;  %v3445_v45 = vrot.slane %v3355_v22, 1 }
 0x311   :  { %v14164_v0 = vpop.f32.mrf.mxu0  ;;  %v14216_v23 = vpop.f32.mrf.mxu1 }
 0x312   :  { %21069 = vst [vmem:[#allocation52_spill] sm:$0xff] %v17997_v14  ;;  %v18001_v16 = vpop.permute.xlu0 %2923  ;;  %3843 = vrot.lane.b32.xlu0 %v17997_v14, %s15961_s0 }
 0x313   :  { %v3360_v11 = vpop.f32.mrf.mxu0  ;;  %v3711_v25 = vpop.f32.mrf.mxu1  ;;  %14382 = vmatmul.mubr.msk.bf16.gmra.mxu0 %vm333_vm3, %v17999_v34  ;;  %14434 = vmatmul.mubr.msk.bf16.gmra.mxu1 %vm333_vm3, %v17999_v34 }
 0x314   :  { %v3446_v46 = vrot.slane %v3360_v11, 1  ;;  %v3797_v43 = vrot.slane %v3711_v25, 7  ;;  %14437 = vmatprep.mubr.msk.bf16.mxu1 %vm15960_vm2, %v20930_v40  ;;  %14385 = vmatprep.mubr.msk.bf16.mxu0 %vm15960_vm2, %v20930_v40 }
 0x315   :  { %v14167_v38 = vpop.f32.mrf.mxu0  ;;  %v14219_v55 = vpop.f32.mrf.mxu1 }
 0x316   :  { %v18013_v37 = vpop.permute.xlu0 %3187  ;;  %v18017_v2 = vsel %vm3790_vm4, %v17997_v14, %v3797_v43  ;;  %v18020_v35 = vsel %vm3439_vm5, %v3445_v45, %v3446_v46  ;;  %v18030_v36 = vpop.permute.xlu1 %2925 }
 0x317   :  { %21070 = vst [vmem:[#allocation51_spill] sm:$0xff] %v18017_v2  ;;  %21071 = vst [vmem:[#allocation57_spill] sm:$0xff] %v18020_v35  ;;  %v3714_v10 = vpop.f32.mrf.mxu1  ;;  %3845 = vrot.lane.b32.xlu1 %v18017_v2, %s15961_s0  ;;  %3492 = vrot.lane.b32.xlu0 %v18020_v35, %s15961_s0  ;;  %v3363_v57 = vpop.f32.mrf.mxu0 }
 0x318   :  { %v18026_v9 = vrot.slane %v3363_v57, 1  ;;  %v3799_v29 = vrot.slane %v3714_v10, 7 }
 0x319   :  { %v14168_v17 = vpop.f32.mrf.mxu0  ;;  %v14220_v8 = vpop.f32.mrf.mxu1 }
 0x31a   :  { %21072 = vst [vmem:[#allocation48_spill] sm:$0xff] %v18026_v9  ;;  %v18032_v22 = vpop.permute.xlu0 %2927  ;;  %v18036_v32 = vsel %vm3439_vm5, %v3446_v46, %v18026_v9  ;;  %v4440_v46 = vld [vmem:[#allocation2 + $0x1b8] sm:$0xff]  ;;  %v18055_v55 = vsel %vm3790_vm4, %v3797_v43, %v3799_v29  ;;  %v18057_v10 = vpop.permute.xlu1 %3189  ;;  %v4439_v8 = vld [vmem:[#allocation2 + $0x1b0] sm:$0xff] }
 0x31b   :  { %21073 = vst [vmem:[#allocation50_spill] sm:$0xff] %v18036_v32  ;;  %v3719_v0 = vpop.f32.mrf.mxu1  ;;  %14386 = vmatmul.mubr.msk.bf16.gmra.mxu0 %vm333_vm3, %v18028_v61  ;;  %14438 = vmatmul.mubr.msk.bf16.gmra.mxu1 %vm333_vm3, %v18028_v61  ;;  %v3368_v23 = vpop.f32.mrf.mxu0  ;;  %21075 = vst [vmem:[#allocation63_spill] sm:$0xff] %v18055_v55 }
 0x31c   :  { %v18042_v11 = vrot.slane %v3719_v0, 7  ;;  %3496 = vrot.lane.b32.xlu0 %v18026_v9, %s15961_s0  ;;  %3494 = vrot.lane.b32.xlu1 %v18036_v32, %s15961_s0  ;;  %v3450_v57 = vrot.slane %v3368_v23, 1 }
 0x31d   :  { %v14171_v25 = vpop.f32.mrf.mxu0  ;;  %v14223_v45 = vpop.f32.mrf.mxu1  ;;  %14389 = vmatprep.mubr.msk.bf16.mxu0 %vm15960_vm2, %v20930_v40  ;;  %14441 = vmatprep.mubr.msk.bf16.mxu1 %vm15960_vm2, %v20930_v40 }
 0x31e   :  { %21074 = vst [vmem:[#allocation60_spill] sm:$0xff] %v18042_v11  ;;  %v18059_v6 = vpop.permute.xlu0 %3191  ;;  %v18065_v45 = vpack.c.bf16 %v4440_v46, %v4439_v8  ;;  %v4442_v8 = vld [vmem:[#allocation2 + $0x1c8] sm:$0xff] }
 0x31f   :  { %v18052_v38 = vpop.f32.mrf.mxu1  ;;  %v3371_v20 = vpop.f32.mrf.mxu0  ;;  %v18101_v59 = vpack.c.bf16 %v4442_v8, %v4441_v60  ;;  %v4444_v8 = vld [vmem:[#allocation2 + $0x1d8] sm:$0xff] }
 0x320   :  { %3847 = vrot.lane.b32.xlu0 %v18055_v55, %s15961_s0  ;;  %3849 = vrot.lane.b32.xlu1 %v18042_v11, %s15961_s0  ;;  %v3451_v17 = vrot.slane %v3371_v20, 1  ;;  %v3802_v29 = vrot.slane %v18052_v38, 7  ;;  %v4445_v55 = vld [vmem:[#allocation2 + $0x1e0] sm:$0xff] }
 0x321   :  { %v14172_v0 = vpop.f32.mrf.mxu0  ;;  %v14224_v25 = vpop.f32.mrf.mxu1 }
 0x322   :  { %v18068_v43 = vsel %vm3439_vm5, %v3450_v57, %v3451_v17  ;;  %v18089_v25 = vsel %vm3790_vm4, %v18042_v11, %v3802_v29 }
 0x323   :  { %21076 = vst [vmem:[#allocation58_spill] sm:$0xff] %v18068_v43  ;;  %v3727_v23 = vpop.f32.mrf.mxu1  ;;  %14390 = vmatmul.mubr.msk.bf16.gmra.mxu0 %vm333_vm3, %v18065_v45  ;;  %14442 = vmatmul.mubr.msk.bf16.gmra.mxu1 %vm333_vm3, %v18065_v45  ;;  %v3376_v56 = vpop.f32.mrf.mxu0  ;;  %21078 = vst [vmem:[#allocation61_spill] sm:$0xff] %v18089_v25 }
 0x324   :  { %3899 = vrot.lane.b32.xlu0 %v18042_v11, %s15954_s29  ;;  %3498 = vrot.lane.b32.xlu1 %v18068_v43, %s15961_s0  ;;  %v18079_v46 = vpop.permute.xlu0 %2974  ;;  %v18081_v20 = vpop.permute.xlu1 %2929  ;;  %v18103_v19 = vrot.slane %v3376_v56, 1  ;;  %v3804_v26 = vrot.slane %v3727_v23, 7  ;;  %v4443_v11 = vld [vmem:[#allocation2 + $0x1d0] sm:$0xff] }
 0x325   :  { %21077 = vst [vmem:[#allocation59_spill] sm:$0xff] %v18081_v20  ;;  %v14175_v57 = vpop.f32.mrf.mxu0  ;;  %v14227_v38 = vpop.f32.mrf.mxu1  ;;  %14393 = vmatprep.mubr.msk.bf16.mxu0 %vm15960_vm2, %v20930_v40  ;;  %14445 = vmatprep.mubr.msk.bf16.mxu1 %vm15960_vm2, %v20930_v40  ;;  %v18139_v30 = vpack.c.bf16 %v4444_v8, %v4443_v11 }
 0x326   :  { %21080 = vst [vmem:[#allocation64_spill] sm:$0xff] %v18103_v19 }
 0x327   :  { %v3730_v0 = vpop.f32.mrf.mxu1  ;;  %v18091_v1 = vpop.f32.mrf.mxu0 }
 0x328   :  { %3548 = vrot.lane.b32.xlu0 %v18068_v43, %s15954_s29  ;;  %3901 = vrot.lane.b32.xlu1 %v18089_v25, %s15954_s29  ;;  %v18097_v57 = vpop.permute.xlu0 %3238  ;;  %v18099_v38 = vpop.permute.xlu1 %3193  ;;  %v18129_v43 = vsel %vm3439_vm5, %v3451_v17, %v18103_v19  ;;  %v18148_v17 = vsel %vm3790_vm4, %v3802_v29, %v3804_v26  ;;  %v18164_v26 = vrot.slane %v3730_v0, 7  ;;  %v4446_v29 = vld [vmem:[#allocation2 + $0x1e8] sm:$0xff]  ;;  %v3455_v0 = vrot.slane %v18091_v1, 1 }
 0x329   :  { %21079 = vst [vmem:[#allocation62_spill] sm:$0xff] %v18099_v38  ;;  %v14176_v54 = vpop.f32.mrf.mxu0  ;;  %v14228_v39 = vpop.f32.mrf.mxu1  ;;  %21082 = vst [vmem:[#allocation66_spill] sm:$0xff] %v18129_v43 }
 0x32a   :  { %21084 = vst [vmem:[#allocation32_spill] sm:$0xff] %v18148_v17  ;;  %21086 = vst [vmem:[#allocation38_spill] sm:$0xff] %v18164_v26 }
 0x32b   :  { %v18105_v13 = vpop.f32.mrf.mxu1  ;;  %14394 = vmatmul.mubr.msk.bf16.gmra.mxu0 %vm333_vm3, %v18101_v59  ;;  %14446 = vmatmul.mubr.msk.bf16.gmra.mxu1 %vm333_vm3, %v18101_v59  ;;  %v18111_v63 = vpop.f32.mrf.mxu0 }
 0x32c   :  { %3851 = vrot.lane.b32.xlu0 %v18089_v25, %s15961_s0  ;;  %3502 = vrot.lane.b32.xlu1 %v18103_v19, %s15961_s0  ;;  %v18117_v39 = vpop.permute.xlu1 %2976  ;;  %v18119_v60 = vpop.permute.xlu0 %2931  ;;  %v3456_v32 = vrot.slane %v18111_v63, 1  ;;  %v18180_v63 = vpack.c.bf16 %v4446_v29, %v4445_v55  ;;  %v3807_v7 = vrot.slane %v18105_v13, 7 }
 0x32d   :  { %21081 = vst [vmem:[#allocation65_spill] sm:$0xff] %v18119_v60  ;;  %v14179_v54 = vpop.f32.mrf.mxu0  ;;  %v14231_v56 = vpop.f32.mrf.mxu1  ;;  %14397 = vmatprep.mubr.msk.bf16.mxu0 %vm15960_vm2, %v20930_v40  ;;  %14449 = vmatprep.mubr.msk.bf16.mxu1 %vm15960_vm2, %v20930_v40 }
 0x32f   :  { %v18125_v50 = vpop.f32.mrf.mxu1  ;;  %v3387_v25 = vpop.f32.mrf.mxu0 }
 0x330   :  { %3552 = vrot.lane.b32.xlu0 %v18103_v19, %s15954_s29  ;;  %3550 = vrot.lane.b32.xlu1 %v18129_v43, %s15954_s29  ;;  %v18135_v54 = vpop.permute.xlu1 %3240  ;;  %v18137_v56 = vpop.permute.xlu0 %3195  ;;  %v18224_v31 = vrot.slane %v3387_v25, 1 }
 0x331   :  { %21083 = vst [vmem:[#allocation67_spill] sm:$0xff] %v18137_v56  ;;  %v14180_v24 = vpop.f32.mrf.mxu0  ;;  %v14232_v23 = vpop.f32.mrf.mxu1 }
 0x332   :  { %21094 = vst [vmem:[#allocation74_spill] sm:$0xff] %v18224_v31 }
 0x333   :  { %v18141_v28 = vpop.f32.mrf.mxu1  ;;  %14398 = vmatmul.mubr.msk.bf16.gmra.mxu0 %vm333_vm3, %v18139_v30  ;;  %14450 = vmatmul.mubr.msk.bf16.gmra.mxu1 %vm333_vm3, %v18139_v30  ;;  %v18150_v19 = vpop.f32.mrf.mxu0 }
 0x334   :  { %3853 = vrot.lane.b32.xlu1 %v18148_v17, %s15961_s0  ;;  %3500 = vrot.lane.b32.xlu0 %v18129_v43, %s15961_s0  ;;  %v18156_v24 = vpop.permute.xlu0 %2978  ;;  %v18158_v11 = vpop.permute.xlu1 %2933 }
 0x335   :  { %21085 = vst [vmem:[#allocation35_spill] sm:$0xff] %v18158_v11  ;;  %v14183_v8 = vpop.f32.mrf.mxu0  ;;  %v14235_v23 = vpop.f32.mrf.mxu1  ;;  %14401 = vmatprep.mubr.msk.bf16.mxu0 %vm15960_vm2, %v20930_v40  ;;  %14453 = vmatprep.mubr.msk.bf16.mxu1 %vm15960_vm2, %v20930_v40 }
 0x337   :  { %v18167_v9 = vpop.f32.mrf.mxu1  ;;  %v18169_v43 = vpop.f32.mrf.mxu0 }
 0x338   :  { %3905 = vrot.lane.b32.xlu1 %v18164_v26, %s15954_s29  ;;  %3903 = vrot.lane.b32.xlu0 %v18148_v17, %s15954_s29  ;;  %v18175_v8 = vpop.permute.xlu0 %3242  ;;  %v18177_v23 = vpop.permute.xlu1 %3197  ;;  %v18190_v17 = vsel %vm3439_vm5, %v3455_v0, %v3456_v32  ;;  %v18210_v0 = vsel %vm3790_vm4, %v18164_v26, %v3807_v7 }
 0x339   :  { %21087 = vst [vmem:[#allocation28_spill] sm:$0xff] %v18177_v23  ;;  %v14184_v35 = vpop.f32.mrf.mxu0  ;;  %v14236_v11 = vpop.f32.mrf.mxu1  ;;  %21088 = vst [vmem:[#allocation68_spill] sm:$0xff] %v18190_v17 }
 0x33a   :  { %v4447_v11 = vld [vmem:[#allocation2 + $0x1f0] sm:$0xff]  ;;  %21091 = vst [vmem:[#allocation71_spill] sm:$0xff] %v18210_v0 }
 0x33b   :  { %v18183_v60 = vpop.f32.mrf.mxu1  ;;  %14402 = vmatmul.mubr.msk.bf16.gmra.mxu0 %vm333_vm3, %v18180_v63  ;;  %14454 = vmatmul.mubr.msk.bf16.gmra.mxu1 %vm333_vm3, %v18180_v63  ;;  %v18192_v51 = vpop.f32.mrf.mxu0  ;;  %v18222_v23 = vpack.c.bf16 %v4447_v11, %v4447_v11 }
 0x33c   :  { %3855 = vrot.lane.b32.xlu0 %v18164_v26, %s15961_s0  ;;  %3554 = vrot.lane.b32.xlu1 %v18190_v17, %s15954_s29  ;;  %v18198_v13 = vpop.permute.xlu1 %2980  ;;  %v18200_v1 = vpop.permute.xlu0 %2935 }
 0x33d   :  { %21089 = vst [vmem:[#allocation69_spill] sm:$0xff] %v18198_v13  ;;  %21090 = vst [vmem:[#allocation70_spill] sm:$0xff] %v18200_v1  ;;  %v14187_v35 = vpop.f32.mrf.mxu0  ;;  %v14239_v55 = vpop.f32.mrf.mxu1  ;;  %14405 = vmatprep.mubr.msk.bf16.mxu0 %vm15960_vm2, %v20930_v40  ;;  %14457 = vmatprep.mubr.msk.bf16.mxu1 %vm15960_vm2, %v20930_v40 }
 0x33f   :  { %v18206_v29 = vpop.f32.mrf.mxu1  ;;  %v18212_v2 = vpop.f32.mrf.mxu0 }
 0x340   :  { %3857 = vrot.lane.b32.xlu1 %v18210_v0, %s15961_s0  ;;  %3504 = vrot.lane.b32.xlu0 %v18190_v17, %s15961_s0  ;;  %v18218_v35 = vpop.permute.xlu1 %3244  ;;  %v18220_v55 = vpop.permute.xlu0 %3199  ;;  %v5258_v17 = vld [vmem:[#allocation2 + $0x200] sm:$0xff] }
 0x341   :  { %21092 = vst [vmem:[#allocation72_spill] sm:$0xff] %v18218_v35  ;;  %21093 = vst [vmem:[#allocation73_spill] sm:$0xff] %v18220_v55  ;;  %v14188_v1 = vpop.f32.mrf.mxu0  ;;  %v14240_v13 = vpop.f32.mrf.mxu1 }
 0x343   :  { %v18226_v26 = vpop.f32.mrf.mxu1  ;;  %14406 = vmatmul.mubr.msk.bf16.gmra.mxu0 %vm333_vm3, %v18222_v23  ;;  %14458 = vmatmul.mubr.msk.bf16.gmra.mxu1 %vm333_vm3, %v18222_v23  ;;  %v18232_v14 = vpop.f32.mrf.mxu0 }
 0x344   :  { %3907 = vrot.lane.b32.xlu0 %v18210_v0, %s15954_s29  ;;  %3558 = vrot.lane.b32.xlu1 %v18224_v31, %s15954_s29  ;;  %v18238_v13 = vpop.permute.xlu0 %2982  ;;  %v18240_v25 = vpop.permute.xlu1 %2937  ;;  %v18250_v0 = vsel %vm3439_vm5, %v3456_v32, %v18224_v31 }
 0x345   :  { %21095 = vst [vmem:[#allocation75_spill] sm:$0xff] %v18238_v13  ;;  %21096 = vst [vmem:[#allocation76_spill] sm:$0xff] %v18240_v25  ;;  %v14191_v1 = vpop.f32.mrf.mxu0  ;;  %v14243_v11 = vpop.f32.mrf.mxu1  ;;  %14469 = vmatprep.mubr.msk.bf16.mxu0 %vm15960_vm2, %v20930_v40  ;;  %14521 = vmatprep.mubr.msk.bf16.mxu1 %vm15960_vm2, %v20930_v40  ;;  %v3809_v13 = vrot.slane %v18125_v50, 7  ;;  %v5257_v25 = vld [vmem:[#allocation2 + $0x1f8] sm:$0xff] }
 0x346   :  { %21097 = vst [vmem:[#allocation77_spill] sm:$0xff] %v18250_v0  ;;  %v18263_v56 = vpack.c.bf16 %v5258_v17, %v5257_v25 }
 0x347   :  { %v18246_v55 = vpop.f32.mrf.mxu1  ;;  %v18252_v20 = vpop.f32.mrf.mxu0 }
 0x348   :  { %3508 = vrot.lane.b32.xlu0 %v18224_v31, %s15961_s0  ;;  %3506 = vrot.lane.b32.xlu1 %v18250_v0, %s15961_s0  ;;  %v18259_v1 = vpop.permute.xlu0 %3246  ;;  %v18261_v11 = vpop.permute.xlu1 %3201  ;;  %v18273_v31 = vsel %vm3790_vm4, %v3807_v7, %v3809_v13  ;;  %v3838_v7 = vrot.slane %v18141_v28, 7 }
 0x349   :  { %21098 = vst [vmem:[#allocation78_spill] sm:$0xff] %v18259_v1  ;;  %21099 = vst [vmem:[#allocation79_spill] sm:$0xff] %v18261_v11  ;;  %v14192_v44 = vpop.f32.mrf.mxu0  ;;  %v14244_v35 = vpop.f32.mrf.mxu1 }
 0x34a   :  { %21100 = vst [vmem:[#allocation80_spill] sm:$0xff] %v18273_v31 }
 0x34b   :  { %v3767_v32 = vpop.f32.mrf.mxu1  ;;  %14522 = vmatmul.mubr.msk.bf16.vlgmr.msra.gmra.mxu1 %vm333_vm3, %v18263_v56  ;;  %v3416_v50 = vpop.f32.mrf.mxu0  ;;  %14470 = vmatmul.mubr.msk.bf16.vlgmr.msra.gmra.mxu0 %vm333_vm3, %v17899_v41  ;;  %v5260_v41 = vld [vmem:[#allocation2 + $0x210] sm:$0xff] }
 0x34c   :  { %14618 = vmatpush3.bf16.msra.mxu1 %v17908_v4  ;;  %3556 = vrot.lane.b32.xlu0 %v18250_v0, %s15954_s29  ;;  %v18275_v44 = vpop.permute.xlu1 %2984  ;;  %v18277_v17 = vpop.permute.xlu0 %2939  ;;  %v15083_v32 = vld [vmem:[#allocation10 + $0x38] sm:$0xff]   ;;  %v15084_v0 = vld [vmem:[#allocation10 + $0x30] sm:$0xff]   ;;  %v3487_v50 = vrot.slane %v18150_v19, 1 }
 0x34d   :  { %21101 = vst [vmem:[#allocation81_spill] sm:$0xff] %v18275_v44  ;;  %21102 = vst [vmem:[#allocation82_spill] sm:$0xff] %v18277_v17  ;;  %3909 = vrot.lane.b32.xlu1 %v18273_v31, %s15954_s29  ;;  %v14195_v35 = vpop.f32.mrf.mxu0  ;;  %v14247_v25 = vpop.f32.mrf.mxu1  ;;  %14566 = vmatpush3.bf16.msra.mxu0 %v15083_v32  ;;  %v5259_v32 = vld [vmem:[#allocation2 + $0x208] sm:$0xff] }
 0x34e   :  { %14473 = vmatprep.mubr.msk.bf16.mxu0 %vm15960_vm2, %v20930_v40  ;;  %14525 = vmatprep.mubr.msk.bf16.mxu1 %vm15960_vm2, %v20930_v40 }
 0x34f   :  { %v3769_v4 = vpop.f32.mrf.mxu1  ;;  %v3418_v13 = vpop.f32.mrf.mxu0  ;;  %14619 = vmatprep.subr.bf16.mxu1 %v20930_v40  ;;  %14567 = vmatprep.subr.bf16.mxu0 %v20930_v40 }
 0x350   :  { %3859 = vrot.lane.b32.xlu0 %v18273_v31, %s15961_s0  ;;  %v18291_v35 = vpop.permute.xlu1 %3248  ;;  %v18293_v25 = vpop.permute.xlu0 %3203  ;;  %14620 = vmatpush3.bf16.msra.mxu1 %v17920_v58  ;;  %v18297_v13 = vpack.c.bf16 %v5260_v41, %v5259_v32  ;;  %v3839_v58 = vrot.slane %v18167_v9, 7  ;;  %v5262_v9 = vld [vmem:[#allocation2 + $0x220] sm:$0xff]  ;;  %v15085_v32 = vld [vmem:[#allocation10 + $0x28] sm:$0xff]  }
 0x351   :  { %21103 = vst [vmem:[#allocation83_spill] sm:$0xff] %v18291_v35  ;;  %21104 = vst [vmem:[#allocation84_spill] sm:$0xff] %v18293_v25  ;;  %3861 = vrot.lane.b32.xlu1 %v3838_v7, %s15961_s0  ;;  %v14196_v28 = vpop.f32.mrf.mxu0  ;;  %v14248_v4 = vpop.f32.mrf.mxu1  ;;  %14568 = vmatpush3.bf16.msra.mxu0 %v15084_v0  ;;  %v21105_v0 = vrot.slane %v18169_v43, 1 }
 0x352   :  { %14621 = vmatprep.subr.bf16.mxu1 %v20930_v40  ;;  %14569 = vmatprep.subr.bf16.mxu0 %v20930_v40  ;;  %v3840_v4 = vsel %vm3790_vm4, %v3838_v7, %v3839_v58 }
 0x353   :  { %v3773_v31 = vpop.f32.mrf.mxu1  ;;  %14526 = vmatmul.mubr.msk.bf16.gmra.mxu1 %vm333_vm3, %v18297_v13  ;;  %v3422_v17 = vpop.f32.mrf.mxu0  ;;  %14474 = vmatmul.mubr.msk.bf16.gmra.mxu0 %vm333_vm3, %v17923_v42  ;;  %v3489_v19 = vsel %vm3439_vm5, %v3487_v50, %v21105_v0 }
 0x354   :  { %3911 = vrot.lane.b32.xlu0 %v3838_v7, %s15954_s29  ;;  %v18311_v41 = vpop.permute.xlu1 %2941  ;;  %14477 = vmatprep.mubr.msk.bf16.mxu0 %vm15960_vm2, %v20930_v40  ;;  %v18318_v42 = vpop.permute.xlu0 %2986 }
 0x355   :  { %21106 = vst [vmem:[#allocation85_spill] sm:$0xff] %v18311_v41  ;;  %3510 = vrot.lane.b32.xlu1 %v3489_v19, %s15961_s0  ;;  %v14199_v31 = vpop.f32.mrf.mxu0  ;;  %v14251_v17 = vpop.f32.mrf.mxu1  ;;  %14529 = vmatprep.mubr.msk.bf16.mxu1 %vm15960_vm2, %v20930_v40  ;;  %21107 = vst [vmem:[#allocation86_spill] sm:$0xff] %v18318_v42 }
 0x356   :  { %14622 = vmatpush3.bf16.msra.mxu1 %v17938_v27  ;;  %14570 = vmatpush3.bf16.msra.mxu0 %v15085_v32  ;;  %v5261_v31 = vld [vmem:[#allocation2 + $0x218] sm:$0xff]  ;;  %v15086_v32 = vld [vmem:[#allocation10 + $0x20] sm:$0xff]  }
 0x357   :  { %v3775_v50 = vpop.f32.mrf.mxu1  ;;  %v3424_v28 = vpop.f32.mrf.mxu0  ;;  %14623 = vmatprep.subr.bf16.mxu1 %v20930_v40  ;;  %14571 = vmatprep.subr.bf16.mxu0 %v20930_v40  ;;  %v18328_v27 = vpack.c.bf16 %v5262_v9, %v5261_v31  ;;  %v5264_v9 = vld [vmem:[#allocation2 + $0x230] sm:$0xff] }
 0x358   :  { %3560 = vrot.lane.b32.xlu0 %v3489_v19, %s15954_s29  ;;  %v18325_v0 = vpop.permute.xlu1 %3205  ;;  %v3490_v50 = vrot.slane %v18192_v51, 1  ;;  %v18340_v19 = vpop.permute.xlu0 %3250 }
 0x359   :  { %21108 = vst [vmem:[#allocation87_spill] sm:$0xff] %v18325_v0  ;;  %3913 = vrot.lane.b32.xlu1 %v3840_v4, %s15954_s29  ;;  %v14200_v17 = vpop.f32.mrf.mxu0  ;;  %v14252_v41 = vpop.f32.mrf.mxu1  ;;  %21109 = vst [vmem:[#allocation88_spill] sm:$0xff] %v18340_v19 }
 0x35a   :  { %14624 = vmatpush3.bf16.msra.mxu1 %v17949_v12  ;;  %14572 = vmatpush3.bf16.msra.mxu0 %v15086_v32  ;;  %v3841_v17 = vrot.slane %v18183_v60, 7 }
 0x35b   :  { %v18332_v28 = vpop.f32.mrf.mxu1  ;;  %14530 = vmatmul.mubr.msk.bf16.gmra.mxu1 %vm333_vm3, %v18328_v27  ;;  %v18336_v7 = vpop.f32.mrf.mxu0  ;;  %14478 = vmatmul.mubr.msk.bf16.gmra.mxu0 %vm333_vm3, %v17946_v18 }
 0x35c   :  { %3863 = vrot.lane.b32.xlu0 %v3840_v4, %s15961_s0  ;;  %v18343_v41 = vpop.permute.xlu1 %2988  ;;  %14481 = vmatprep.mubr.msk.bf16.mxu0 %vm15960_vm2, %v20930_v40  ;;  %v21112_v4 = vrot.slane %v18169_v43, 1  ;;  %v18364_v42 = vpop.permute.xlu0 %2943  ;;  %v3842_v43 = vsel %vm3790_vm4, %v3839_v58, %v3841_v17 }
 0x35d   :  { %21110 = vst [vmem:[#allocation89_spill] sm:$0xff] %v18343_v41  ;;  %3514 = vrot.lane.b32.xlu1 %v3490_v50, %s15961_s0  ;;  %v14263_v51 = vpop.f32.mrf.mxu0  ;;  %v14315_v12 = vpop.f32.mrf.mxu1  ;;  %14533 = vmatprep.mubr.msk.bf16.mxu1 %vm15960_vm2, %v20930_v40  ;;  %21114 = vst [vmem:[#allocation92_spill] sm:$0xff] %v18364_v42 }
 0x35e   :  { %v3491_v32 = vsel %vm3439_vm5, %v21112_v4, %v3490_v50  ;;  %v5263_v51 = vld [vmem:[#allocation2 + $0x228] sm:$0xff]  ;;  %v5266_v4 = vld [vmem:[#allocation2 + $0x240] sm:$0xff] }
 0x35f   :  { %v18350_v31 = vpop.f32.mrf.mxu1  ;;  %v18352_v18 = vpop.f32.mrf.mxu0  ;;  %v18362_v25 = vpack.c.bf16 %v5264_v9, %v5263_v51  ;;  %v3894_v51 = vrot.slane %v18206_v29, 7  ;;  %v3543_v29 = vrot.slane %v18212_v2, 1 }
 0x360   :  { %21111 = vst [vmem:[#allocation90_spill] sm:$0xff] %v18352_v18  ;;  %3564 = vrot.lane.b32.xlu0 %v3490_v50, %s15954_s29  ;;  %v18359_v0 = vpop.permute.xlu1 %3252  ;;  %v21147_v18 = vld [vmem:[#allocation53_spill] sm:$0xff] }
 0x361   :  { %21113 = vst [vmem:[#allocation91_spill] sm:$0xff] %v18359_v0  ;;  %3562 = vrot.lane.b32.xlu1 %v3491_v32, %s15954_s29  ;;  %v14264_v12 = vpop.f32.mrf.mxu0  ;;  %v14316_v41 = vpop.f32.mrf.mxu1  ;;  %v3224_v21 = vadd.f32 %v18057_v10, %v21147_v18 }
 0x362   :  { %v18390_v12 = vpop.permute.xlu0 %3207 }
 0x363   :  { %v18366_v19 = vpop.f32.mrf.mxu1  ;;  %14534 = vmatmul.mubr.msk.bf16.gmra.mxu1 %vm333_vm3, %v18362_v25  ;;  %v18370_v60 = vpop.f32.mrf.mxu0  ;;  %14482 = vmatmul.mubr.msk.bf16.gmra.mxu0 %vm333_vm3, %v17968_v5  ;;  %v3895_v5 = vrot.slane %v18226_v26, 7  ;;  %21119 = vst [vmem:[#allocation97_spill] sm:$0xff] %v18390_v12  ;;  %v3546_v26 = vrot.slane %v18252_v20, 1  ;;  %v3275_v62 = vadd.f32 %v18135_v54, %v3224_v21 }
 0x364   :  { %21115 = vst [vmem:[#allocation93_spill] sm:$0xff] %v18366_v19  ;;  %3512 = vrot.lane.b32.xlu0 %v3491_v32, %s15961_s0  ;;  %14485 = vmatprep.mubr.msk.bf16.mxu0 %vm15960_vm2, %v20930_v40  ;;  %v18381_v9 = vpop.permute.xlu1 %2945  ;;  %v3544_v32 = vrot.slane %v18232_v14, 1 }
 0x365   :  { %3865 = vrot.lane.b32.xlu1 %v3842_v43, %s15961_s0  ;;  %v14267_v50 = vpop.f32.mrf.mxu0  ;;  %v14319_v41 = vpop.f32.mrf.mxu1  ;;  %14537 = vmatprep.mubr.msk.bf16.mxu1 %vm15960_vm2, %v20930_v40  ;;  %21116 = vst [vmem:[#allocation94_spill] sm:$0xff] %v18381_v9  ;;  %v3896_v14 = vsel %vm3790_vm4, %v3894_v51, %v3895_v5 }
 0x366   :  { %v5265_v50 = vld [vmem:[#allocation2 + $0x238] sm:$0xff]  ;;  %v3545_v2 = vsel %vm3439_vm5, %v3543_v29, %v3544_v32  ;;  %v3897_v29 = vrot.slane %v18246_v55, 7 }
 0x367   :  { %v18385_v58 = vpop.f32.mrf.mxu1  ;;  %v18387_v17 = vpop.f32.mrf.mxu0  ;;  %v18394_v42 = vpack.c.bf16 %v5266_v4, %v5265_v50  ;;  %v3547_v50 = vsel %vm3439_vm5, %v3544_v32, %v3546_v26 }
 0x368   :  { %21117 = vst [vmem:[#allocation95_spill] sm:$0xff] %v18385_v58  ;;  %21118 = vst [vmem:[#allocation96_spill] sm:$0xff] %v18387_v17  ;;  %3915 = vrot.lane.b32.xlu0 %v3842_v43, %s15954_s29  ;;  %v18407_v43 = vpop.permute.xlu1 %3209  ;;  %v18416_v4 = vpop.permute.xlu0 %2990 }
 0x369   :  { %3917 = vrot.lane.b32.xlu1 %v3894_v51, %s15954_s29  ;;  %v14268_v41 = vpop.f32.mrf.mxu0  ;;  %v14320_v9 = vpop.f32.mrf.mxu1  ;;  %21122 = vst [vmem:[#allocation100_spill] sm:$0xff] %v18407_v43  ;;  %21123 = vst [vmem:[#allocation101_spill] sm:$0xff] %v18416_v4  ;;  %v5268_v51 = vld [vmem:[#allocation2 + $0x250] sm:$0xff] }
 0x36b   :  { %v18398_v0 = vpop.f32.mrf.mxu1  ;;  %14538 = vmatmul.mubr.msk.bf16.gmra.mxu1 %vm333_vm3, %v18394_v42  ;;  %v18403_v12 = vpop.f32.mrf.mxu0  ;;  %14486 = vmatmul.mubr.msk.bf16.gmra.mxu0 %vm333_vm3, %v17999_v34 }
 0x36c   :  { %21120 = vst [vmem:[#allocation98_spill] sm:$0xff] %v18398_v0  ;;  %21121 = vst [vmem:[#allocation99_spill] sm:$0xff] %v18403_v12  ;;  %3919 = vrot.lane.b32.xlu0 %v3896_v14, %s15954_s29  ;;  %14489 = vmatprep.mubr.msk.bf16.mxu0 %vm15960_vm2, %v20930_v40  ;;  %v5267_v14 = vld [vmem:[#allocation2 + $0x248] sm:$0xff]  ;;  %v18428_v43 = vpop.permute.xlu1 %2992  ;;  %v18438_v32 = vpop.permute.xlu0 %3254 }
 0x36d   :  { %3566 = vrot.lane.b32.xlu1 %v3545_v2, %s15954_s29  ;;  %v14271_v20 = vpop.f32.mrf.mxu0  ;;  %v14323_v9 = vpop.f32.mrf.mxu1  ;;  %14541 = vmatprep.mubr.msk.bf16.mxu1 %vm15960_vm2, %v20930_v40  ;;  %21126 = vst [vmem:[#allocation104_spill] sm:$0xff] %v18428_v43  ;;  %21129 = vst [vmem:[#allocation107_spill] sm:$0xff] %v18438_v32 }
 0x36e   :  { %v18426_v9 = vpack.c.bf16 %v5268_v51, %v5267_v14 }
 0x36f   :  { %v18418_v34 = vpop.f32.mrf.mxu1  ;;  %v18421_v41 = vpop.f32.mrf.mxu0 }
 0x370   :  { %21124 = vst [vmem:[#allocation102_spill] sm:$0xff] %v18418_v34  ;;  %21125 = vst [vmem:[#allocation103_spill] sm:$0xff] %v18421_v41  ;;  %3568 = vrot.lane.b32.xlu0 %v3547_v50, %s15954_s29 }
 0x371   :  { %3570 = vrot.lane.b32.xlu1 %v3546_v26, %s15954_s29  ;;  %v14272_v2 = vpop.f32.mrf.mxu0  ;;  %v14324_v20 = vpop.f32.mrf.mxu1  ;;  %v3898_v26 = vsel %vm3790_vm4, %v3895_v5, %v3897_v29  ;;  %v5269_v5 = vld [vmem:[#allocation2 + $0x258] sm:$0xff] }
 0x372   :  { %v18452_v20 = vpop.permute.xlu1 %3256 }
 0x373   :  { %v18430_v4 = vpop.f32.mrf.mxu1  ;;  %14542 = vmatmul.mubr.msk.bf16.gmra.mxu1 %vm333_vm3, %v18426_v9  ;;  %14490 = vmatmul.mubr.msk.bf16.gmra.mxu0 %vm333_vm3, %v18028_v61  ;;  %v18436_v55 = vpop.f32.mrf.mxu0  ;;  %v5270_v61 = vld [vmem:[#allocation2 + $0x260] sm:$0xff]  ;;  %21132 = vst [vmem:[#allocation110_spill] sm:$0xff] %v18452_v20 }
 0x374   :  { %21127 = vst [vmem:[#allocation105_spill] sm:$0xff] %v18430_v4  ;;  %21128 = vst [vmem:[#allocation106_spill] sm:$0xff] %v18436_v55  ;;  %4088 = vrot.lane.b32.xlu0 %v18387_v17, %s15961_s0  ;;  %14493 = vmatprep.mubr.msk.bf16.mxu0 %vm15960_vm2, %v20930_v40 }
 0x375   :  { %3921 = vrot.lane.b32.xlu1 %v3898_v26, %s15954_s29  ;;  %v14275_v51 = vpop.f32.mrf.mxu0  ;;  %v14327_v50 = vpop.f32.mrf.mxu1  ;;  %14545 = vmatprep.mubr.msk.bf16.mxu1 %vm15960_vm2, %v20930_v40 }
 0x376   :  { %v18458_v51 = vpack.c.bf16 %v5270_v61, %v5269_v5  ;;  %v18460_v50 = vpop.permute.xlu0 %2994 }
 0x377   :  { %v18448_v14 = vpop.f32.mrf.mxu1  ;;  %v18450_v2 = vpop.f32.mrf.mxu0  ;;  %21133 = vst [vmem:[#allocation111_spill] sm:$0xff] %v18460_v50 }
 0x378   :  { %21130 = vst [vmem:[#allocation108_spill] sm:$0xff] %v18448_v14  ;;  %21131 = vst [vmem:[#allocation109_spill] sm:$0xff] %v18450_v2  ;;  %4328 = vrot.lane.b32.xlu0 %v18385_v58, %s15961_s0 }
 0x379   :  { %4090 = vrot.lane.b32.xlu1 %v18403_v12, %s15961_s0  ;;  %v14276_v29 = vpop.f32.mrf.mxu0  ;;  %v14328_v26 = vpop.f32.mrf.mxu1  ;;  %v5271_v12 = vld [vmem:[#allocation2 + $0x268] sm:$0xff] }
 0x37a   :  { %v5272_v29 = vld [vmem:[#allocation2 + $0x270] sm:$0xff]  ;;  %v18484_v32 = vpop.permute.xlu0 %3258 }
 0x37b   :  { %v18462_v43 = vpop.f32.mrf.mxu1  ;;  %14494 = vmatmul.mubr.msk.bf16.gmra.mxu0 %vm333_vm3, %v18065_v45  ;;  %14546 = vmatmul.mubr.msk.bf16.gmra.mxu1 %vm333_vm3, %v18458_v51  ;;  %v18468_v20 = vpop.f32.mrf.mxu0  ;;  %21139 = vst [vmem:[#allocation117_spill] sm:$0xff] %v18484_v32 }
 0x37c   :  { %21134 = vst [vmem:[#allocation112_spill] sm:$0xff] %v18462_v43  ;;  %21135 = vst [vmem:[#allocation113_spill] sm:$0xff] %v18468_v20  ;;  %4092 = vrot.lane.b32.xlu0 %v18421_v41, %s15961_s0  ;;  %14497 = vmatprep.mubr.msk.bf16.mxu0 %vm15960_vm2, %v20930_v40  ;;  %v18478_v45 = vpop.permute.xlu1 %2996  ;;  %v18490_v41 = vpack.c.bf16 %v5272_v29, %v5271_v12 }
 0x37d   :  { %4330 = vrot.lane.b32.xlu1 %v18398_v0, %s15961_s0  ;;  %v14279_v61 = vpop.f32.mrf.mxu0  ;;  %v14331_v5 = vpop.f32.mrf.mxu1  ;;  %14549 = vmatprep.mubr.msk.bf16.mxu1 %vm15960_vm2, %v20930_v40  ;;  %21136 = vst [vmem:[#allocation114_spill] sm:$0xff] %v18478_v45 }
 0x37f   :  { %v18480_v26 = vpop.f32.mrf.mxu1  ;;  %v18482_v50 = vpop.f32.mrf.mxu0 }
 0x380   :  { %21137 = vst [vmem:[#allocation115_spill] sm:$0xff] %v18480_v26  ;;  %21138 = vst [vmem:[#allocation116_spill] sm:$0xff] %v18482_v50  ;;  %4332 = vrot.lane.b32.xlu0 %v18418_v34, %s15961_s0  ;;  %v18500_v32 = vpop.permute.xlu1 %3260 }
 0x381   :  { %4094 = vrot.lane.b32.xlu1 %v18436_v55, %s15961_s0  ;;  %v14280_v61 = vpop.f32.mrf.mxu0  ;;  %v14332_v5 = vpop.f32.mrf.mxu1  ;;  %21142 = vst [vmem:[#allocation120_spill] sm:$0xff] %v18500_v32  ;;  %v5273_v32 = vld [vmem:[#allocation2 + $0x278] sm:$0xff] }
 0x383   :  { %v18492_v11 = vpop.f32.mrf.mxu1  ;;  %14498 = vmatmul.mubr.msk.bf16.gmra.mxu0 %vm333_vm3, %v18101_v59  ;;  %14550 = vmatmul.mubr.msk.bf16.gmra.mxu1 %vm333_vm3, %v18490_v41  ;;  %v18498_v45 = vpop.f32.mrf.mxu0  ;;  %v5274_v59 = vld [vmem:[#allocation2 + $0x280] sm:$0xff] }
 0x384   :  { %21140 = vst [vmem:[#allocation118_spill] sm:$0xff] %v18492_v11  ;;  %21141 = vst [vmem:[#allocation119_spill] sm:$0xff] %v18498_v45  ;;  %4139 = vrot.lane.b32.xlu0 %v18436_v55, %s15954_s29  ;;  %v3844_v34 = vpop.permute.xlu0 %3843  ;;  %14501 = vmatprep.mubr.msk.bf16.mxu0 %vm15960_vm2, %v20930_v40  ;;  %v18518_v0 = vpack.c.bf16 %v5274_v59, %v5273_v32 }
 0x385   :  { %4334 = vrot.lane.b32.xlu1 %v18430_v4, %s15961_s0  ;;  %v14283_v12 = vpop.f32.mrf.mxu0  ;;  %v14335_v29 = vpop.f32.mrf.mxu1  ;;  %14553 = vmatprep.mubr.msk.bf16.mxu1 %vm15960_vm2, %v20930_v40 }
 0x387   :  { %v18510_v61 = vpop.f32.mrf.mxu1  ;;  %v18512_v5 = vpop.f32.mrf.mxu0 }
 0x388   :  { %21143 = vst [vmem:[#allocation121_spill] sm:$0xff] %v18510_v61  ;;  %21144 = vst [vmem:[#allocation122_spill] sm:$0xff] %v18512_v5  ;;  %4379 = vrot.lane.b32.xlu0 %v18430_v4, %s15954_s29 }
 0x389   :  { %4141 = vrot.lane.b32.xlu1 %v18450_v2, %s15954_s29  ;;  %v14336_v55 = vpop.f32.mrf.mxu1  ;;  %v3846_v17 = vpop.permute.xlu1 %3845 }
 0x38a   :  { %v3493_v12 = vpop.permute.xlu0 %3492  ;;  %v14284_v29 = vpop.f32.mrf.mxu0  ;;  %v21145_v55 = vld [vmem:[#allocation36_spill] sm:$0xff] }
 0x38b   :  { %v18520_v58 = vpop.f32.mrf.mxu1  ;;  %14502 = vmatmul.mubr.msk.bf16.gmra.mxu0 %vm333_vm3, %v18139_v30  ;;  %14554 = vmatmul.mubr.msk.bf16.gmra.mxu1 %vm333_vm3, %v18518_v0  ;;  %v3223_v32 = vadd.f32 %v18013_v37, %v21145_v55  ;;  %v5275_v37 = vld [vmem:[#allocation2 + $0x288] sm:$0xff] }
 0x38c   :  { %4096 = vrot.lane.b32.xlu0 %v18450_v2, %s15961_s0  ;;  %v18528_v4 = vpop.f32.mrf.mxu0  ;;  %14505 = vmatprep.mubr.msk.bf16.mxu0 %vm15960_vm2, %v20930_v40  ;;  %v5276_v2 = vld [vmem:[#allocation2 + $0x290] sm:$0xff]  ;;  %v21146_v55 = vld [vmem:[#allocation29_spill] sm:$0xff] }
 0x38d   :  { %4381 = vrot.lane.b32.xlu1 %v18448_v14, %s15954_s29  ;;  %v14339_v59 = vpop.f32.mrf.mxu1  ;;  %14557 = vmatprep.mubr.msk.bf16.mxu1 %vm15960_vm2, %v20930_v40  ;;  %v3274_v44 = vadd.f32 %v18097_v57, %v3223_v32  ;;  %v18555_v57 = vpack.c.bf16 %v5276_v2, %v5275_v37 }
 0x38e   :  { %v18538_v30 = vpop.permute.xlu0 %3496  ;;  %v18540_v29 = vpop.permute.xlu1 %3494  ;;  %v2959_v59 = vadd.f32 %v18001_v16, %v21146_v55  ;;  %v21148_v16 = vrot.slane %v17954_v15, 7 }
 0x38f   :  { %v14287_v35 = vpop.f32.mrf.mxu0  ;;  %v18543_v1 = vpop.f32.mrf.mxu1 }
 0x390   :  { %4336 = vrot.lane.b32.xlu0 %v18448_v14, %s15961_s0  ;;  %v3010_v14 = vadd.f32 %v18079_v46, %v2959_v59  ;;  %v3823_v55 = vadd.f32 %v21148_v16, %v3274_v44  ;;  %v3824_v44 = vadd.f32 %v17973_v48, %v3275_v62 }
 0x391   :  { %4098 = vrot.lane.b32.xlu1 %v18468_v20, %s15961_s0  ;;  %v18553_v19 = vpop.f32.mrf.mxu0  ;;  %v14340_v38 = vpop.f32.mrf.mxu1 }
 0x392   :  { %v18557_v35 = vpop.permute.xlu0 %3847  ;;  %v18559_v32 = vpop.permute.xlu1 %3849  ;;  %v3879_v46 = vadd.f32 %v3844_v34, %v3823_v55  ;;  %v5277_v38 = vld [vmem:[#allocation2 + $0x298] sm:$0xff]  ;;  %v3472_v2 = vadd.f32 %v17976_v52, %v3010_v14  ;;  %v2961_v55 = vadd.f32 %v18032_v22, %v17598_v49 }
 0x393   :  { %v14288_v10 = vpop.f32.mrf.mxu0  ;;  %v18565_v18 = vpop.f32.mrf.mxu1  ;;  %14506 = vmatmul.mubr.msk.bf16.gmra.mxu0 %vm333_vm3, %v18180_v63  ;;  %14558 = vmatmul.mubr.msk.bf16.gmra.mxu1 %vm333_vm3, %v18555_v57  ;;  %v18589_v16 = vpack.c.bf16 %v5277_v38, %v5277_v38 }
 0x394   :  { %4143 = vrot.lane.b32.xlu0 %v18468_v20, %s15954_s29  ;;  %14509 = vmatprep.mubr.msk.bf16.mxu0 %vm15960_vm2, %v20930_v40  ;;  %v3880_v10 = vadd.f32 %v3846_v17, %v3824_v44 }
 0x395   :  { %4338 = vrot.lane.b32.xlu1 %v18462_v43, %s15961_s0  ;;  %v18577_v21 = vpop.f32.mrf.mxu0  ;;  %v14343_v15 = vpop.f32.mrf.mxu1  ;;  %14561 = vmatprep.mubr.msk.bf16.mxu1 %vm15960_vm2, %v20930_v40 }
 0x396   :  { %v3900_v54 = vpop.permute.xlu0 %3899  ;;  %v18581_v63 = vpop.permute.xlu1 %3498  ;;  %v3528_v15 = vadd.f32 %v3493_v12, %v3472_v2 }
 0x397   :  { %v3935_v37 = vadd.f32 %v3900_v54, %v3879_v46  ;;  %v14291_v59 = vpop.f32.mrf.mxu0  ;;  %v18585_v34 = vpop.f32.mrf.mxu1  ;;  %v3012_v54 = vadd.f32 %v18156_v24, %v2961_v55 }
 0x398   :  { %4383 = vrot.lane.b32.xlu0 %v18462_v43, %s15954_s29 }
 0x399   :  { %4145 = vrot.lane.b32.xlu1 %v18482_v50, %s15954_s29  ;;  %v18595_v62 = vpop.f32.mrf.mxu0  ;;  %v14344_v48 = vpop.f32.mrf.mxu1  ;;  %v18598_v52 = vadd.f32 %v18332_v28, %v3935_v37 }
 0x39a   :  { %v3549_v14 = vpop.permute.xlu0 %3548  ;;  %v3902_v46 = vpop.permute.xlu1 %3901 }
 0x39b   :  { %v3584_v38 = vadd.f32 %v3549_v14, %v3528_v15  ;;  %v3936_v59 = vadd.f32 %v3902_v46, %v3880_v10  ;;  %v14292_v20 = vpop.f32.mrf.mxu0  ;;  %v18601_v43 = vpop.f32.mrf.mxu1  ;;  %14562 = vmatmul.mubr.msk.bf16.gmra.mxu1 %vm333_vm3, %v18589_v16  ;;  %14510 = vmatmul.mubr.msk.bf16.gmra.mxu0 %vm333_vm3, %v18222_v23 }
 0x39c   :  { %4100 = vrot.lane.b32.xlu0 %v18482_v50, %s15961_s0  ;;  %14573 = vmatprep.mubr.msk.bf16.mxu0 %vm15960_vm2, %v20930_v40  ;;  %v21149_v20 = vrot.slane %v17978_v47, 1 }
 0x39d   :  { %4385 = vrot.lane.b32.xlu1 %v18480_v26, %s15954_s29  ;;  %v18613_v49 = vpop.f32.mrf.mxu0  ;;  %v14347_v22 = vpop.f32.mrf.mxu1  ;;  %14625 = vmatprep.mubr.msk.bf16.mxu1 %vm15960_vm2, %v20930_v40  ;;  %v18618_v24 = vadd.f32 %v18336_v7, %v3584_v38  ;;  %v18621_v23 = vadd.f32 %v18350_v31, %v3936_v59 }
 0x39e   :  { %v18623_v28 = vpop.permute.xlu0 %3851  ;;  %v18625_v17 = vpop.permute.xlu1 %3502  ;;  %v3474_v12 = vadd.f32 %v21149_v20, %v3012_v54 }
 0x39f   :  { %v14295_v44 = vpop.f32.mrf.mxu0  ;;  %v18629_v2 = vpop.f32.mrf.mxu1 }
 0x3a0   :  { %4340 = vrot.lane.b32.xlu0 %v18480_v26, %s15961_s0  ;;  %v3530_v37 = vadd.f32 %v18538_v30, %v3474_v12 }
 0x3a1   :  { %4102 = vrot.lane.b32.xlu1 %v18498_v45, %s15961_s0  ;;  %v18636_v7 = vpop.f32.mrf.mxu0  ;;  %v14348_v31 = vpop.f32.mrf.mxu1 }
 0x3a2   :  { %v3553_v55 = vpop.permute.xlu0 %3552  ;;  %v18638_v10 = vpop.permute.xlu1 %3550 }
 0x3a3   :  { %v3586_v15 = vadd.f32 %v3553_v55, %v3530_v37  ;;  %v14296_v47 = vpop.f32.mrf.mxu0  ;;  %v4293_v48 = vpop.f32.mrf.mxu1  ;;  %14626 = vmatmul.mubr.msk.bf16.vlgmr.msra.gmra.mxu1 %vm333_vm3, %v18263_v56  ;;  %14574 = vmatmul.mubr.msk.bf16.vlgmr.msra.gmra.mxu0 %vm333_vm3, %v18263_v56 }
 0x3a4   :  { %4147 = vrot.lane.b32.xlu0 %v18498_v45, %s15954_s29  ;;  %14577 = vmatprep.mubr.msk.bf16.mxu0 %vm15960_vm2, %v20930_v40 }
 0x3a5   :  { %4342 = vrot.lane.b32.xlu1 %v18492_v11, %s15961_s0  ;;  %v4053_v30 = vpop.f32.mrf.mxu0  ;;  %v14351_v14 = vpop.f32.mrf.mxu1  ;;  %14629 = vmatprep.mubr.msk.bf16.mxu1 %vm15960_vm2, %v20930_v40  ;;  %v18653_v46 = vadd.f32 %v18370_v60, %v3586_v15 }
 0x3a6   :  { %v18655_v54 = vpop.permute.xlu1 %3853  ;;  %v18657_v56 = vpop.permute.xlu0 %3500 }
 0x3a7   :  { %v14299_v38 = vpop.f32.mrf.mxu0  ;;  %v4295_v59 = vpop.f32.mrf.mxu1 }
 0x3a8   :  { %4387 = vrot.lane.b32.xlu0 %v18492_v11, %s15954_s29 }
 0x3a9   :  { %4149 = vrot.lane.b32.xlu1 %v18512_v5, %s15954_s29  ;;  %v4055_v22 = vpop.f32.mrf.mxu0  ;;  %v14352_v20 = vpop.f32.mrf.mxu1 }
 0x3aa   :  { %v18663_v12 = vpop.permute.xlu1 %3905  ;;  %v18665_v44 = vpop.permute.xlu0 %3903 }
 0x3ab   :  { %v14300_v60 = vpop.f32.mrf.mxu0  ;;  %v4299_v37 = vpop.f32.mrf.mxu1  ;;  %14630 = vmatmul.mubr.msk.bf16.gmra.mxu1 %vm333_vm3, %v18297_v13  ;;  %14578 = vmatmul.mubr.msk.bf16.gmra.mxu0 %vm333_vm3, %v18297_v13 }
 0x3ac   :  { %4104 = vrot.lane.b32.xlu0 %v18512_v5, %s15961_s0  ;;  %14581 = vmatprep.mubr.msk.bf16.mxu0 %vm15960_vm2, %v20930_v40 }
 0x3ad   :  { %4389 = vrot.lane.b32.xlu1 %v18510_v61, %s15954_s29  ;;  %v4059_v31 = vpop.f32.mrf.mxu0  ;;  %v14355_v55 = vpop.f32.mrf.mxu1  ;;  %14633 = vmatprep.mubr.msk.bf16.mxu1 %vm15960_vm2, %v20930_v40 }
 0x3ae   :  { %v18679_v15 = vpop.permute.xlu0 %3855  ;;  %v18681_v47 = vpop.permute.xlu1 %3554 }
 0x3af   :  { %v14303_v48 = vpop.f32.mrf.mxu0  ;;  %v4301_v13 = vpop.f32.mrf.mxu1 }
 0x3b0   :  { %4344 = vrot.lane.b32.xlu0 %v18510_v61, %s15961_s0 }
 0x3b1   :  { %4106 = vrot.lane.b32.xlu1 %v18528_v4, %s15961_s0  ;;  %v4061_v30 = vpop.f32.mrf.mxu0  ;;  %v14356_v14 = vpop.f32.mrf.mxu1 }
 0x3b2   :  { %v18687_v38 = vpop.permute.xlu1 %3857  ;;  %v18689_v59 = vpop.permute.xlu0 %3504 }
 0x3b3   :  { %v14304_v22 = vpop.f32.mrf.mxu0  ;;  %v18691_v20 = vpop.f32.mrf.mxu1  ;;  %14634 = vmatmul.mubr.msk.bf16.gmra.mxu1 %vm333_vm3, %v18328_v27  ;;  %14582 = vmatmul.mubr.msk.bf16.gmra.mxu0 %vm333_vm3, %v18328_v27 }
 0x3b4   :  { %21150 = vst [vmem:[#allocation36_spill] sm:$0xff] %v18691_v20  ;;  %4151 = vrot.lane.b32.xlu0 %v18528_v4, %s15954_s29  ;;  %14585 = vmatprep.mubr.msk.bf16.mxu0 %vm15960_vm2, %v20930_v40 }
 0x3b5   :  { %4346 = vrot.lane.b32.xlu1 %v18520_v58, %s15961_s0  ;;  %v18703_v60 = vpop.f32.mrf.mxu0  ;;  %v14419_v37 = vpop.f32.mrf.mxu1  ;;  %14637 = vmatprep.mubr.msk.bf16.mxu1 %vm15960_vm2, %v20930_v40 }
 0x3b6   :  { %21151 = vst [vmem:[#allocation29_spill] sm:$0xff] %v18703_v60  ;;  %v18707_v31 = vpop.permute.xlu0 %3907  ;;  %v18709_v55 = vpop.permute.xlu1 %3558 }
 0x3b7   :  { %v14367_v27 = vpop.f32.mrf.mxu0  ;;  %v18711_v48 = vpop.f32.mrf.mxu1 }
 0x3b8   :  { %21152 = vst [vmem:[#allocation53_spill] sm:$0xff] %v18711_v48  ;;  %4391 = vrot.lane.b32.xlu0 %v18520_v58, %s15954_s29 }
 0x3b9   :  { %4153 = vrot.lane.b32.xlu1 %v18553_v19, %s15954_s29  ;;  %v18717_v4 = vpop.f32.mrf.mxu0  ;;  %v14420_v13 = vpop.f32.mrf.mxu1 }
 0x3ba   :  { %21153 = vst [vmem:[#allocation123_spill] sm:$0xff] %v18717_v4  ;;  %v18719_v30 = vpop.permute.xlu0 %3508  ;;  %v18721_v14 = vpop.permute.xlu1 %3506 }
 0x3bb   :  { %21154 = vst [vmem:[#allocation124_spill] sm:$0xff] %v18719_v30  ;;  %21155 = vst [vmem:[#allocation125_spill] sm:$0xff] %v18721_v14  ;;  %v14368_v22 = vpop.f32.mrf.mxu0  ;;  %v18723_v37 = vpop.f32.mrf.mxu1  ;;  %14638 = vmatmul.mubr.msk.bf16.gmra.mxu1 %vm333_vm3, %v18362_v25  ;;  %14586 = vmatmul.mubr.msk.bf16.gmra.mxu0 %vm333_vm3, %v18362_v25 }
 0x3bc   :  { %21156 = vst [vmem:[#allocation126_spill] sm:$0xff] %v18723_v37  ;;  %4108 = vrot.lane.b32.xlu0 %v18553_v19, %s15961_s0  ;;  %14589 = vmatprep.mubr.msk.bf16.mxu0 %vm15960_vm2, %v20930_v40 }
 0x3bd   :  { %4393 = vrot.lane.b32.xlu1 %v18543_v1, %s15954_s29  ;;  %v18735_v58 = vpop.f32.mrf.mxu0  ;;  %v14423_v27 = vpop.f32.mrf.mxu1  ;;  %14641 = vmatprep.mubr.msk.bf16.mxu1 %vm15960_vm2, %v20930_v40 }
 0x3be   :  { %21157 = vst [vmem:[#allocation127_spill] sm:$0xff] %v18735_v58  ;;  %v18739_v13 = vpop.permute.xlu0 %3556 }
 0x3bf   :  { %v18741_v22 = vpop.permute.xlu1 %3909  ;;  %v14371_v25 = vpop.f32.mrf.mxu0 }
 0x3c0   :  { %v18743_v20 = vpop.f32.mrf.mxu1  ;;  %4348 = vrot.lane.b32.xlu0 %v18543_v1, %s15961_s0 }
 0x3c1   :  { %21158 = vst [vmem:[#allocation128_spill] sm:$0xff] %v18743_v20  ;;  %4110 = vrot.lane.b32.xlu1 %v18577_v21, %s15961_s0  ;;  %v18749_v19 = vpop.f32.mrf.mxu0 }
 0x3c2   :  { %21159 = vst [vmem:[#allocation129_spill] sm:$0xff] %v18749_v19  ;;  %v14424_v37 = vpop.f32.mrf.mxu1  ;;  %v18751_v27 = vpop.permute.xlu0 %3859 }
 0x3c3   :  { %21160 = vst [vmem:[#allocation130_spill] sm:$0xff] %v18751_v27  ;;  %v18753_v4 = vpop.permute.xlu1 %3861  ;;  %v14372_v58 = vpop.f32.mrf.mxu0  ;;  %14642 = vmatmul.mubr.msk.bf16.gmra.mxu1 %vm333_vm3, %v18394_v42  ;;  %14590 = vmatmul.mubr.msk.bf16.gmra.mxu0 %vm333_vm3, %v18394_v42 }
 0x3c4   :  { %21161 = vst [vmem:[#allocation131_spill] sm:$0xff] %v18753_v4  ;;  %v18759_v25 = vpop.f32.mrf.mxu1  ;;  %4155 = vrot.lane.b32.xlu0 %v18577_v21, %s15954_s29  ;;  %14593 = vmatprep.mubr.msk.bf16.mxu0 %vm15960_vm2, %v20930_v40 }
 0x3c5   :  { %21162 = vst [vmem:[#allocation132_spill] sm:$0xff] %v18759_v25  ;;  %4350 = vrot.lane.b32.xlu1 %v18565_v18, %s15961_s0  ;;  %v18767_v1 = vpop.f32.mrf.mxu0  ;;  %14645 = vmatprep.mubr.msk.bf16.mxu1 %vm15960_vm2, %v20930_v40 }
 0x3c6   :  { %21163 = vst [vmem:[#allocation133_spill] sm:$0xff] %v18767_v1  ;;  %v14427_v37 = vpop.f32.mrf.mxu1  ;;  %v18771_v58 = vpop.permute.xlu0 %3911 }
 0x3c7   :  { %v18773_v42 = vpop.permute.xlu1 %3510  ;;  %v14375_v48 = vpop.f32.mrf.mxu0 }
 0x3c8   :  { %21164 = vst [vmem:[#allocation134_spill] sm:$0xff] %v18773_v42  ;;  %v18775_v60 = vpop.f32.mrf.mxu1  ;;  %4395 = vrot.lane.b32.xlu0 %v18565_v18, %s15954_s29 }
 0x3c9   :  { %21165 = vst [vmem:[#allocation135_spill] sm:$0xff] %v18775_v60  ;;  %4157 = vrot.lane.b32.xlu1 %v18595_v62, %s15954_s29  ;;  %v18781_v21 = vpop.f32.mrf.mxu0 }
 0x3ca   :  { %21166 = vst [vmem:[#allocation136_spill] sm:$0xff] %v18781_v21  ;;  %v14428_v45 = vpop.f32.mrf.mxu1  ;;  %v18783_v5 = vpop.permute.xlu0 %3560 }
 0x3cb   :  { %21167 = vst [vmem:[#allocation137_spill] sm:$0xff] %v18783_v5  ;;  %v18785_v61 = vpop.permute.xlu1 %3913  ;;  %v14376_v37 = vpop.f32.mrf.mxu0  ;;  %14646 = vmatmul.mubr.msk.bf16.gmra.mxu1 %vm333_vm3, %v18426_v9  ;;  %14594 = vmatmul.mubr.msk.bf16.gmra.mxu0 %vm333_vm3, %v18426_v9  ;;  %v21198_v5 = vld [vmem:[#allocation27_spill] sm:$0xff] }
 0x3cc   :  { %v18791_v48 = vpop.f32.mrf.mxu1  ;;  %4159 = vrot.lane.b32.xlu0 %v18613_v49, %s15954_s29  ;;  %14597 = vmatprep.mubr.msk.bf16.mxu0 %vm15960_vm2, %v20930_v40 }
 0x3cd   :  { %21168 = vst [vmem:[#allocation138_spill] sm:$0xff] %v18791_v48  ;;  %4397 = vrot.lane.b32.xlu1 %v18585_v34, %s15954_s29  ;;  %v18799_v45 = vpop.f32.mrf.mxu0  ;;  %14649 = vmatprep.mubr.msk.bf16.mxu1 %vm15960_vm2, %v20930_v40 }
 0x3ce   :  { %21169 = vst [vmem:[#allocation139_spill] sm:$0xff] %v18799_v45  ;;  %v14431_v18 = vpop.f32.mrf.mxu1  ;;  %v18803_v62 = vpop.permute.xlu0 %3863 }
 0x3cf   :  { %21170 = vst [vmem:[#allocation140_spill] sm:$0xff] %v18803_v62  ;;  %v18805_v9 = vpop.permute.xlu1 %3514  ;;  %v14379_v37 = vpop.f32.mrf.mxu0 }
 0x3d0   :  { %21171 = vst [vmem:[#allocation141_spill] sm:$0xff] %v18805_v9  ;;  %v18807_v50 = vpop.f32.mrf.mxu1  ;;  %4399 = vrot.lane.b32.xlu0 %v18601_v43, %s15954_s29 }
 0x3d1   :  { %21172 = vst [vmem:[#allocation142_spill] sm:$0xff] %v18807_v50  ;;  %4161 = vrot.lane.b32.xlu1 %v18636_v7, %s15954_s29  ;;  %v18813_v34 = vpop.f32.mrf.mxu0 }
 0x3d2   :  { %21173 = vst [vmem:[#allocation143_spill] sm:$0xff] %v18813_v34  ;;  %v14432_v49 = vpop.f32.mrf.mxu1  ;;  %v18815_v30 = vpop.permute.xlu0 %3564 }
 0x3d3   :  { %21174 = vst [vmem:[#allocation144_spill] sm:$0xff] %v18815_v30  ;;  %v18817_v11 = vpop.permute.xlu1 %3562  ;;  %v14380_v18 = vpop.f32.mrf.mxu0  ;;  %14650 = vmatmul.mubr.msk.bf16.gmra.mxu1 %vm333_vm3, %v18458_v51  ;;  %14598 = vmatmul.mubr.msk.bf16.gmra.mxu0 %vm333_vm3, %v18458_v51 }
 0x3d4   :  { %21175 = vst [vmem:[#allocation145_spill] sm:$0xff] %v18817_v11  ;;  %v18823_v37 = vpop.f32.mrf.mxu1  ;;  %4633 = vrot.lane.b32.xlu0 %v18749_v19, %s15961_s0  ;;  %14601 = vmatprep.mubr.msk.bf16.mxu0 %vm15960_vm2, %v20930_v40 }
 0x3d5   :  { %21176 = vst [vmem:[#allocation146_spill] sm:$0xff] %v18823_v37  ;;  %4401 = vrot.lane.b32.xlu1 %v18629_v2, %s15954_s29  ;;  %v18831_v43 = vpop.f32.mrf.mxu0  ;;  %14653 = vmatprep.mubr.msk.bf16.mxu1 %vm15960_vm2, %v20930_v40 }
 0x3d6   :  { %21177 = vst [vmem:[#allocation147_spill] sm:$0xff] %v18831_v43  ;;  %v14435_v7 = vpop.f32.mrf.mxu1  ;;  %v18835_v49 = vpop.permute.xlu0 %3512 }
 0x3d7   :  { %21178 = vst [vmem:[#allocation148_spill] sm:$0xff] %v18835_v49  ;;  %v18837_v51 = vpop.permute.xlu1 %3865  ;;  %v14383_v18 = vpop.f32.mrf.mxu0 }
 0x3d8   :  { %21179 = vst [vmem:[#allocation149_spill] sm:$0xff] %v18837_v51  ;;  %v18839_v30 = vpop.f32.mrf.mxu1  ;;  %4873 = vrot.lane.b32.xlu0 %v18743_v20, %s15961_s0 }
 0x3d9   :  { %21180 = vst [vmem:[#allocation150_spill] sm:$0xff] %v18839_v30  ;;  %4635 = vrot.lane.b32.xlu1 %v18767_v1, %s15961_s0  ;;  %v18845_v2 = vpop.f32.mrf.mxu0 }
 0x3da   :  { %21181 = vst [vmem:[#allocation151_spill] sm:$0xff] %v18845_v2  ;;  %v14436_v19 = vpop.f32.mrf.mxu1  ;;  %v18847_v9 = vpop.permute.xlu0 %3915 }
 0x3db   :  { %21182 = vst [vmem:[#allocation152_spill] sm:$0xff] %v18847_v9  ;;  %v18849_v26 = vpop.permute.xlu1 %3917  ;;  %v14384_v7 = vpop.f32.mrf.mxu0  ;;  %14602 = vmatmul.mubr.msk.bf16.gmra.mxu0 %vm333_vm3, %v18490_v41  ;;  %14654 = vmatmul.mubr.msk.bf16.gmra.mxu1 %vm333_vm3, %v18490_v41 }
 0x3dc   :  { %21183 = vst [vmem:[#allocation153_spill] sm:$0xff] %v18849_v26  ;;  %v18855_v18 = vpop.f32.mrf.mxu1  ;;  %4637 = vrot.lane.b32.xlu0 %v18781_v21, %s15961_s0  ;;  %14605 = vmatprep.mubr.msk.bf16.mxu0 %vm15960_vm2, %v20930_v40 }
 0x3dd   :  { %21184 = vst [vmem:[#allocation154_spill] sm:$0xff] %v18855_v18  ;;  %4875 = vrot.lane.b32.xlu1 %v18759_v25, %s15961_s0  ;;  %v18863_v19 = vpop.f32.mrf.mxu0  ;;  %14657 = vmatprep.mubr.msk.bf16.mxu1 %vm15960_vm2, %v20930_v40 }
 0x3de   :  { %21185 = vst [vmem:[#allocation155_spill] sm:$0xff] %v18863_v19  ;;  %v14439_v7 = vpop.f32.mrf.mxu1  ;;  %v18867_v20 = vpop.permute.xlu0 %3919 }
 0x3df   :  { %21186 = vst [vmem:[#allocation156_spill] sm:$0xff] %v18867_v20  ;;  %v18869_v41 = vpop.permute.xlu1 %3566  ;;  %v14387_v1 = vpop.f32.mrf.mxu0 }
 0x3e0   :  { %21187 = vst [vmem:[#allocation157_spill] sm:$0xff] %v18869_v41  ;;  %v18871_v49 = vpop.f32.mrf.mxu1  ;;  %4877 = vrot.lane.b32.xlu0 %v18775_v60, %s15961_s0 }
 0x3e1   :  { %21188 = vst [vmem:[#allocation158_spill] sm:$0xff] %v18871_v49  ;;  %4639 = vrot.lane.b32.xlu1 %v18799_v45, %s15961_s0  ;;  %v18877_v25 = vpop.f32.mrf.mxu0 }
 0x3e2   :  { %21189 = vst [vmem:[#allocation159_spill] sm:$0xff] %v18877_v25  ;;  %v14440_v21 = vpop.f32.mrf.mxu1  ;;  %v18879_v51 = vpop.permute.xlu0 %3568 }
 0x3e3   :  { %21190 = vst [vmem:[#allocation160_spill] sm:$0xff] %v18879_v51  ;;  %v18881_v42 = vpop.permute.xlu1 %3570  ;;  %v14388_v7 = vpop.f32.mrf.mxu0  ;;  %14606 = vmatmul.mubr.msk.bf16.gmra.mxu0 %vm333_vm3, %v18518_v0  ;;  %14658 = vmatmul.mubr.msk.bf16.gmra.mxu1 %vm333_vm3, %v18518_v0 }
 0x3e4   :  { %21191 = vst [vmem:[#allocation161_spill] sm:$0xff] %v18881_v42  ;;  %v18887_v1 = vpop.f32.mrf.mxu1  ;;  %4684 = vrot.lane.b32.xlu0 %v18799_v45, %s15954_s29  ;;  %14609 = vmatprep.mubr.msk.bf16.mxu0 %vm15960_vm2, %v20930_v40 }
 0x3e5   :  { %4879 = vrot.lane.b32.xlu1 %v18791_v48, %s15961_s0  ;;  %v18895_v21 = vpop.f32.mrf.mxu0  ;;  %14661 = vmatprep.mubr.msk.bf16.mxu1 %vm15960_vm2, %v20930_v40 }
 0x3e6   :  { %v14443_v7 = vpop.f32.mrf.mxu1  ;;  %v18899_v60 = vpop.permute.xlu0 %4088 }
 0x3e7   :  { %v18901_v0 = vpop.permute.xlu1 %3921  ;;  %v14391_v51 = vpop.f32.mrf.mxu0 }
 0x3e8   :  { %21192 = vst [vmem:[#allocation162_spill] sm:$0xff] %v18901_v0  ;;  %v18903_v42 = vpop.f32.mrf.mxu1  ;;  %4924 = vrot.lane.b32.xlu0 %v18791_v48, %s15954_s29 }
 0x3e9   :  { %4686 = vrot.lane.b32.xlu1 %v18813_v34, %s15954_s29  ;;  %v18909_v45 = vpop.f32.mrf.mxu0 }
 0x3ea   :  { %v14444_v41 = vpop.f32.mrf.mxu1  ;;  %v4329_v20 = vpop.permute.xlu0 %4328 }
 0x3eb   :  { %v18911_v26 = vpop.permute.xlu1 %4090  ;;  %v14392_v7 = vpop.f32.mrf.mxu0  ;;  %14662 = vmatmul.mubr.msk.bf16.gmra.mxu1 %vm333_vm3, %v18555_v57  ;;  %14610 = vmatmul.mubr.msk.bf16.gmra.mxu0 %vm333_vm3, %v18555_v57 }
 0x3ec   :  { %v18917_v51 = vpop.f32.mrf.mxu1  ;;  %4641 = vrot.lane.b32.xlu0 %v18813_v34, %s15961_s0  ;;  %14613 = vmatprep.mubr.msk.bf16.mxu0 %vm15960_vm2, %v20930_v40 }
 0x3ed   :  { %4926 = vrot.lane.b32.xlu1 %v18807_v50, %s15954_s29  ;;  %v18925_v41 = vpop.f32.mrf.mxu0  ;;  %14665 = vmatprep.mubr.msk.bf16.mxu1 %vm15960_vm2, %v20930_v40 }
 0x3ee   :  { %v14447_v7 = vpop.f32.mrf.mxu1  ;;  %v18929_v48 = vpop.permute.xlu0 %4092 }
 0x3ef   :  { %v4331_v57 = vpop.permute.xlu1 %4330  ;;  %v14395_v0 = vpop.f32.mrf.mxu0 }
 0x3f0   :  { %v18931_v62 = vpop.f32.mrf.mxu1  ;;  %4881 = vrot.lane.b32.xlu0 %v18807_v50, %s15961_s0 }
 0x3f1   :  { %21193 = vst [vmem:[#allocation163_spill] sm:$0xff] %v18931_v62  ;;  %4643 = vrot.lane.b32.xlu1 %v18831_v43, %s15961_s0  ;;  %v18937_v34 = vpop.f32.mrf.mxu0 }
 0x3f2   :  { %21194 = vst [vmem:[#allocation164_spill] sm:$0xff] %v18937_v34  ;;  %v14448_v4 = vpop.f32.mrf.mxu1  ;;  %v18939_v11 = vpop.permute.xlu0 %4332 }
 0x3f3   :  { %v18941_v14 = vpop.permute.xlu1 %4094  ;;  %v14396_v7 = vpop.f32.mrf.mxu0  ;;  %14666 = vmatmul.mubr.msk.bf16.gmra.mxu1 %vm333_vm3, %v18589_v16  ;;  %14614 = vmatmul.mubr.msk.bf16.gmra.mxu0 %vm333_vm3, %v18589_v16  ;;  %v3225_v16 = vadd.f32 %v18059_v6, %v17600_v53 }
 0x3f4   :  { %v18947_v0 = vpop.f32.mrf.mxu1  ;;  %4688 = vrot.lane.b32.xlu0 %v18831_v43, %s15954_s29 }
 0x3f5   :  { %21195 = vst [vmem:[#allocation165_spill] sm:$0xff] %v18947_v0  ;;  %4883 = vrot.lane.b32.xlu1 %v18823_v37, %s15961_s0  ;;  %v18953_v4 = vpop.f32.mrf.mxu0 }
 0x3f6   :  { %21196 = vst [vmem:[#allocation166_spill] sm:$0xff] %v18953_v4  ;;  %v14451_v40 = vpop.f32.mrf.mxu1  ;;  %v4140_v50 = vpop.permute.xlu0 %4139 }
 0x3f7   :  { %v18955_v9 = vpop.permute.xlu1 %4334  ;;  %v14399_v7 = vpop.f32.mrf.mxu0  ;;  %v3276_v40 = vadd.f32 %v18175_v8, %v3225_v16  ;;  %v4365_v8 = vadd.f32 %v4331_v57, %v18621_v23 }
 0x3f8   :  { %v18957_v27 = vpop.f32.mrf.mxu1  ;;  %4928 = vrot.lane.b32.xlu0 %v18823_v37, %s15954_s29  ;;  %v4364_v37 = vadd.f32 %v4329_v20, %v18598_v52 }
 0x3f9   :  { %21197 = vst [vmem:[#allocation167_spill] sm:$0xff] %v18957_v27  ;;  %4690 = vrot.lane.b32.xlu1 %v18845_v2, %s15954_s29  ;;  %v18965_v43 = vpop.f32.mrf.mxu0  ;;  %v2960_v27 = vadd.f32 %v18030_v36, %v21198_v5  ;;  %v3825_v36 = vadd.f32 %v17995_v3, %v3276_v40 }
 0x3fa   :  { %v14452_v0 = vpop.f32.mrf.mxu1  ;;  %v4380_v62 = vpop.permute.xlu0 %4379 }
 0x3fb   :  { %v18968_v4 = vpop.permute.xlu1 %4141  ;;  %v14400_v7 = vpop.f32.mrf.mxu0  ;;  %v3011_v6 = vadd.f32 %v18117_v39, %v2960_v27  ;;  %v4415_v0 = vadd.f32 %v4380_v62, %v4364_v37  ;;  %v4124_v39 = vadd.f32 %v18899_v60, %v18618_v24 }
 0x3fc   :  { %v4838_v34 = vpop.f32.mrf.mxu1  ;;  %4645 = vrot.lane.b32.xlu0 %v18845_v2, %s15961_s0 }
 0x3fd   :  { %4930 = vrot.lane.b32.xlu1 %v18839_v30, %s15954_s29  ;;  %v4598_v53 = vpop.f32.mrf.mxu0  ;;  %v3473_v27 = vadd.f32 %v17992_v33, %v3011_v6  ;;  %v6099_v3 = vrot.slane %v4415_v0, 1 }
 0x3fe   :  { %v14455_v16 = vpop.f32.mrf.mxu1  ;;  %v18979_v7 = vpop.permute.xlu0 %4096  ;;  %v3881_v53 = vadd.f32 %v18557_v35, %v3825_v36 }
 0x3ff   :  { %v4382_v5 = vpop.permute.xlu1 %4381  ;;  %v14403_v52 = vpop.f32.mrf.mxu0  ;;  %v3529_v24 = vadd.f32 %v18540_v29, %v3473_v27  ;;  %v21200_v29 = vld [vmem:[#allocation62_spill] sm:$0xff]  ;;  %v21202_v27 = vld [vmem:[#allocation43_spill] sm:$0xff] }
 0x400   :  { %v18982_v20 = vadd.f32 %v4382_v5, %v4365_v8  ;;  %v4840_v34 = vpop.f32.mrf.mxu1  ;;  %4885 = vrot.lane.b32.xlu0 %v18839_v30, %s15961_s0  ;;  %v3937_v40 = vadd.f32 %v18665_v44, %v3881_v53  ;;  %v18996_v8 = vadd.f32 %v4140_v50, %v4124_v39  ;;  %v21199_v5 = vld [vmem:[#allocation34_spill] sm:$0xff] }
 0x401   :  { %4647 = vrot.lane.b32.xlu1 %v18863_v19, %s15961_s0  ;;  %v4600_v23 = vpop.f32.mrf.mxu0  ;;  %v3585_v44 = vadd.f32 %v18638_v10, %v3529_v24  ;;  %v3226_v52 = vadd.f32 %v21200_v29, %v21199_v5  ;;  %v21206_v29 = vld [vmem:[#allocation78_spill] sm:$0xff] }
 0x402   :  { %v6100_v62 = vrot.slane %v18982_v20, 1  ;;  %v14456_v37 = vpop.f32.mrf.mxu1  ;;  %v18993_v57 = vpop.permute.xlu0 %4336  ;;  %v21201_v20 = vld [vmem:[#allocation93_spill] sm:$0xff] }
 0x403   :  { %v18998_v35 = vpop.permute.xlu1 %4098  ;;  %v14404_v16 = vpop.f32.mrf.mxu0  ;;  %v4306_v34 = vadd.f32 %v21201_v20, %v3937_v40 }
 0x404   :  { %v19002_v60 = vsel %vm3439_vm5, %v6099_v3, %v6100_v62  ;;  %v4844_v36 = vpop.f32.mrf.mxu1  ;;  %4692 = vrot.lane.b32.xlu0 %v18863_v19, %s15954_s29  ;;  %v21203_v3 = vld [vmem:[#allocation67_spill] sm:$0xff]  ;;  %v21204_v16 = vld [vmem:[#allocation72_spill] sm:$0xff] }
 0x405   :  { %4887 = vrot.lane.b32.xlu1 %v18855_v18, %s15961_s0  ;;  %v4604_v50 = vpop.f32.mrf.mxu0  ;;  %v3227_v37 = vadd.f32 %v21203_v3, %v21202_v27  ;;  %v3277_v36 = vadd.f32 %v21204_v16, %v3226_v52  ;;  %v4366_v10 = vadd.f32 %v18939_v11, %v4306_v34  ;;  %v21207_v52 = vld [vmem:[#allocation41_spill] sm:$0xff]  ;;  %v21208_v3 = vld [vmem:[#allocation59_spill] sm:$0xff] }
 0x406   :  { %v14459_v6 = vpop.f32.mrf.mxu1  ;;  %v4144_v0 = vpop.permute.xlu0 %4143  ;;  %v21205_v50 = vld [vmem:[#allocation90_spill] sm:$0xff]  ;;  %v2962_v11 = vadd.f32 %v21208_v3, %v21207_v52  ;;  %v21223_v19 = vld [vmem:[#allocation75_spill] sm:$0xff] }
 0x407   :  { %v19014_v53 = vpop.permute.xlu1 %4338  ;;  %v14407_v39 = vpop.f32.mrf.mxu0  ;;  %v4065_v40 = vadd.f32 %v21205_v50, %v3585_v44  ;;  %v3278_v20 = vadd.f32 %v21206_v29, %v3227_v37  ;;  %v21210_v44 = vld [vmem:[#allocation52_spill] sm:$0xff] }
 0x408   :  { %v4846_v23 = vpop.f32.mrf.mxu1  ;;  %4932 = vrot.lane.b32.xlu0 %v18855_v18, %s15954_s29  ;;  %v4126_v39 = vadd.f32 %v18929_v48, %v18653_v46  ;;  %v21211_v48 = vld [vmem:[#allocation30_spill] sm:$0xff]  ;;  %v21306_v18 = vld [vmem:[#allocation77_spill] sm:$0xff] }
 0x409   :  { %4694 = vrot.lane.b32.xlu1 %v18877_v25, %s15954_s29  ;;  %v4606_v24 = vpop.f32.mrf.mxu0  ;;  %v4125_v34 = vadd.f32 %v18911_v26, %v4065_v40 }
 0x40a   :  { %v14460_v6 = vpop.f32.mrf.mxu1  ;;  %v4384_v5 = vpop.permute.xlu0 %4383  ;;  %v3826_v24 = vadd.f32 %v21210_v44, %v3277_v36  ;;  %v4177_v37 = vadd.f32 %v4144_v0, %v4126_v39  ;;  %v21214_v36 = vld [vmem:[#allocation51_spill] sm:$0xff] }
 0x40b   :  { %v4417_v23 = vadd.f32 %v4384_v5, %v4366_v10  ;;  %v19028_v33 = vpop.permute.xlu1 %4145  ;;  %v14408_v27 = vpop.f32.mrf.mxu0  ;;  %v21212_v10 = vld [vmem:[#allocation28_spill] sm:$0xff]  ;;  %v21213_v5 = vld [vmem:[#allocation69_spill] sm:$0xff]  ;;  %v19044_v26 = vadd.f32 %v18968_v4, %v4125_v34  ;;  %v3827_v0 = vadd.f32 %v21214_v36, %v3278_v20  ;;  %v21219_v4 = vld [vmem:[#allocation35_spill] sm:$0xff] }
 0x40c   :  { %v19033_v16 = vpop.f32.mrf.mxu1  ;;  %4649 = vrot.lane.b32.xlu0 %v18877_v25, %s15961_s0  ;;  %v3228_v6 = vadd.f32 %v21212_v10, %v21211_v48  ;;  %v3013_v29 = vadd.f32 %v21213_v5, %v2962_v11  ;;  %v3882_v52 = vadd.f32 %v18559_v32, %v3826_v24  ;;  %v21216_v48 = vld [vmem:[#allocation54_spill] sm:$0xff]  ;;  %v21217_v10 = vld [vmem:[#allocation65_spill] sm:$0xff]  ;;  %v21218_v5 = vld [vmem:[#allocation44_spill] sm:$0xff] }
 0x40d   :  { %21209 = vst [vmem:[#allocation27_spill] sm:$0xff] %v19033_v16  ;;  %v6102_v50 = vrot.slane %v4417_v23, 1  ;;  %4934 = vrot.lane.b32.xlu1 %v18871_v49, %s15954_s29  ;;  %v5006_v46 = vpop.f32.mrf.mxu0  ;;  %v2963_v11 = vadd.f32 %v21217_v10, %v21216_v48  ;;  %v2964_v34 = vadd.f32 %v21219_v4, %v21218_v5  ;;  %v21222_v48 = vld [vmem:[#allocation57_spill] sm:$0xff] }
 0x40e   :  { %v14523_v40 = vpop.f32.mrf.mxu1  ;;  %v19046_v27 = vpop.permute.xlu0 %4100  ;;  %v3938_v20 = vadd.f32 %v18663_v12, %v3882_v52  ;;  %v3475_v10 = vadd.f32 %v21222_v48, %v3013_v29  ;;  %v5101_v5 = vrot.slane %v5006_v46, 1  ;;  %v21224_v29 = vld [vmem:[#allocation63_spill] sm:$0xff]  ;;  %v21226_v48 = vld [vmem:[#allocation48_spill] sm:$0xff] }
 0x40f   :  { %v19051_v39 = vsel %vm3439_vm5, %v6100_v62, %v6102_v50  ;;  %v19053_v23 = vmax.f32 %v4177_v37, %v6102_v50  ;;  %v4386_v3 = vpop.permute.xlu1 %4385  ;;  %v14471_v44 = vpop.f32.mrf.mxu0  ;;  %v21220_v40 = vld [vmem:[#allocation83_spill] sm:$0xff]  ;;  %v3883_v62 = vadd.f32 %v18623_v28, %v3827_v0  ;;  %v20866_v37 = vrot.slane %v19033_v16, 7 }
 0x410   :  { %v3279_v25 = vadd.f32 %v21220_v40, %v3228_v6  ;;  %v5359_v24 = vpop.f32.mrf.mxu1  ;;  %4889 = vrot.lane.b32.xlu0 %v18871_v49, %s15961_s0  ;;  %v21221_v44 = vld [vmem:[#allocation81_spill] sm:$0xff]  ;;  %v3014_v28 = vadd.f32 %v21223_v19, %v2963_v11 }
 0x411   :  { %21215 = vst [vmem:[#allocation34_spill] sm:$0xff] %v19053_v23  ;;  %v5452_v50 = vrot.slane %v5359_v24, 7  ;;  %4651 = vrot.lane.b32.xlu1 %v18895_v21, %s15961_s0  ;;  %v5009_v36 = vpop.f32.mrf.mxu0  ;;  %v3015_v6 = vadd.f32 %v21221_v44, %v2964_v34  ;;  %v3939_v12 = vadd.f32 %v18707_v31, %v3883_v62  ;;  %v3531_v34 = vadd.f32 %v18581_v63, %v3475_v10  ;;  %v21225_v31 = vld [vmem:[#allocation95_spill] sm:$0xff] }
 0x412   :  { %v5102_v4 = vrot.slane %v5009_v36, 1  ;;  %v14524_v40 = vpop.f32.mrf.mxu1  ;;  %v19071_v32 = vpop.permute.xlu0 %4340  ;;  %v3828_v46 = vadd.f32 %v21224_v29, %v3279_v25  ;;  %v4307_v11 = vadd.f32 %v21225_v31, %v3938_v20 }
 0x413   :  { %v19075_v52 = vpop.permute.xlu1 %4102  ;;  %v14472_v0 = vpop.f32.mrf.mxu0  ;;  %v19080_v24 = vsel %vm3790_vm4, %v20866_v37, %v5452_v50  ;;  %v3477_v40 = vadd.f32 %v21226_v48, %v3015_v6  ;;  %v3587_v25 = vadd.f32 %v18681_v47, %v3531_v34 }
 0x414   :  { %v5364_v36 = vpop.f32.mrf.mxu1  ;;  %4696 = vrot.lane.b32.xlu0 %v18895_v21, %s15954_s29  ;;  %v19087_v19 = vsel %vm3439_vm5, %v5101_v5, %v5102_v4  ;;  %v3884_v63 = vadd.f32 %v18655_v54, %v3828_v46  ;;  %v21227_v5 = vld [vmem:[#allocation50_spill] sm:$0xff]  ;;  %v4367_v20 = vadd.f32 %v18955_v9, %v4307_v11 }
 0x415   :  { %v5454_v62 = vrot.slane %v5364_v36, 7  ;;  %4891 = vrot.lane.b32.xlu1 %v18887_v1, %s15961_s0  ;;  %v19092_v44 = vpop.f32.mrf.mxu0  ;;  %v3476_v29 = vadd.f32 %v21227_v5, %v3014_v28  ;;  %v21228_v36 = vld [vmem:[#allocation98_spill] sm:$0xff]  ;;  %v3533_v54 = vadd.f32 %v18625_v17, %v3477_v40  ;;  %v21231_v40 = vld [vmem:[#allocation73_spill] sm:$0xff] }
 0x416   :  { %v20869_v10 = vrot.slane %v19092_v44, 1  ;;  %v14527_v21 = vpop.f32.mrf.mxu1  ;;  %v4148_v0 = vpop.permute.xlu0 %4147  ;;  %v4308_v31 = vadd.f32 %v21228_v36, %v3939_v12  ;;  %v3940_v47 = vadd.f32 %v18741_v22, %v3884_v63  ;;  %v21229_v12 = vld [vmem:[#allocation96_spill] sm:$0xff]  ;;  %v21232_v63 = vld [vmem:[#allocation102_spill] sm:$0xff] }
 0x417   :  { %v19101_v37 = vpop.permute.xlu1 %4342  ;;  %v14475_v16 = vpop.f32.mrf.mxu0  ;;  %v19104_v49 = vsel %vm3790_vm4, %v5452_v50, %v5454_v62  ;;  %v3532_v28 = vadd.f32 %v18657_v56, %v3476_v29  ;;  %v4418_v50 = vadd.f32 %v4386_v3, %v4367_v20  ;;  %v3589_v22 = vadd.f32 %v18709_v55, %v3533_v54  ;;  %v21230_v56 = vld [vmem:[#allocation31_spill] sm:$0xff]  ;;  %v21233_v55 = vld [vmem:[#allocation37_spill] sm:$0xff] }
 0x418   :  { %v19108_v6 = vpop.f32.mrf.mxu1  ;;  %4936 = vrot.lane.b32.xlu0 %v18887_v1, %s15954_s29  ;;  %v19115_v9 = vsel %vm3439_vm5, %v5102_v4, %v20869_v10  ;;  %v4368_v16 = vadd.f32 %v18993_v57, %v4308_v31  ;;  %v4067_v34 = vadd.f32 %v21229_v12, %v3587_v25  ;;  %v3229_v57 = vadd.f32 %v21231_v40, %v21230_v56  ;;  %v21234_v25 = vld [vmem:[#allocation79_spill] sm:$0xff]  ;;  %v21235_v31 = vld [vmem:[#allocation88_spill] sm:$0xff] }
 0x419   :  { %4698 = vrot.lane.b32.xlu1 %v18909_v45, %s15954_s29  ;;  %v19121_v17 = vpop.f32.mrf.mxu0  ;;  %v3588_v11 = vadd.f32 %v18739_v13, %v3532_v28  ;;  %v4309_v21 = vadd.f32 %v21232_v63, %v3940_v47  ;;  %v3230_v29 = vadd.f32 %v21234_v25, %v21233_v55  ;;  %v6104_v20 = vrot.slane %v4418_v50, 1  ;;  %v21241_v55 = vld [vmem:[#allocation60_spill] sm:$0xff] }
 0x41a   :  { %v14528_v1 = vpop.f32.mrf.mxu1  ;;  %v4388_v46 = vpop.permute.xlu0 %4387  ;;  %v4127_v3 = vadd.f32 %v18941_v14, %v4067_v34  ;;  %v3280_v54 = vadd.f32 %v21235_v31, %v3229_v57  ;;  %v21236_v14 = vld [vmem:[#allocation103_spill] sm:$0xff] }
 0x41b   :  { %v4419_v4 = vadd.f32 %v4388_v46, %v4368_v16  ;;  %v4150_v62 = vpop.permute.xlu1 %4149  ;;  %v14476_v48 = vpop.f32.mrf.mxu0  ;;  %v4069_v28 = vadd.f32 %v21236_v14, %v3589_v22  ;;  %v4369_v47 = vadd.f32 %v19014_v53, %v4309_v21  ;;  %v21237_v34 = vld [vmem:[#allocation99_spill] sm:$0xff]  ;;  %v21240_v53 = vld [vmem:[#allocation70_spill] sm:$0xff] }
 0x41c   :  { %v19130_v5 = vpop.f32.mrf.mxu1  ;;  %4653 = vrot.lane.b32.xlu0 %v18909_v45, %s15961_s0  ;;  %v4178_v16 = vadd.f32 %v19028_v33, %v4127_v3  ;;  %v4068_v1 = vadd.f32 %v21237_v34, %v3588_v11  ;;  %v21238_v48 = vld [vmem:[#allocation91_spill] sm:$0xff]  ;;  %v21239_v33 = vld [vmem:[#allocation46_spill] sm:$0xff]  ;;  %v3829_v25 = vadd.f32 %v21241_v55, %v3280_v54 }
 0x41d   :  { %v6105_v13 = vrot.slane %v4419_v4, 1  ;;  %4938 = vrot.lane.b32.xlu1 %v18903_v42, %s15954_s29  ;;  %v19138_v36 = vpop.f32.mrf.mxu0  ;;  %v3281_v56 = vadd.f32 %v21238_v48, %v3230_v29  ;;  %v4129_v40 = vadd.f32 %v18998_v35, %v4069_v28  ;;  %v2965_v3 = vadd.f32 %v21240_v53, %v21239_v33  ;;  %v21244_v28 = vld [vmem:[#allocation86_spill] sm:$0xff] }
 0x41e   :  { %v14531_v12 = vpop.f32.mrf.mxu1  ;;  %v19144_v45 = vpop.permute.xlu0 %4104  ;;  %v4128_v11 = vadd.f32 %v18979_v7, %v4068_v1  ;;  %v21242_v35 = vmax.f32 %v18996_v8, %v19002_v60  ;;  %v3885_v34 = vadd.f32 %v18679_v15, %v3829_v25  ;;  %v21245_v1 = vld [vmem:[#allocation61_spill] sm:$0xff]  ;;  %v21252_v25 = vld [vmem:[#allocation164_spill] sm:$0xff] }
 0x41f   :  { %v6106_v50 = vsel %vm3439_vm5, %v6104_v20, %v6105_v13  ;;  %v4390_v46 = vpop.permute.xlu1 %4389  ;;  %v14479_v4 = vpop.f32.mrf.mxu0  ;;  %v4180_v20 = vadd.f32 %v4150_v62, %v4129_v40  ;;  %v3830_v54 = vadd.f32 %v21245_v1, %v3281_v56  ;;  %v21247_v56 = vld [vmem:[#allocation58_spill] sm:$0xff] }
 0x420   :  { %v6134_v57 = vmax.f32 %v4178_v16, %v6106_v50  ;;  %v4420_v63 = vadd.f32 %v4390_v46, %v4369_v47  ;;  %v19150_v22 = vpop.f32.mrf.mxu1  ;;  %4893 = vrot.lane.b32.xlu0 %v18903_v42, %s15961_s0  ;;  %v3016_v47 = vadd.f32 %v21244_v28, %v2965_v3  ;;  %v4179_v7 = vadd.f32 %v4148_v0, %v4128_v11  ;;  %v21251_v3 = vld [vmem:[#allocation84_spill] sm:$0xff] }
 0x421   :  { %4655 = vrot.lane.b32.xlu1 %v18925_v41, %s15961_s0  ;;  %v19159_v21 = vpop.f32.mrf.mxu0  ;;  %v3886_v46 = vadd.f32 %v18687_v38, %v3830_v54  ;;  %v3941_v15 = vadd.f32 %v18771_v58, %v3885_v34  ;;  %v21250_v58 = vld [vmem:[#allocation42_spill] sm:$0xff]  ;;  %v21258_v54 = vld [vmem:[#allocation108_spill] sm:$0xff] }
 0x422   :  { %v19165_v29 = vmax.f32 %v21242_v35, %v6134_v57  ;;  %v6107_v31 = vrot.slane %v4420_v63, 1  ;;  %v14532_v42 = vpop.f32.mrf.mxu1  ;;  %v19167_v14 = vpop.permute.xlu0 %4344  ;;  %v3478_v40 = vadd.f32 %v21247_v56, %v3016_v47  ;;  %v3231_v11 = vadd.f32 %v21251_v3, %v21250_v58  ;;  %v21256_v47 = vld [vmem:[#allocation107_spill] sm:$0xff] }
 0x423   :  { %v19170_v16 = vpop.permute.xlu1 %4106  ;;  %v14480_v12 = vpop.f32.mrf.mxu0  ;;  %v3942_v53 = vadd.f32 %v18785_v61, %v3886_v46  ;;  %v21254_v61 = vld [vmem:[#allocation33_spill] sm:$0xff]  ;;  %v21255_v42 = vld [vmem:[#allocation76_spill] sm:$0xff]  ;;  %v21259_v46 = vld [vmem:[#allocation166_spill] sm:$0xff] }
 0x424   :  { %21243 = vst [vmem:[#allocation62_spill] sm:$0xff] %v19165_v29  ;;  %v6108_v50 = vsel %vm3439_vm5, %v6105_v13, %v6107_v31  ;;  %v19175_v8 = vmax.f32 %v4180_v20, %v6107_v31  ;;  %v19177_v60 = vpop.f32.mrf.mxu1  ;;  %4700 = vrot.lane.b32.xlu0 %v18925_v41, %s15954_s29  ;;  %v21248_v41 = vmax.f32 %v19044_v26, %v19051_v39  ;;  %v21253_v39 = vld [vmem:[#allocation105_spill] sm:$0xff]  ;;  %v21261_v56 = vld [vmem:[#allocation163_spill] sm:$0xff] }
 0x425   :  { %v6135_v62 = vmax.f32 %v4179_v7, %v6108_v50  ;;  %4895 = vrot.lane.b32.xlu1 %v18917_v51, %s15961_s0  ;;  %v19183_v0 = vpop.f32.mrf.mxu0  ;;  %v3534_v55 = vadd.f32 %v18689_v59, %v3478_v40  ;;  %v4310_v35 = vadd.f32 %v21253_v39, %v3941_v15  ;;  %v2966_v28 = vadd.f32 %v21255_v42, %v21254_v61  ;;  %v21260_v15 = vld [vmem:[#allocation89_spill] sm:$0xff]  ;;  %v21265_v39 = vld [vmem:[#allocation106_spill] sm:$0xff]  ;;  %v21266_v42 = vld [vmem:[#allocation55_spill] sm:$0xff] }
 0x426   :  { %21246 = vst [vmem:[#allocation93_spill] sm:$0xff] %v19175_v8  ;;  %v14535_v4 = vpop.f32.mrf.mxu1  ;;  %v4152_v48 = vpop.permute.xlu0 %4151  ;;  %v3282_v7 = vadd.f32 %v21256_v47, %v3231_v11  ;;  %v4311_v50 = vadd.f32 %v21258_v54, %v3942_v53  ;;  %v21263_v53 = vld [vmem:[#allocation87_spill] sm:$0xff]  ;;  %v21294_v8 = vld [vmem:[#allocation112_spill] sm:$0xff] }
 0x427   :  { %v19193_v57 = vmax.f32 %v21248_v41, %v6135_v62  ;;  %v19195_v63 = vpop.permute.xlu1 %4346  ;;  %v14483_v33 = vpop.f32.mrf.mxu0  ;;  %v4370_v59 = vadd.f32 %v19071_v32, %v4310_v35  ;;  %v3017_v4 = vadd.f32 %v21260_v15, %v2966_v28  ;;  %v21262_v32 = vld [vmem:[#allocation45_spill] sm:$0xff]  ;;  %v21267_v28 = vld [vmem:[#allocation82_spill] sm:$0xff] }
 0x428   :  { %v19198_v38 = vpop.f32.mrf.mxu1  ;;  %4940 = vrot.lane.b32.xlu0 %v18917_v51, %s15954_s29  ;;  %v21257_v51 = vld [vmem:[#allocation137_spill] sm:$0xff]  ;;  %v4371_v41 = vadd.f32 %v19101_v37, %v4311_v50  ;;  %v3232_v11 = vadd.f32 %v21263_v53, %v21262_v32  ;;  %v2967_v47 = vadd.f32 %v21267_v28, %v21266_v42  ;;  %v21275_v32 = vld [vmem:[#allocation130_spill] sm:$0xff] }
 0x429   :  { %21249 = vst [vmem:[#allocation43_spill] sm:$0xff] %v19193_v57  ;;  %4702 = vrot.lane.b32.xlu1 %v21252_v25, %s15954_s29  ;;  %v19207_v26 = vpop.f32.mrf.mxu0  ;;  %v3590_v12 = vadd.f32 %v21257_v51, %v3534_v55  ;;  %v21264_v55 = vld [vmem:[#allocation32_spill] sm:$0xff]  ;;  %v21268_v51 = vld [vmem:[#allocation39_spill] sm:$0xff]  ;;  %v21270_v37 = vld [vmem:[#allocation49_spill] sm:$0xff] }
 0x42a   :  { %v14536_v20 = vpop.f32.mrf.mxu1  ;;  %v4392_v31 = vpop.permute.xlu0 %4391  ;;  %v3831_v25 = vadd.f32 %v21264_v55, %v3282_v7  ;;  %v21272_v15 = vld [vmem:[#allocation165_spill] sm:$0xff]  ;;  %v21273_v7 = vld [vmem:[#allocation110_spill] sm:$0xff] }
 0x42b   :  { %v19214_v34 = vpop.permute.xlu1 %4153  ;;  %v14484_v1 = vpop.f32.mrf.mxu0  ;;  %v4421_v33 = vadd.f32 %v4392_v31, %v4370_v59  ;;  %v4070_v35 = vadd.f32 %v21265_v39, %v3590_v12  ;;  %v21271_v31 = vld [vmem:[#allocation97_spill] sm:$0xff]  ;;  %v3283_v12 = vadd.f32 %v21273_v7, %v3232_v11 }
 0x42c   :  { %v19218_v62 = vpop.f32.mrf.mxu1  ;;  %4704 = vrot.lane.b32.xlu0 %v21259_v46, %s15954_s29  ;;  %v21269_v1 = vld [vmem:[#allocation85_spill] sm:$0xff]  ;;  %v3233_v59 = vadd.f32 %v21271_v31, %v21270_v37  ;;  %v3887_v53 = vadd.f32 %v21275_v32, %v3831_v25  ;;  %v21279_v25 = vld [vmem:[#allocation92_spill] sm:$0xff] }
 0x42d   :  { %4942 = vrot.lane.b32.xlu1 %v21261_v56, %s15954_s29  ;;  %v19225_v40 = vpop.f32.mrf.mxu0  ;;  %v2968_v54 = vadd.f32 %v21269_v1, %v21268_v51  ;;  %v21274_v56 = vld [vmem:[#allocation66_spill] sm:$0xff]  ;;  %v4130_v55 = vadd.f32 %v19046_v27, %v4070_v35  ;;  %v6109_v42 = vrot.slane %v4421_v33, 1  ;;  %v21280_v27 = vld [vmem:[#allocation152_spill] sm:$0xff]  ;;  %v21282_v33 = vld [vmem:[#allocation125_spill] sm:$0xff] }
 0x42e   :  { %v14539_v58 = vpop.f32.mrf.mxu1  ;;  %v19228_v3 = vpop.permute.xlu0 %4108  ;;  %v3943_v35 = vadd.f32 %v21280_v27, %v3887_v53 }
 0x42f   :  { %v4394_v20 = vpop.permute.xlu1 %4393  ;;  %v14487_v61 = vpop.f32.mrf.mxu0  ;;  %v3479_v58 = vadd.f32 %v21274_v56, %v3017_v4  ;;  %v21278_v4 = vld [vmem:[#allocation40_spill] sm:$0xff]  ;;  %v19265_v37 = vadd.f32 %v4152_v48, %v4130_v55  ;;  %v5457_v56 = vrot.slane %v19130_v5, 7  ;;  %v21285_v55 = vld [vmem:[#allocation38_spill] sm:$0xff]  ;;  %v21293_v5 = vld [vmem:[#allocation131_spill] sm:$0xff] }
 0x430   :  { %v19240_v50 = vadd.f32 %v4394_v20, %v4371_v41  ;;  %v19242_v46 = vpop.f32.mrf.mxu1  ;;  %4944 = vrot.lane.b32.xlu0 %v21272_v15, %s15954_s29  ;;  %v21276_v41 = vld [vmem:[#allocation117_spill] sm:$0xff]  ;;  %v19256_v61 = vrot.slane %v19108_v6, 7  ;;  %v2969_v1 = vadd.f32 %v21279_v25, %v21278_v4  ;;  %v21284_v48 = vld [vmem:[#allocation100_spill] sm:$0xff]  ;;  %v21287_v4 = vld [vmem:[#allocation47_spill] sm:$0xff] }
 0x431   :  { %4706 = vrot.lane.b32.xlu1 %v18965_v43, %s15954_s29  ;;  %v19252_v39 = vpop.f32.mrf.mxu0  ;;  %v3284_v20 = vadd.f32 %v21276_v41, %v3233_v59  ;;  %v5107_v43 = vrot.slane %v19138_v36, 1  ;;  %v21281_v6 = vld [vmem:[#allocation101_spill] sm:$0xff]  ;;  %v3535_v7 = vadd.f32 %v21282_v33, %v3479_v58  ;;  %v21283_v36 = vld [vmem:[#allocation56_spill] sm:$0xff]  ;;  %v21286_v58 = vld [vmem:[#allocation167_spill] sm:$0xff] }
 0x432   :  { %21277 = vst [vmem:[#allocation67_spill] sm:$0xff] %v19256_v61  ;;  %v20870_v28 = vrot.slane %v19240_v50, 1  ;;  %v14540_v11 = vpop.f32.mrf.mxu1  ;;  %v19259_v51 = vpop.permute.xlu0 %4348  ;;  %v3018_v15 = vadd.f32 %v21281_v6, %v2967_v47  ;;  %v3234_v53 = vadd.f32 %v21284_v48, %v21283_v36  ;;  %v5106_v47 = vrot.slane %v19121_v17, 1  ;;  %v21288_v25 = vld [vmem:[#allocation94_spill] sm:$0xff]  ;;  %v21290_v33 = vld [vmem:[#allocation71_spill] sm:$0xff]  ;;  %v21291_v36 = vld [vmem:[#allocation145_spill] sm:$0xff] }
 0x433   :  { %v19267_v31 = vpop.permute.xlu1 %4110  ;;  %v14488_v59 = vpop.f32.mrf.mxu0  ;;  %v3832_v11 = vadd.f32 %v21285_v55, %v3283_v12  ;;  %v2970_v27 = vadd.f32 %v21288_v25, %v21287_v4  ;;  %v3833_v13 = vadd.f32 %v21290_v33, %v3284_v20  ;;  %v3591_v48 = vadd.f32 %v21291_v36, %v3535_v7  ;;  %v21292_v17 = vld [vmem:[#allocation120_spill] sm:$0xff] }
 0x434   :  { %v19275_v32 = vsel %vm3439_vm5, %v6109_v42, %v20870_v28  ;;  %v19277_v41 = vpop.f32.mrf.mxu1  ;;  %5503 = vrot.lane.b32.xlu0 %v19256_v61, %s15961_s0  ;;  %v21289_v59 = vld [vmem:[#allocation104_spill] sm:$0xff]  ;;  %v3285_v10 = vadd.f32 %v21292_v17, %v3234_v53  ;;  %v19304_v4 = vsel %vm3439_vm5, %v5106_v47, %v5107_v43  ;;  %v19309_v7 = vrot.slane %v19159_v21, 1 }
 0x435   :  { %4946 = vrot.lane.b32.xlu1 %v21286_v58, %s15954_s29  ;;  %v19289_v42 = vpop.f32.mrf.mxu0  ;;  %v3019_v6 = vadd.f32 %v21289_v59, %v2968_v54  ;;  %v3888_v28 = vadd.f32 %v21293_v5, %v3832_v11  ;;  %v4312_v58 = vadd.f32 %v21294_v8, %v3943_v35  ;;  %v21295_v54 = vld [vmem:[#allocation111_spill] sm:$0xff]  ;;  %v21296_v20 = vld [vmem:[#allocation140_spill] sm:$0xff]  ;;  %v19315_v53 = vsel %vm3790_vm4, %v19256_v61, %v5457_v56  ;;  %v21298_v8 = vld [vmem:[#allocation114_spill] sm:$0xff] }
 0x436   :  { %v14543_v12 = vpop.f32.mrf.mxu1  ;;  %v19296_v55 = vpop.permute.xlu0 %4155  ;;  %v3020_v25 = vadd.f32 %v21295_v54, %v2969_v1  ;;  %v3889_v59 = vadd.f32 %v21296_v20, %v3833_v13  ;;  %21297 = vst [vmem:[#allocation72_spill] sm:$0xff] %v19315_v53  ;;  %v21299_v35 = vld [vmem:[#allocation153_spill] sm:$0xff]  ;;  %v21300_v13 = vld [vmem:[#allocation68_spill] sm:$0xff]  ;;  %v5459_v54 = vrot.slane %v19150_v22, 7  ;;  %v19343_v22 = vsel %vm3439_vm5, %v5107_v43, %v19309_v7  ;;  %v21311_v43 = vld [vmem:[#allocation118_spill] sm:$0xff] }
 0x437   :  { %v19301_v23 = vpop.permute.xlu1 %4350  ;;  %v14491_v57 = vpop.f32.mrf.mxu0  ;;  %v3944_v11 = vadd.f32 %v21299_v35, %v3888_v28  ;;  %v4372_v1 = vadd.f32 %v19167_v14, %v4312_v58  ;;  %v3481_v47 = vadd.f32 %v21300_v13, %v3019_v6  ;;  %v21301_v5 = vld [vmem:[#allocation156_spill] sm:$0xff]  ;;  %v21302_v12 = vld [vmem:[#allocation109_spill] sm:$0xff] }
 0x438   :  { %v19311_v33 = vpop.f32.mrf.mxu1  ;;  %5153 = vrot.lane.b32.xlu0 %v19304_v4, %s15961_s0  ;;  %v3021_v57 = vadd.f32 %v21298_v8, %v2970_v27  ;;  %v3945_v36 = vadd.f32 %v21301_v5, %v3889_v59  ;;  %v4071_v17 = vadd.f32 %v21302_v12, %v3591_v48  ;;  %v21303_v27 = vld [vmem:[#allocation64_spill] sm:$0xff]  ;;  %v3482_v6 = vadd.f32 %v21306_v18, %v3020_v25 }
 0x439   :  { %5505 = vrot.lane.b32.xlu1 %v19315_v53, %s15961_s0  ;;  %v19324_v21 = vpop.f32.mrf.mxu0  ;;  %v3480_v8 = vadd.f32 %v21303_v27, %v3018_v15  ;;  %v21304_v28 = vld [vmem:[#allocation80_spill] sm:$0xff]  ;;  %v21305_v53 = vld [vmem:[#allocation134_spill] sm:$0xff]  ;;  %v21308_v15 = vld [vmem:[#allocation149_spill] sm:$0xff]  ;;  %v20877_v27 = vrot.slane %v19207_v26, 1 }
 0x43a   :  { %v14544_v20 = vpop.f32.mrf.mxu1  ;;  %v4396_v29 = vpop.permute.xlu0 %4395  ;;  %v3834_v35 = vadd.f32 %v21304_v28, %v3285_v10  ;;  %v3537_v2 = vadd.f32 %v21305_v53, %v3481_v47  ;;  %v4131_v59 = vadd.f32 %v19075_v52, %v4071_v17  ;;  %v21307_v10 = vld [vmem:[#allocation74_spill] sm:$0xff]  ;;  %v21310_v52 = vld [vmem:[#allocation157_spill] sm:$0xff]  ;;  %v4314_v5 = vadd.f32 %v21311_v43, %v3945_v36 }
 0x43b   :  { %v19332_v14 = vadd.f32 %v4396_v29, %v4372_v1  ;;  %v4158_v58 = vpop.permute.xlu1 %4157  ;;  %v14492_v61 = vpop.f32.mrf.mxu0  ;;  %v3483_v29 = vadd.f32 %v21307_v10, %v3021_v57  ;;  %v19361_v17 = vsel %vm3790_vm4, %v5457_v56, %v5459_v54  ;;  %v21315_v56 = vld [vmem:[#allocation141_spill] sm:$0xff]  ;;  %v21316_v10 = vld [vmem:[#allocation162_spill] sm:$0xff] }
 0x43c   :  { %v19337_v13 = vpop.f32.mrf.mxu1  ;;  %5157 = vrot.lane.b32.xlu0 %v19309_v7, %s15961_s0  ;;  %v3890_v48 = vadd.f32 %v21308_v15, %v3834_v35  ;;  %v21309_v61 = vld [vmem:[#allocation115_spill] sm:$0xff]  ;;  %v3593_v25 = vadd.f32 %v21310_v52, %v3537_v2  ;;  %v19355_v47 = vadd.f32 %v19214_v34, %v4131_v59  ;;  %21312 = vst [vmem:[#allocation90_spill] sm:$0xff] %v19361_v17  ;;  %v21313_v2 = vrot.slane %v19240_v50, 1  ;;  %v21314_v35 = vld [vmem:[#allocation124_spill] sm:$0xff] }
 0x43d   :  { %v4313_v1 = vadd.f32 %v21309_v61, %v3944_v11  ;;  %v6112_v53 = vrot.slane %v19332_v14, 1  ;;  %5155 = vrot.lane.b32.xlu1 %v19343_v22, %s15961_s0  ;;  %v19351_v18 = vpop.f32.mrf.mxu0  ;;  %v19364_v11 = vrot.slane %v19177_v60, 7  ;;  %v3536_v59 = vadd.f32 %v21314_v35, %v3480_v8  ;;  %v21317_v50 = vld [vmem:[#allocation148_spill] sm:$0xff] }
 0x43e   :  { %v14547_v12 = vpop.f32.mrf.mxu1  ;;  %v19358_v57 = vpop.permute.xlu0 %4159  ;;  %v3539_v54 = vadd.f32 %v21315_v56, %v3483_v29  ;;  %v3946_v60 = vadd.f32 %v21316_v10, %v3890_v48  ;;  %v3538_v61 = vadd.f32 %v21317_v50, %v3482_v6  ;;  %v4374_v52 = vadd.f32 %v19259_v51, %v4314_v5  ;;  %v21318_v29 = vld [vmem:[#allocation144_spill] sm:$0xff] }
 0x43f   :  { %v4373_v20 = vadd.f32 %v19195_v63, %v4313_v1  ;;  %v19373_v34 = vsel %vm3439_vm5, %v21313_v2, %v6112_v53  ;;  %v4398_v36 = vpop.permute.xlu1 %4397  ;;  %v14495_v28 = vpop.f32.mrf.mxu0  ;;  %v5111_v1 = vrot.slane %v19183_v0, 1  ;;  %v3592_v48 = vadd.f32 %v21318_v29, %v3536_v59  ;;  %v21319_v12 = vld [vmem:[#allocation161_spill] sm:$0xff]  ;;  %v21321_v63 = vld [vmem:[#allocation160_spill] sm:$0xff] }
 0x440   :  { %v19380_v15 = vpop.f32.mrf.mxu1  ;;  %5507 = vrot.lane.b32.xlu0 %v19361_v17, %s15961_s0  ;;  %v3595_v2 = vadd.f32 %v21319_v12, %v3539_v54  ;;  %v21320_v28 = vld [vmem:[#allocation116_spill] sm:$0xff]  ;;  %v3594_v6 = vadd.f32 %v21321_v63, %v3538_v61  ;;  %v5462_v0 = vrot.slane %v19198_v38, 7  ;;  %v21322_v59 = vld [vmem:[#allocation121_spill] sm:$0xff] }
 0x441   :  { %v4424_v43 = vadd.f32 %v4398_v36, %v4373_v20  ;;  %5509 = vrot.lane.b32.xlu1 %v19364_v11, %s15961_s0  ;;  %v19389_v8 = vpop.f32.mrf.mxu0  ;;  %v4073_v35 = vadd.f32 %v21320_v28, %v3593_v25  ;;  %v19399_v20 = vsel %vm3439_vm5, %v5111_v1, %v20877_v27  ;;  %v4315_v54 = vadd.f32 %v21322_v59, %v3946_v60  ;;  %v21324_v1 = vld [vmem:[#allocation122_spill] sm:$0xff] }
 0x442   :  { %v14548_v56 = vpop.f32.mrf.mxu1  ;;  %v4400_v10 = vpop.permute.xlu0 %4399  ;;  %v4075_v28 = vadd.f32 %v21324_v1, %v3595_v2 }
 0x443   :  { %v4425_v50 = vadd.f32 %v4400_v10, %v4374_v52  ;;  %v4162_v51 = vpop.permute.xlu1 %4161  ;;  %v14496_v5 = vpop.f32.mrf.mxu0  ;;  %v4133_v36 = vadd.f32 %v19170_v16, %v4073_v35  ;;  %v6114_v25 = vrot.slane %v4424_v43, 1  ;;  %v21323_v52 = vld [vmem:[#allocation113_spill] sm:$0xff]  ;;  %v4375_v16 = vadd.f32 %v19301_v23, %v4315_v54  ;;  %v21326_v43 = vld [vmem:[#allocation119_spill] sm:$0xff] }
 0x444   :  { %v19403_v29 = vpop.f32.mrf.mxu1  ;;  %5209 = vrot.lane.b32.xlu0 %v19399_v20, %s15954_s29  ;;  %v4072_v12 = vadd.f32 %v21323_v52, %v3592_v48  ;;  %v19417_v10 = vrot.slane %v19225_v40, 1  ;;  %v19425_v48 = vsel %vm3790_vm4, %v19364_v11, %v5462_v0 }
 0x445   :  { %v6115_v63 = vrot.slane %v4425_v50, 1  ;;  %5159 = vrot.lane.b32.xlu1 %v19399_v20, %s15961_s0  ;;  %v19409_v61 = vpop.f32.mrf.mxu0  ;;  %v4184_v35 = vadd.f32 %v4158_v58, %v4133_v36  ;;  %v4074_v50 = vadd.f32 %v21326_v43, %v3594_v6  ;;  %v4135_v58 = vadd.f32 %v19267_v31, %v4075_v28 }
 0x446   :  { %v14551_v60 = vpop.f32.mrf.mxu1  ;;  %v19414_v56 = vpop.permute.xlu0 %4633  ;;  %21325 = vst [vmem:[#allocation78_spill] sm:$0xff] %v19417_v10  ;;  %v4132_v23 = vadd.f32 %v19144_v45, %v4072_v12  ;;  %v21327_v45 = vmax.f32 %v19265_v37, %v19275_v32  ;;  %v5464_v28 = vrot.slane %v19218_v62, 7  ;;  %v21331_v62 = vrot.slane %v19207_v26, 1 }
 0x447   :  { %v6116_v5 = vsel %vm3439_vm5, %v6114_v25, %v6115_v63  ;;  %v4402_v59 = vpop.permute.xlu1 %4401  ;;  %v14499_v27 = vpop.f32.mrf.mxu0  ;;  %v4134_v6 = vadd.f32 %v19228_v3, %v4074_v50  ;;  %v4186_v25 = vadd.f32 %v4162_v51, %v4135_v58  ;;  %v21334_v26 = vmax.f32 %v19355_v47, %v19373_v34 }
 0x448   :  { %v6140_v2 = vmax.f32 %v4184_v35, %v6116_v5  ;;  %v4426_v36 = vadd.f32 %v4402_v59, %v4375_v16  ;;  %v19429_v40 = vpop.f32.mrf.mxu1  ;;  %5511 = vrot.lane.b32.xlu0 %v19425_v48, %s15961_s0  ;;  %v4183_v54 = vadd.f32 %v19296_v55, %v4132_v23 }
 0x449   :  { %5163 = vrot.lane.b32.xlu1 %v19417_v10, %s15961_s0  ;;  %v19436_v27 = vpop.f32.mrf.mxu0  ;;  %v4185_v3 = vadd.f32 %v19358_v57, %v4134_v6  ;;  %v19463_v57 = vsel %vm3439_vm5, %v21331_v62, %v19417_v10  ;;  %v19487_v6 = vsel %vm3790_vm4, %v5462_v0, %v5464_v28 }
 0x44a   :  { %v6158_v31 = vmax.f32 %v21327_v45, %v6140_v2  ;;  %v6117_v52 = vrot.slane %v4426_v36, 1  ;;  %v14552_v12 = vpop.f32.mrf.mxu1  ;;  %v19442_v1 = vpop.permute.xlu0 %4873  ;;  %v19450_v60 = vmax.f32 %v4183_v54, %v6112_v53  ;;  %21332 = vst [vmem:[#allocation30_spill] sm:$0xff] %v19463_v57  ;;  %v19469_v53 = vld [vmem:[#allocation11] ss:$0 sm:$0xff]  ;;  %v5117_v2 = vrot.slane %v19289_v42, 1 }
 0x44b   :  { %21328 = vst [vmem:[#allocation41_spill] sm:$0xff] %v19442_v1  ;;  %v19446_v16 = vpop.permute.xlu1 %4635  ;;  %v14500_v35 = vpop.f32.mrf.mxu0  ;;  %21333 = vst [vmem:[#allocation28_spill] sm:$0xff] %v19469_v53  ;;  %v19497_v54 = vrot.slane %v19242_v46, 7  ;;  %v5116_v42 = vrot.slane %v19252_v39, 1  ;;  %v5467_v12 = vrot.slane %v19277_v41, 7 }
 0x44c   :  { %21329 = vst [vmem:[#allocation59_spill] sm:$0xff] %v19450_v60  ;;  %v6118_v55 = vsel %vm3439_vm5, %v6115_v63, %v6117_v52  ;;  %v19453_v37 = vmax.f32 %v4186_v25, %v6117_v52  ;;  %v19455_v32 = vpop.f32.mrf.mxu1  ;;  %5213 = vrot.lane.b32.xlu0 %v19417_v10, %s15954_s29  ;;  %v6161_v58 = vadd.f32 %v19469_v53, %v6158_v31 }
 0x44d   :  { %v6141_v51 = vmax.f32 %v4185_v3, %v6118_v55  ;;  %5211 = vrot.lane.b32.xlu1 %v19463_v57, %s15954_s29  ;;  %v19467_v14 = vpop.f32.mrf.mxu0  ;;  %v19508_v3 = vsel %vm3439_vm5, %v5116_v42, %v5117_v2 }
 0x44e   :  { %21330 = vst [vmem:[#allocation52_spill] sm:$0xff] %v19453_v37  ;;  %v14555_v43 = vpop.f32.mrf.mxu1  ;;  %v19473_v50 = vpop.permute.xlu0 %4637  ;;  %v6164_v25 = vmax.f32 %v6161_v58, 0.0  ;;  %21335 = vst [vmem:[#allocation69_spill] sm:$0xff] %v19508_v3  ;;  %v5205_v60 = vrot.slane %v19467_v14, 1 }
 0x44f   :  { %v6159_v5 = vmax.f32 %v21334_v26, %v6141_v51  ;;  %v19478_v59 = vpop.permute.xlu1 %4875  ;;  %v14503_v23 = vpop.f32.mrf.mxu0  ;;  %v19520_v43 = vsel %vm3790_vm4, %v19497_v54, %v5467_v12 }
 0x450   :  { %v19482_v36 = vpop.f32.mrf.mxu1  ;;  %5161 = vrot.lane.b32.xlu0 %v19463_v57, %s15961_s0 }
 0x451   :  { %5513 = vrot.lane.b32.xlu1 %v19487_v6, %s15961_s0  ;;  %v19493_v47 = vpop.f32.mrf.mxu0  ;;  %v6162_v34 = vadd.f32 %v19469_v53, %v6159_v5  ;;  %v19527_v5 = vrot.slane %v19324_v21, 1  ;;  %v5469_v21 = vrot.slane %v19311_v33, 7  ;;  %v5498_v33 = vrot.slane %v19337_v13, 7 }
 0x452   :  { %v14556_v45 = vpop.f32.mrf.mxu1  ;;  %v19500_v38 = vpop.permute.xlu0 %4877  ;;  %v5555_v53 = vrot.slane %v19455_v32, 7 }
 0x453   :  { %v19502_v0 = vpop.permute.xlu1 %4639  ;;  %v14504_v31 = vpop.f32.mrf.mxu0  ;;  %v6165_v52 = vmax.f32 %v6162_v34, 0.0  ;;  %21338 = vst [vmem:[#allocation65_spill] sm:$0xff] %v19527_v5 }
 0x454   :  { %v5428_v28 = vpop.f32.mrf.mxu1  ;;  %5515 = vrot.lane.b32.xlu0 %v19497_v54, %s15961_s0 }
 0x455   :  { %5215 = vrot.lane.b32.xlu1 %v19508_v3, %s15954_s29  ;;  %v5078_v46 = vpop.f32.mrf.mxu0  ;;  %v19512_v39 = vpack.i.bf16 %v6165_v52, %v6164_v25 }
 0x456   :  { %v14559_v35 = vpop.f32.mrf.mxu1  ;;  %v19514_v55 = vpop.permute.xlu0 %4684 }
 0x457   :  { %21336 = vst [vmem:[#allocation51_spill] sm:$0xff] %v19512_v39  ;;  %v19516_v62 = vpop.permute.xlu1 %4879  ;;  %v14507_v51 = vpop.f32.mrf.mxu0  ;;  %v19544_v35 = vsel %vm3439_vm5, %v5117_v2, %v19527_v5  ;;  %v5149_v2 = vrot.slane %v19389_v8, 1 }
 0x458   :  { %21337 = vst [vmem:[#allocation54_spill] sm:$0xff] %v19516_v62  ;;  %v5430_v41 = vpop.f32.mrf.mxu1  ;;  %5165 = vrot.lane.b32.xlu0 %v19508_v3, %s15961_s0  ;;  %21340 = vst [vmem:[#allocation35_spill] sm:$0xff] %v19544_v35 }
 0x459   :  { %5517 = vrot.lane.b32.xlu1 %v19520_v43, %s15961_s0  ;;  %v5080_v26 = vpop.f32.mrf.mxu0 }
 0x45a   :  { %v14560_v23 = vpop.f32.mrf.mxu1  ;;  %v19529_v58 = vpop.permute.xlu0 %4924 }
 0x45b   :  { %21339 = vst [vmem:[#allocation44_spill] sm:$0xff] %v19529_v58  ;;  %v19531_v34 = vpop.permute.xlu1 %4686  ;;  %v14508_v42 = vpop.f32.mrf.mxu0 }
 0x45c   :  { %v5434_v45 = vpop.f32.mrf.mxu1  ;;  %5169 = vrot.lane.b32.xlu0 %v19527_v5, %s15961_s0 }
 0x45d   :  { %5219 = vrot.lane.b32.xlu1 %v19527_v5, %s15954_s29  ;;  %v5084_v31 = vpop.f32.mrf.mxu0 }
 0x45e   :  { %v14563_v25 = vpop.f32.mrf.mxu1  ;;  %v19537_v52 = vpop.permute.xlu0 %4641  ;;  %v19556_v31 = vsel %vm3790_vm4, %v5467_v12, %v5469_v21  ;;  %v5499_v21 = vrot.slane %v19380_v15, 7 }
 0x45f   :  { %v19540_v28 = vpop.permute.xlu1 %4926  ;;  %v14511_v46 = vpop.f32.mrf.mxu0 }
 0x460   :  { %v5436_v51 = vpop.f32.mrf.mxu1  ;;  %5217 = vrot.lane.b32.xlu0 %v19544_v35, %s15954_s29  ;;  %v5500_v15 = vsel %vm3790_vm4, %v5498_v33, %v5499_v21 }
 0x461   :  { %5167 = vrot.lane.b32.xlu1 %v19544_v35, %s15961_s0  ;;  %v5086_v41 = vpop.f32.mrf.mxu0  ;;  %v5148_v51 = vrot.slane %v19351_v18, 1 }
 0x462   :  { %v14564_v26 = vpop.f32.mrf.mxu1  ;;  %v19550_v23 = vpop.permute.xlu0 %4881 }
 0x463   :  { %21341 = vst [vmem:[#allocation83_spill] sm:$0xff] %v19550_v23  ;;  %v19553_v42 = vpop.permute.xlu1 %4643  ;;  %v14512_v45 = vpop.f32.mrf.mxu0 }
 0x464   :  { %v19559_v25 = vpop.f32.mrf.mxu1  ;;  %5519 = vrot.lane.b32.xlu0 %v19556_v31, %s15961_s0  ;;  %v5150_v45 = vsel %vm3439_vm5, %v5148_v51, %v5149_v2 }
 0x465   :  { %21342 = vst [vmem:[#allocation81_spill] sm:$0xff] %v19559_v25  ;;  %5521 = vrot.lane.b32.xlu1 %v5498_v33, %s15961_s0  ;;  %v19564_v46 = vpop.f32.mrf.mxu0 }
 0x466   :  { %21343 = vst [vmem:[#allocation57_spill] sm:$0xff] %v19564_v46  ;;  %v14627_v13 = vpop.f32.mrf.mxu1  ;;  %v19567_v41 = vpop.permute.xlu0 %4688 }
 0x467   :  { %v19569_v26 = vpop.permute.xlu1 %4883  ;;  %v14575_v12 = vpop.f32.mrf.mxu0 }
 0x468   :  { %21344 = vst [vmem:[#allocation75_spill] sm:$0xff] %v19569_v26  ;;  %v19572_v8 = vpop.f32.mrf.mxu1  ;;  %5571 = vrot.lane.b32.xlu0 %v5498_v33, %s15954_s29 }
 0x469   :  { %21345 = vst [vmem:[#allocation63_spill] sm:$0xff] %v19572_v8  ;;  %5171 = vrot.lane.b32.xlu1 %v5150_v45, %s15961_s0  ;;  %v19577_v63 = vpop.f32.mrf.mxu0 }
 0x46a   :  { %21346 = vst [vmem:[#allocation95_spill] sm:$0xff] %v19577_v63  ;;  %v14628_v46 = vpop.f32.mrf.mxu1  ;;  %v19579_v18 = vpop.permute.xlu0 %4928 }
 0x46b   :  { %v19581_v13 = vpop.permute.xlu1 %4690  ;;  %v14576_v17 = vpop.f32.mrf.mxu0  ;;  %v5151_v46 = vrot.slane %v19409_v61, 1 }
 0x46c   :  { %v19583_v25 = vpop.f32.mrf.mxu1  ;;  %5221 = vrot.lane.b32.xlu0 %v5150_v45, %s15954_s29 }
 0x46d   :  { %21347 = vst [vmem:[#allocation48_spill] sm:$0xff] %v19583_v25  ;;  %5573 = vrot.lane.b32.xlu1 %v5500_v15, %s15954_s29  ;;  %v19588_v12 = vpop.f32.mrf.mxu0  ;;  %v5501_v25 = vrot.slane %v19403_v29, 7 }
 0x46e   :  { %21348 = vst [vmem:[#allocation50_spill] sm:$0xff] %v19588_v12  ;;  %v14631_v51 = vpop.f32.mrf.mxu1  ;;  %v19590_v8 = vpop.permute.xlu0 %4645 }
 0x46f   :  { %v19593_v63 = vpop.permute.xlu1 %4930  ;;  %v14579_v26 = vpop.f32.mrf.mxu0  ;;  %v5502_v29 = vsel %vm3790_vm4, %v5499_v21, %v5501_v25  ;;  %v5204_v21 = vrot.slane %v19436_v27, 1 }
 0x470   :  { %21349 = vst [vmem:[#allocation98_spill] sm:$0xff] %v19593_v63  ;;  %v19595_v62 = vpop.f32.mrf.mxu1  ;;  %5523 = vrot.lane.b32.xlu0 %v5500_v15, %s15961_s0  ;;  %v5152_v26 = vsel %vm3439_vm5, %v5149_v2, %v5151_v46 }
 0x471   :  { %21350 = vst [vmem:[#allocation96_spill] sm:$0xff] %v19595_v62  ;;  %5175 = vrot.lane.b32.xlu1 %v5151_v46, %s15961_s0  ;;  %v19599_v17 = vpop.f32.mrf.mxu0 }
 0x472   :  { %21351 = vst [vmem:[#allocation31_spill] sm:$0xff] %v19599_v17  ;;  %v14632_v33 = vpop.f32.mrf.mxu1  ;;  %v19601_v45 = vpop.permute.xlu0 %4885 }
 0x473   :  { %v19603_v12 = vpop.permute.xlu1 %4647  ;;  %v14580_v51 = vpop.f32.mrf.mxu0 }
 0x474   :  { %21352 = vst [vmem:[#allocation73_spill] sm:$0xff] %v19603_v12  ;;  %v19606_v61 = vpop.f32.mrf.mxu1  ;;  %5225 = vrot.lane.b32.xlu0 %v5151_v46, %s15954_s29 }
 0x475   :  { %21353 = vst [vmem:[#allocation102_spill] sm:$0xff] %v19606_v61  ;;  %5223 = vrot.lane.b32.xlu1 %v5152_v26, %s15954_s29  ;;  %v19611_v15 = vpop.f32.mrf.mxu0 }
 0x476   :  { %21354 = vst [vmem:[#allocation37_spill] sm:$0xff] %v19611_v15  ;;  %v14635_v63 = vpop.f32.mrf.mxu1  ;;  %v19613_v23 = vpop.permute.xlu0 %4692 }
 0x477   :  { %v19615_v33 = vpop.permute.xlu1 %4887  ;;  %v14583_v58 = vpop.f32.mrf.mxu0  ;;  %v5554_v63 = vrot.slane %v19429_v40, 7  ;;  %v5207_v40 = vrot.slane %v19493_v47, 1 }
 0x478   :  { %21355 = vst [vmem:[#allocation79_spill] sm:$0xff] %v19615_v33  ;;  %v19617_v1 = vpop.f32.mrf.mxu1  ;;  %5173 = vrot.lane.b32.xlu0 %v5152_v26, %s15961_s0 }
 0x479   :  { %21356 = vst [vmem:[#allocation88_spill] sm:$0xff] %v19617_v1  ;;  %5525 = vrot.lane.b32.xlu1 %v5502_v29, %s15961_s0  ;;  %v19622_v51 = vpop.f32.mrf.mxu0  ;;  %v5556_v14 = vsel %vm3790_vm4, %v5554_v63, %v5555_v53 }
 0x47a   :  { %21357 = vst [vmem:[#allocation103_spill] sm:$0xff] %v19622_v51  ;;  %v14636_v2 = vpop.f32.mrf.mxu1  ;;  %v19624_v46 = vpop.permute.xlu0 %4932 }
 0x47b   :  { %21358 = vst [vmem:[#allocation99_spill] sm:$0xff] %v19624_v46  ;;  %v19628_v37 = vpop.permute.xlu1 %4694  ;;  %v14584_v58 = vpop.f32.mrf.mxu0 }
 0x47c   :  { %v19631_v5 = vpop.f32.mrf.mxu1  ;;  %5575 = vrot.lane.b32.xlu0 %v5502_v29, %s15954_s29  ;;  %v5206_v29 = vsel %vm3439_vm5, %v5204_v21, %v5205_v60 }
 0x47d   :  { %5577 = vrot.lane.b32.xlu1 %v5554_v63, %s15954_s29  ;;  %v19635_v25 = vpop.f32.mrf.mxu0  ;;  %v5557_v63 = vrot.slane %v19482_v36, 7 }
 0x47e   :  { %21359 = vst [vmem:[#allocation91_spill] sm:$0xff] %v19635_v25  ;;  %v14639_v26 = vpop.f32.mrf.mxu1  ;;  %v19638_v2 = vpop.permute.xlu0 %4649  ;;  %v21384_v25 = vld [vmem:[#allocation53_spill] sm:$0xff] }
 0x47f   :  { %21360 = vst [vmem:[#allocation46_spill] sm:$0xff] %v19638_v2  ;;  %v19641_v32 = vpop.permute.xlu1 %4934  ;;  %v14587_v58 = vpop.f32.mrf.mxu0 }
 0x480   :  { %21361 = vst [vmem:[#allocation70_spill] sm:$0xff] %v19641_v32  ;;  %v19644_v46 = vpop.f32.mrf.mxu1  ;;  %5579 = vrot.lane.b32.xlu0 %v5556_v14, %s15954_s29  ;;  %v5208_v58 = vsel %vm3439_vm5, %v5205_v60, %v5207_v40  ;;  %v5558_v60 = vsel %vm3790_vm4, %v5555_v53, %v5557_v63 }
 0x481   :  { %5227 = vrot.lane.b32.xlu1 %v5206_v29, %s15954_s29  ;;  %v19649_v35 = vpop.f32.mrf.mxu0 }
 0x482   :  { %21362 = vst [vmem:[#allocation60_spill] sm:$0xff] %v19649_v35  ;;  %v14640_v27 = vpop.f32.mrf.mxu1  ;;  %v19651_v26 = vpop.permute.xlu0 %4889 }
 0x483   :  { %21363 = vst [vmem:[#allocation86_spill] sm:$0xff] %v19651_v26  ;;  %v19653_v3 = vpop.permute.xlu1 %4651  ;;  %v14588_v47 = vpop.f32.mrf.mxu0 }
 0x484   :  { %21364 = vst [vmem:[#allocation61_spill] sm:$0xff] %v19653_v3  ;;  %v19657_v32 = vpop.f32.mrf.mxu1  ;;  %5229 = vrot.lane.b32.xlu0 %v5208_v58, %s15954_s29 }
 0x485   :  { %5231 = vrot.lane.b32.xlu1 %v5207_v40, %s15954_s29  ;;  %v19661_v21 = vpop.f32.mrf.mxu0 }
 0x486   :  { %21365 = vst [vmem:[#allocation58_spill] sm:$0xff] %v19661_v21  ;;  %v14643_v14 = vpop.f32.mrf.mxu1  ;;  %v19663_v29 = vpop.permute.xlu0 %4696 }
 0x487   :  { %v19665_v27 = vpop.permute.xlu1 %4891  ;;  %v14591_v10 = vpop.f32.mrf.mxu0 }
 0x488   :  { %21366 = vst [vmem:[#allocation42_spill] sm:$0xff] %v19665_v27  ;;  %v19667_v3 = vpop.f32.mrf.mxu1 }
 0x489   :  { %5581 = vrot.lane.b32.xlu1 %v5558_v60, %s15954_s29  ;;  %v19671_v36 = vpop.f32.mrf.mxu0  ;;  %6000 = vrot.lane.b32.xlu0 %v19667_v3, %s15961_s0 }
 0x48a   :  { %21367 = vst [vmem:[#allocation84_spill] sm:$0xff] %v19671_v36  ;;  %v14644_v40 = vpop.f32.mrf.mxu1  ;;  %v19675_v47 = vpop.permute.xlu0 %4936 }
 0x48b   :  { %v19677_v58 = vpop.permute.xlu1 %4698  ;;  %v14592_v14 = vpop.f32.mrf.mxu0 }
 0x48c   :  { %21368 = vst [vmem:[#allocation164_spill] sm:$0xff] %v19677_v58  ;;  %v19679_v57 = vpop.f32.mrf.mxu1 }
 0x48d   :  { %v19681_v10 = vpop.f32.mrf.mxu0  ;;  %6002 = vrot.lane.b32.xlu1 %v19679_v57, %s15961_s0  ;;  %5760 = vrot.lane.b32.xlu0 %v19671_v36, %s15961_s0 }
 0x48e   :  { %21369 = vst [vmem:[#allocation105_spill] sm:$0xff] %v19681_v10  ;;  %v14647_v53 = vpop.f32.mrf.mxu1  ;;  %v19687_v63 = vpop.permute.xlu0 %4653 }
 0x48f   :  { %21370 = vst [vmem:[#allocation33_spill] sm:$0xff] %v19687_v63  ;;  %v19689_v60 = vpop.permute.xlu1 %4938  ;;  %v14595_v40 = vpop.f32.mrf.mxu0 }
 0x490   :  { %21371 = vst [vmem:[#allocation76_spill] sm:$0xff] %v19689_v60  ;;  %v19691_v27 = vpop.f32.mrf.mxu1 }
 0x491   :  { %v19693_v30 = vpop.f32.mrf.mxu0  ;;  %6004 = vrot.lane.b32.xlu0 %v19691_v27, %s15961_s0  ;;  %5762 = vrot.lane.b32.xlu1 %v19681_v10, %s15961_s0 }
 0x492   :  { %21372 = vst [vmem:[#allocation107_spill] sm:$0xff] %v19693_v30  ;;  %v14648_v14 = vpop.f32.mrf.mxu1  ;;  %v19699_v58 = vpop.permute.xlu0 %4893 }
 0x493   :  { %21373 = vst [vmem:[#allocation137_spill] sm:$0xff] %v19699_v58  ;;  %v19701_v2 = vpop.permute.xlu1 %4655  ;;  %v14596_v53 = vpop.f32.mrf.mxu0 }
 0x494   :  { %21374 = vst [vmem:[#allocation108_spill] sm:$0xff] %v19701_v2  ;;  %v5929_v63 = vpop.f32.mrf.mxu1 }
 0x495   :  { %v5689_v12 = vpop.f32.mrf.mxu0  ;;  %6006 = vrot.lane.b32.xlu1 %v5929_v63, %s15961_s0  ;;  %5764 = vrot.lane.b32.xlu0 %v19693_v30, %s15961_s0 }
 0x496   :  { %v14651_v40 = vpop.f32.mrf.mxu1  ;;  %v19706_v26 = vpop.permute.xlu0 %4700 }
 0x497   :  { %21375 = vst [vmem:[#allocation166_spill] sm:$0xff] %v19706_v26  ;;  %v19708_v60 = vpop.permute.xlu1 %4895  ;;  %v14599_v33 = vpop.f32.mrf.mxu0 }
 0x498   :  { %21376 = vst [vmem:[#allocation89_spill] sm:$0xff] %v19708_v60  ;;  %v5932_v39 = vpop.f32.mrf.mxu1 }
 0x499   :  { %v5692_v14 = vpop.f32.mrf.mxu0  ;;  %6051 = vrot.lane.b32.xlu0 %v5929_v63, %s15954_s29  ;;  %5766 = vrot.lane.b32.xlu1 %v5689_v12, %s15961_s0 }
 0x49a   :  { %v14652_v53 = vpop.f32.mrf.mxu1  ;;  %v19712_v2 = vpop.permute.xlu0 %4940 }
 0x49b   :  { %21377 = vst [vmem:[#allocation163_spill] sm:$0xff] %v19712_v2  ;;  %v19714_v58 = vpop.permute.xlu1 %4702  ;;  %v14600_v36 = vpop.f32.mrf.mxu0 }
 0x49c   :  { %21378 = vst [vmem:[#allocation45_spill] sm:$0xff] %v19714_v58  ;;  %v5937_v10 = vpop.f32.mrf.mxu1  ;;  %v21382_v58 = vld [vmem:[#allocation29_spill] sm:$0xff] }
 0x49d   :  { %v5697_v30 = vpop.f32.mrf.mxu0  ;;  %5811 = vrot.lane.b32.xlu0 %v5689_v12, %s15954_s29  ;;  %6053 = vrot.lane.b32.xlu1 %v5932_v39, %s15954_s29  ;;  %v4669_v12 = vadd.f32 %v19414_v56, %v21382_v58  ;;  %v21386_v56 = vld [vmem:[#allocation127_spill] sm:$0xff] }
 0x49e   :  { %v14655_v40 = vpop.f32.mrf.mxu1  ;;  %v19718_v33 = vpop.permute.xlu0 %4704  ;;  %v4671_v58 = vadd.f32 %v19473_v50, %v21386_v56 }
 0x49f   :  { %21379 = vst [vmem:[#allocation87_spill] sm:$0xff] %v19718_v33  ;;  %v19720_v60 = vpop.permute.xlu1 %4942  ;;  %v14603_v63 = vpop.f32.mrf.mxu0  ;;  %v4910_v33 = vadd.f32 %v19478_v59, %v21384_v25  ;;  %v21388_v59 = vld [vmem:[#allocation123_spill] sm:$0xff] }
 0x4a0   :  { %21380 = vst [vmem:[#allocation32_spill] sm:$0xff] %v19720_v60  ;;  %v5940_v26 = vpop.f32.mrf.mxu1  ;;  %v4720_v63 = vadd.f32 %v19514_v55, %v4669_v12  ;;  %v4670_v25 = vadd.f32 %v19446_v16, %v21388_v59  ;;  %v4722_v12 = vadd.f32 %v19567_v41, %v4671_v58 }
 0x4a1   :  { %v5700_v21 = vpop.f32.mrf.mxu0  ;;  %6008 = vrot.lane.b32.xlu0 %v5932_v39, %s15961_s0  ;;  %5813 = vrot.lane.b32.xlu1 %v5692_v14, %s15954_s29  ;;  %v4961_v39 = vadd.f32 %v19540_v28, %v4910_v33 }
 0x4a2   :  { %v14656_v53 = vpop.f32.mrf.mxu1  ;;  %v19724_v36 = vpop.permute.xlu0 %4944  ;;  %v5133_v28 = vadd.f32 %v19087_v19, %v4720_v63  ;;  %v21391_v19 = vrot.slane %v19092_v44, 1 }
 0x4a3   :  { %21381 = vst [vmem:[#allocation106_spill] sm:$0xff] %v19724_v36  ;;  %v19728_v2 = vpop.permute.xlu1 %4706  ;;  %v14604_v40 = vpop.f32.mrf.mxu0  ;;  %v5484_v50 = vadd.f32 %v19080_v24, %v4961_v39 }
 0x4a4   :  { %21383 = vst [vmem:[#allocation55_spill] sm:$0xff] %v19728_v2  ;;  %v5945_v60 = vpop.f32.mrf.mxu1  ;;  %v5135_v24 = vadd.f32 %v21391_v19, %v4722_v12 }
 0x4a5   :  { %v5705_v35 = vpop.f32.mrf.mxu0  ;;  %6010 = vrot.lane.b32.xlu1 %v5937_v10, %s15961_s0  ;;  %5768 = vrot.lane.b32.xlu0 %v5692_v14, %s15961_s0  ;;  %v4721_v14 = vadd.f32 %v19531_v34, %v4670_v25 }
 0x4a6   :  { %v14659_v53 = vpop.f32.mrf.mxu1  ;;  %v19736_v36 = vpop.permute.xlu0 %5503 }
 0x4a7   :  { %21385 = vst [vmem:[#allocation82_spill] sm:$0xff] %v19736_v36  ;;  %v19740_v40 = vpop.permute.xlu1 %4946  ;;  %v14607_v2 = vpop.f32.mrf.mxu0 }
 0x4a8   :  { %21387 = vst [vmem:[#allocation39_spill] sm:$0xff] %v19740_v40  ;;  %v5948_v55 = vpop.f32.mrf.mxu1  ;;  %v21389_v2 = vld [vmem:[#allocation126_spill] sm:$0xff] }
 0x4a9   :  { %v5708_v15 = vpop.f32.mrf.mxu0  ;;  %6055 = vrot.lane.b32.xlu0 %v5937_v10, %s15954_s29  ;;  %5770 = vrot.lane.b32.xlu1 %v5697_v30, %s15961_s0  ;;  %v4911_v56 = vadd.f32 %v19500_v38, %v21389_v2  ;;  %v5134_v38 = vadd.f32 %v19115_v9, %v4721_v14 }
 0x4aa   :  { %v14660_v33 = vpop.f32.mrf.mxu1  ;;  %v5154_v53 = vpop.permute.xlu0 %5153 }
 0x4ab   :  { %v5506_v16 = vpop.permute.xlu1 %5505  ;;  %v5189_v59 = vadd.f32 %v5154_v53, %v5133_v28  ;;  %v14608_v36 = vpop.f32.mrf.mxu0  ;;  %v4962_v10 = vadd.f32 %v19579_v18, %v4911_v56  ;;  %v21392_v28 = vld [vmem:[#allocation129_spill] sm:$0xff] }
 0x4ac   :  { %v19752_v41 = vadd.f32 %v5506_v16, %v5484_v50  ;;  %v5953_v58 = vpop.f32.mrf.mxu1  ;;  %v4672_v33 = vadd.f32 %v19502_v0, %v21392_v28 }
 0x4ad   :  { %v5713_v40 = vpop.f32.mrf.mxu0  ;;  %5815 = vrot.lane.b32.xlu0 %v5697_v30, %s15954_s29  ;;  %6057 = vrot.lane.b32.xlu1 %v5940_v26, %s15954_s29  ;;  %v5485_v30 = vadd.f32 %v19104_v49, %v4962_v10 }
 0x4ae   :  { %21390 = vst [vmem:[#allocation85_spill] sm:$0xff] %v19752_v41  ;;  %v14663_v34 = vpop.f32.mrf.mxu1  ;;  %v5158_v63 = vpop.permute.xlu0 %5157  ;;  %v4723_v44 = vadd.f32 %v19581_v13, %v4672_v33  ;;  %v21425_v41 = vld [vmem:[#allocation164_spill] sm:$0xff] }
 0x4af   :  { %v5191_v39 = vadd.f32 %v5158_v63, %v5135_v24  ;;  %v5156_v25 = vpop.permute.xlu1 %5155  ;;  %v14611_v36 = vpop.f32.mrf.mxu0 }
 0x4b0   :  { %v5190_v50 = vadd.f32 %v5156_v25, %v5134_v38  ;;  %v5955_v18 = vpop.f32.mrf.mxu1 }
 0x4b1   :  { %v5715_v40 = vpop.f32.mrf.mxu0  ;;  %6059 = vrot.lane.b32.xlu0 %v5945_v60, %s15954_s29  ;;  %5817 = vrot.lane.b32.xlu1 %v5700_v21, %s15954_s29  ;;  %v5136_v21 = vadd.f32 %v19304_v4, %v4723_v44 }
 0x4b2   :  { %v14664_v26 = vpop.f32.mrf.mxu1  ;;  %v5508_v12 = vpop.permute.xlu0 %5507 }
 0x4b3   :  { %v19766_v9 = vadd.f32 %v5508_v12, %v5485_v30  ;;  %v19768_v14 = vpop.permute.xlu1 %5509  ;;  %v14612_v53 = vpop.f32.mrf.mxu0 }
 0x4b4   :  { %21394 = vst [vmem:[#allocation97_spill] sm:$0xff] %v19768_v14  ;;  %v5959_v2 = vpop.f32.mrf.mxu1  ;;  %v21424_v14 = vld [vmem:[#allocation46_spill] sm:$0xff] }
 0x4b5   :  { %21393 = vst [vmem:[#allocation49_spill] sm:$0xff] %v19766_v9  ;;  %v5719_v0 = vpop.f32.mrf.mxu0  ;;  %6061 = vrot.lane.b32.xlu1 %v5948_v55, %s15954_s29  ;;  %5819 = vrot.lane.b32.xlu0 %v5705_v35, %s15954_s29  ;;  %v21397_v35 = vld [vmem:[#allocation133_spill] sm:$0xff]  ;;  %v21426_v9 = vld [vmem:[#allocation150_spill] sm:$0xff] }
 0x4b6   :  { %v14667_v60 = vpop.f32.mrf.mxu1  ;;  %v5210_v56 = vpop.permute.xlu0 %5209  ;;  %v4673_v34 = vadd.f32 %v19537_v52, %v21397_v35  ;;  %v21404_v0 = vld [vmem:[#allocation138_spill] sm:$0xff] }
 0x4b7   :  { %v19773_v49 = vadd.f32 %v5210_v56, %v5189_v59  ;;  %v5160_v13 = vpop.permute.xlu1 %5159  ;;  %v14615_v16 = vpop.f32.mrf.mxu0  ;;  %v4915_v60 = vadd.f32 %v19601_v45, %v21404_v0 }
 0x4b8   :  { %v5192_v58 = vadd.f32 %v5160_v13, %v5136_v21  ;;  %v5961_v10 = vpop.f32.mrf.mxu1  ;;  %v4724_v59 = vadd.f32 %v19613_v23, %v4673_v34  ;;  %v21406_v16 = vld [vmem:[#allocation139_spill] sm:$0xff] }
 0x4b9   :  { %21395 = vst [vmem:[#allocation165_spill] sm:$0xff] %v19773_v49  ;;  %v5721_v19 = vpop.f32.mrf.mxu0  ;;  %5559 = vrot.lane.b32.xlu0 %v19364_v11, %s15954_s29  ;;  %5821 = vrot.lane.b32.xlu1 %v5708_v15, %s15954_s29  ;;  %v4966_v56 = vadd.f32 %v19675_v47, %v4915_v60  ;;  %v21413_v60 = vld [vmem:[#allocation51_spill] sm:$0xff]  ;;  %v21419_v49 = vld [vmem:[#allocation86_spill] sm:$0xff] }
 0x4ba   :  { %v14668_v24 = vpop.f32.mrf.mxu1  ;;  %v19778_v55 = vpop.permute.xlu0 %5511  ;;  %v5137_v52 = vadd.f32 %v19343_v22, %v4724_v59 }
 0x4bb   :  { %21396 = vst [vmem:[#allocation110_spill] sm:$0xff] %v19778_v55  ;;  %v5164_v63 = vpop.permute.xlu1 %5163  ;;  %v14616_v4 = vpop.f32.mrf.mxu0  ;;  %v5489_v19 = vadd.f32 %v19364_v11, %v4966_v56 }
 0x4bd   :  { %5563 = vrot.lane.b32.xlu0 %v19487_v6, %s15954_s29  ;;  %5561 = vrot.lane.b32.xlu1 %v19425_v48, %s15954_s29 }
 0x4be   :  { %v5214_v38 = vpop.permute.xlu0 %5213 }
 0x4bf   :  { %v19787_v25 = vadd.f32 %v5214_v38, %v5191_v39  ;;  %v5212_v15 = vpop.permute.xlu1 %5211  ;;  %v21401_v39 = vld [vmem:[#allocation136_spill] sm:$0xff]  ;;  %v21407_v38 = vld [vmem:[#allocation37_spill] sm:$0xff] }
 0x4c0   :  { %v19789_v36 = vadd.f32 %v5212_v15, %v5190_v50  ;;  %v4674_v50 = vadd.f32 %v19553_v42, %v21401_v39 }
 0x4c1   :  { %21398 = vst [vmem:[#allocation66_spill] sm:$0xff] %v19787_v25  ;;  %5567 = vrot.lane.b32.xlu0 %v19520_v43, %s15954_s29  ;;  %5565 = vrot.lane.b32.xlu1 %v19497_v54, %s15954_s29  ;;  %v21418_v25 = vld [vmem:[#allocation146_spill] sm:$0xff] }
 0x4c2   :  { %21399 = vst [vmem:[#allocation130_spill] sm:$0xff] %v19789_v36  ;;  %v5162_v23 = vpop.permute.xlu0 %5161  ;;  %v4725_v30 = vadd.f32 %v19628_v37, %v4674_v50  ;;  %v21410_v50 = vld [vmem:[#allocation58_spill] sm:$0xff] }
 0x4c3   :  { %v19796_v28 = vpop.permute.xlu1 %5513  ;;  %v5193_v33 = vadd.f32 %v5162_v23, %v5137_v52  ;;  %v21408_v52 = vld [vmem:[#allocation60_spill] sm:$0xff]  ;;  %v21409_v23 = vld [vmem:[#allocation91_spill] sm:$0xff] }
 0x4c4   :  { %21400 = vst [vmem:[#allocation117_spill] sm:$0xff] %v19796_v28  ;;  %v5138_v12 = vadd.f32 %v19309_v7, %v4725_v30  ;;  %v21423_v28 = vld [vmem:[#allocation147_spill] sm:$0xff] }
 0x4c5   :  { %5988 = vrot.lane.b32.xlu0 %v19595_v62, %s15961_s0  ;;  %5569 = vrot.lane.b32.xlu1 %v19556_v31, %s15954_s29  ;;  %v4677_v55 = vadd.f32 %v21424_v14, %v21423_v28  ;;  %v21431_v28 = vld [vmem:[#allocation32_spill] sm:$0xff] }
 0x4c6   :  { %v5516_v18 = vpop.permute.xlu0 %5515  ;;  %v5194_v37 = vadd.f32 %v5164_v63, %v5138_v12  ;;  %v21411_v12 = vld [vmem:[#allocation105_spill] sm:$0xff] }
 0x4c7   :  { %v5216_v40 = vpop.permute.xlu1 %5215  ;;  %v5545_v24 = vadd.f32 %v5516_v18, %v5489_v19  ;;  %v21415_v19 = vld [vmem:[#allocation142_spill] sm:$0xff] }
 0x4c8   :  { %v19805_v44 = vadd.f32 %v5216_v40, %v5192_v58  ;;  %v4675_v58 = vadd.f32 %v19590_v8, %v21406_v16 }
 0x4c9   :  { %5992 = vrot.lane.b32.xlu0 %v19617_v1, %s15961_s0  ;;  %5990 = vrot.lane.b32.xlu1 %v19606_v61, %s15961_s0  ;;  %v4917_v1 = vadd.f32 %v21419_v49, %v21418_v25 }
 0x4ca   :  { %21402 = vst [vmem:[#allocation40_spill] sm:$0xff] %v19805_v44  ;;  %v5166_v22 = vpop.permute.xlu0 %5165  ;;  %v4726_v10 = vadd.f32 %v19663_v29, %v4675_v58 }
 0x4cb   :  { %v19811_v26 = vpop.permute.xlu1 %5517 }
 0x4cc   :  { %v5139_v35 = vadd.f32 %v19399_v20, %v4726_v10 }
 0x4cd   :  { %5996 = vrot.lane.b32.xlu0 %v19644_v46, %s15961_s0  ;;  %5994 = vrot.lane.b32.xlu1 %v19631_v5, %s15961_s0 }
 0x4ce   :  { %v19818_v42 = vpop.permute.xlu0 %5169  ;;  %v5195_v4 = vadd.f32 %v5166_v22, %v5139_v35 }
 0x4cf   :  { %v5220_v53 = vpop.permute.xlu1 %5219 }
 0x4d0   :  { %v19820_v2 = vadd.f32 %v5220_v53, %v5194_v37  ;;  %v21412_v37 = vld [vmem:[#allocation84_spill] sm:$0xff] }
 0x4d1   :  { %6039 = vrot.lane.b32.xlu0 %v19631_v5, %s15954_s29  ;;  %5998 = vrot.lane.b32.xlu1 %v19657_v32, %s15961_s0 }
 0x4d2   :  { %21403 = vst [vmem:[#allocation92_spill] sm:$0xff] %v19820_v2  ;;  %v5218_v7 = vpop.permute.xlu0 %5217 }
 0x4d3   :  { %v19829_v21 = vadd.f32 %v5218_v7, %v5193_v33  ;;  %v19831_v13 = vpop.permute.xlu1 %5167  ;;  %v21414_v7 = vld [vmem:[#allocation107_spill] sm:$0xff] }
 0x4d5   :  { %21405 = vst [vmem:[#allocation152_spill] sm:$0xff] %v19829_v21  ;;  %6043 = vrot.lane.b32.xlu0 %v19657_v32, %s15954_s29  ;;  %6041 = vrot.lane.b32.xlu1 %v19644_v46, %s15954_s29 }
 0x4d6   :  { %v19839_v45 = vpop.permute.xlu0 %5519 }
 0x4d7   :  { %v19843_v47 = vpop.permute.xlu1 %5521 }
 0x4d9   :  { %6047 = vrot.lane.b32.xlu0 %v19679_v57, %s15954_s29  ;;  %6045 = vrot.lane.b32.xlu1 %v19667_v3, %s15954_s29 }
 0x4da   :  { %v5572_v8 = vpop.permute.xlu0 %5571 }
 0x4db   :  { %v5601_v34 = vadd.f32 %v5572_v8, %v5545_v24  ;;  %v19850_v63 = vpop.permute.xlu1 %5171  ;;  %v21416_v24 = vld [vmem:[#allocation79_spill] sm:$0xff] }
 0x4dc   :  { %v4916_v8 = vadd.f32 %v21416_v24, %v21415_v19 }
 0x4dd   :  { %5748 = vrot.lane.b32.xlu0 %v19599_v17, %s15961_s0  ;;  %6049 = vrot.lane.b32.xlu1 %v19691_v27, %s15954_s29  ;;  %v5970_v19 = vadd.f32 %v19631_v5, %v5601_v34 }
 0x4de   :  { %v5222_v11 = vpop.permute.xlu0 %5221 }
 0x4df   :  { %v5251_v29 = vadd.f32 %v5222_v11, %v5195_v4  ;;  %v5574_v59 = vpop.permute.xlu1 %5573  ;;  %v21417_v11 = vld [vmem:[#allocation76_spill] sm:$0xff] }
 0x4e1   :  { %5752 = vrot.lane.b32.xlu0 %v19622_v51, %s15961_s0  ;;  %5750 = vrot.lane.b32.xlu1 %v21407_v38, %s15961_s0  ;;  %v4967_v51 = vadd.f32 %v21417_v11, %v4916_v8  ;;  %v21420_v8 = vld [vmem:[#allocation163_spill] sm:$0xff]  ;;  %v5730_v5 = vadd.f32 %v21409_v23, %v5251_v29 }
 0x4e2   :  { %v19860_v20 = vpop.permute.xlu0 %5523  ;;  %v4968_v11 = vadd.f32 %v21420_v8, %v4917_v1  ;;  %v21429_v8 = vld [vmem:[#allocation154_spill] sm:$0xff] }
 0x4e3   :  { %v19862_v15 = vpop.permute.xlu1 %5175 }
 0x4e5   :  { %5756 = vrot.lane.b32.xlu0 %v21408_v52, %s15961_s0  ;;  %5754 = vrot.lane.b32.xlu1 %v21409_v23, %s15961_s0 }
 0x4e6   :  { %v19868_v33 = vpop.permute.xlu0 %5225 }
 0x4e7   :  { %v19870_v39 = vpop.permute.xlu1 %5223 }
 0x4e9   :  { %5799 = vrot.lane.b32.xlu0 %v21409_v23, %s15954_s29  ;;  %5758 = vrot.lane.b32.xlu1 %v21410_v50, %s15961_s0  ;;  %v21432_v23 = vld [vmem:[#allocation106_spill] sm:$0xff] }
 0x4ea   :  { %v19876_v18 = vpop.permute.xlu0 %5173 }
 0x4eb   :  { %v19878_v40 = vpop.permute.xlu1 %5525 }
 0x4ed   :  { %5803 = vrot.lane.b32.xlu0 %v21410_v50, %s15954_s29  ;;  %5801 = vrot.lane.b32.xlu1 %v21408_v52, %s15954_s29 }
 0x4ee   :  { %v5576_v30 = vpop.permute.xlu0 %5575 }
 0x4ef   :  { %v19884_v22 = vpop.permute.xlu1 %5577 }
 0x4f1   :  { %5807 = vrot.lane.b32.xlu0 %v21411_v12, %s15954_s29  ;;  %5805 = vrot.lane.b32.xlu1 %v21412_v37, %s15954_s29 }
 0x4f2   :  { %v19890_v53 = vpop.permute.xlu0 %5579 }
 0x4f3   :  { %v19892_v0 = vpop.permute.xlu1 %5227 }
 0x4f5   :  { %14989 = vrot.lane.b32.xlu0 %v21413_v60, %s15962_s25  ;;  %5809 = vrot.lane.b32.xlu1 %v21414_v7, %s15954_s29  ;;  %v5490_v60 = vadd.f32 %v19425_v48, %v4967_v51  ;;  %v21421_v51 = vld [vmem:[#allocation143_spill] sm:$0xff]  ;;  %v21427_v7 = vld [vmem:[#allocation42_spill] sm:$0xff]  ;;  %s15963_s29 = smov [#allocation3]  }
 0x4f6   :  { %v19898_v56 = vpop.permute.xlu0 %5229  ;;  %v4918_v1 = vadd.f32 %v21427_v7, %v21426_v9  ;;  %s113_s26 = sshll.u32 %s15963_s29, 4  ;;  %s114_s26 = int_to_ptr.vmem [resolvable:$true] %s113_s26 }
 0x4f7   :  { %v19900_v16 = vpop.permute.xlu1 %5231  ;;  %v5546_v44 = vadd.f32 %v19811_v26, %v5490_v60  ;;  %v21422_v26 = vld [vmem:[#allocation73_spill] sm:$0xff]  ;;  %s15904_s27 = scalar_lea.vmem %s114_s26, 58880  ;;  %p15909_p3 = scmp.lt.s32.totalorder %s114_s26, %s114_s26 }
 0x4f8   :  { %v4676_v60 = vadd.f32 %v21422_v26, %v21421_v51  ;;  %v21430_v51 = vld [vmem:[#allocation137_spill] sm:$0xff]  ;;  %p15905_p2 = scmp.ne.s32.totalorder %s114_s26, %s15904_s27  ;;  %p15910_p4 = scmp.lt.s32.totalorder %s15904_s27, %s15904_s27 }
 0x4f9   :  { %v5602_v36 = vadd.f32 %v5574_v59, %v5546_v44  ;;  %v4919_v26 = vadd.f32 %v21430_v51, %v21429_v8  ;;  %v21441_v51 = vld [vmem:[#allocation45_spill] sm:$0xff] }
 0x4fa   :  { %v4727_v49 = vadd.f32 %v21425_v41, %v4676_v60  ;;  %p15911_p5 = por %p15910_p4, %p15909_p3 }
 0x4fb   :  { %v19902_v58 = vpop.permute.xlu1 %5581  ;;  %v6001_v10 = vpop.permute.xlu0 %6000  ;;  %v5971_v48 = vadd.f32 %v19644_v46, %v5602_v36  ;;  %v5491_v46 = vadd.f32 %v19487_v6, %v4968_v11  ;;  %v21434_v6 = vld [vmem:[#allocation78_spill] sm:$0xff] }
 0x4fc   :  { %v6030_v61 = vadd.f32 %v6001_v10, %v5970_v19  ;;  %v21428_v10 = vld [vmem:[#allocation166_spill] sm:$0xff]  ;;  %p15912_p6 = pnand %p15911_p5, %p15905_p2 }
 0x4fd   :  { %v4728_v19 = vadd.f32 %v21428_v10, %v4677_v55  ;;  %v5547_v41 = vadd.f32 %v19839_v45, %v5491_v46  ;;  %v21437_v10 = vld [vmem:[#allocation158_spill] sm:$0xff] }
 0x4ff   :  { %v6003_v35 = vpop.permute.xlu1 %6002  ;;  %v5761_v4 = vpop.permute.xlu0 %5760  ;;  %v5141_v11 = vadd.f32 %v21434_v6, %v4728_v19  ;;  %v21439_v19 = vld [vmem:[#allocation155_spill] sm:$0xff] }
 0x500   :  { %v6031_v44 = vadd.f32 %v6003_v35, %v5971_v48  ;;  %v5790_v14 = vadd.f32 %v5761_v4, %v5730_v5  ;;  %v21433_v48 = vld [vmem:[#allocation30_spill] sm:$0xff]  ;;  %v21435_v4 = vld [vmem:[#allocation151_spill] sm:$0xff]  ;;  %v21436_v5 = vld [vmem:[#allocation61_spill] sm:$0xff] }
 0x501   :  { %v5140_v60 = vadd.f32 %v21433_v48, %v4727_v49  ;;  %v21438_v49 = vld [vmem:[#allocation89_spill] sm:$0xff]  ;;  %v5197_v46 = vadd.f32 %v19818_v42, %v5141_v11  ;;  %v21445_v11 = vld [vmem:[#allocation87_spill] sm:$0xff] }
 0x503   :  { %v6005_v2 = vpop.permute.xlu0 %6004  ;;  %v19907_v17 = vpop.permute.xlu1 %5762  ;;  %v5196_v45 = vadd.f32 %v19831_v13, %v5140_v60  ;;  %v5253_v60 = vadd.f32 %v19868_v33, %v5197_v46 }
 0x507   :  { %v19911_v38 = vpop.permute.xlu1 %6006  ;;  %v19913_v21 = vpop.permute.xlu0 %5764 }
 0x50b   :  { %v6052_v24 = vpop.permute.xlu0 %6051  ;;  %v19918_v62 = vpop.permute.xlu1 %5766 }
 0x50c   :  { %v6081_v59 = vadd.f32 %v6052_v24, %v6030_v61  ;;  %v4969_v61 = vadd.f32 %v21431_v28, %v4918_v1  ;;  %v4970_v24 = vadd.f32 %v21432_v23, %v4919_v26  ;;  %v4678_v1 = vadd.f32 %v21436_v5, %v21435_v4 }
 0x50d   :  { %v5252_v28 = vadd.f32 %v19870_v39, %v5196_v45  ;;  %v21447_v45 = vld [vmem:[#allocation69_spill] sm:$0xff] }
 0x50e   :  { %v6207_v35 = vrot.slane %v6081_v59, 1  ;;  %v4729_v26 = vadd.f32 %v21441_v51, %v4678_v1 }
 0x50f   :  { %v5812_v25 = vpop.permute.xlu0 %5811  ;;  %v6054_v34 = vpop.permute.xlu1 %6053  ;;  %v5731_v33 = vadd.f32 %v21408_v52, %v5252_v28 }
 0x510   :  { %v6082_v36 = vadd.f32 %v6054_v34, %v6031_v44  ;;  %v19938_v9 = vadd.f32 %v5812_v25, %v5790_v14  ;;  %v5603_v44 = vadd.f32 %v5576_v30, %v5547_v41  ;;  %v4920_v25 = vadd.f32 %v21438_v49, %v21437_v10  ;;  %v21440_v30 = vld [vmem:[#allocation33_spill] sm:$0xff] }
 0x511   :  { %v4679_v8 = vadd.f32 %v21440_v30, %v21439_v19  ;;  %v5493_v14 = vadd.f32 %v19520_v43, %v4970_v24  ;;  %v21446_v24 = vld [vmem:[#allocation55_spill] sm:$0xff]  ;;  %v5142_v10 = vadd.f32 %v21447_v45, %v4729_v26 }
 0x512   :  { %v6208_v29 = vrot.slane %v6082_v36, 1  ;;  %v5492_v36 = vadd.f32 %v19497_v54, %v4969_v61  ;;  %v5972_v42 = vadd.f32 %v19657_v32, %v5603_v44  ;;  %v21443_v54 = vld [vmem:[#allocation159_spill] sm:$0xff]  ;;  %v21444_v61 = vld [vmem:[#allocation108_spill] sm:$0xff] }
 0x513   :  { %v6009_v55 = vpop.permute.xlu0 %6008  ;;  %v5814_v7 = vpop.permute.xlu1 %5813  ;;  %v4680_v6 = vadd.f32 %v21444_v61, %v21443_v54  ;;  %v4730_v4 = vadd.f32 %v21445_v11, %v4679_v8  ;;  %v5549_v5 = vadd.f32 %v19860_v20, %v5493_v14  ;;  %v5198_v20 = vadd.f32 %v19850_v63, %v5142_v10  ;;  %v21449_v8 = vld [vmem:[#allocation65_spill] sm:$0xff]  ;;  %v21451_v45 = vld [vmem:[#allocation59_spill] sm:$0xff]  ;;  %v21452_v10 = vld [vmem:[#allocation52_spill] sm:$0xff] }
 0x514   :  { %v19942_v34 = vsel %vm3439_vm5, %v6207_v35, %v6208_v29  ;;  %v21442_v35 = vld [vmem:[#allocation39_spill] sm:$0xff]  ;;  %v5548_v48 = vadd.f32 %v19843_v47, %v5492_v36  ;;  %v6032_v39 = vadd.f32 %v6005_v2, %v5972_v42  ;;  %v5791_v2 = vadd.f32 %v19907_v17, %v5731_v33 }
 0x515   :  { %v6235_v59 = vmax.f32 %v19938_v9, %v19942_v34  ;;  %v4971_v23 = vadd.f32 %v21442_v35, %v4920_v25  ;;  %v4731_v1 = vadd.f32 %v21446_v24, %v4680_v6  ;;  %v5605_v47 = vadd.f32 %v19890_v53, %v5549_v5  ;;  %v21448_v36 = vld [vmem:[#allocation35_spill] sm:$0xff] }
 0x516   :  { %v5604_v43 = vadd.f32 %v19884_v22, %v5548_v48  ;;  %v5732_v25 = vadd.f32 %v21410_v50, %v5253_v60  ;;  %v5143_v22 = vadd.f32 %v21448_v36, %v4730_v4  ;;  %v5842_v26 = vadd.f32 %v5814_v7, %v5791_v2 }
 0x517   :  { %v6011_v13 = vpop.permute.xlu1 %6010  ;;  %v5769_v41 = vpop.permute.xlu0 %5768  ;;  %v5494_v44 = vadd.f32 %v19556_v31, %v4971_v23  ;;  %v5144_v51 = vadd.f32 %v21449_v8, %v4731_v1  ;;  %v5254_v31 = vadd.f32 %v19892_v0, %v5198_v20  ;;  %v5974_v50 = vadd.f32 %v19679_v57, %v5605_v47 }
 0x518   :  { %v5973_v30 = vadd.f32 %v19667_v3, %v5604_v43  ;;  %v5792_v53 = vadd.f32 %v19913_v21, %v5732_v25  ;;  %v5199_v3 = vadd.f32 %v19876_v18, %v5143_v22 }
 0x519   :  { %v5550_v19 = vadd.f32 %v19878_v40, %v5494_v44  ;;  %v5200_v23 = vadd.f32 %v19862_v15, %v5144_v51  ;;  %v6034_v48 = vadd.f32 %v6009_v55, %v5974_v50  ;;  %v5733_v7 = vadd.f32 %v21412_v37, %v5254_v31 }
 0x51a   :  { %v6033_v17 = vadd.f32 %v19911_v38, %v5973_v30  ;;  %v5255_v57 = vadd.f32 %v19898_v56, %v5199_v3  ;;  %v21450_v56 = vld [vmem:[#allocation107_spill] sm:$0xff] }
 0x51b   :  { %v6056_v49 = vpop.permute.xlu0 %6055  ;;  %v5771_v32 = vpop.permute.xlu1 %5770  ;;  %v5606_v28 = vadd.f32 %v19902_v58, %v5550_v19  ;;  %v5256_v58 = vadd.f32 %v19900_v16, %v5200_v23  ;;  %v5793_v61 = vadd.f32 %v19918_v62, %v5733_v7  ;;  %v21453_v62 = vmax.f32 %v21451_v45, %v21452_v10 }
 0x51c   :  { %v6083_v46 = vadd.f32 %v6056_v49, %v6032_v39  ;;  %v5734_v15 = vadd.f32 %v21411_v12, %v5255_v57 }
 0x51d   :  { %v5975_v38 = vadd.f32 %v19691_v27, %v5606_v28  ;;  %v5735_v43 = vadd.f32 %v21450_v56, %v5256_v58 }
 0x51e   :  { %v6210_v52 = vrot.slane %v6083_v46, 1  ;;  %v5794_v24 = vadd.f32 %v5769_v41, %v5734_v15 }
 0x51f   :  { %v5816_v14 = vpop.permute.xlu0 %5815  ;;  %v6058_v63 = vpop.permute.xlu1 %6057  ;;  %v6035_v18 = vadd.f32 %v6011_v13, %v5975_v38  ;;  %v5795_v1 = vadd.f32 %v5771_v32, %v5735_v43  ;;  %v21454_v13 = vld [vmem:[#allocation28_spill] sm:$0xff] }
 0x520   :  { %v6211_v40 = vsel %vm3439_vm5, %v6208_v29, %v6210_v52  ;;  %v5843_v35 = vadd.f32 %v5816_v14, %v5792_v53  ;;  %v6084_v0 = vadd.f32 %v6058_v63, %v6033_v17  ;;  %v6163_v47 = vadd.f32 %v21454_v13, %v21453_v62 }
 0x521   :  { %v6236_v21 = vmax.f32 %v5842_v26, %v6211_v40 }
 0x522   :  { %v6237_v60 = vmax.f32 %v5843_v35, %v6210_v52  ;;  %v6212_v6 = vrot.slane %v6084_v0, 1  ;;  %v6166_v36 = vmax.f32 %v6163_v47, 0.0 }
 0x523   :  { %v6060_v42 = vpop.permute.xlu0 %6059  ;;  %v5818_v54 = vpop.permute.xlu1 %5817 }
 0x524   :  { %v6085_v29 = vadd.f32 %v6060_v42, %v6034_v48  ;;  %v5844_v55 = vadd.f32 %v5818_v54, %v5793_v61 }
 0x526   :  { %v6213_v11 = vrot.slane %v6085_v29, 1 }
 0x527   :  { %v6062_v4 = vpop.permute.xlu1 %6061  ;;  %v5820_v5 = vpop.permute.xlu0 %5819 }
 0x528   :  { %v6214_v37 = vsel %vm3439_vm5, %v6212_v6, %v6213_v11  ;;  %v6086_v39 = vadd.f32 %v6062_v4, %v6035_v18  ;;  %v5845_v33 = vadd.f32 %v5820_v5, %v5794_v24 }
 0x529   :  { %v6238_v16 = vmax.f32 %v5844_v55, %v6214_v37 }
 0x52a   :  { %v6215_v27 = vrot.slane %v6086_v39, 1 }
 0x52b   :  { %v6250_v12 = vmax.f32 %v6235_v59, %v6238_v16  ;;  %v5560_v49 = vpop.permute.xlu0 %5559  ;;  %v5822_v44 = vpop.permute.xlu1 %5821 }
 0x52c   :  { %v6216_v25 = vsel %vm3439_vm5, %v6213_v11, %v6215_v27  ;;  %v5846_v46 = vadd.f32 %v5822_v44, %v5795_v1 }
 0x52d   :  { %v6253_v41 = vadd.f32 %v21454_v13, %v6250_v12  ;;  %v6239_v20 = vmax.f32 %v5845_v33, %v6216_v25 }
 0x52e   :  { %v6240_v32 = vmax.f32 %v5846_v46, %v6215_v27 }
 0x52f   :  { %v6256_v22 = vmax.f32 %v6253_v41, 0.0  ;;  %v6251_v2 = vmax.f32 %v6236_v21, %v6239_v20  ;;  %v5564_v19 = vpop.permute.xlu0 %5563  ;;  %v5562_v30 = vpop.permute.xlu1 %5561 }
 0x530   :  { %15915 = shalt.err (!%p15912_p6)  }
 0x531   :  { %116 = dma.hbm_to_vmem [thread:$0]  %s20715_s5, 58880, %s114_s26, [#allocation4]  ;;  %v6252_v9 = vmax.f32 %v6237_v60, %v6240_v32  ;;  %v6254_v34 = vadd.f32 %v21454_v13, %v6251_v2  ;;  %v14993_v59 = vpack.i.bf16 %v6256_v22, %v6166_v36  ;;  %v21455_v31 = vld [vmem:[#allocation36_spill] sm:$0xff]  ;;  %v21456_v50 = vld [vmem:[#allocation41_spill] sm:$0xff]  ;;  %v21459_v21 = vld [vmem:[#allocation83_spill] sm:$0xff]  ;;  %vm6179_vm6 = vcmask 261120  }
 0x532   :  { %v4909_v26 = vadd.f32 %v21456_v50, %v21455_v31  ;;  %v21457_v63 = vld [vmem:[#allocation44_spill] sm:$0xff]  ;;  %v21461_v60 = vld [vmem:[#allocation54_spill] sm:$0xff]  ;;  %v21462_v57 = vld [vmem:[#allocation27_spill] sm:$0xff] }
 0x533   :  { %v6255_v53 = vadd.f32 %v21454_v13, %v6252_v9  ;;  %v6257_v52 = vmax.f32 %v6254_v34, 0.0  ;;  %v5568_v8 = vpop.permute.xlu0 %5567  ;;  %14994 = vrot.lane.b32.xlu1 %v14993_v59, %s15962_s25  ;;  %v5566_v51 = vpop.permute.xlu1 %5565  ;;  %v21458_v3 = vld [vmem:[#allocation132_spill] sm:$0xff]  ;;  %v21463_v7 = vrot.slane %v21462_v57, 7  ;;  %v21464_v54 = vld [vmem:[#allocation99_spill] sm:$0xff]  ;;  %v21465_v61 = vld [vmem:[#allocation98_spill] sm:$0xff] }
 0x534   :  { %v4960_v28 = vadd.f32 %v21457_v63, %v4909_v26  ;;  %v4913_v23 = vadd.f32 %v21459_v21, %v21458_v3  ;;  %v21460_v48 = vld [vmem:[#allocation128_spill] sm:$0xff]  ;;  %v21466_v6 = vld [vmem:[#allocation82_spill] sm:$0xff]  ;;  %v21467_v15 = vld [vmem:[#allocation135_spill] sm:$0xff] }
 0x535   :  { %v6258_v14 = vmax.f32 %v6255_v53, 0.0  ;;  %v4912_v0 = vadd.f32 %v21461_v60, %v21460_v48  ;;  %v21468_v55 = vld [vmem:[#allocation75_spill] sm:$0xff]  ;;  %v21469_v56 = vld [vmem:[#allocation70_spill] sm:$0xff]  ;;  %v21470_v37 = vld [vmem:[#allocation72_spill] sm:$0xff] }
 0x536   :  { %v5483_v42 = vadd.f32 %v21463_v7, %v4960_v28  ;;  %v4964_v58 = vadd.f32 %v21464_v54, %v4913_v23  ;;  %v4914_v4 = vadd.f32 %v21468_v55, %v21467_v15  ;;  %v21471_v1 = vld [vmem:[#allocation67_spill] sm:$0xff]  ;;  %v21472_v45 = vld [vmem:[#allocation49_spill] sm:$0xff]  ;;  %v21474_v47 = vld [vmem:[#allocation110_spill] sm:$0xff] }
 0x537   :  { %v14998_v17 = vpack.i.bf16 %v6258_v14, %v6257_v52  ;;  %v5989_v40 = vpop.permute.xlu0 %5988  ;;  %v5570_v35 = vpop.permute.xlu1 %5569  ;;  %v4963_v18 = vadd.f32 %v21465_v61, %v4912_v0  ;;  %v5597_v10 = vadd.f32 %v5564_v19, %v21472_v45  ;;  %v21473_v62 = vld [vmem:[#allocation85_spill] sm:$0xff]  ;;  %v21477_v41 = vld [vmem:[#allocation90_spill] sm:$0xff]  ;;  %v21478_v9 = vld [vmem:[#allocation48_spill] sm:$0xff] }
 0x538   :  { %v5539_v11 = vadd.f32 %v21466_v6, %v5483_v42  ;;  %v4965_v43 = vadd.f32 %v21469_v56, %v4914_v4  ;;  %v5487_v39 = vadd.f32 %v21470_v37, %v4964_v58  ;;  %v5596_v13 = vadd.f32 %v5562_v30, %v21473_v62  ;;  %v21475_v33 = vld [vmem:[#allocation97_spill] sm:$0xff]  ;;  %v21479_v59 = vld [vmem:[#allocation63_spill] sm:$0xff]  ;;  %v21481_v14 = vld [vmem:[#allocation102_spill] sm:$0xff] }
 0x539   :  { %14999 = vrot.lane.b32.xlu0 %v14998_v17, %s15962_s25  ;;  %v5486_v27 = vadd.f32 %v21471_v1, %v4963_v18  ;;  %v21476_v25 = vld [vmem:[#allocation81_spill] sm:$0xff]  ;;  %v5966_v34 = vadd.f32 %v21478_v9, %v5597_v10  ;;  %v21482_v3 = vld [vmem:[#allocation96_spill] sm:$0xff] }
 0x53a   :  { %v5595_v5 = vadd.f32 %v5560_v49, %v5539_v11  ;;  %v5543_v12 = vadd.f32 %v21474_v47, %v5487_v39  ;;  %v5488_v49 = vadd.f32 %v21477_v41, %v4965_v43  ;;  %v5965_v53 = vadd.f32 %v21479_v59, %v5596_v13  ;;  %v21480_v19 = vld [vmem:[#allocation117_spill] sm:$0xff]  ;;  %v21483_v57 = vld [vmem:[#allocation88_spill] sm:$0xff]  ;;  %v21486_v13 = vld [vmem:[#allocation66_spill] sm:$0xff] }
 0x53b   :  { %v5993_v38 = vpop.permute.xlu0 %5992  ;;  %v5991_v29 = vpop.permute.xlu1 %5990  ;;  %v5542_v44 = vadd.f32 %v21475_v33, %v5486_v27  ;;  %v21485_v1 = vld [vmem:[#allocation57_spill] sm:$0xff]  ;;  %v21487_v47 = vld [vmem:[#allocation50_spill] sm:$0xff]  ;;  %v21493_v59 = vld [vmem:[#allocation31_spill] sm:$0xff] }
 0x53c   :  { %v5964_v46 = vadd.f32 %v21476_v25, %v5595_v5  ;;  %v5599_v20 = vadd.f32 %v5568_v8, %v5543_v12  ;;  %v5544_v52 = vadd.f32 %v21480_v19, %v5488_v49  ;;  %v6026_v30 = vadd.f32 %v5993_v38, %v5966_v34  ;;  %v21488_v33 = vld [vmem:[#allocation130_spill] sm:$0xff]  ;;  %v21492_v34 = vld [vmem:[#allocation40_spill] sm:$0xff] }
 0x53d   :  { %v5598_v22 = vadd.f32 %v5566_v51, %v5542_v44  ;;  %v6025_v31 = vadd.f32 %v5991_v29, %v5965_v53  ;;  %v5726_v12 = vadd.f32 %v21487_v47, %v21486_v13  ;;  %v21489_v44 = vld [vmem:[#allocation95_spill] sm:$0xff]  ;;  %v5727_v53 = vadd.f32 %v21493_v59, %v21492_v34 }
 0x53e   :  { %v6024_v2 = vadd.f32 %v5989_v40, %v5964_v46  ;;  %v5600_v26 = vadd.f32 %v5570_v35, %v5544_v52  ;;  %v5968_v63 = vadd.f32 %v21481_v14, %v5599_v20  ;;  %v5725_v25 = vadd.f32 %v21489_v44, %v21488_v33 }
 0x53f   :  { %v5997_v24 = vpop.permute.xlu0 %5996  ;;  %v5995_v16 = vpop.permute.xlu1 %5994  ;;  %v5967_v8 = vadd.f32 %v21482_v3, %v5598_v22  ;;  %v21490_v22 = vld [vmem:[#allocation152_spill] sm:$0xff] }
 0x540   :  { %v6028_v51 = vadd.f32 %v5997_v24, %v5968_v63  ;;  %v5969_v7 = vadd.f32 %v21483_v57, %v5600_v26 }
 0x541   :  { %v6027_v40 = vadd.f32 %v5995_v16, %v5967_v8  ;;  %v21484_v16 = vld [vmem:[#allocation165_spill] sm:$0xff]  ;;  %v21495_v8 = vld [vmem:[#allocation43_spill] sm:$0xff] }
 0x542   :  { %v5724_v27 = vadd.f32 %v21485_v1, %v21484_v16 }
 0x543   :  { %v6040_v32 = vpop.permute.xlu0 %6039  ;;  %v5999_v36 = vpop.permute.xlu1 %5998 }
 0x544   :  { %v6075_v50 = vadd.f32 %v6040_v32, %v6024_v2  ;;  %v6029_v61 = vadd.f32 %v5999_v36, %v5969_v7  ;;  %v21491_v2 = vld [vmem:[#allocation37_spill] sm:$0xff] }
 0x545   :  { %v5728_v9 = vadd.f32 %v21491_v2, %v21490_v22 }
 0x546   :  { %v6197_v48 = vrot.slane %v6075_v50, 1 }
 0x547   :  { %v6044_v28 = vpop.permute.xlu0 %6043  ;;  %v6042_v17 = vpop.permute.xlu1 %6041 }
 0x548   :  { %v6077_v21 = vadd.f32 %v6044_v28, %v6026_v30  ;;  %v6076_v23 = vadd.f32 %v6042_v17, %v6025_v31  ;;  %v15087_v28 = vld [vmem:[#allocation11] ss:$0 sm:$0xff]  ;;  %v21494_v17 = vld [vmem:[#allocation62_spill] sm:$0xff] }
 0x549   :  { %v6152_v3 = vadd.f32 %v15087_v28, %v21494_v17 }
 0x54a   :  { %v6200_v60 = vrot.slane %v6077_v21, 1  ;;  %v6198_v0 = vrot.slane %v6076_v23, 1  ;;  %v6153_v21 = vadd.f32 %v15087_v28, %v21495_v8 }
 0x54b   :  { %v6048_v42 = vpop.permute.xlu0 %6047  ;;  %v6046_v54 = vpop.permute.xlu1 %6045 }
 0x54c   :  { %v6079_v58 = vadd.f32 %v6048_v42, %v6028_v51  ;;  %v6078_v38 = vadd.f32 %v6046_v54, %v6027_v40  ;;  %v6199_v35 = vsel %vm3439_vm5, %v6197_v48, %v6198_v0  ;;  %v6201_v29 = vsel %vm3439_vm5, %v6198_v0, %v6200_v60  ;;  %v21496_v40 = vld [vmem:[#allocation92_spill] sm:$0xff]  ;;  %v21497_v48 = vld [vmem:[#allocation103_spill] sm:$0xff] }
 0x54d   :  { %v5729_v0 = vadd.f32 %v21497_v48, %v21496_v40  ;;  %v6155_v54 = vmax.f32 %v6152_v3, 0.0 }
 0x54e   :  { %v6203_v18 = vrot.slane %v6079_v58, 1  ;;  %v6202_v6 = vrot.slane %v6078_v38, 1  ;;  %v6156_v58 = vmax.f32 %v6153_v21, 0.0 }
 0x54f   :  { %v5749_v11 = vpop.permute.xlu0 %5748  ;;  %v6050_v15 = vpop.permute.xlu1 %6049 }
 0x550   :  { %v6080_v55 = vadd.f32 %v6050_v15, %v6029_v61  ;;  %v6204_v4 = vsel %vm3439_vm5, %v6202_v6, %v6203_v18  ;;  %v5784_v45 = vadd.f32 %v5749_v11, %v5724_v27 }
 0x552   :  { %v6205_v5 = vrot.slane %v6080_v55, 1 }
 0x553   :  { %v5753_v56 = vpop.permute.xlu0 %5752  ;;  %v5751_v43 = vpop.permute.xlu1 %5750 }
 0x554   :  { %v6206_v37 = vsel %vm3439_vm5, %v6203_v18, %v6205_v5  ;;  %v5786_v41 = vadd.f32 %v5753_v56, %v5726_v12  ;;  %v5785_v49 = vadd.f32 %v5751_v43, %v5725_v25 }
 0x557   :  { %v5757_v39 = vpop.permute.xlu0 %5756  ;;  %v5755_v24 = vpop.permute.xlu1 %5754 }
 0x558   :  { %v5788_v30 = vadd.f32 %v5757_v39, %v5728_v9  ;;  %v5787_v31 = vadd.f32 %v5755_v24, %v5727_v53 }
 0x55b   :  { %v5800_v10 = vpop.permute.xlu0 %5799  ;;  %v5759_v62 = vpop.permute.xlu1 %5758 }
 0x55c   :  { %v5835_v46 = vadd.f32 %v5800_v10, %v5784_v45  ;;  %v5789_v42 = vadd.f32 %v5759_v62, %v5729_v0 }
 0x55e   :  { %v6229_v20 = vmax.f32 %v5835_v46, %v6199_v35 }
 0x55f   :  { %v5804_v32 = vpop.permute.xlu0 %5803  ;;  %v5802_v36 = vpop.permute.xlu1 %5801 }
 0x560   :  { %v5837_v19 = vadd.f32 %v5804_v32, %v5786_v41  ;;  %v5836_v52 = vadd.f32 %v5802_v36, %v5785_v49 }
 0x562   :  { %v6231_v50 = vmax.f32 %v5837_v19, %v6200_v60  ;;  %v6230_v26 = vmax.f32 %v5836_v52, %v6201_v29 }
 0x563   :  { %v5808_v14 = vpop.permute.xlu0 %5807  ;;  %v5806_v63 = vpop.permute.xlu1 %5805 }
 0x564   :  { %v5839_v23 = vadd.f32 %v5808_v14, %v5788_v30  ;;  %v5838_v51 = vadd.f32 %v5806_v63, %v5787_v31 }
 0x566   :  { %v6233_v57 = vmax.f32 %v5839_v23, %v6206_v37  ;;  %v6232_v7 = vmax.f32 %v5838_v51, %v6204_v4  ;;  %v21498_v4 = vld [vmem:[#allocation34_spill] sm:$0xff]  ;;  %v21499_v37 = vld [vmem:[#allocation93_spill] sm:$0xff] }
 0x567   :  { %v14990_v60 = vpop.permute.xlu0 %14989  ;;  %v5810_v38 = vpop.permute.xlu1 %5809  ;;  %v21500_v39 = vmax.f32 %v21498_v4, %v21499_v37 }
 0x568   :  { %v6242_v35 = vmax.f32 %v6230_v26, %v6233_v57  ;;  %v6241_v29 = vmax.f32 %v6229_v20, %v6232_v7  ;;  %v14992_v61 = vunpack.i.h.bf16 %v14990_v60  ;;  %v14991_v18 = vunpack.i.l.bf16 %v14990_v60 }
 0x569   :  { %v5840_v6 = vadd.f32 %v5810_v38, %v5789_v42  ;;  %v6154_v24 = vadd.f32 %v15087_v28, %v21500_v39 }
 0x56a   :  { %v6181_v11 = vsel %vm6179_vm6, %v6156_v58, %v14992_v61  ;;  %v6180_v15 = vsel %vm6179_vm6, %v6155_v54, %v14991_v18  ;;  %v6245_v27 = vadd.f32 %v15087_v28, %v6242_v35  ;;  %v6244_v10 = vadd.f32 %v15087_v28, %v6241_v29 }
 0x56b   :  { %v20060_v55 = vpack.c.bf16 %v6181_v11, %v6180_v15  ;;  %v6234_v56 = vmax.f32 %v5840_v6, %v6205_v5  ;;  %v6157_v1 = vmax.f32 %v6154_v24, 0.0 }
 0x56c   :  { %v6248_v33 = vmax.f32 %v6245_v27, 0.0  ;;  %v6247_v25 = vmax.f32 %v6244_v10, 0.0 }
 0x56d   :  { %v6243_v43 = vmax.f32 %v6231_v50, %v6234_v56 }
 0x56f   :  { %v6246_v62 = vadd.f32 %v15087_v28, %v6243_v43 }
 0x571   :  { %v6249_v5 = vmax.f32 %v6246_v62, 0.0 }
 0x5a5   :  { %v14995_v16 = vpop.permute.xlu1 %14994 }
 0x5a6   :  { %v14996_v45 = vunpack.i.l.bf16 %v14995_v16  ;;  %v14997_v47 = vunpack.i.h.bf16 %v14995_v16 }
 0x5a8   :  { %v6182_v13 = vsel %vm6179_vm6, %v6157_v1, %v14996_v45  ;;  %v6271_v49 = vsel %vm6179_vm6, %v6247_v25, %v14997_v47 }
 0x5a9   :  { %v20066_v12 = vpack.c.bf16 %v6182_v13, %v6182_v13 }
 0x5ab   :  { %v15000_v44 = vpop.permute.xlu0 %14999 }
 0x5ac   :  { %v15002_v46 = vunpack.i.h.bf16 %v15000_v44  ;;  %v15001_v41 = vunpack.i.l.bf16 %v15000_v44 }
 0x5ae   :  { %v6272_v20 = vsel %vm6179_vm6, %v6248_v33, %v15001_v41  ;;  %v6273_v32 = vsel %vm6179_vm6, %v6249_v5, %v15002_v46 }
 0x5af   :  { %v20071_v36 = vpack.c.bf16 %v6272_v20, %v6271_v49  ;;  %v20073_v22 = vpack.c.bf16 %v6273_v32, %v6273_v32 }
 0x5b0   :  { %15944 = dma.done.wait [#allocation4], 58880 }
 0x5b1   :  { %15945 = vsyncadd [#allocation4], 4294908416  ;;  %v21501_v2 = vmov 0   ;;  %v15088_v9 = vld [vmem:[#allocation3 + $0x11c] ss:$20 sps:$4 sm:$0xff]   ;;  %v20083_v21 = vshrl.u32 %v20060_v55, 16 }
 0x5b2   :  { %6482 = vmatprep.mubr.bf16.mxu0 %v21501_v2  ;;  %6523 = vmatprep.mubr.bf16.mxu1 %v21501_v2  ;;  %v15090_v34 = vld [vmem:[#allocation3 + $0x124] ss:$20 sps:$4 sm:$0xff]   ;;  %v15093_v53 = vld [vmem:[#allocation3 + $0x120] ss:$20 sps:$4 sm:$0xff]   ;;  %v15096_v52 = vld [vmem:[#allocation3 + $0xfc] ss:$20 sps:$4 sm:$0xff]  }
 0x5b3   :  { %6458 = vmatprep.subr.bf16.mxu0 %v15088_v9  ;;  %v15092_v59 = vld [vmem:[#allocation3 + $0x118] ss:$20 sps:$4 sm:$0xff]   ;;  %6499 = vmatprep.subr.bf16.mxu1 %v15090_v34  ;;  %v15094_v19 = vld [vmem:[#allocation3 + $0xf4] ss:$20 sps:$4 sm:$0xff]   ;;  %v15098_v30 = vld [vmem:[#allocation3 + $0xf0] ss:$20 sps:$4 sm:$0xff]  }
 0x5b4   :  { %6459 = vmatpush1.bf16.msra.mxu0 %v15092_v59  ;;  %6500 = vmatpush1.bf16.msra.mxu1 %v15093_v53  ;;  %v15099_v31 = vld [vmem:[#allocation3 + $0xf8] ss:$20 sps:$4 sm:$0xff]   ;;  %v15102_v26 = vld [vmem:[#allocation3 + $0xd4] ss:$20 sps:$4 sm:$0xff]   ;;  %v15105_v63 = vld [vmem:[#allocation3 + $0xd0] ss:$20 sps:$4 sm:$0xff]  }
 0x5b5   :  { %6460 = vmatprep.subr.bf16.mxu0 %v15094_v19  ;;  %6501 = vmatprep.subr.bf16.mxu1 %v15096_v52  ;;  %v15100_v50 = vld [vmem:[#allocation3 + $0xcc] ss:$20 sps:$4 sm:$0xff]   ;;  %v15104_v14 = vld [vmem:[#allocation3 + $0xc8] ss:$20 sps:$4 sm:$0xff]   ;;  %v15106_v28 = vld [vmem:[#allocation3 + $0xa4] ss:$20 sps:$4 sm:$0xff]  }
 0x5b6   :  { %vm6286_vm7 = vsmask.f32 256  ;;  %v15108_v17 = vld [vmem:[#allocation3 + $0xac] ss:$20 sps:$4 sm:$0xff]   ;;  %v15111_v23 = vld [vmem:[#allocation3 + $0xa8] ss:$20 sps:$4 sm:$0xff]  }
 0x5b7   :  { %v15110_v3 = vld [vmem:[#allocation3 + $0xa0] ss:$20 sps:$4 sm:$0xff]   ;;  %vm20078_vm8 = vmand %vm3790_vm4, %vm6286_vm7  ;;  %v15114_v51 = vld [vmem:[#allocation3 + $0x7c] ss:$20 sps:$4 sm:$0xff]   ;;  %v21504_v57 = vmov 0.0   ;;  %v20098_v61 = vshll.u32 %v20071_v36, 16 }
 0x5b8   :  { %6461 = vmatpush1.bf16.msra.mxu0 %v15098_v30  ;;  %6502 = vmatpush1.bf16.msra.mxu1 %v15099_v31  ;;  %v6317_v40 = vsel %vm20078_vm8, %v20083_v21, %v20071_v36  ;;  %v15112_v48 = vld [vmem:[#allocation3 + $0x78] ss:$20 sps:$4 sm:$0xff]   ;;  %v15115_v0 = vld [vmem:[#allocation3 + $0x128] ss:$20 sps:$4 sm:$0xff]   ;;  %v15116_v42 = vld [vmem:[#allocation3 + $0x50] ss:$20 sps:$4 sm:$0xff]  }
 0x5b9   :  { %6462 = vmatprep.subr.bf16.mxu0 %v15100_v50  ;;  %6503 = vmatprep.subr.bf16.mxu1 %v15102_v26  ;;  %v15118_v7 = vld [vmem:[#allocation3 + $0x54] ss:$20 sps:$4 sm:$0xff]   ;;  %v15122_v58 = vld [vmem:[#allocation3 + $0x2c] ss:$20 sps:$4 sm:$0xff]   ;;  %v15126_v35 = vld [vmem:[#allocation3 + $0x4] ss:$20 sps:$4 sm:$0xff]   ;;  %v6288_v15 = vsel %vm20078_vm8, %v20060_v55, %v20098_v61 }
 0x5ba   :  { %v15119_v54 = vld [vmem:[#allocation3 + $0x100] ss:$20 sps:$4 sm:$0xff]   ;;  %v15120_v60 = vld [vmem:[#allocation3 + $0x28] ss:$20 sps:$4 sm:$0xff]   ;;  %v15123_v38 = vld [vmem:[#allocation3 + $0xd8] ss:$20 sps:$4 sm:$0xff]  }
 0x5bb   :  { %v15124_v29 = vld [vmem:[#allocation3] ss:$20 sps:$4 sm:$0xff]   ;;  %v15127_v18 = vld [vmem:[#allocation3 + $0xb0] ss:$20 sps:$4 sm:$0xff]   ;;  %v15131_v56 = vld [vmem:[#allocation3 + $0x88] ss:$20 sps:$4 sm:$0xff]  }
 0x5bc   :  { %6463 = vmatpush1.bf16.msra.mxu0 %v15104_v14  ;;  %6504 = vmatpush1.bf16.msra.mxu1 %v15105_v63  ;;  %v15130_v6 = vld [vmem:[#allocation3 + $0x84] ss:$20 sps:$4 sm:$0xff]   ;;  %v15128_v11 = vld [vmem:[#allocation3 + $0x80] ss:$20 sps:$4 sm:$0xff]   ;;  %v15134_v43 = vld [vmem:[#allocation3 + $0x5c] ss:$20 sps:$4 sm:$0xff]  }
 0x5bd   :  { %6464 = vmatprep.subr.bf16.mxu0 %v15106_v28  ;;  %6505 = vmatprep.subr.bf16.mxu1 %v15108_v17  ;;  %v15132_v4 = vld [vmem:[#allocation3 + $0x58] ss:$20 sps:$4 sm:$0xff]   ;;  %v15135_v37 = vld [vmem:[#allocation3 + $0x60] ss:$20 sps:$4 sm:$0xff]   ;;  %v15136_v24 = vld [vmem:[#allocation3 + $0x30] ss:$20 sps:$4 sm:$0xff]  }
 0x5be   :  { %v15138_v39 = vld [vmem:[#allocation3 + $0x34] ss:$20 sps:$4 sm:$0xff]   ;;  %v15139_v16 = vld [vmem:[#allocation3 + $0x38] ss:$20 sps:$4 sm:$0xff]   ;;  %v15143_v45 = vld [vmem:[#allocation3 + $0x10] ss:$20 sps:$4 sm:$0xff]  }
 0x5bf   :  { %v15142_v1 = vld [vmem:[#allocation3 + $0xc] ss:$20 sps:$4 sm:$0xff]   ;;  %v15140_v27 = vld [vmem:[#allocation3 + $0x8] ss:$20 sps:$4 sm:$0xff]   ;;  %v15149_v62 = vld [vmem:[#allocation3 + $0x1c4] ss:$20 sps:$4 sm:$0xff]  }
 0x5c0   :  { %6465 = vmatpush1.bf16.msra.mxu0 %v15110_v3  ;;  %6506 = vmatpush1.bf16.msra.mxu1 %v15111_v23  ;;  %v15146_v10 = vld [vmem:[#allocation3 + $0x1bc] ss:$20 sps:$4 sm:$0xff]   ;;  %v15144_v13 = vld [vmem:[#allocation3 + $0x1b8] ss:$20 sps:$4 sm:$0xff]   ;;  %v15147_v47 = vld [vmem:[#allocation3 + $0x1c0] ss:$20 sps:$4 sm:$0xff]  }
 0x5c1   :  { %14669 = vmatprep.subr.bf16.mxu0 %v21504_v57  ;;  %6687 = vmatprep.subr.bf16.mxu1 %v15114_v51  ;;  %v15152_v33 = vld [vmem:[#allocation3 + $0x194] ss:$20 sps:$4 sm:$0xff]   ;;  %v15155_v44 = vld [vmem:[#allocation3 + $0x19c] ss:$20 sps:$4 sm:$0xff]   ;;  %v15153_v5 = vld [vmem:[#allocation3 + $0x198] ss:$20 sps:$4 sm:$0xff]  }
 0x5c2   :  { %v15150_v25 = vld [vmem:[#allocation3 + $0x190] ss:$20 sps:$4 sm:$0xff]   ;;  %v15158_v46 = vld [vmem:[#allocation3 + $0x16c] ss:$20 sps:$4 sm:$0xff]   ;;  %v15161_v41 = vld [vmem:[#allocation3 + $0x174] ss:$20 sps:$4 sm:$0xff]  }
 0x5c3   :  { %13146 = vmatmul.mubr.msk.bf16.vlgmr.msra.gmra.mxu0 %vm333_vm3, %v6317_v40  ;;  %13147 = vmatmul.mubr.msk.bf16.vlgmr.msra.gmra.mxu1 %vm333_vm3, %v6317_v40  ;;  %v15156_v49 = vld [vmem:[#allocation3 + $0x168] ss:$20 sps:$4 sm:$0xff]   ;;  %v15159_v20 = vld [vmem:[#allocation3 + $0x170] ss:$20 sps:$4 sm:$0xff]   ;;  %v15167_v9 = vld [vmem:[#allocation3 + $0x14c] ss:$20 sps:$4 sm:$0xff]  }
 0x5c4   :  { %14670 = vmatpush3.bf16.msra.mxu0 %v15115_v0  ;;  %6688 = vmatpush1.bf16.msra.mxu1 %v15112_v48  ;;  %v15164_v32 = vld [vmem:[#allocation3 + $0x144] ss:$20 sps:$4 sm:$0xff]   ;;  %v15162_v34 = vld [vmem:[#allocation3 + $0x140] ss:$20 sps:$4 sm:$0xff]   ;;  %v15165_v59 = vld [vmem:[#allocation3 + $0x148] ss:$20 sps:$4 sm:$0xff]  }
 0x5c5   :  { %14671 = vmatprep.subr.bf16.mxu0 %v21504_v57  ;;  %6689 = vmatprep.subr.bf16.mxu1 %v15118_v7  ;;  %v6802_v53 = vrot.slane %v20060_v55, 1  ;;  %v6804_v19 = vrot.slane %v20098_v61, 1  ;;  %v15170_v52 = vld [vmem:[#allocation3 + $0x25c] ss:$20 sps:$4 sm:$0xff]   ;;  %v15168_v30 = vld [vmem:[#allocation3 + $0x258] ss:$20 sps:$4 sm:$0xff]  }
 0x5c6   :  { %14677 = vmatprep.mubr.msk.bf16.mxu0 %vm15960_vm2, %v21504_v57  ;;  %6711 = vmatprep.mubr.bf16.mxu1 %v21501_v2  ;;  %v15171_v50 = vld [vmem:[#allocation3 + $0x1c8] ss:$20 sps:$4 sm:$0xff]   ;;  %v15172_v14 = vld [vmem:[#allocation3 + $0x230] ss:$20 sps:$4 sm:$0xff]   ;;  %v15175_v63 = vld [vmem:[#allocation3 + $0x1a0] ss:$20 sps:$4 sm:$0xff]  }
 0x5c7   :  { %v6806_v31 = vsel %vm20078_vm8, %v6802_v53, %v6804_v19  ;;  %v15174_v26 = vld [vmem:[#allocation3 + $0x234] ss:$20 sps:$4 sm:$0xff]   ;;  %v15178_v28 = vld [vmem:[#allocation3 + $0x20c] ss:$20 sps:$4 sm:$0xff]   ;;  %v15182_v23 = vld [vmem:[#allocation3 + $0x1e4] ss:$20 sps:$4 sm:$0xff]  }
 0x5c8   :  { %14672 = vmatpush3.bf16.msra.mxu0 %v15119_v54  ;;  %6690 = vmatpush1.bf16.msra.mxu1 %v15116_v42  ;;  %v15176_v17 = vld [vmem:[#allocation3 + $0x208] ss:$20 sps:$4 sm:$0xff]   ;;  %v15179_v3 = vld [vmem:[#allocation3 + $0x178] ss:$20 sps:$4 sm:$0xff]   ;;  %v15180_v51 = vld [vmem:[#allocation3 + $0x1e0] ss:$20 sps:$4 sm:$0xff]  }
 0x5c9   :  { %14673 = vmatprep.subr.bf16.mxu0 %v21504_v57  ;;  %6691 = vmatprep.subr.bf16.mxu1 %v15122_v58  ;;  %v7066_v48 = vrot.slane %v20083_v21, 1  ;;  %v7069_v0 = vrot.slane %v20071_v36, 1  ;;  %v15186_v7 = vld [vmem:[#allocation3 + $0x264] ss:$20 sps:$4 sm:$0xff]   ;;  %v15184_v42 = vld [vmem:[#allocation3 + $0x260] ss:$20 sps:$4 sm:$0xff]  }
 0x5ca   :  { %v15187_v58 = vld [vmem:[#allocation3 + $0x268] ss:$20 sps:$4 sm:$0xff]   ;;  %v15234_v53 = vld [vmem:[#allocation3 + $0x34c] ss:$20 sps:$4 sm:$0xff]   ;;  %vm12838_vm9 = vcmask 74752  }
 0x5cb   :  { %v7071_v54 = vsel %vm20078_vm8, %v7066_v48, %v7069_v0  ;;  %v15232_v19 = vld [vmem:[#allocation3 + $0x348] ss:$20 sps:$4 sm:$0xff]   ;;  %v15248_v0 = vld [vmem:[#allocation3 + $0x350] ss:$20 sps:$4 sm:$0xff]  }
 0x5cc   :  { %14674 = vmatpush3.bf16.msra.mxu0 %v15123_v38  ;;  %6692 = vmatpush1.bf16.msra.mxu1 %v15120_v60  ;;  %v15190_v60 = vld [vmem:[#allocation3 + $0x23c] ss:$20 sps:$4 sm:$0xff]   ;;  %v15188_v38 = vld [vmem:[#allocation3 + $0x238] ss:$20 sps:$4 sm:$0xff]   ;;  %v15250_v48 = vld [vmem:[#allocation3 + $0x354] ss:$20 sps:$4 sm:$0xff]  }
 0x5cd   :  { %14675 = vmatprep.subr.bf16.mxu0 %v21504_v57  ;;  %6693 = vmatprep.subr.bf16.mxu1 %v15126_v35  ;;  %v15191_v35 = vld [vmem:[#allocation3 + $0x240] ss:$20 sps:$4 sm:$0xff]  }
 0x5d0   :  { %14676 = vmatpush3.bf16.msra.mxu0 %v15127_v18  ;;  %6694 = vmatpush1.bf16.msra.mxu1 %v15124_v29  ;;  %v15194_v29 = vld [vmem:[#allocation3 + $0x214] ss:$20 sps:$4 sm:$0xff]   ;;  %v15192_v18 = vld [vmem:[#allocation3 + $0x210] ss:$20 sps:$4 sm:$0xff]  }
 0x5d1   :  { %6728 = vmatprep.subr.bf16.mxu0 %v15130_v6  ;;  %14681 = vmatprep.subr.bf16.mxu1 %v21504_v57  ;;  %v15195_v6 = vld [vmem:[#allocation3 + $0x218] ss:$20 sps:$4 sm:$0xff]  }
 0x5d3   :  { %14678 = vmatmul.mubr.msk.bf16.vlgmr.msra.gmra.mxu0 %vm333_vm3, %v6317_v40  ;;  %13169 = vmatmul.mubr.msk.bf16.vlgmr.msra.gmra.mxu1 %vm333_vm3, %v6288_v15  ;;  %v15183_v40 = vld [vmem:[#allocation3 + $0x150] ss:$20 sps:$4 sm:$0xff]  }
 0x5d4   :  { %6729 = vmatpush1.bf16.msra.mxu0 %v15128_v11  ;;  %14682 = vmatpush3.bf16.msra.mxu1 %v15131_v56  ;;  %v15198_v11 = vld [vmem:[#allocation3 + $0x1ec] ss:$20 sps:$4 sm:$0xff]   ;;  %v15199_v56 = vld [vmem:[#allocation3 + $0x1f0] ss:$20 sps:$4 sm:$0xff]  }
 0x5d5   :  { %6730 = vmatprep.subr.bf16.mxu0 %v15134_v43  ;;  %14683 = vmatprep.subr.bf16.mxu1 %v21504_v57  ;;  %v15202_v43 = vld [vmem:[#allocation3 + $0x2fc] ss:$20 sps:$4 sm:$0xff]  }
 0x5d6   :  { %6752 = vmatprep.mubr.bf16.mxu0 %v21501_v2  ;;  %14689 = vmatprep.mubr.msk.bf16.mxu1 %vm15960_vm2, %v21504_v57 }
 0x5d8   :  { %6731 = vmatpush1.bf16.msra.mxu0 %v15132_v4  ;;  %14684 = vmatpush3.bf16.msra.mxu1 %v15135_v37  ;;  %v15205_v4 = vld [vmem:[#allocation3 + $0x304] ss:$20 sps:$4 sm:$0xff]  }
 0x5d9   :  { %6732 = vmatprep.subr.bf16.mxu0 %v15138_v39  ;;  %14685 = vmatprep.subr.bf16.mxu1 %v21504_v57  ;;  %v15200_v37 = vld [vmem:[#allocation3 + $0x2f8] ss:$20 sps:$4 sm:$0xff]   ;;  %v15203_v39 = vld [vmem:[#allocation3 + $0x300] ss:$20 sps:$4 sm:$0xff]  }
 0x5dc   :  { %6733 = vmatpush1.bf16.msra.mxu0 %v15136_v24  ;;  %14686 = vmatpush3.bf16.msra.mxu1 %v15139_v16  ;;  %v15208_v24 = vld [vmem:[#allocation3 + $0x2d4] ss:$20 sps:$4 sm:$0xff]   ;;  %v15211_v16 = vld [vmem:[#allocation3 + $0x2dc] ss:$20 sps:$4 sm:$0xff]  }
 0x5dd   :  { %6734 = vmatprep.subr.bf16.mxu0 %v15142_v1  ;;  %14687 = vmatprep.subr.bf16.mxu1 %v21504_v57  ;;  %v15206_v1 = vld [vmem:[#allocation3 + $0x2d0] ss:$20 sps:$4 sm:$0xff]  }
 0x5e0   :  { %6735 = vmatpush1.bf16.msra.mxu0 %v15140_v27  ;;  %14688 = vmatpush3.bf16.msra.mxu1 %v15143_v45  ;;  %v15209_v27 = vld [vmem:[#allocation3 + $0x2d8] ss:$20 sps:$4 sm:$0xff]  }
 0x5e1   :  { %6947 = vmatprep.subr.bf16.mxu0 %v15146_v10  ;;  %6988 = vmatprep.subr.bf16.mxu1 %v15149_v62  ;;  %v15214_v45 = vld [vmem:[#allocation3 + $0x2ac] ss:$20 sps:$4 sm:$0xff]   ;;  %v15217_v10 = vld [vmem:[#allocation3 + $0x2b4] ss:$20 sps:$4 sm:$0xff]  }
 0x5e2   :  { %v15212_v62 = vld [vmem:[#allocation3 + $0x2a8] ss:$20 sps:$4 sm:$0xff]  }
 0x5e3   :  { %13170 = vmatmul.mubr.msk.bf16.vlgmr.msra.gmra.mxu0 %vm333_vm3, %v6288_v15  ;;  %14690 = vmatmul.mubr.msk.bf16.vlgmr.msra.gmra.mxu1 %vm333_vm3, %v6288_v15  ;;  %v15196_v15 = vld [vmem:[#allocation3 + $0x1e8] ss:$20 sps:$4 sm:$0xff]  }
 0x5e4   :  { %6948 = vmatpush1.bf16.msra.mxu0 %v15144_v13  ;;  %6989 = vmatpush1.bf16.msra.mxu1 %v15147_v47  ;;  %v15215_v13 = vld [vmem:[#allocation3 + $0x2b0] ss:$20 sps:$4 sm:$0xff]  }
 0x5e5   :  { %6949 = vmatprep.subr.bf16.mxu0 %v15152_v33  ;;  %6990 = vmatprep.subr.bf16.mxu1 %v15155_v44  ;;  %v15220_v47 = vld [vmem:[#allocation3 + $0x284] ss:$20 sps:$4 sm:$0xff]   ;;  %v15223_v33 = vld [vmem:[#allocation3 + $0x28c] ss:$20 sps:$4 sm:$0xff]  }
 0x5e6   :  { %6971 = vmatprep.mubr.bf16.mxu0 %v21501_v2  ;;  %7012 = vmatprep.mubr.bf16.mxu1 %v21501_v2  ;;  %v15218_v44 = vld [vmem:[#allocation3 + $0x280] ss:$20 sps:$4 sm:$0xff]  }
 0x5e8   :  { %6950 = vmatpush1.bf16.msra.mxu0 %v15150_v25  ;;  %6991 = vmatpush1.bf16.msra.mxu1 %v15153_v5  ;;  %v15221_v25 = vld [vmem:[#allocation3 + $0x288] ss:$20 sps:$4 sm:$0xff]   ;;  %v7331_v5 = vrot.slane %v20060_v55, 2 }
 0x5e9   :  { %6951 = vmatprep.subr.bf16.mxu0 %v15158_v46  ;;  %6992 = vmatprep.subr.bf16.mxu1 %v15161_v41  ;;  %v7333_v46 = vrot.slane %v20098_v61, 2  ;;  %v15226_v41 = vld [vmem:[#allocation3 + $0x39c] ss:$20 sps:$4 sm:$0xff]  }
 0x5ec   :  { %6952 = vmatpush1.bf16.msra.mxu0 %v15156_v49  ;;  %6993 = vmatpush1.bf16.msra.mxu1 %v15159_v20  ;;  %v15224_v49 = vld [vmem:[#allocation3 + $0x398] ss:$20 sps:$4 sm:$0xff]   ;;  %v7335_v20 = vsel %vm20078_vm8, %v7331_v5, %v7333_v46  ;;  %v15288_v46 = vld [vmem:[#allocation3 + $0x488] ss:$20 sps:$4 sm:$0xff]  }
 0x5ed   :  { %6953 = vmatprep.subr.bf16.mxu0 %v15164_v32  ;;  %6994 = vmatprep.subr.bf16.mxu1 %v15167_v9  ;;  %v15227_v32 = vld [vmem:[#allocation3 + $0x308] ss:$20 sps:$4 sm:$0xff]   ;;  %v15290_v5 = vld [vmem:[#allocation3 + $0x48c] ss:$20 sps:$4 sm:$0xff]  }
 0x5ee   :  { %v15230_v9 = vld [vmem:[#allocation3 + $0x374] ss:$20 sps:$4 sm:$0xff]  }
 0x5f0   :  { %6954 = vmatpush1.bf16.msra.mxu0 %v15162_v34  ;;  %6995 = vmatpush1.bf16.msra.mxu1 %v15165_v59  ;;  %v15228_v34 = vld [vmem:[#allocation3 + $0x370] ss:$20 sps:$4 sm:$0xff]   ;;  %v15231_v59 = vld [vmem:[#allocation3 + $0x2e0] ss:$20 sps:$4 sm:$0xff]  }
 0x5f1   :  { %14693 = vmatprep.subr.bf16.mxu0 %v21504_v57  ;;  %7212 = vmatprep.subr.bf16.mxu1 %v15170_v52  ;;  %v15235_v52 = vld [vmem:[#allocation3 + $0x2b8] ss:$20 sps:$4 sm:$0xff]  }
 0x5f3   :  { %13192 = vmatmul.mubr.msk.bf16.vlgmr.msra.gmra.mxu0 %vm333_vm3, %v6806_v31  ;;  %13193 = vmatmul.mubr.msk.bf16.vlgmr.msra.gmra.mxu1 %vm333_vm3, %v6806_v31 }
 0x5f4   :  { %14694 = vmatpush3.bf16.msra.mxu0 %v15171_v50  ;;  %7213 = vmatpush1.bf16.msra.mxu1 %v15168_v30  ;;  %v15238_v30 = vld [vmem:[#allocation3 + $0x324] ss:$20 sps:$4 sm:$0xff]  }
 0x5f5   :  { %14695 = vmatprep.subr.bf16.mxu0 %v21504_v57  ;;  %7214 = vmatprep.subr.bf16.mxu1 %v15174_v26  ;;  %v15239_v50 = vld [vmem:[#allocation3 + $0x290] ss:$20 sps:$4 sm:$0xff]   ;;  %v7595_v26 = vrot.slane %v20083_v21, 2 }
 0x5f6   :  { %14701 = vmatprep.mubr.msk.bf16.mxu0 %vm15960_vm2, %v21504_v57  ;;  %7236 = vmatprep.mubr.bf16.mxu1 %v21501_v2 }
 0x5f8   :  { %14696 = vmatpush3.bf16.msra.mxu0 %v15175_v63  ;;  %7215 = vmatpush1.bf16.msra.mxu1 %v15172_v14  ;;  %v7597_v14 = vrot.slane %v20071_v36, 2  ;;  %v15242_v63 = vld [vmem:[#allocation3 + $0x3a4] ss:$20 sps:$4 sm:$0xff]  }
 0x5f9   :  { %14697 = vmatprep.subr.bf16.mxu0 %v21504_v57  ;;  %7216 = vmatprep.subr.bf16.mxu1 %v15178_v28  ;;  %v15240_v28 = vld [vmem:[#allocation3 + $0x3a0] ss:$20 sps:$4 sm:$0xff]  }
 0x5fc   :  { %14698 = vmatpush3.bf16.msra.mxu0 %v15179_v3  ;;  %7217 = vmatpush1.bf16.msra.mxu1 %v15176_v17  ;;  %v7599_v17 = vsel %vm20078_vm8, %v7595_v26, %v7597_v14  ;;  %v15243_v3 = vld [vmem:[#allocation3 + $0x3a8] ss:$20 sps:$4 sm:$0xff]   ;;  %v15304_v14 = vld [vmem:[#allocation3 + $0x490] ss:$20 sps:$4 sm:$0xff]  }
 0x5fd   :  { %14699 = vmatprep.subr.bf16.mxu0 %v21504_v57  ;;  %7218 = vmatprep.subr.bf16.mxu1 %v15182_v23  ;;  %v15246_v23 = vld [vmem:[#allocation3 + $0x37c] ss:$20 sps:$4 sm:$0xff]   ;;  %v15306_v26 = vld [vmem:[#allocation3 + $0x494] ss:$20 sps:$4 sm:$0xff]  }
 0x600   :  { %14700 = vmatpush3.bf16.msra.mxu0 %v15183_v40  ;;  %7219 = vmatpush1.bf16.msra.mxu1 %v15180_v51  ;;  %v15244_v51 = vld [vmem:[#allocation3 + $0x378] ss:$20 sps:$4 sm:$0xff]   ;;  %v15247_v40 = vld [vmem:[#allocation3 + $0x380] ss:$20 sps:$4 sm:$0xff]  }
 0x601   :  { %7253 = vmatprep.subr.bf16.mxu0 %v15186_v7  ;;  %14705 = vmatprep.subr.bf16.mxu1 %v21504_v57  ;;  %v15251_v7 = vld [vmem:[#allocation3 + $0x358] ss:$20 sps:$4 sm:$0xff]  }
 0x603   :  { %14702 = vmatmul.mubr.msk.bf16.vlgmr.msra.gmra.mxu0 %vm333_vm3, %v6806_v31  ;;  %13215 = vmatmul.mubr.msk.bf16.vlgmr.msra.gmra.mxu1 %vm333_vm3, %v7071_v54  ;;  %v15236_v31 = vld [vmem:[#allocation3 + $0x320] ss:$20 sps:$4 sm:$0xff]  }
 0x604   :  { %7254 = vmatpush1.bf16.msra.mxu0 %v15184_v42  ;;  %14706 = vmatpush3.bf16.msra.mxu1 %v15187_v58  ;;  %v15254_v42 = vld [vmem:[#allocation3 + $0x32c] ss:$20 sps:$4 sm:$0xff]   ;;  %v15255_v58 = vld [vmem:[#allocation3 + $0x330] ss:$20 sps:$4 sm:$0xff]  }
 0x605   :  { %7255 = vmatprep.subr.bf16.mxu0 %v15190_v60  ;;  %14707 = vmatprep.subr.bf16.mxu1 %v21504_v57  ;;  %v15258_v60 = vld [vmem:[#allocation3 + $0x43c] ss:$20 sps:$4 sm:$0xff]  }
 0x606   :  { %7277 = vmatprep.mubr.bf16.mxu0 %v21501_v2  ;;  %14713 = vmatprep.mubr.msk.bf16.mxu1 %vm15960_vm2, %v21504_v57 }
 0x608   :  { %7256 = vmatpush1.bf16.msra.mxu0 %v15188_v38  ;;  %14708 = vmatpush3.bf16.msra.mxu1 %v15191_v35  ;;  %v15261_v38 = vld [vmem:[#allocation3 + $0x444] ss:$20 sps:$4 sm:$0xff]  }
 0x609   :  { %7257 = vmatprep.subr.bf16.mxu0 %v15194_v29  ;;  %14709 = vmatprep.subr.bf16.mxu1 %v21504_v57  ;;  %v15256_v35 = vld [vmem:[#allocation3 + $0x438] ss:$20 sps:$4 sm:$0xff]   ;;  %v15259_v29 = vld [vmem:[#allocation3 + $0x440] ss:$20 sps:$4 sm:$0xff]  }
 0x60c   :  { %7258 = vmatpush1.bf16.msra.mxu0 %v15192_v18  ;;  %14710 = vmatpush3.bf16.msra.mxu1 %v15195_v6  ;;  %v15264_v18 = vld [vmem:[#allocation3 + $0x414] ss:$20 sps:$4 sm:$0xff]   ;;  %v15267_v6 = vld [vmem:[#allocation3 + $0x41c] ss:$20 sps:$4 sm:$0xff]  }
 0x60d   :  { %7259 = vmatprep.subr.bf16.mxu0 %v15198_v11  ;;  %14711 = vmatprep.subr.bf16.mxu1 %v21504_v57  ;;  %v15262_v11 = vld [vmem:[#allocation3 + $0x410] ss:$20 sps:$4 sm:$0xff]  }
 0x610   :  { %7260 = vmatpush1.bf16.msra.mxu0 %v15196_v15  ;;  %14712 = vmatpush3.bf16.msra.mxu1 %v15199_v56  ;;  %v15265_v15 = vld [vmem:[#allocation3 + $0x418] ss:$20 sps:$4 sm:$0xff]  }
 0x611   :  { %7476 = vmatprep.subr.bf16.mxu0 %v15202_v43  ;;  %7517 = vmatprep.subr.bf16.mxu1 %v15205_v4  ;;  %v15270_v56 = vld [vmem:[#allocation3 + $0x3ec] ss:$20 sps:$4 sm:$0xff]   ;;  %v15273_v43 = vld [vmem:[#allocation3 + $0x3f4] ss:$20 sps:$4 sm:$0xff]  }
 0x612   :  { %v15268_v4 = vld [vmem:[#allocation3 + $0x3e8] ss:$20 sps:$4 sm:$0xff]  }
 0x613   :  { %13216 = vmatmul.mubr.msk.bf16.vlgmr.msra.gmra.mxu0 %vm333_vm3, %v7071_v54  ;;  %14714 = vmatmul.mubr.msk.bf16.vlgmr.msra.gmra.mxu1 %vm333_vm3, %v7071_v54  ;;  %v15252_v54 = vld [vmem:[#allocation3 + $0x328] ss:$20 sps:$4 sm:$0xff]  }
 0x614   :  { %7477 = vmatpush1.bf16.msra.mxu0 %v15200_v37  ;;  %7518 = vmatpush1.bf16.msra.mxu1 %v15203_v39  ;;  %v15271_v37 = vld [vmem:[#allocation3 + $0x3f0] ss:$20 sps:$4 sm:$0xff]  }
 0x615   :  { %7478 = vmatprep.subr.bf16.mxu0 %v15208_v24  ;;  %7519 = vmatprep.subr.bf16.mxu1 %v15211_v16  ;;  %v15276_v39 = vld [vmem:[#allocation3 + $0x3c4] ss:$20 sps:$4 sm:$0xff]   ;;  %v15279_v24 = vld [vmem:[#allocation3 + $0x3cc] ss:$20 sps:$4 sm:$0xff]  }
 0x616   :  { %7500 = vmatprep.mubr.bf16.mxu0 %v21501_v2  ;;  %7541 = vmatprep.mubr.bf16.mxu1 %v21501_v2  ;;  %v15274_v16 = vld [vmem:[#allocation3 + $0x3c0] ss:$20 sps:$4 sm:$0xff]  }
 0x618   :  { %7479 = vmatpush1.bf16.msra.mxu0 %v15206_v1  ;;  %7520 = vmatpush1.bf16.msra.mxu1 %v15209_v27  ;;  %v15277_v1 = vld [vmem:[#allocation3 + $0x3c8] ss:$20 sps:$4 sm:$0xff]   ;;  %v7859_v27 = vrot.slane %v20060_v55, 3 }
 0x619   :  { %7480 = vmatprep.subr.bf16.mxu0 %v15214_v45  ;;  %7521 = vmatprep.subr.bf16.mxu1 %v15217_v10  ;;  %v7861_v45 = vrot.slane %v20098_v61, 3  ;;  %v15282_v10 = vld [vmem:[#allocation3 + $0x4dc] ss:$20 sps:$4 sm:$0xff]  }
 0x61c   :  { %7481 = vmatpush1.bf16.msra.mxu0 %v15212_v62  ;;  %7522 = vmatpush1.bf16.msra.mxu1 %v15215_v13  ;;  %v7863_v62 = vsel %vm20078_vm8, %v7859_v27, %v7861_v45  ;;  %v15280_v13 = vld [vmem:[#allocation3 + $0x4d8] ss:$20 sps:$4 sm:$0xff]  }
 0x61d   :  { %7482 = vmatprep.subr.bf16.mxu0 %v15220_v47  ;;  %7523 = vmatprep.subr.bf16.mxu1 %v15223_v33  ;;  %v15283_v47 = vld [vmem:[#allocation3 + $0x448] ss:$20 sps:$4 sm:$0xff]  }
 0x61e   :  { %v15286_v33 = vld [vmem:[#allocation3 + $0x4b4] ss:$20 sps:$4 sm:$0xff]  }
 0x620   :  { %7483 = vmatpush1.bf16.msra.mxu0 %v15218_v44  ;;  %7524 = vmatpush1.bf16.msra.mxu1 %v15221_v25  ;;  %v15284_v44 = vld [vmem:[#allocation3 + $0x4b0] ss:$20 sps:$4 sm:$0xff]   ;;  %v15287_v25 = vld [vmem:[#allocation3 + $0x420] ss:$20 sps:$4 sm:$0xff]  }
 0x621   :  { %14717 = vmatprep.subr.bf16.mxu0 %v21504_v57  ;;  %7740 = vmatprep.subr.bf16.mxu1 %v15226_v41  ;;  %v15291_v41 = vld [vmem:[#allocation3 + $0x3f8] ss:$20 sps:$4 sm:$0xff]  }
 0x623   :  { %13238 = vmatmul.mubr.msk.bf16.vlgmr.msra.gmra.mxu0 %vm333_vm3, %v7335_v20  ;;  %13239 = vmatmul.mubr.msk.bf16.vlgmr.msra.gmra.mxu1 %vm333_vm3, %v7335_v20 }
 0x624   :  { %14718 = vmatpush3.bf16.msra.mxu0 %v15227_v32  ;;  %7741 = vmatpush1.bf16.msra.mxu1 %v15224_v49  ;;  %v15294_v49 = vld [vmem:[#allocation3 + $0x464] ss:$20 sps:$4 sm:$0xff]   ;;  %v8125_v32 = vrot.slane %v20071_v36, 3 }
 0x625   :  { %14719 = vmatprep.subr.bf16.mxu0 %v21504_v57  ;;  %7742 = vmatprep.subr.bf16.mxu1 %v15230_v9  ;;  %v15292_v9 = vld [vmem:[#allocation3 + $0x460] ss:$20 sps:$4 sm:$0xff]  }
 0x626   :  { %14725 = vmatprep.mubr.msk.bf16.mxu0 %vm15960_vm2, %v21504_v57  ;;  %7764 = vmatprep.mubr.bf16.mxu1 %v21501_v2 }
 0x628   :  { %14720 = vmatpush3.bf16.msra.mxu0 %v15231_v59  ;;  %7743 = vmatpush1.bf16.msra.mxu1 %v15228_v34  ;;  %v15295_v34 = vld [vmem:[#allocation3 + $0x3d0] ss:$20 sps:$4 sm:$0xff]  }
 0x629   :  { %14721 = vmatprep.subr.bf16.mxu0 %v21504_v57  ;;  %7744 = vmatprep.subr.bf16.mxu1 %v15234_v53  ;;  %v15298_v59 = vld [vmem:[#allocation3 + $0x4e4] ss:$20 sps:$4 sm:$0xff]   ;;  %v15296_v53 = vld [vmem:[#allocation3 + $0x4e0] ss:$20 sps:$4 sm:$0xff]  }
 0x62c   :  { %14722 = vmatpush3.bf16.msra.mxu0 %v15235_v52  ;;  %7745 = vmatpush1.bf16.msra.mxu1 %v15232_v19  ;;  %v15299_v52 = vld [vmem:[#allocation3 + $0x4e8] ss:$20 sps:$4 sm:$0xff]  }
 0x62d   :  { %14723 = vmatprep.subr.bf16.mxu0 %v21504_v57  ;;  %7746 = vmatprep.subr.bf16.mxu1 %v15238_v30  ;;  %v15302_v30 = vld [vmem:[#allocation3 + $0x4bc] ss:$20 sps:$4 sm:$0xff]  }
 0x630   :  { %14724 = vmatpush3.bf16.msra.mxu0 %v15239_v50  ;;  %7747 = vmatpush1.bf16.msra.mxu1 %v15236_v31  ;;  %v15300_v31 = vld [vmem:[#allocation3 + $0x4b8] ss:$20 sps:$4 sm:$0xff]   ;;  %v15303_v50 = vld [vmem:[#allocation3 + $0x4c0] ss:$20 sps:$4 sm:$0xff]  }
 0x631   :  { %7781 = vmatprep.subr.bf16.mxu0 %v15242_v63  ;;  %14729 = vmatprep.subr.bf16.mxu1 %v21504_v57  ;;  %v15307_v63 = vld [vmem:[#allocation3 + $0x498] ss:$20 sps:$4 sm:$0xff]  }
 0x633   :  { %14726 = vmatmul.mubr.msk.bf16.vlgmr.msra.gmra.mxu0 %vm333_vm3, %v7335_v20  ;;  %13261 = vmatmul.mubr.msk.bf16.vlgmr.msra.gmra.mxu1 %vm333_vm3, %v7599_v17  ;;  %v8123_v20 = vrot.slane %v20083_v21, 3 }
 0x634   :  { %7782 = vmatpush1.bf16.msra.mxu0 %v15240_v28  ;;  %14730 = vmatpush3.bf16.msra.mxu1 %v15243_v3  ;;  %v15310_v28 = vld [vmem:[#allocation3 + $0x46c] ss:$20 sps:$4 sm:$0xff]   ;;  %v15311_v3 = vld [vmem:[#allocation3 + $0x470] ss:$20 sps:$4 sm:$0xff]  }
 0x635   :  { %7783 = vmatprep.subr.bf16.mxu0 %v15246_v23  ;;  %14731 = vmatprep.subr.bf16.mxu1 %v21504_v57  ;;  %v8127_v19 = vsel %vm20078_vm8, %v8123_v20, %v8125_v32  ;;  %v15314_v23 = vld [vmem:[#allocation3 + $0x57c] ss:$20 sps:$4 sm:$0xff]   ;;  %v15348_v20 = vld [vmem:[#allocation3 + $0x5a0] ss:$20 sps:$4 sm:$0xff]  }
 0x636   :  { %7805 = vmatprep.mubr.bf16.mxu0 %v21501_v2  ;;  %14737 = vmatprep.mubr.msk.bf16.mxu1 %vm15960_vm2, %v21504_v57  ;;  %v15351_v32 = vld [vmem:[#allocation3 + $0x510] ss:$20 sps:$4 sm:$0xff]  }
 0x638   :  { %7784 = vmatpush1.bf16.msra.mxu0 %v15244_v51  ;;  %14732 = vmatpush3.bf16.msra.mxu1 %v15247_v40  ;;  %v15317_v51 = vld [vmem:[#allocation3 + $0x584] ss:$20 sps:$4 sm:$0xff]  }
 0x639   :  { %7785 = vmatprep.subr.bf16.mxu0 %v15250_v48  ;;  %14733 = vmatprep.subr.bf16.mxu1 %v21504_v57  ;;  %v15312_v40 = vld [vmem:[#allocation3 + $0x578] ss:$20 sps:$4 sm:$0xff]   ;;  %v15315_v48 = vld [vmem:[#allocation3 + $0x580] ss:$20 sps:$4 sm:$0xff]  }
 0x63c   :  { %7786 = vmatpush1.bf16.msra.mxu0 %v15248_v0  ;;  %14734 = vmatpush3.bf16.msra.mxu1 %v15251_v7  ;;  %v15320_v0 = vld [vmem:[#allocation3 + $0x554] ss:$20 sps:$4 sm:$0xff]   ;;  %v15323_v7 = vld [vmem:[#allocation3 + $0x55c] ss:$20 sps:$4 sm:$0xff]  }
 0x63d   :  { %7787 = vmatprep.subr.bf16.mxu0 %v15254_v42  ;;  %14735 = vmatprep.subr.bf16.mxu1 %v21504_v57  ;;  %v15318_v42 = vld [vmem:[#allocation3 + $0x550] ss:$20 sps:$4 sm:$0xff]  }
 0x640   :  { %7788 = vmatpush1.bf16.msra.mxu0 %v15252_v54  ;;  %14736 = vmatpush3.bf16.msra.mxu1 %v15255_v58  ;;  %v15321_v54 = vld [vmem:[#allocation3 + $0x558] ss:$20 sps:$4 sm:$0xff]  }
 0x641   :  { %8004 = vmatprep.subr.bf16.mxu0 %v15258_v60  ;;  %8045 = vmatprep.subr.bf16.mxu1 %v15261_v38  ;;  %v15326_v58 = vld [vmem:[#allocation3 + $0x52c] ss:$20 sps:$4 sm:$0xff]   ;;  %v15329_v60 = vld [vmem:[#allocation3 + $0x534] ss:$20 sps:$4 sm:$0xff]  }
 0x642   :  { %v15324_v38 = vld [vmem:[#allocation3 + $0x528] ss:$20 sps:$4 sm:$0xff]  }
 0x643   :  { %13262 = vmatmul.mubr.msk.bf16.vlgmr.msra.gmra.mxu0 %vm333_vm3, %v7599_v17  ;;  %14738 = vmatmul.mubr.msk.bf16.vlgmr.msra.gmra.mxu1 %vm333_vm3, %v7599_v17  ;;  %v15308_v17 = vld [vmem:[#allocation3 + $0x468] ss:$20 sps:$4 sm:$0xff]  }
 0x644   :  { %8005 = vmatpush1.bf16.msra.mxu0 %v15256_v35  ;;  %8046 = vmatpush1.bf16.msra.mxu1 %v15259_v29  ;;  %v15327_v35 = vld [vmem:[#allocation3 + $0x530] ss:$20 sps:$4 sm:$0xff]  }
 0x645   :  { %8006 = vmatprep.subr.bf16.mxu0 %v15264_v18  ;;  %8047 = vmatprep.subr.bf16.mxu1 %v15267_v6  ;;  %v15332_v29 = vld [vmem:[#allocation3 + $0x504] ss:$20 sps:$4 sm:$0xff]   ;;  %v15335_v18 = vld [vmem:[#allocation3 + $0x50c] ss:$20 sps:$4 sm:$0xff]  }
 0x646   :  { %8028 = vmatprep.mubr.bf16.mxu0 %v21501_v2  ;;  %8069 = vmatprep.mubr.bf16.mxu1 %v21501_v2  ;;  %v15330_v6 = vld [vmem:[#allocation3 + $0x500] ss:$20 sps:$4 sm:$0xff]  }
 0x648   :  { %8007 = vmatpush1.bf16.msra.mxu0 %v15262_v11  ;;  %8048 = vmatpush1.bf16.msra.mxu1 %v15265_v15  ;;  %v8387_v11 = vrot.slane %v20060_v55, 4  ;;  %v8389_v15 = vrot.slane %v20098_v61, 4 }
 0x649   :  { %8008 = vmatprep.subr.bf16.mxu0 %v15270_v56  ;;  %8049 = vmatprep.subr.bf16.mxu1 %v15273_v43  ;;  %v15333_v56 = vld [vmem:[#allocation3 + $0x508] ss:$20 sps:$4 sm:$0xff]  }
 0x64a   :  { %v15338_v43 = vld [vmem:[#allocation3 + $0x61c] ss:$20 sps:$4 sm:$0xff]  }
 0x64c   :  { %8009 = vmatpush1.bf16.msra.mxu0 %v15268_v4  ;;  %8050 = vmatpush1.bf16.msra.mxu1 %v15271_v37  ;;  %v15336_v4 = vld [vmem:[#allocation3 + $0x618] ss:$20 sps:$4 sm:$0xff]   ;;  %v15339_v37 = vld [vmem:[#allocation3 + $0x588] ss:$20 sps:$4 sm:$0xff]  }
 0x64d   :  { %8010 = vmatprep.subr.bf16.mxu0 %v15276_v39  ;;  %8051 = vmatprep.subr.bf16.mxu1 %v15279_v24  ;;  %v8391_v39 = vsel %vm20078_vm8, %v8387_v11, %v8389_v15  ;;  %v15342_v24 = vld [vmem:[#allocation3 + $0x5f4] ss:$20 sps:$4 sm:$0xff]   ;;  %v15374_v11 = vld [vmem:[#allocation3 + $0x690] ss:$20 sps:$4 sm:$0xff]   ;;  %v15377_v15 = vld [vmem:[#allocation3 + $0x698] ss:$20 sps:$4 sm:$0xff]  }
 0x650   :  { %8011 = vmatpush1.bf16.msra.mxu0 %v15274_v16  ;;  %8052 = vmatpush1.bf16.msra.mxu1 %v15277_v1  ;;  %v15340_v16 = vld [vmem:[#allocation3 + $0x5f0] ss:$20 sps:$4 sm:$0xff]   ;;  %v15343_v1 = vld [vmem:[#allocation3 + $0x560] ss:$20 sps:$4 sm:$0xff]  }
 0x651   :  { %14741 = vmatprep.subr.bf16.mxu0 %v21504_v57  ;;  %8268 = vmatprep.subr.bf16.mxu1 %v15282_v10 }
 0x653   :  { %13284 = vmatmul.mubr.msk.bf16.vlgmr.msra.gmra.mxu0 %vm333_vm3, %v7863_v62  ;;  %13285 = vmatmul.mubr.msk.bf16.vlgmr.msra.gmra.mxu1 %vm333_vm3, %v7863_v62 }
 0x654   :  { %14742 = vmatpush3.bf16.msra.mxu0 %v15283_v47  ;;  %8269 = vmatpush1.bf16.msra.mxu1 %v15280_v13  ;;  %v15344_v47 = vld [vmem:[#allocation3 + $0x5c8] ss:$20 sps:$4 sm:$0xff]  }
 0x655   :  { %14743 = vmatprep.subr.bf16.mxu0 %v21504_v57  ;;  %8270 = vmatprep.subr.bf16.mxu1 %v15286_v33  ;;  %v15347_v33 = vld [vmem:[#allocation3 + $0x538] ss:$20 sps:$4 sm:$0xff]  }
 0x656   :  { %14749 = vmatprep.mubr.msk.bf16.mxu0 %vm15960_vm2, %v21504_v57  ;;  %8292 = vmatprep.mubr.bf16.mxu1 %v21501_v2 }
 0x658   :  { %14744 = vmatpush3.bf16.msra.mxu0 %v15287_v25  ;;  %8271 = vmatpush1.bf16.msra.mxu1 %v15284_v44 }
 0x659   :  { %14745 = vmatprep.subr.bf16.mxu0 %v21504_v57  ;;  %8272 = vmatprep.subr.bf16.mxu1 %v15290_v5 }
 0x65c   :  { %14746 = vmatpush3.bf16.msra.mxu0 %v15291_v41  ;;  %8273 = vmatpush1.bf16.msra.mxu1 %v15288_v46  ;;  %v15350_v46 = vld [vmem:[#allocation3 + $0x5a4] ss:$20 sps:$4 sm:$0xff]  }
 0x65d   :  { %14747 = vmatprep.subr.bf16.mxu0 %v21504_v57  ;;  %8274 = vmatprep.subr.bf16.mxu1 %v15294_v49  ;;  %v8651_v49 = vrot.slane %v20083_v21, 4 }
 0x660   :  { %14748 = vmatpush3.bf16.msra.mxu0 %v15295_v34  ;;  %8275 = vmatpush1.bf16.msra.mxu1 %v15292_v9  ;;  %v8653_v9 = vrot.slane %v20071_v36, 4  ;;  %v15354_v34 = vld [vmem:[#allocation3 + $0x624] ss:$20 sps:$4 sm:$0xff]  }
 0x661   :  { %8309 = vmatprep.subr.bf16.mxu0 %v15298_v59  ;;  %14753 = vmatprep.subr.bf16.mxu1 %v21504_v57  ;;  %v15352_v59 = vld [vmem:[#allocation3 + $0x620] ss:$20 sps:$4 sm:$0xff]  }
 0x663   :  { %14750 = vmatmul.mubr.msk.bf16.vlgmr.msra.gmra.mxu0 %vm333_vm3, %v7863_v62  ;;  %13307 = vmatmul.mubr.msk.bf16.vlgmr.msra.gmra.mxu1 %vm333_vm3, %v8127_v19  ;;  %v15346_v62 = vld [vmem:[#allocation3 + $0x5cc] ss:$20 sps:$4 sm:$0xff]  }
 0x664   :  { %8310 = vmatpush1.bf16.msra.mxu0 %v15296_v53  ;;  %14754 = vmatpush3.bf16.msra.mxu1 %v15299_v52  ;;  %v15355_v53 = vld [vmem:[#allocation3 + $0x628] ss:$20 sps:$4 sm:$0xff]  }
 0x665   :  { %8311 = vmatprep.subr.bf16.mxu0 %v15302_v30  ;;  %14755 = vmatprep.subr.bf16.mxu1 %v21504_v57  ;;  %v15358_v52 = vld [vmem:[#allocation3 + $0x5fc] ss:$20 sps:$4 sm:$0xff]   ;;  %v15356_v30 = vld [vmem:[#allocation3 + $0x5f8] ss:$20 sps:$4 sm:$0xff]  }
 0x666   :  { %8333 = vmatprep.mubr.bf16.mxu0 %v21501_v2  ;;  %14761 = vmatprep.mubr.msk.bf16.mxu1 %vm15960_vm2, %v21504_v57 }
 0x668   :  { %8312 = vmatpush1.bf16.msra.mxu0 %v15300_v31  ;;  %14756 = vmatpush3.bf16.msra.mxu1 %v15303_v50  ;;  %v15359_v31 = vld [vmem:[#allocation3 + $0x600] ss:$20 sps:$4 sm:$0xff]  }
 0x669   :  { %8313 = vmatprep.subr.bf16.mxu0 %v15306_v26  ;;  %14757 = vmatprep.subr.bf16.mxu1 %v21504_v57 }
 0x66c   :  { %8314 = vmatpush1.bf16.msra.mxu0 %v15304_v14  ;;  %14758 = vmatpush3.bf16.msra.mxu1 %v15307_v63 }
 0x66d   :  { %8315 = vmatprep.subr.bf16.mxu0 %v15310_v28  ;;  %14759 = vmatprep.subr.bf16.mxu1 %v21504_v57 }
 0x670   :  { %8316 = vmatpush1.bf16.msra.mxu0 %v15308_v17  ;;  %14760 = vmatpush3.bf16.msra.mxu1 %v15311_v3  ;;  %v15362_v17 = vld [vmem:[#allocation3 + $0x5d4] ss:$20 sps:$4 sm:$0xff]  }
 0x671   :  { %8532 = vmatprep.subr.bf16.mxu0 %v15314_v23  ;;  %8573 = vmatprep.subr.bf16.mxu1 %v15317_v51  ;;  %v15360_v23 = vld [vmem:[#allocation3 + $0x5d0] ss:$20 sps:$4 sm:$0xff]   ;;  %v15363_v51 = vld [vmem:[#allocation3 + $0x5d8] ss:$20 sps:$4 sm:$0xff]  }
 0x673   :  { %13308 = vmatmul.mubr.msk.bf16.vlgmr.msra.gmra.mxu0 %vm333_vm3, %v8127_v19  ;;  %14762 = vmatmul.mubr.msk.bf16.vlgmr.msra.gmra.mxu1 %vm333_vm3, %v8127_v19  ;;  %v8655_v19 = vsel %vm20078_vm8, %v8651_v49, %v8653_v9  ;;  %v8917_v49 = vrot.slane %v20098_v61, 5  ;;  %v15395_v9 = vld [vmem:[#allocation3 + $0x6c8] ss:$20 sps:$4 sm:$0xff]  }
 0x674   :  { %8533 = vmatpush1.bf16.msra.mxu0 %v15312_v40  ;;  %8574 = vmatpush1.bf16.msra.mxu1 %v15315_v48 }
 0x675   :  { %8534 = vmatprep.subr.bf16.mxu0 %v15320_v0  ;;  %8575 = vmatprep.subr.bf16.mxu1 %v15323_v7  ;;  %v15366_v7 = vld [vmem:[#allocation3 + $0x5ac] ss:$20 sps:$4 sm:$0xff]  }
 0x676   :  { %8556 = vmatprep.mubr.bf16.mxu0 %v21501_v2  ;;  %8597 = vmatprep.mubr.bf16.mxu1 %v21501_v2 }
 0x678   :  { %8535 = vmatpush1.bf16.msra.mxu0 %v15318_v42  ;;  %8576 = vmatpush1.bf16.msra.mxu1 %v15321_v54  ;;  %v15364_v54 = vld [vmem:[#allocation3 + $0x5a8] ss:$20 sps:$4 sm:$0xff]  }
 0x679   :  { %8536 = vmatprep.subr.bf16.mxu0 %v15326_v58  ;;  %8577 = vmatprep.subr.bf16.mxu1 %v15329_v60  ;;  %v15367_v58 = vld [vmem:[#allocation3 + $0x5b0] ss:$20 sps:$4 sm:$0xff]  }
 0x67a   :  { %v15370_v60 = vld [vmem:[#allocation3 + $0x6bc] ss:$20 sps:$4 sm:$0xff]  }
 0x67c   :  { %8537 = vmatpush1.bf16.msra.mxu0 %v15324_v38  ;;  %8578 = vmatpush1.bf16.msra.mxu1 %v15327_v35  ;;  %v15373_v38 = vld [vmem:[#allocation3 + $0x6c4] ss:$20 sps:$4 sm:$0xff]  }
 0x67d   :  { %8538 = vmatprep.subr.bf16.mxu0 %v15332_v29  ;;  %8579 = vmatprep.subr.bf16.mxu1 %v15335_v18  ;;  %v15368_v35 = vld [vmem:[#allocation3 + $0x6b8] ss:$20 sps:$4 sm:$0xff]   ;;  %v15371_v29 = vld [vmem:[#allocation3 + $0x6c0] ss:$20 sps:$4 sm:$0xff]  }
 0x67e   :  { %v15376_v18 = vld [vmem:[#allocation3 + $0x694] ss:$20 sps:$4 sm:$0xff]  }
 0x680   :  { %8539 = vmatpush1.bf16.msra.mxu0 %v15330_v6  ;;  %8580 = vmatpush1.bf16.msra.mxu1 %v15333_v56  ;;  %v15379_v6 = vld [vmem:[#allocation3 + $0x69c] ss:$20 sps:$4 sm:$0xff]  }
 0x681   :  { %14765 = vmatprep.subr.bf16.mxu0 %v21504_v57  ;;  %8796 = vmatprep.subr.bf16.mxu1 %v15338_v43 }
 0x683   :  { %v6484_v27 = vpop.f32.mrf.mxu0  ;;  %13330 = vmatmul.mubr.msk.bf16.vlgmr.msra.gmra.mxu0 %vm333_vm3, %v8391_v39  ;;  %13331 = vmatmul.mubr.msk.bf16.vlgmr.msra.gmra.mxu1 %vm333_vm3, %v8391_v39  ;;  %v20215_v45 = vpop.f32.mrf.mxu1 }
 0x684   :  { %14766 = vmatpush3.bf16.msra.mxu0 %v15339_v37  ;;  %8797 = vmatpush1.bf16.msra.mxu1 %v15336_v4  ;;  %v15382_v4 = vld [vmem:[#allocation3 + $0x66c] ss:$20 sps:$4 sm:$0xff]  }
 0x685   :  { %v6486_v10 = vpop.f32.mrf.mxu0  ;;  %14767 = vmatprep.subr.bf16.mxu0 %v21504_v57  ;;  %8798 = vmatprep.subr.bf16.mxu1 %v15342_v24  ;;  %v20218_v13 = vpop.f32.mrf.mxu1 }
 0x686   :  { %14773 = vmatprep.mubr.msk.bf16.mxu0 %vm15960_vm2, %v21504_v57  ;;  %8820 = vmatprep.mubr.bf16.mxu1 %v21501_v2 }
 0x687   :  { %v6488_v44 = vpop.f32.mrf.mxu0  ;;  %v6529_v25 = vpop.f32.mrf.mxu1 }
 0x688   :  { %14768 = vmatpush3.bf16.msra.mxu0 %v15343_v1  ;;  %8799 = vmatpush1.bf16.msra.mxu1 %v15340_v16  ;;  %v15385_v16 = vld [vmem:[#allocation3 + $0x674] ss:$20 sps:$4 sm:$0xff]   ;;  %v15388_v44 = vld [vmem:[#allocation3 + $0x644] ss:$20 sps:$4 sm:$0xff]   ;;  %v15391_v25 = vld [vmem:[#allocation3 + $0x64c] ss:$20 sps:$4 sm:$0xff]  }
 0x689   :  { %v6489_v5 = vpop.f32.mrf.mxu0  ;;  %14769 = vmatprep.subr.bf16.mxu0 %v21504_v57  ;;  %8800 = vmatprep.subr.bf16.mxu1 %v15346_v62  ;;  %v6530_v41 = vpop.f32.mrf.mxu1  ;;  %v15383_v62 = vld [vmem:[#allocation3 + $0x670] ss:$20 sps:$4 sm:$0xff]  }
 0x68a   :  { %v8915_v41 = vrot.slane %v20060_v55, 5 }
 0x68c   :  { %14770 = vmatpush3.bf16.msra.mxu0 %v15347_v33  ;;  %8801 = vmatpush1.bf16.msra.mxu1 %v15344_v47 }
 0x68d   :  { %14771 = vmatprep.subr.bf16.mxu0 %v21504_v57  ;;  %8802 = vmatprep.subr.bf16.mxu1 %v15350_v46  ;;  %v15386_v46 = vld [vmem:[#allocation3 + $0x640] ss:$20 sps:$4 sm:$0xff]  }
 0x690   :  { %14772 = vmatpush3.bf16.msra.mxu0 %v15351_v32  ;;  %8803 = vmatpush1.bf16.msra.mxu1 %v15348_v20  ;;  %v15394_v20 = vld [vmem:[#allocation3 + $0x75c] ss:$20 sps:$4 sm:$0xff]   ;;  %v15392_v32 = vld [vmem:[#allocation3 + $0x758] ss:$20 sps:$4 sm:$0xff]  }
 0x691   :  { %8837 = vmatprep.subr.bf16.mxu0 %v15354_v34  ;;  %14777 = vmatprep.subr.bf16.mxu1 %v21504_v57  ;;  %v8919_v34 = vsel %vm20078_vm8, %v8915_v41, %v8917_v49  ;;  %v15429_v41 = vld [vmem:[#allocation3 + $0x804] ss:$20 sps:$4 sm:$0xff]   ;;  %v15427_v49 = vld [vmem:[#allocation3 + $0x800] ss:$20 sps:$4 sm:$0xff]  }
 0x693   :  { %v6566_v50 = vpop.f32.mrf.mxu0  ;;  %v6713_v26 = vpop.f32.mrf.mxu1  ;;  %14774 = vmatmul.mubr.msk.bf16.vlgmr.msra.gmra.mxu0 %vm333_vm3, %v8391_v39  ;;  %13353 = vmatmul.mubr.msk.bf16.vlgmr.msra.gmra.mxu1 %vm333_vm3, %v8655_v19 }
 0x694   :  { %v20232_v14 = vadd.f32 %v6713_v26, %v6484_v27  ;;  %8838 = vmatpush1.bf16.msra.mxu0 %v15352_v59  ;;  %14778 = vmatpush3.bf16.msra.mxu1 %v15355_v53  ;;  %v15398_v59 = vld [vmem:[#allocation3 + $0x734] ss:$20 sps:$4 sm:$0xff]   ;;  %v15396_v53 = vld [vmem:[#allocation3 + $0x730] ss:$20 sps:$4 sm:$0xff]  }
 0x695   :  { %v14679_v63 = vpop.f32.mrf.mxu0  ;;  %v6715_v28 = vpop.f32.mrf.mxu1  ;;  %8839 = vmatprep.subr.bf16.mxu0 %v15358_v52  ;;  %14779 = vmatprep.subr.bf16.mxu1 %v21504_v57 }
 0x696   :  { %v20235_v3 = vadd.f32 %v6715_v28, %v6486_v10  ;;  %8861 = vmatprep.mubr.bf16.mxu0 %v21501_v2  ;;  %14785 = vmatprep.mubr.msk.bf16.mxu1 %vm15960_vm2, %v21504_v57  ;;  %v15380_v10 = vld [vmem:[#allocation3 + $0x668] ss:$20 sps:$4 sm:$0xff]   ;;  %v15402_v28 = vld [vmem:[#allocation3 + $0x70c] ss:$20 sps:$4 sm:$0xff]  }
 0x697   :  { %v6569_v40 = vpop.f32.mrf.mxu0  ;;  %v6717_v48 = vpop.f32.mrf.mxu1 }
 0x698   :  { %8840 = vmatpush1.bf16.msra.mxu0 %v15356_v30  ;;  %14780 = vmatpush3.bf16.msra.mxu1 %v15359_v31  ;;  %v15403_v40 = vld [vmem:[#allocation3 + $0x678] ss:$20 sps:$4 sm:$0xff]  }
 0x699   :  { %v14680_v0 = vpop.f32.mrf.mxu0  ;;  %8841 = vmatprep.subr.bf16.mxu0 %v15362_v17  ;;  %14781 = vmatprep.subr.bf16.mxu1 %v21504_v57  ;;  %v6718_v42 = vpop.f32.mrf.mxu1 }
 0x69c   :  { %8842 = vmatpush1.bf16.msra.mxu0 %v15360_v23  ;;  %14782 = vmatpush3.bf16.msra.mxu1 %v15363_v51  ;;  %v15400_v51 = vld [vmem:[#allocation3 + $0x708] ss:$20 sps:$4 sm:$0xff]  }
 0x69d   :  { %8843 = vmatprep.subr.bf16.mxu0 %v15366_v7  ;;  %14783 = vmatprep.subr.bf16.mxu1 %v21504_v57  ;;  %v15406_v7 = vld [vmem:[#allocation3 + $0x6e4] ss:$20 sps:$4 sm:$0xff]  }
 0x6a0   :  { %8844 = vmatpush1.bf16.msra.mxu0 %v15364_v54  ;;  %14784 = vmatpush3.bf16.msra.mxu1 %v15367_v58  ;;  %v15404_v54 = vld [vmem:[#allocation3 + $0x6e0] ss:$20 sps:$4 sm:$0xff]   ;;  %v15407_v58 = vld [vmem:[#allocation3 + $0x650] ss:$20 sps:$4 sm:$0xff]  }
 0x6a1   :  { %9060 = vmatprep.subr.bf16.mxu0 %v15370_v60  ;;  %9101 = vmatprep.subr.bf16.mxu1 %v15373_v38  ;;  %v9181_v60 = vrot.slane %v20071_v36, 5  ;;  %v15410_v38 = vld [vmem:[#allocation3 + $0x764] ss:$20 sps:$4 sm:$0xff]  }
 0x6a3   :  { %v6754_v56 = vpop.f32.mrf.mxu0  ;;  %v6795_v43 = vpop.f32.mrf.mxu1  ;;  %13354 = vmatmul.mubr.msk.bf16.vlgmr.msra.gmra.mxu0 %vm333_vm3, %v8655_v19  ;;  %14786 = vmatmul.mubr.msk.bf16.vlgmr.msra.gmra.mxu1 %vm333_vm3, %v8655_v19  ;;  %v15399_v19 = vld [vmem:[#allocation3 + $0x6a0] ss:$20 sps:$4 sm:$0xff]  }
 0x6a4   :  { %v6755_v37 = vadd.f32 %v6754_v56, %v20215_v45  ;;  %v20245_v39 = vadd.f32 %v6795_v43, %v6566_v50  ;;  %9061 = vmatpush1.bf16.msra.mxu0 %v15368_v35  ;;  %9102 = vmatpush1.bf16.msra.mxu1 %v15371_v29  ;;  %v15408_v35 = vld [vmem:[#allocation3 + $0x760] ss:$20 sps:$4 sm:$0xff]   ;;  %v15411_v29 = vld [vmem:[#allocation3 + $0x768] ss:$20 sps:$4 sm:$0xff]  }
 0x6a5   :  { %v6756_v24 = vpop.f32.mrf.mxu0  ;;  %9062 = vmatprep.subr.bf16.mxu0 %v15376_v18  ;;  %9103 = vmatprep.subr.bf16.mxu1 %v15379_v6  ;;  %v14691_v1 = vpop.f32.mrf.mxu1  ;;  %v15414_v6 = vld [vmem:[#allocation3 + $0x73c] ss:$20 sps:$4 sm:$0xff]  }
 0x6a6   :  { %v6757_v27 = vadd.f32 %v6756_v24, %v20218_v13  ;;  %9084 = vmatprep.mubr.bf16.mxu0 %v21501_v2  ;;  %9125 = vmatprep.mubr.bf16.mxu1 %v21501_v2  ;;  %v15389_v13 = vld [vmem:[#allocation3 + $0x648] ss:$20 sps:$4 sm:$0xff]  }
 0x6a7   :  { %v6758_v47 = vpop.f32.mrf.mxu0  ;;  %v6798_v33 = vpop.f32.mrf.mxu1  ;;  %v15418_v1 = vld [vmem:[#allocation3 + $0x714] ss:$20 sps:$4 sm:$0xff]  }
 0x6a8   :  { %9063 = vmatpush1.bf16.msra.mxu0 %v15374_v11  ;;  %9104 = vmatpush1.bf16.msra.mxu1 %v15377_v15  ;;  %v15412_v11 = vld [vmem:[#allocation3 + $0x738] ss:$20 sps:$4 sm:$0xff]   ;;  %v15415_v15 = vld [vmem:[#allocation3 + $0x740] ss:$20 sps:$4 sm:$0xff]  }
 0x6a9   :  { %v6759_v45 = vpop.f32.mrf.mxu0  ;;  %9064 = vmatprep.subr.bf16.mxu0 %v15382_v4  ;;  %9105 = vmatprep.subr.bf16.mxu1 %v15385_v16  ;;  %v14692_v5 = vpop.f32.mrf.mxu1 }
 0x6aa   :  { %v15422_v45 = vld [vmem:[#allocation3 + $0x6ec] ss:$20 sps:$4 sm:$0xff]   ;;  %v15423_v5 = vld [vmem:[#allocation3 + $0x6f0] ss:$20 sps:$4 sm:$0xff]  }
 0x6ac   :  { %9065 = vmatpush1.bf16.msra.mxu0 %v15380_v10  ;;  %9106 = vmatpush1.bf16.msra.mxu1 %v15383_v62  ;;  %v15416_v10 = vld [vmem:[#allocation3 + $0x710] ss:$20 sps:$4 sm:$0xff]   ;;  %v15419_v62 = vld [vmem:[#allocation3 + $0x718] ss:$20 sps:$4 sm:$0xff]  }
 0x6ad   :  { %9066 = vmatprep.subr.bf16.mxu0 %v15388_v44  ;;  %9107 = vmatprep.subr.bf16.mxu1 %v15391_v25  ;;  %v15420_v25 = vld [vmem:[#allocation3 + $0x6e8] ss:$20 sps:$4 sm:$0xff]  }
 0x6b0   :  { %9067 = vmatpush1.bf16.msra.mxu0 %v15386_v46  ;;  %9108 = vmatpush1.bf16.msra.mxu1 %v15389_v13  ;;  %v15426_v46 = vld [vmem:[#allocation3 + $0x7fc] ss:$20 sps:$4 sm:$0xff]   ;;  %v15424_v13 = vld [vmem:[#allocation3 + $0x7f8] ss:$20 sps:$4 sm:$0xff]  }
 0x6b1   :  { %14789 = vmatprep.subr.bf16.mxu0 %v21504_v57  ;;  %9324 = vmatprep.subr.bf16.mxu1 %v15394_v20  ;;  %v15432_v20 = vld [vmem:[#allocation3 + $0x7d4] ss:$20 sps:$4 sm:$0xff]  }
 0x6b3   :  { %v6973_v52 = vpop.f32.mrf.mxu0  ;;  %v7014_v30 = vpop.f32.mrf.mxu1  ;;  %13376 = vmatmul.mubr.msk.bf16.vlgmr.msra.gmra.mxu0 %vm333_vm3, %v8919_v34  ;;  %13377 = vmatmul.mubr.msk.bf16.vlgmr.msra.gmra.mxu1 %vm333_vm3, %v8919_v34 }
 0x6b4   :  { %v7061_v31 = vadd.f32 %v6973_v52, %v20232_v14  ;;  %v20258_v50 = vadd.f32 %v7014_v30, %v6755_v37  ;;  %14790 = vmatpush3.bf16.msra.mxu0 %v15395_v9  ;;  %9325 = vmatpush1.bf16.msra.mxu1 %v15392_v32  ;;  %v15435_v32 = vld [vmem:[#allocation3 + $0x7dc] ss:$20 sps:$4 sm:$0xff]  }
 0x6b5   :  { %v6975_v26 = vpop.f32.mrf.mxu0  ;;  %v7016_v63 = vpop.f32.mrf.mxu1  ;;  %14791 = vmatprep.subr.bf16.mxu0 %v21504_v57  ;;  %9326 = vmatprep.subr.bf16.mxu1 %v15398_v59  ;;  %v15430_v9 = vld [vmem:[#allocation3 + $0x7d0] ss:$20 sps:$4 sm:$0xff]  }
 0x6b6   :  { %v7062_v17 = vadd.f32 %v6975_v26, %v20235_v3  ;;  %v20262_v23 = vadd.f32 %v7016_v63, %v6757_v27  ;;  %14797 = vmatprep.mubr.msk.bf16.mxu0 %vm15960_vm2, %v21504_v57  ;;  %9348 = vmatprep.mubr.bf16.mxu1 %v21501_v2  ;;  %v9179_v3 = vrot.slane %v20083_v21, 5  ;;  %v15441_v26 = vld [vmem:[#allocation3 + $0x7b4] ss:$20 sps:$4 sm:$0xff]  }
 0x6b7   :  { %v6977_v14 = vpop.f32.mrf.mxu0  ;;  %v7018_v48 = vpop.f32.mrf.mxu1 }
 0x6b8   :  { %14792 = vmatpush3.bf16.msra.mxu0 %v15399_v19  ;;  %9327 = vmatpush1.bf16.msra.mxu1 %v15396_v53  ;;  %v9183_v18 = vsel %vm20078_vm8, %v9179_v3, %v9181_v60  ;;  %v15438_v19 = vld [vmem:[#allocation3 + $0x7ac] ss:$20 sps:$4 sm:$0xff]   ;;  %v15444_v48 = vld [vmem:[#allocation3 + $0x784] ss:$20 sps:$4 sm:$0xff]   ;;  %v9443_v3 = vrot.slane %v20060_v55, 6 }
 0x6b9   :  { %v6978_v0 = vpop.f32.mrf.mxu0  ;;  %14793 = vmatprep.subr.bf16.mxu0 %v21504_v57  ;;  %9328 = vmatprep.subr.bf16.mxu1 %v15402_v28  ;;  %v7019_v42 = vpop.f32.mrf.mxu1  ;;  %v15448_v60 = vld [vmem:[#allocation3 + $0x898] ss:$20 sps:$4 sm:$0xff]  }
 0x6ba   :  { %v15447_v0 = vld [vmem:[#allocation3 + $0x78c] ss:$20 sps:$4 sm:$0xff]  }
 0x6bb   :  { %v15442_v42 = vld [vmem:[#allocation3 + $0x780] ss:$20 sps:$4 sm:$0xff]  }
 0x6bc   :  { %14794 = vmatpush3.bf16.msra.mxu0 %v15403_v40  ;;  %9329 = vmatpush1.bf16.msra.mxu1 %v15400_v51  ;;  %v15439_v51 = vld [vmem:[#allocation3 + $0x7b0] ss:$20 sps:$4 sm:$0xff]  }
 0x6bd   :  { %14795 = vmatprep.subr.bf16.mxu0 %v21504_v57  ;;  %9330 = vmatprep.subr.bf16.mxu1 %v15406_v7 }
 0x6c0   :  { %14796 = vmatpush3.bf16.msra.mxu0 %v15407_v58  ;;  %9331 = vmatpush1.bf16.msra.mxu1 %v15404_v54  ;;  %v9445_v54 = vrot.slane %v20098_v61, 6  ;;  %v15450_v58 = vld [vmem:[#allocation3 + $0x89c] ss:$20 sps:$4 sm:$0xff]  }
 0x6c1   :  { %9365 = vmatprep.subr.bf16.mxu0 %v15410_v38  ;;  %14801 = vmatprep.subr.bf16.mxu1 %v21504_v57  ;;  %v15451_v38 = vld [vmem:[#allocation3 + $0x808] ss:$20 sps:$4 sm:$0xff]  }
 0x6c3   :  { %v7055_v56 = vpop.f32.mrf.mxu0  ;;  %v7238_v43 = vpop.f32.mrf.mxu1  ;;  %14798 = vmatmul.mubr.msk.bf16.vlgmr.msra.gmra.mxu0 %vm333_vm3, %v8919_v34  ;;  %13399 = vmatmul.mubr.msk.bf16.vlgmr.msra.gmra.mxu1 %vm333_vm3, %v9183_v18  ;;  %v15433_v34 = vld [vmem:[#allocation3 + $0x7d8] ss:$20 sps:$4 sm:$0xff]  }
 0x6c4   :  { %v7065_v4 = vadd.f32 %v7055_v56, %v20245_v39  ;;  %v20277_v37 = vadd.f32 %v7238_v43, %v7061_v31  ;;  %9366 = vmatpush1.bf16.msra.mxu0 %v15408_v35  ;;  %14802 = vmatpush3.bf16.msra.mxu1 %v15411_v29  ;;  %v9447_v35 = vsel %vm20078_vm8, %v9443_v3, %v9445_v54  ;;  %v15454_v29 = vld [vmem:[#allocation3 + $0x874] ss:$20 sps:$4 sm:$0xff]   ;;  %v15485_v3 = vld [vmem:[#allocation3 + $0x944] ss:$20 sps:$4 sm:$0xff]  }
 0x6c5   :  { %v14703_v24 = vpop.f32.mrf.mxu0  ;;  %v7240_v16 = vpop.f32.mrf.mxu1  ;;  %9367 = vmatprep.subr.bf16.mxu0 %v15414_v6  ;;  %14803 = vmatprep.subr.bf16.mxu1 %v21504_v57  ;;  %v15455_v6 = vld [vmem:[#allocation3 + $0x7e0] ss:$20 sps:$4 sm:$0xff]  }
 0x6c6   :  { %v20280_v27 = vadd.f32 %v7240_v16, %v7062_v17  ;;  %9389 = vmatprep.mubr.bf16.mxu0 %v21501_v2  ;;  %14809 = vmatprep.mubr.msk.bf16.mxu1 %vm15960_vm2, %v21504_v57  ;;  %v15436_v17 = vld [vmem:[#allocation3 + $0x7a8] ss:$20 sps:$4 sm:$0xff]   ;;  %v15458_v16 = vld [vmem:[#allocation3 + $0x84c] ss:$20 sps:$4 sm:$0xff]  }
 0x6c7   :  { %v7058_v39 = vpop.f32.mrf.mxu0  ;;  %v7242_v47 = vpop.f32.mrf.mxu1  ;;  %v15483_v54 = vld [vmem:[#allocation3 + $0x940] ss:$20 sps:$4 sm:$0xff]  }
 0x6c8   :  { %9368 = vmatpush1.bf16.msra.mxu0 %v15412_v11  ;;  %14804 = vmatpush3.bf16.msra.mxu1 %v15415_v15  ;;  %v15459_v39 = vld [vmem:[#allocation3 + $0x7b8] ss:$20 sps:$4 sm:$0xff]  }
 0x6c9   :  { %v14704_v33 = vpop.f32.mrf.mxu0  ;;  %9369 = vmatprep.subr.bf16.mxu0 %v15418_v1  ;;  %14805 = vmatprep.subr.bf16.mxu1 %v21504_v57  ;;  %v7243_v44 = vpop.f32.mrf.mxu1 }
 0x6cc   :  { %9370 = vmatpush1.bf16.msra.mxu0 %v15416_v10  ;;  %14806 = vmatpush3.bf16.msra.mxu1 %v15419_v62  ;;  %v15456_v62 = vld [vmem:[#allocation3 + $0x848] ss:$20 sps:$4 sm:$0xff]  }
 0x6cd   :  { %9371 = vmatprep.subr.bf16.mxu0 %v15422_v45  ;;  %14807 = vmatprep.subr.bf16.mxu1 %v21504_v57  ;;  %v15462_v45 = vld [vmem:[#allocation3 + $0x824] ss:$20 sps:$4 sm:$0xff]  }
 0x6d0   :  { %9372 = vmatpush1.bf16.msra.mxu0 %v15420_v25  ;;  %14808 = vmatpush3.bf16.msra.mxu1 %v15423_v5  ;;  %v15463_v25 = vld [vmem:[#allocation3 + $0x790] ss:$20 sps:$4 sm:$0xff]   ;;  %v9707_v5 = vrot.slane %v20083_v21, 6 }
 0x6d1   :  { %9588 = vmatprep.subr.bf16.mxu0 %v15426_v46  ;;  %9629 = vmatprep.subr.bf16.mxu1 %v15429_v41  ;;  %v9709_v46 = vrot.slane %v20071_v36, 6  ;;  %v15466_v41 = vld [vmem:[#allocation3 + $0x8a4] ss:$20 sps:$4 sm:$0xff]  }
 0x6d3   :  { %v7279_v59 = vpop.f32.mrf.mxu0  ;;  %v7320_v53 = vpop.f32.mrf.mxu1  ;;  %13400 = vmatmul.mubr.msk.bf16.vlgmr.msra.gmra.mxu0 %vm333_vm3, %v9183_v18  ;;  %14810 = vmatmul.mubr.msk.bf16.vlgmr.msra.gmra.mxu1 %vm333_vm3, %v9183_v18  ;;  %v15452_v18 = vld [vmem:[#allocation3 + $0x870] ss:$20 sps:$4 sm:$0xff]  }
 0x6d4   :  { %v7328_v52 = vadd.f32 %v7279_v59, %v20258_v50  ;;  %v20290_v30 = vadd.f32 %v7320_v53, %v7065_v4  ;;  %9589 = vmatpush1.bf16.msra.mxu0 %v15424_v13  ;;  %9630 = vmatpush1.bf16.msra.mxu1 %v15427_v49  ;;  %v15464_v13 = vld [vmem:[#allocation3 + $0x8a0] ss:$20 sps:$4 sm:$0xff]   ;;  %v9711_v49 = vsel %vm20078_vm8, %v9707_v5, %v9709_v46  ;;  %v15506_v5 = vld [vmem:[#allocation3 + $0x9dc] ss:$20 sps:$4 sm:$0xff]  }
 0x6d5   :  { %v7281_v31 = vpop.f32.mrf.mxu0  ;;  %9590 = vmatprep.subr.bf16.mxu0 %v15432_v20  ;;  %9631 = vmatprep.subr.bf16.mxu1 %v15435_v32  ;;  %v14715_v63 = vpop.f32.mrf.mxu1  ;;  %v15467_v20 = vld [vmem:[#allocation3 + $0x8a8] ss:$20 sps:$4 sm:$0xff]  }
 0x6d6   :  { %v7329_v28 = vadd.f32 %v7281_v31, %v20262_v23  ;;  %9612 = vmatprep.mubr.bf16.mxu0 %v21501_v2  ;;  %9653 = vmatprep.mubr.bf16.mxu1 %v21501_v2  ;;  %v15445_v23 = vld [vmem:[#allocation3 + $0x788] ss:$20 sps:$4 sm:$0xff]  }
 0x6d7   :  { %v7283_v40 = vpop.f32.mrf.mxu0  ;;  %v7323_v14 = vpop.f32.mrf.mxu1  ;;  %v15470_v32 = vld [vmem:[#allocation3 + $0x87c] ss:$20 sps:$4 sm:$0xff]   ;;  %v15474_v63 = vld [vmem:[#allocation3 + $0x854] ss:$20 sps:$4 sm:$0xff]  }
 0x6d8   :  { %9591 = vmatpush1.bf16.msra.mxu0 %v15430_v9  ;;  %9632 = vmatpush1.bf16.msra.mxu1 %v15433_v34  ;;  %v15468_v9 = vld [vmem:[#allocation3 + $0x878] ss:$20 sps:$4 sm:$0xff]   ;;  %v15471_v34 = vld [vmem:[#allocation3 + $0x880] ss:$20 sps:$4 sm:$0xff]  }
 0x6d9   :  { %v7284_v50 = vpop.f32.mrf.mxu0  ;;  %9592 = vmatprep.subr.bf16.mxu0 %v15438_v19  ;;  %9633 = vmatprep.subr.bf16.mxu1 %v15441_v26  ;;  %v14716_v7 = vpop.f32.mrf.mxu1 }
 0x6da   :  { %v15478_v50 = vld [vmem:[#allocation3 + $0x82c] ss:$20 sps:$4 sm:$0xff]   ;;  %v15479_v7 = vld [vmem:[#allocation3 + $0x830] ss:$20 sps:$4 sm:$0xff]  }
 0x6dc   :  { %9593 = vmatpush1.bf16.msra.mxu0 %v15436_v17  ;;  %9634 = vmatpush1.bf16.msra.mxu1 %v15439_v51  ;;  %v15472_v17 = vld [vmem:[#allocation3 + $0x850] ss:$20 sps:$4 sm:$0xff]   ;;  %v15475_v51 = vld [vmem:[#allocation3 + $0x858] ss:$20 sps:$4 sm:$0xff]  }
 0x6dd   :  { %9594 = vmatprep.subr.bf16.mxu0 %v15444_v48  ;;  %9635 = vmatprep.subr.bf16.mxu1 %v15447_v0  ;;  %v15476_v0 = vld [vmem:[#allocation3 + $0x828] ss:$20 sps:$4 sm:$0xff]  }
 0x6e0   :  { %9595 = vmatpush1.bf16.msra.mxu0 %v15442_v42  ;;  %9636 = vmatpush1.bf16.msra.mxu1 %v15445_v23  ;;  %v15482_v42 = vld [vmem:[#allocation3 + $0x93c] ss:$20 sps:$4 sm:$0xff]   ;;  %v15480_v23 = vld [vmem:[#allocation3 + $0x938] ss:$20 sps:$4 sm:$0xff]  }
 0x6e1   :  { %14813 = vmatprep.subr.bf16.mxu0 %v21504_v57  ;;  %9852 = vmatprep.subr.bf16.mxu1 %v15450_v58  ;;  %v15488_v58 = vld [vmem:[#allocation3 + $0x914] ss:$20 sps:$4 sm:$0xff]  }
 0x6e3   :  { %v7502_v11 = vpop.f32.mrf.mxu0  ;;  %v7543_v15 = vpop.f32.mrf.mxu1  ;;  %13422 = vmatmul.mubr.msk.bf16.vlgmr.msra.gmra.mxu0 %vm333_vm3, %v9447_v35  ;;  %13423 = vmatmul.mubr.msk.bf16.vlgmr.msra.gmra.mxu1 %vm333_vm3, %v9447_v35 }
 0x6e4   :  { %v7590_v56 = vadd.f32 %v7502_v11, %v20277_v37  ;;  %v20303_v43 = vadd.f32 %v7543_v15, %v7328_v52  ;;  %14814 = vmatpush3.bf16.msra.mxu0 %v15451_v38  ;;  %9853 = vmatpush1.bf16.msra.mxu1 %v15448_v60  ;;  %v15491_v60 = vld [vmem:[#allocation3 + $0x91c] ss:$20 sps:$4 sm:$0xff]  }
 0x6e5   :  { %v7504_v4 = vpop.f32.mrf.mxu0  ;;  %v7545_v24 = vpop.f32.mrf.mxu1  ;;  %14815 = vmatprep.subr.bf16.mxu0 %v21504_v57  ;;  %9854 = vmatprep.subr.bf16.mxu1 %v15454_v29  ;;  %v15486_v38 = vld [vmem:[#allocation3 + $0x910] ss:$20 sps:$4 sm:$0xff]  }
 0x6e6   :  { %v7591_v1 = vadd.f32 %v7504_v4, %v20280_v27  ;;  %v20307_v10 = vadd.f32 %v7545_v24, %v7329_v28  ;;  %14821 = vmatprep.mubr.msk.bf16.mxu0 %vm15960_vm2, %v21504_v57  ;;  %9876 = vmatprep.mubr.bf16.mxu1 %v21501_v2  ;;  %v15460_v27 = vld [vmem:[#allocation3 + $0x820] ss:$20 sps:$4 sm:$0xff]  }
 0x6e7   :  { %v7506_v37 = vpop.f32.mrf.mxu0  ;;  %v7547_v47 = vpop.f32.mrf.mxu1  ;;  %v15497_v4 = vld [vmem:[#allocation3 + $0x8f4] ss:$20 sps:$4 sm:$0xff]  }
 0x6e8   :  { %14816 = vmatpush3.bf16.msra.mxu0 %v15455_v6  ;;  %9855 = vmatpush1.bf16.msra.mxu1 %v15452_v18  ;;  %v15494_v6 = vld [vmem:[#allocation3 + $0x8ec] ss:$20 sps:$4 sm:$0xff]   ;;  %v15500_v47 = vld [vmem:[#allocation3 + $0x8c4] ss:$20 sps:$4 sm:$0xff]  }
 0x6e9   :  { %v7507_v33 = vpop.f32.mrf.mxu0  ;;  %14817 = vmatprep.subr.bf16.mxu0 %v21504_v57  ;;  %9856 = vmatprep.subr.bf16.mxu1 %v15458_v16  ;;  %v7548_v44 = vpop.f32.mrf.mxu1 }
 0x6ea   :  { %v15503_v33 = vld [vmem:[#allocation3 + $0x8cc] ss:$20 sps:$4 sm:$0xff]  }
 0x6eb   :  { %v15498_v44 = vld [vmem:[#allocation3 + $0x8c0] ss:$20 sps:$4 sm:$0xff]  }
 0x6ec   :  { %14818 = vmatpush3.bf16.msra.mxu0 %v15459_v39  ;;  %9857 = vmatpush1.bf16.msra.mxu1 %v15456_v62  ;;  %v15495_v39 = vld [vmem:[#allocation3 + $0x8f0] ss:$20 sps:$4 sm:$0xff]  }
 0x6ed   :  { %14819 = vmatprep.subr.bf16.mxu0 %v21504_v57  ;;  %9858 = vmatprep.subr.bf16.mxu1 %v15462_v45 }
 0x6f0   :  { %14820 = vmatpush3.bf16.msra.mxu0 %v15463_v25  ;;  %9859 = vmatpush1.bf16.msra.mxu1 %v15460_v27  ;;  %v9971_v27 = vrot.slane %v20060_v55, 7  ;;  %v9973_v25 = vrot.slane %v20098_v61, 7 }
 0x6f1   :  { %9893 = vmatprep.subr.bf16.mxu0 %v15466_v41  ;;  %14825 = vmatprep.subr.bf16.mxu1 %v21504_v57  ;;  %v15504_v41 = vld [vmem:[#allocation3 + $0x9d8] ss:$20 sps:$4 sm:$0xff]  }
 0x6f2   :  { %v9975_v46 = vsel %vm20078_vm8, %v9971_v27, %v9973_v25 }
 0x6f3   :  { %v7584_v59 = vpop.f32.mrf.mxu0  ;;  %v7766_v53 = vpop.f32.mrf.mxu1  ;;  %14822 = vmatmul.mubr.msk.bf16.vlgmr.msra.gmra.mxu0 %vm333_vm3, %v9447_v35  ;;  %13445 = vmatmul.mubr.msk.bf16.vlgmr.msra.gmra.mxu1 %vm333_vm3, %v9711_v49  ;;  %v15489_v35 = vld [vmem:[#allocation3 + $0x918] ss:$20 sps:$4 sm:$0xff]  }
 0x6f4   :  { %v7594_v19 = vadd.f32 %v7584_v59, %v20290_v30  ;;  %v20322_v52 = vadd.f32 %v7766_v53, %v7590_v56  ;;  %9894 = vmatpush1.bf16.msra.mxu0 %v15464_v13  ;;  %14826 = vmatpush3.bf16.msra.mxu1 %v15467_v20  ;;  %v15507_v13 = vld [vmem:[#allocation3 + $0x948] ss:$20 sps:$4 sm:$0xff]  }
 0x6f5   :  { %v14727_v31 = vpop.f32.mrf.mxu0  ;;  %v7768_v26 = vpop.f32.mrf.mxu1  ;;  %9895 = vmatprep.subr.bf16.mxu0 %v15470_v32  ;;  %14827 = vmatprep.subr.bf16.mxu1 %v21504_v57 }
 0x6f6   :  { %v20325_v28 = vadd.f32 %v7768_v26, %v7591_v1  ;;  %9917 = vmatprep.mubr.bf16.mxu0 %v21501_v2  ;;  %14833 = vmatprep.mubr.msk.bf16.mxu1 %vm15960_vm2, %v21504_v57 }
 0x6f7   :  { %v7587_v30 = vpop.f32.mrf.mxu0  ;;  %v7770_v40 = vpop.f32.mrf.mxu1 }
 0x6f8   :  { %9896 = vmatpush1.bf16.msra.mxu0 %v15468_v9  ;;  %14828 = vmatpush3.bf16.msra.mxu1 %v15471_v34  ;;  %v15508_v9 = vld [vmem:[#allocation3 + $0x9b0] ss:$20 sps:$4 sm:$0xff]   ;;  %v15511_v34 = vld [vmem:[#allocation3 + $0x920] ss:$20 sps:$4 sm:$0xff]  }
 0x6f9   :  { %v14728_v14 = vpop.f32.mrf.mxu0  ;;  %9897 = vmatprep.subr.bf16.mxu0 %v15474_v63  ;;  %14829 = vmatprep.subr.bf16.mxu1 %v21504_v57  ;;  %v7771_v48 = vpop.f32.mrf.mxu1  ;;  %v15518_v40 = vld [vmem:[#allocation3 + $0x964] ss:$20 sps:$4 sm:$0xff]  }
 0x6fa   :  { %v10235_v48 = vrot.slane %v20083_v21, 7 }
 0x6fc   :  { %9898 = vmatpush1.bf16.msra.mxu0 %v15472_v17  ;;  %14830 = vmatpush3.bf16.msra.mxu1 %v15475_v51  ;;  %v15512_v17 = vld [vmem:[#allocation3 + $0x988] ss:$20 sps:$4 sm:$0xff]   ;;  %v15515_v51 = vld [vmem:[#allocation3 + $0x8f8] ss:$20 sps:$4 sm:$0xff]  }
 0x6fd   :  { %9899 = vmatprep.subr.bf16.mxu0 %v15478_v50  ;;  %14831 = vmatprep.subr.bf16.mxu1 %v21504_v57  ;;  %v15519_v50 = vld [vmem:[#allocation3 + $0x8d0] ss:$20 sps:$4 sm:$0xff]  }
 0x700   :  { %9900 = vmatpush1.bf16.msra.mxu0 %v15476_v0  ;;  %14832 = vmatpush3.bf16.msra.mxu1 %v15479_v7  ;;  %v10237_v0 = vrot.slane %v20071_v36, 7  ;;  %v15522_v7 = vld [vmem:[#allocation3 + $0x9e4] ss:$20 sps:$4 sm:$0xff]  }
 0x701   :  { %10116 = vmatprep.subr.bf16.mxu0 %v15482_v42  ;;  %10157 = vmatprep.subr.bf16.mxu1 %v15485_v3  ;;  %v15520_v3 = vld [vmem:[#allocation3 + $0x9e0] ss:$20 sps:$4 sm:$0xff]  }
 0x702   :  { %v10239_v42 = vsel %vm20078_vm8, %v10235_v48, %v10237_v0 }
 0x703   :  { %v7807_v29 = vpop.f32.mrf.mxu0  ;;  %v7848_v18 = vpop.f32.mrf.mxu1  ;;  %13446 = vmatmul.mubr.msk.bf16.vlgmr.msra.gmra.mxu0 %vm333_vm3, %v9711_v49  ;;  %14834 = vmatmul.mubr.msk.bf16.vlgmr.msra.gmra.mxu1 %vm333_vm3, %v9711_v49  ;;  %v15510_v49 = vld [vmem:[#allocation3 + $0x9b4] ss:$20 sps:$4 sm:$0xff]  }
 0x704   :  { %v7856_v11 = vadd.f32 %v7807_v29, %v20303_v43  ;;  %v20335_v15 = vadd.f32 %v7848_v18, %v7594_v19  ;;  %10117 = vmatpush1.bf16.msra.mxu0 %v15480_v23  ;;  %10158 = vmatpush1.bf16.msra.mxu1 %v15483_v54  ;;  %v15492_v43 = vld [vmem:[#allocation3 + $0x8e8] ss:$20 sps:$4 sm:$0xff]   ;;  %v15514_v19 = vld [vmem:[#allocation3 + $0x98c] ss:$20 sps:$4 sm:$0xff]  }
 0x705   :  { %v7809_v56 = vpop.f32.mrf.mxu0  ;;  %10118 = vmatprep.subr.bf16.mxu0 %v15488_v58  ;;  %10159 = vmatprep.subr.bf16.mxu1 %v15491_v60  ;;  %v14739_v24 = vpop.f32.mrf.mxu1  ;;  %v15523_v23 = vld [vmem:[#allocation3 + $0x9e8] ss:$20 sps:$4 sm:$0xff]  }
 0x706   :  { %v7857_v16 = vadd.f32 %v7809_v56, %v20307_v10  ;;  %10140 = vmatprep.mubr.bf16.mxu0 %v21501_v2  ;;  %10181 = vmatprep.mubr.bf16.mxu1 %v21501_v2  ;;  %v15501_v10 = vld [vmem:[#allocation3 + $0x8c8] ss:$20 sps:$4 sm:$0xff]   ;;  %v15531_v24 = vld [vmem:[#allocation3 + $0x998] ss:$20 sps:$4 sm:$0xff]  }
 0x707   :  { %v7811_v1 = vpop.f32.mrf.mxu0  ;;  %v7851_v62 = vpop.f32.mrf.mxu1  ;;  %v15526_v54 = vld [vmem:[#allocation3 + $0x9bc] ss:$20 sps:$4 sm:$0xff]  }
 0x708   :  { %10119 = vmatpush1.bf16.msra.mxu0 %v15486_v38  ;;  %10160 = vmatpush1.bf16.msra.mxu1 %v15489_v35  ;;  %v15524_v38 = vld [vmem:[#allocation3 + $0x9b8] ss:$20 sps:$4 sm:$0xff]   ;;  %v15527_v35 = vld [vmem:[#allocation3 + $0x9c0] ss:$20 sps:$4 sm:$0xff]  }
 0x709   :  { %v7812_v37 = vpop.f32.mrf.mxu0  ;;  %10120 = vmatprep.subr.bf16.mxu0 %v15494_v6  ;;  %10161 = vmatprep.subr.bf16.mxu1 %v15497_v4  ;;  %v14740_v45 = vpop.f32.mrf.mxu1  ;;  %v15530_v6 = vld [vmem:[#allocation3 + $0x994] ss:$20 sps:$4 sm:$0xff]   ;;  %v15528_v4 = vld [vmem:[#allocation3 + $0x990] ss:$20 sps:$4 sm:$0xff]   ;;  %v15534_v1 = vld [vmem:[#allocation3 + $0x96c] ss:$20 sps:$4 sm:$0xff]  }
 0x70a   :  { %v15538_v37 = vld [vmem:[#allocation3 + $0xa7c] ss:$20 sps:$4 sm:$0xff]   ;;  %v15539_v45 = vld [vmem:[#allocation3 + $0xa80] ss:$20 sps:$4 sm:$0xff]  }
 0x70c   :  { %10121 = vmatpush1.bf16.msra.mxu0 %v15492_v43  ;;  %10162 = vmatpush1.bf16.msra.mxu1 %v15495_v39  ;;  %v15532_v43 = vld [vmem:[#allocation3 + $0x968] ss:$20 sps:$4 sm:$0xff]   ;;  %v15535_v39 = vld [vmem:[#allocation3 + $0x970] ss:$20 sps:$4 sm:$0xff]  }
 0x70d   :  { %10122 = vmatprep.subr.bf16.mxu0 %v15500_v47  ;;  %10163 = vmatprep.subr.bf16.mxu1 %v15503_v33  ;;  %v15541_v47 = vld [vmem:[#allocation3 + $0xa84] ss:$20 sps:$4 sm:$0xff]  }
 0x70e   :  { %v15536_v33 = vld [vmem:[#allocation3 + $0xa78] ss:$20 sps:$4 sm:$0xff]  }
 0x710   :  { %10123 = vmatpush1.bf16.msra.mxu0 %v15498_v44  ;;  %10164 = vmatpush1.bf16.msra.mxu1 %v15501_v10  ;;  %v15544_v44 = vld [vmem:[#allocation3 + $0xa54] ss:$20 sps:$4 sm:$0xff]   ;;  %v15547_v10 = vld [vmem:[#allocation3 + $0xa5c] ss:$20 sps:$4 sm:$0xff]  }
 0x711   :  { %14837 = vmatprep.subr.bf16.mxu0 %v21504_v57  ;;  %10380 = vmatprep.subr.bf16.mxu1 %v15506_v5 }
 0x713   :  { %v8030_v20 = vpop.f32.mrf.mxu0  ;;  %v8071_v32 = vpop.f32.mrf.mxu1  ;;  %13468 = vmatmul.mubr.msk.bf16.vlgmr.msra.gmra.mxu0 %vm333_vm3, %v9975_v46  ;;  %13469 = vmatmul.mubr.msk.bf16.vlgmr.msra.gmra.mxu1 %vm333_vm3, %v9975_v46 }
 0x714   :  { %v8118_v55 = vadd.f32 %v8030_v20, %v20322_v52  ;;  %v20348_v61 = vadd.f32 %v8071_v32, %v7856_v11  ;;  %14838 = vmatpush3.bf16.msra.mxu0 %v15507_v13  ;;  %10381 = vmatpush1.bf16.msra.mxu1 %v15504_v41  ;;  %v15542_v41 = vld [vmem:[#allocation3 + $0xa50] ss:$20 sps:$4 sm:$0xff]   ;;  %v15545_v13 = vld [vmem:[#allocation3 + $0xa58] ss:$20 sps:$4 sm:$0xff]   ;;  %v15553_v32 = vld [vmem:[#allocation3 + $0xa34] ss:$20 sps:$4 sm:$0xff]  }
 0x715   :  { %v8032_v59 = vpop.f32.mrf.mxu0  ;;  %v8073_v53 = vpop.f32.mrf.mxu1  ;;  %14839 = vmatprep.subr.bf16.mxu0 %v21504_v57  ;;  %10382 = vmatprep.subr.bf16.mxu1 %v15510_v49  ;;  %v15550_v20 = vld [vmem:[#allocation3 + $0xa2c] ss:$20 sps:$4 sm:$0xff]  }
 0x716   :  { %v8119_v31 = vadd.f32 %v8032_v59, %v20325_v28  ;;  %v20352_v26 = vadd.f32 %v8073_v53, %v7857_v16  ;;  %14845 = vmatprep.mubr.msk.bf16.mxu0 %vm15960_vm2, %v21504_v57  ;;  %10404 = vmatprep.mubr.bf16.mxu1 %v21501_v2  ;;  %v15516_v28 = vld [vmem:[#allocation3 + $0x960] ss:$20 sps:$4 sm:$0xff]   ;;  %v15548_v59 = vld [vmem:[#allocation3 + $0xa28] ss:$20 sps:$4 sm:$0xff]   ;;  %v15551_v53 = vld [vmem:[#allocation3 + $0xa30] ss:$20 sps:$4 sm:$0xff]  }
 0x717   :  { %v8034_v52 = vpop.f32.mrf.mxu0  ;;  %v8075_v63 = vpop.f32.mrf.mxu1 }
 0x718   :  { %14840 = vmatpush3.bf16.msra.mxu0 %v15511_v34  ;;  %10383 = vmatpush1.bf16.msra.mxu1 %v15508_v9  ;;  %v15559_v52 = vld [vmem:[#allocation3 + $0xa0c] ss:$20 sps:$4 sm:$0xff]  }
 0x719   :  { %v8035_v30 = vpop.f32.mrf.mxu0  ;;  %14841 = vmatprep.subr.bf16.mxu0 %v21504_v57  ;;  %10384 = vmatprep.subr.bf16.mxu1 %v15514_v19  ;;  %v8076_v14 = vpop.f32.mrf.mxu1 }
 0x71a   :  { %v15562_v30 = vld [vmem:[#allocation3 + $0xb1c] ss:$20 sps:$4 sm:$0xff]   ;;  %v15560_v14 = vld [vmem:[#allocation3 + $0xb18] ss:$20 sps:$4 sm:$0xff]  }
 0x71c   :  { %14842 = vmatpush3.bf16.msra.mxu0 %v15515_v51  ;;  %10385 = vmatpush1.bf16.msra.mxu1 %v15512_v17  ;;  %v15554_v17 = vld [vmem:[#allocation3 + $0xa00] ss:$20 sps:$4 sm:$0xff]   ;;  %v20386_v51 = vshll.u32 %v20073_v22, 16 }
 0x71d   :  { %14843 = vmatprep.subr.bf16.mxu0 %v21504_v57  ;;  %10386 = vmatprep.subr.bf16.mxu1 %v15518_v40 }
 0x71e   :  { %v10503_v40 = vsel %vm20078_vm8, %v20066_v12, %v20386_v51 }
 0x720   :  { %14844 = vmatpush3.bf16.msra.mxu0 %v15519_v50  ;;  %10387 = vmatpush1.bf16.msra.mxu1 %v15516_v28  ;;  %v15563_v28 = vld [vmem:[#allocation3 + $0xa88] ss:$20 sps:$4 sm:$0xff]  }
 0x721   :  { %10421 = vmatprep.subr.bf16.mxu0 %v15522_v7  ;;  %14849 = vmatprep.subr.bf16.mxu1 %v21504_v57  ;;  %v15566_v50 = vld [vmem:[#allocation3 + $0xaf4] ss:$20 sps:$4 sm:$0xff]  }
 0x723   :  { %v8112_v58 = vpop.f32.mrf.mxu0  ;;  %v8294_v60 = vpop.f32.mrf.mxu1  ;;  %14846 = vmatmul.mubr.msk.bf16.vlgmr.msra.gmra.mxu0 %vm333_vm3, %v9975_v46  ;;  %13491 = vmatmul.mubr.msk.bf16.vlgmr.msra.gmra.mxu1 %vm333_vm3, %v10239_v42 }
 0x724   :  { %v8122_v36 = vadd.f32 %v8112_v58, %v20335_v15  ;;  %v20367_v21 = vadd.f32 %v8294_v60, %v8118_v55  ;;  %10422 = vmatpush1.bf16.msra.mxu0 %v15520_v3  ;;  %14850 = vmatpush3.bf16.msra.mxu1 %v15523_v23  ;;  %v15564_v3 = vld [vmem:[#allocation3 + $0xaf0] ss:$20 sps:$4 sm:$0xff]   ;;  %v15567_v23 = vld [vmem:[#allocation3 + $0xa60] ss:$20 sps:$4 sm:$0xff]  }
 0x725   :  { %v14751_v29 = vpop.f32.mrf.mxu0  ;;  %v8296_v18 = vpop.f32.mrf.mxu1  ;;  %10423 = vmatprep.subr.bf16.mxu0 %v15526_v54  ;;  %14851 = vmatprep.subr.bf16.mxu1 %v21504_v57  ;;  %v15570_v60 = vld [vmem:[#allocation3 + $0xacc] ss:$20 sps:$4 sm:$0xff]  }
 0x726   :  { %v20370_v11 = vadd.f32 %v8296_v18, %v8119_v31  ;;  %10445 = vmatprep.mubr.bf16.mxu0 %v21501_v2  ;;  %14857 = vmatprep.mubr.msk.bf16.mxu1 %vm15960_vm2, %v21504_v57  ;;  %v15556_v31 = vld [vmem:[#allocation3 + $0xa04] ss:$20 sps:$4 sm:$0xff]   ;;  %v15568_v29 = vld [vmem:[#allocation3 + $0xac8] ss:$20 sps:$4 sm:$0xff]  }
 0x727   :  { %v8115_v15 = vpop.f32.mrf.mxu0  ;;  %v8298_v56 = vpop.f32.mrf.mxu1  ;;  %v15571_v18 = vld [vmem:[#allocation3 + $0xa38] ss:$20 sps:$4 sm:$0xff]  }
 0x728   :  { %10424 = vmatpush1.bf16.msra.mxu0 %v15524_v38  ;;  %14852 = vmatpush3.bf16.msra.mxu1 %v15527_v35  ;;  %v15574_v15 = vld [vmem:[#allocation3 + $0xaa4] ss:$20 sps:$4 sm:$0xff]  }
 0x729   :  { %v14752_v16 = vpop.f32.mrf.mxu0  ;;  %10425 = vmatprep.subr.bf16.mxu0 %v15530_v6  ;;  %14853 = vmatprep.subr.bf16.mxu1 %v21504_v57  ;;  %v8299_v62 = vpop.f32.mrf.mxu1 }
 0x72a   :  { %v15578_v16 = vld [vmem:[#allocation3 + $0xb24] ss:$20 sps:$4 sm:$0xff]   ;;  %v15576_v62 = vld [vmem:[#allocation3 + $0xb20] ss:$20 sps:$4 sm:$0xff]  }
 0x72c   :  { %10426 = vmatpush1.bf16.msra.mxu0 %v15528_v4  ;;  %14854 = vmatpush3.bf16.msra.mxu1 %v15531_v24  ;;  %v15575_v4 = vld [vmem:[#allocation3 + $0xa10] ss:$20 sps:$4 sm:$0xff]   ;;  %v20407_v24 = vshrl.u32 %v20066_v12, 16 }
 0x72d   :  { %10427 = vmatprep.subr.bf16.mxu0 %v15534_v1  ;;  %14855 = vmatprep.subr.bf16.mxu1 %v21504_v57 }
 0x72e   :  { %v10767_v1 = vsel %vm20078_vm8, %v20407_v24, %v20073_v22 }
 0x730   :  { %10428 = vmatpush1.bf16.msra.mxu0 %v15532_v43  ;;  %14856 = vmatpush3.bf16.msra.mxu1 %v15535_v39  ;;  %v15579_v43 = vld [vmem:[#allocation3 + $0xb28] ss:$20 sps:$4 sm:$0xff]  }
 0x731   :  { %10644 = vmatprep.subr.bf16.mxu0 %v15538_v37  ;;  %10685 = vmatprep.subr.bf16.mxu1 %v15541_v47  ;;  %v15582_v39 = vld [vmem:[#allocation3 + $0xafc] ss:$20 sps:$4 sm:$0xff]  }
 0x733   :  { %v8335_v27 = vpop.f32.mrf.mxu0  ;;  %v8376_v25 = vpop.f32.mrf.mxu1  ;;  %13492 = vmatmul.mubr.msk.bf16.vlgmr.msra.gmra.mxu0 %vm333_vm3, %v10239_v42  ;;  %14858 = vmatmul.mubr.msk.bf16.vlgmr.msra.gmra.mxu1 %vm333_vm3, %v10239_v42 }
 0x734   :  { %v8384_v5 = vadd.f32 %v8335_v27, %v20348_v61  ;;  %v20380_v46 = vadd.f32 %v8376_v25, %v8122_v36  ;;  %10645 = vmatpush1.bf16.msra.mxu0 %v15536_v33  ;;  %10686 = vmatpush1.bf16.msra.mxu1 %v15539_v45 }
 0x735   :  { %v8337_v49 = vpop.f32.mrf.mxu0  ;;  %10646 = vmatprep.subr.bf16.mxu0 %v15544_v44  ;;  %10687 = vmatprep.subr.bf16.mxu1 %v15547_v10  ;;  %v14763_v55 = vpop.f32.mrf.mxu1  ;;  %v15580_v44 = vld [vmem:[#allocation3 + $0xaf8] ss:$20 sps:$4 sm:$0xff]   ;;  %v15583_v10 = vld [vmem:[#allocation3 + $0xb00] ss:$20 sps:$4 sm:$0xff]  }
 0x736   :  { %v8385_v9 = vadd.f32 %v8337_v49, %v20352_v26  ;;  %10668 = vmatprep.mubr.bf16.mxu0 %v21501_v2  ;;  %10709 = vmatprep.mubr.bf16.mxu1 %v21501_v2  ;;  %v15557_v26 = vld [vmem:[#allocation3 + $0xa08] ss:$20 sps:$4 sm:$0xff]   ;;  %v15584_v49 = vld [vmem:[#allocation3 + $0xad0] ss:$20 sps:$4 sm:$0xff]   ;;  %v15590_v55 = vld [vmem:[#allocation3 + $0xaac] ss:$20 sps:$4 sm:$0xff]  }
 0x737   :  { %v8339_v34 = vpop.f32.mrf.mxu0  ;;  %v8379_v61 = vpop.f32.mrf.mxu1 }
 0x738   :  { %10647 = vmatpush1.bf16.msra.mxu0 %v15542_v41  ;;  %10688 = vmatpush1.bf16.msra.mxu1 %v15545_v13  ;;  %v15588_v34 = vld [vmem:[#allocation3 + $0xaa8] ss:$20 sps:$4 sm:$0xff]   ;;  %v15591_v61 = vld [vmem:[#allocation3 + $0xab0] ss:$20 sps:$4 sm:$0xff]  }
 0x739   :  { %v8340_v19 = vpop.f32.mrf.mxu0  ;;  %10648 = vmatprep.subr.bf16.mxu0 %v15550_v20  ;;  %10689 = vmatprep.subr.bf16.mxu1 %v15553_v32  ;;  %v14764_v63 = vpop.f32.mrf.mxu1  ;;  %v15587_v20 = vld [vmem:[#allocation3 + $0xad8] ss:$20 sps:$4 sm:$0xff]  }
 0x73a   :  { %v15592_v19 = vld [vmem:[#allocation3 + $0xbb8] ss:$20 sps:$4 sm:$0xff]   ;;  %v15603_v63 = vld [vmem:[#allocation3 + $0xb9c] ss:$20 sps:$4 sm:$0xff]  }
 0x73c   :  { %10649 = vmatpush1.bf16.msra.mxu0 %v15548_v59  ;;  %10690 = vmatpush1.bf16.msra.mxu1 %v15551_v53  ;;  %v15594_v59 = vld [vmem:[#allocation3 + $0xbbc] ss:$20 sps:$4 sm:$0xff]   ;;  %v15597_v53 = vld [vmem:[#allocation3 + $0xbc4] ss:$20 sps:$4 sm:$0xff]  }
 0x73d   :  { %10650 = vmatprep.subr.bf16.mxu0 %v15556_v31  ;;  %10691 = vmatprep.subr.bf16.mxu1 %v15559_v52  ;;  %v15595_v31 = vld [vmem:[#allocation3 + $0xbc0] ss:$20 sps:$4 sm:$0xff]  }
 0x73e   :  { %v15600_v52 = vld [vmem:[#allocation3 + $0xb94] ss:$20 sps:$4 sm:$0xff]  }
 0x740   :  { %10651 = vmatpush1.bf16.msra.mxu0 %v15554_v17  ;;  %10692 = vmatpush1.bf16.msra.mxu1 %v15557_v26 }
 0x741   :  { %14861 = vmatprep.subr.bf16.mxu0 %v21504_v57  ;;  %10908 = vmatprep.subr.bf16.mxu1 %v15562_v30 }
 0x743   :  { %v8558_v48 = vpop.f32.mrf.mxu0  ;;  %v8599_v0 = vpop.f32.mrf.mxu1  ;;  %13514 = vmatmul.mubr.msk.bf16.vlgmr.msra.gmra.mxu0 %vm333_vm3, %v10503_v40  ;;  %13515 = vmatmul.mubr.msk.bf16.vlgmr.msra.gmra.mxu1 %vm333_vm3, %v10503_v40 }
 0x744   :  { %v8646_v7 = vadd.f32 %v8558_v48, %v20367_v21  ;;  %v20396_v42 = vadd.f32 %v8599_v0, %v8384_v5  ;;  %14862 = vmatpush3.bf16.msra.mxu0 %v15563_v28  ;;  %10909 = vmatpush1.bf16.msra.mxu1 %v15560_v14  ;;  %v15586_v5 = vld [vmem:[#allocation3 + $0xad4] ss:$20 sps:$4 sm:$0xff]   ;;  %v15598_v14 = vld [vmem:[#allocation3 + $0xb90] ss:$20 sps:$4 sm:$0xff]   ;;  %v15601_v28 = vld [vmem:[#allocation3 + $0xb98] ss:$20 sps:$4 sm:$0xff]  }
 0x745   :  { %v8560_v54 = vpop.f32.mrf.mxu0  ;;  %v8601_v58 = vpop.f32.mrf.mxu1  ;;  %14863 = vmatprep.subr.bf16.mxu0 %v21504_v57  ;;  %10910 = vmatprep.subr.bf16.mxu1 %v15566_v50  ;;  %v15606_v48 = vld [vmem:[#allocation3 + $0xb6c] ss:$20 sps:$4 sm:$0xff]   ;;  %v15609_v0 = vld [vmem:[#allocation3 + $0xb74] ss:$20 sps:$4 sm:$0xff]  }
 0x746   :  { %v8647_v36 = vadd.f32 %v8560_v54, %v20370_v11  ;;  %v20400_v38 = vadd.f32 %v8601_v58, %v8385_v9  ;;  %14869 = vmatprep.mubr.msk.bf16.mxu0 %vm15960_vm2, %v21504_v57  ;;  %10932 = vmatprep.mubr.bf16.mxu1 %v21501_v2  ;;  %v15572_v11 = vld [vmem:[#allocation3 + $0xaa0] ss:$20 sps:$4 sm:$0xff]   ;;  %v15604_v54 = vld [vmem:[#allocation3 + $0xb68] ss:$20 sps:$4 sm:$0xff]   ;;  %v15607_v58 = vld [vmem:[#allocation3 + $0xb70] ss:$20 sps:$4 sm:$0xff]  }
 0x747   :  { %v8562_v21 = vpop.f32.mrf.mxu0  ;;  %v8603_v35 = vpop.f32.mrf.mxu1 }
 0x748   :  { %14864 = vmatpush3.bf16.msra.mxu0 %v15567_v23  ;;  %10911 = vmatpush1.bf16.msra.mxu1 %v15564_v3  ;;  %v15615_v21 = vld [vmem:[#allocation3 + $0xb4c] ss:$20 sps:$4 sm:$0xff]  }
 0x749   :  { %v8563_v6 = vpop.f32.mrf.mxu0  ;;  %14865 = vmatprep.subr.bf16.mxu0 %v21504_v57  ;;  %10912 = vmatprep.subr.bf16.mxu1 %v15570_v60  ;;  %v8604_v56 = vpop.f32.mrf.mxu1 }
 0x74a   :  { %v11030_v6 = vrot.slane %v20386_v51, 1 }
 0x74c   :  { %14866 = vmatpush3.bf16.msra.mxu0 %v15571_v18  ;;  %10913 = vmatpush1.bf16.msra.mxu1 %v15568_v29  ;;  %v15610_v29 = vld [vmem:[#allocation3 + $0xb40] ss:$20 sps:$4 sm:$0xff]   ;;  %v11028_v18 = vrot.slane %v20066_v12, 1 }
 0x74d   :  { %14867 = vmatprep.subr.bf16.mxu0 %v21504_v57  ;;  %10914 = vmatprep.subr.bf16.mxu1 %v15574_v15  ;;  %v15618_v15 = vld [vmem:[#allocation3 + $0xc5c] ss:$20 sps:$4 sm:$0xff]  }
 0x74e   :  { %v11032_v56 = vsel %vm20078_vm8, %v11028_v18, %v11030_v6  ;;  %v15656_v18 = vld [vmem:[#allocation3 + $0xcd4] ss:$20 sps:$4 sm:$0xff]   ;;  %v15659_v6 = vld [vmem:[#allocation3 + $0xcdc] ss:$20 sps:$4 sm:$0xff]  }
 0x750   :  { %14868 = vmatpush3.bf16.msra.mxu0 %v15575_v4  ;;  %10915 = vmatpush1.bf16.msra.mxu1 %v15572_v11  ;;  %v15616_v11 = vld [vmem:[#allocation3 + $0xc58] ss:$20 sps:$4 sm:$0xff]   ;;  %v15619_v4 = vld [vmem:[#allocation3 + $0xbc8] ss:$20 sps:$4 sm:$0xff]  }
 0x751   :  { %10949 = vmatprep.subr.bf16.mxu0 %v15578_v16  ;;  %14873 = vmatprep.subr.bf16.mxu1 %v21504_v57  ;;  %v15622_v16 = vld [vmem:[#allocation3 + $0xc34] ss:$20 sps:$4 sm:$0xff]  }
 0x753   :  { %v8640_v37 = vpop.f32.mrf.mxu0  ;;  %v8822_v47 = vpop.f32.mrf.mxu1  ;;  %14870 = vmatmul.mubr.msk.bf16.vlgmr.msra.gmra.mxu0 %vm333_vm3, %v10503_v40  ;;  %13537 = vmatmul.mubr.msk.bf16.vlgmr.msra.gmra.mxu1 %vm333_vm3, %v10767_v1 }
 0x754   :  { %v8650_v33 = vadd.f32 %v8640_v37, %v20380_v46  ;;  %v20418_v45 = vadd.f32 %v8822_v47, %v8646_v7  ;;  %10950 = vmatpush1.bf16.msra.mxu0 %v15576_v62  ;;  %14874 = vmatpush3.bf16.msra.mxu1 %v15579_v43  ;;  %v15620_v37 = vld [vmem:[#allocation3 + $0xc30] ss:$20 sps:$4 sm:$0xff]   ;;  %v15623_v47 = vld [vmem:[#allocation3 + $0xba0] ss:$20 sps:$4 sm:$0xff]  }
 0x755   :  { %v14775_v27 = vpop.f32.mrf.mxu0  ;;  %v8824_v25 = vpop.f32.mrf.mxu1  ;;  %10951 = vmatprep.subr.bf16.mxu0 %v15582_v39  ;;  %14875 = vmatprep.subr.bf16.mxu1 %v21504_v57 }
 0x756   :  { %v20421_v41 = vadd.f32 %v8824_v25, %v8647_v36  ;;  %10973 = vmatprep.mubr.bf16.mxu0 %v21501_v2  ;;  %14881 = vmatprep.mubr.msk.bf16.mxu1 %vm15960_vm2, %v21504_v57  ;;  %v15612_v36 = vld [vmem:[#allocation3 + $0xb44] ss:$20 sps:$4 sm:$0xff]  }
 0x757   :  { %v8643_v46 = vpop.f32.mrf.mxu0  ;;  %v8826_v13 = vpop.f32.mrf.mxu1 }
 0x758   :  { %10952 = vmatpush1.bf16.msra.mxu0 %v15580_v44  ;;  %14876 = vmatpush3.bf16.msra.mxu1 %v15583_v10  ;;  %v15626_v10 = vld [vmem:[#allocation3 + $0xc0c] ss:$20 sps:$4 sm:$0xff]   ;;  %v15624_v46 = vld [vmem:[#allocation3 + $0xc08] ss:$20 sps:$4 sm:$0xff]  }
 0x759   :  { %v14776_v32 = vpop.f32.mrf.mxu0  ;;  %10953 = vmatprep.subr.bf16.mxu0 %v15586_v5  ;;  %14877 = vmatprep.subr.bf16.mxu1 %v21504_v57  ;;  %v8827_v9 = vpop.f32.mrf.mxu1  ;;  %v15627_v13 = vld [vmem:[#allocation3 + $0xb78] ss:$20 sps:$4 sm:$0xff]  }
 0x75a   :  { %v11292_v9 = vrot.slane %v20407_v24, 1 }
 0x75c   :  { %10954 = vmatpush1.bf16.msra.mxu0 %v15584_v49  ;;  %14878 = vmatpush3.bf16.msra.mxu1 %v15587_v20  ;;  %v15630_v20 = vld [vmem:[#allocation3 + $0xbe4] ss:$20 sps:$4 sm:$0xff]  }
 0x75d   :  { %10955 = vmatprep.subr.bf16.mxu0 %v15590_v55  ;;  %14879 = vmatprep.subr.bf16.mxu1 %v21504_v57  ;;  %v15631_v55 = vld [vmem:[#allocation3 + $0xb50] ss:$20 sps:$4 sm:$0xff]  }
 0x760   :  { %10956 = vmatpush1.bf16.msra.mxu0 %v15588_v34  ;;  %14880 = vmatpush3.bf16.msra.mxu1 %v15591_v61  ;;  %v11295_v34 = vrot.slane %v20073_v22, 1  ;;  %v15634_v61 = vld [vmem:[#allocation3 + $0xc64] ss:$20 sps:$4 sm:$0xff]  }
 0x761   :  { %11173 = vmatprep.subr.bf16.mxu0 %v15594_v59  ;;  %11214 = vmatprep.subr.bf16.mxu1 %v15597_v53  ;;  %v15632_v53 = vld [vmem:[#allocation3 + $0xc60] ss:$20 sps:$4 sm:$0xff]  }
 0x762   :  { %v11297_v59 = vsel %vm20078_vm8, %v11292_v9, %v11295_v34  ;;  %v15672_v9 = vld [vmem:[#allocation3 + $0xd98] ss:$20 sps:$4 sm:$0xff]   ;;  %v15675_v34 = vld [vmem:[#allocation3 + $0xd08] ss:$20 sps:$4 sm:$0xff]  }
 0x763   :  { %v8863_v17 = vpop.f32.mrf.mxu0  ;;  %v8904_v26 = vpop.f32.mrf.mxu1  ;;  %13538 = vmatmul.mubr.msk.bf16.vlgmr.msra.gmra.mxu0 %vm333_vm3, %v10767_v1  ;;  %14882 = vmatmul.mubr.msk.bf16.vlgmr.msra.gmra.mxu1 %vm333_vm3, %v10767_v1 }
 0x764   :  { %v8912_v30 = vadd.f32 %v8863_v17, %v20396_v42  ;;  %v20431_v40 = vadd.f32 %v8904_v26, %v8650_v33  ;;  %11174 = vmatpush1.bf16.msra.mxu0 %v15592_v19  ;;  %11215 = vmatpush1.bf16.msra.mxu1 %v15595_v31  ;;  %v15635_v19 = vld [vmem:[#allocation3 + $0xc68] ss:$20 sps:$4 sm:$0xff]  }
 0x765   :  { %v8865_v50 = vpop.f32.mrf.mxu0  ;;  %11175 = vmatprep.subr.bf16.mxu0 %v15600_v52  ;;  %11216 = vmatprep.subr.bf16.mxu1 %v15603_v63  ;;  %v14787_v7 = vpop.f32.mrf.mxu1  ;;  %v15638_v31 = vld [vmem:[#allocation3 + $0xc3c] ss:$20 sps:$4 sm:$0xff]  }
 0x766   :  { %v8913_v3 = vadd.f32 %v8865_v50, %v20400_v38  ;;  %11197 = vmatprep.mubr.bf16.mxu0 %v21501_v2  ;;  %11238 = vmatprep.mubr.bf16.mxu1 %v21501_v2  ;;  %v15613_v38 = vld [vmem:[#allocation3 + $0xb48] ss:$20 sps:$4 sm:$0xff]  }
 0x767   :  { %v8867_v23 = vpop.f32.mrf.mxu0  ;;  %v8907_v42 = vpop.f32.mrf.mxu1 }
 0x768   :  { %11176 = vmatpush1.bf16.msra.mxu0 %v15598_v14  ;;  %11217 = vmatpush1.bf16.msra.mxu1 %v15601_v28  ;;  %v15639_v14 = vld [vmem:[#allocation3 + $0xc40] ss:$20 sps:$4 sm:$0xff]   ;;  %v15643_v23 = vld [vmem:[#allocation3 + $0xc18] ss:$20 sps:$4 sm:$0xff]  }
 0x769   :  { %v8868_v60 = vpop.f32.mrf.mxu0  ;;  %11177 = vmatprep.subr.bf16.mxu0 %v15606_v48  ;;  %11218 = vmatprep.subr.bf16.mxu1 %v15609_v0  ;;  %v14788_v35 = vpop.f32.mrf.mxu1  ;;  %v15642_v48 = vld [vmem:[#allocation3 + $0xc14] ss:$20 sps:$4 sm:$0xff]  }
 0x76a   :  { %v15644_v60 = vld [vmem:[#allocation3 + $0xbe8] ss:$20 sps:$4 sm:$0xff]   ;;  %v15653_v35 = vld [vmem:[#allocation3 + $0xd04] ss:$20 sps:$4 sm:$0xff]  }
 0x76c   :  { %11178 = vmatpush1.bf16.msra.mxu0 %v15604_v54  ;;  %11219 = vmatpush1.bf16.msra.mxu1 %v15607_v58  ;;  %v15646_v54 = vld [vmem:[#allocation3 + $0xbec] ss:$20 sps:$4 sm:$0xff]  }
 0x76d   :  { %11179 = vmatprep.subr.bf16.mxu0 %v15612_v36  ;;  %11220 = vmatprep.subr.bf16.mxu1 %v15615_v21  ;;  %v15647_v36 = vld [vmem:[#allocation3 + $0xbf0] ss:$20 sps:$4 sm:$0xff]  }
 0x76e   :  { %v15650_v21 = vld [vmem:[#allocation3 + $0xcfc] ss:$20 sps:$4 sm:$0xff]  }
 0x770   :  { %11180 = vmatpush1.bf16.msra.mxu0 %v15610_v29  ;;  %11221 = vmatpush1.bf16.msra.mxu1 %v15613_v38  ;;  %v15648_v29 = vld [vmem:[#allocation3 + $0xcf8] ss:$20 sps:$4 sm:$0xff]   ;;  %v15651_v38 = vld [vmem:[#allocation3 + $0xd00] ss:$20 sps:$4 sm:$0xff]  }
 0x771   :  { %14885 = vmatprep.subr.bf16.mxu0 %v21504_v57  ;;  %11438 = vmatprep.subr.bf16.mxu1 %v15618_v15 }
 0x773   :  { %v9086_v1 = vpop.f32.mrf.mxu0  ;;  %v9127_v62 = vpop.f32.mrf.mxu1  ;;  %13560 = vmatmul.mubr.msk.bf16.vlgmr.msra.gmra.mxu0 %vm333_vm3, %v11032_v56  ;;  %13561 = vmatmul.mubr.msk.bf16.vlgmr.msra.gmra.mxu1 %vm333_vm3, %v11032_v56 }
 0x774   :  { %v9174_v43 = vadd.f32 %v9086_v1, %v20418_v45  ;;  %v20444_v39 = vadd.f32 %v9127_v62, %v8912_v30  ;;  %14886 = vmatpush3.bf16.msra.mxu0 %v15619_v4  ;;  %11439 = vmatpush1.bf16.msra.mxu1 %v15616_v11  ;;  %v15636_v30 = vld [vmem:[#allocation3 + $0xc38] ss:$20 sps:$4 sm:$0xff]  }
 0x775   :  { %v9088_v33 = vpop.f32.mrf.mxu0  ;;  %v9129_v44 = vpop.f32.mrf.mxu1  ;;  %14887 = vmatprep.subr.bf16.mxu0 %v21504_v57  ;;  %11440 = vmatprep.subr.bf16.mxu1 %v15622_v16  ;;  %v15654_v16 = vld [vmem:[#allocation3 + $0xcd0] ss:$20 sps:$4 sm:$0xff]   ;;  %v15657_v1 = vld [vmem:[#allocation3 + $0xcd8] ss:$20 sps:$4 sm:$0xff]  }
 0x776   :  { %v9175_v27 = vadd.f32 %v9088_v33, %v20421_v41  ;;  %v20448_v25 = vadd.f32 %v9129_v44, %v8913_v3  ;;  %14893 = vmatprep.mubr.msk.bf16.mxu0 %vm15960_vm2, %v21504_v57  ;;  %11462 = vmatprep.mubr.bf16.mxu1 %v21501_v2  ;;  %v15628_v41 = vld [vmem:[#allocation3 + $0xbe0] ss:$20 sps:$4 sm:$0xff]   ;;  %v15640_v3 = vld [vmem:[#allocation3 + $0xc10] ss:$20 sps:$4 sm:$0xff]  }
 0x777   :  { %v9090_v45 = vpop.f32.mrf.mxu0  ;;  %v9131_v5 = vpop.f32.mrf.mxu1 }
 0x778   :  { %14888 = vmatpush3.bf16.msra.mxu0 %v15623_v47  ;;  %11441 = vmatpush1.bf16.msra.mxu1 %v15620_v37  ;;  %v15665_v37 = vld [vmem:[#allocation3 + $0xcb4] ss:$20 sps:$4 sm:$0xff]   ;;  %v15668_v5 = vld [vmem:[#allocation3 + $0xc84] ss:$20 sps:$4 sm:$0xff]  }
 0x779   :  { %v9091_v49 = vpop.f32.mrf.mxu0  ;;  %14889 = vmatprep.subr.bf16.mxu0 %v21504_v57  ;;  %11442 = vmatprep.subr.bf16.mxu1 %v15626_v10  ;;  %v9132_v32 = vpop.f32.mrf.mxu1  ;;  %v15660_v10 = vld [vmem:[#allocation3 + $0xca8] ss:$20 sps:$4 sm:$0xff]  }
 0x77a   :  { %v15666_v49 = vld [vmem:[#allocation3 + $0xc80] ss:$20 sps:$4 sm:$0xff]   ;;  %v11559_v32 = vrot.slane %v20386_v51, 2 }
 0x77c   :  { %14890 = vmatpush3.bf16.msra.mxu0 %v15627_v13  ;;  %11443 = vmatpush1.bf16.msra.mxu1 %v15624_v46  ;;  %v15671_v46 = vld [vmem:[#allocation3 + $0xc8c] ss:$20 sps:$4 sm:$0xff]  }
 0x77d   :  { %14891 = vmatprep.subr.bf16.mxu0 %v21504_v57  ;;  %11444 = vmatprep.subr.bf16.mxu1 %v15630_v20  ;;  %v11557_v20 = vrot.slane %v20066_v12, 2 }
 0x780   :  { %14892 = vmatpush3.bf16.msra.mxu0 %v15631_v55  ;;  %11445 = vmatpush1.bf16.msra.mxu1 %v15628_v41  ;;  %v15674_v41 = vld [vmem:[#allocation3 + $0xd9c] ss:$20 sps:$4 sm:$0xff]   ;;  %v11561_v55 = vsel %vm20078_vm8, %v11557_v20, %v11559_v32 }
 0x781   :  { %11479 = vmatprep.subr.bf16.mxu0 %v15634_v61  ;;  %14897 = vmatprep.subr.bf16.mxu1 %v21504_v57  ;;  %v15678_v61 = vld [vmem:[#allocation3 + $0xd74] ss:$20 sps:$4 sm:$0xff]  }
 0x783   :  { %v9168_v52 = vpop.f32.mrf.mxu0  ;;  %v9350_v63 = vpop.f32.mrf.mxu1  ;;  %14894 = vmatmul.mubr.msk.bf16.vlgmr.msra.gmra.mxu0 %vm333_vm3, %v11032_v56  ;;  %13583 = vmatmul.mubr.msk.bf16.vlgmr.msra.gmra.mxu1 %vm333_vm3, %v11297_v59 }
 0x784   :  { %v9178_v17 = vadd.f32 %v9168_v52, %v20431_v40  ;;  %v20463_v26 = vadd.f32 %v9350_v63, %v9174_v43  ;;  %11480 = vmatpush1.bf16.msra.mxu0 %v15632_v53  ;;  %14898 = vmatpush3.bf16.msra.mxu1 %v15635_v19  ;;  %v15662_v43 = vld [vmem:[#allocation3 + $0xcac] ss:$20 sps:$4 sm:$0xff]   ;;  %v15676_v52 = vld [vmem:[#allocation3 + $0xd70] ss:$20 sps:$4 sm:$0xff]  }
 0x785   :  { %v14799_v28 = vpop.f32.mrf.mxu0  ;;  %v9352_v50 = vpop.f32.mrf.mxu1  ;;  %11481 = vmatprep.subr.bf16.mxu0 %v15638_v31  ;;  %14899 = vmatprep.subr.bf16.mxu1 %v21504_v57  ;;  %v15679_v63 = vld [vmem:[#allocation3 + $0xce0] ss:$20 sps:$4 sm:$0xff]  }
 0x786   :  { %v20466_v0 = vadd.f32 %v9352_v50, %v9175_v27  ;;  %11503 = vmatprep.mubr.bf16.mxu0 %v21501_v2  ;;  %14905 = vmatprep.mubr.msk.bf16.mxu1 %vm15960_vm2, %v21504_v57  ;;  %v15663_v27 = vld [vmem:[#allocation3 + $0xcb0] ss:$20 sps:$4 sm:$0xff]  }
 0x787   :  { %v9171_v40 = vpop.f32.mrf.mxu0  ;;  %v9354_v7 = vpop.f32.mrf.mxu1 }
 0x788   :  { %11482 = vmatpush1.bf16.msra.mxu0 %v15636_v30  ;;  %14900 = vmatpush3.bf16.msra.mxu1 %v15639_v14  ;;  %v15682_v14 = vld [vmem:[#allocation3 + $0xd4c] ss:$20 sps:$4 sm:$0xff]   ;;  %v15680_v40 = vld [vmem:[#allocation3 + $0xd48] ss:$20 sps:$4 sm:$0xff]  }
 0x789   :  { %v14800_v42 = vpop.f32.mrf.mxu0  ;;  %11483 = vmatprep.subr.bf16.mxu0 %v15642_v48  ;;  %14901 = vmatprep.subr.bf16.mxu1 %v21504_v57  ;;  %v9355_v58 = vpop.f32.mrf.mxu1  ;;  %v15683_v7 = vld [vmem:[#allocation3 + $0xcb8] ss:$20 sps:$4 sm:$0xff]  }
 0x78a   :  { %v11821_v58 = vrot.slane %v20407_v24, 2 }
 0x78c   :  { %11484 = vmatpush1.bf16.msra.mxu0 %v15640_v3  ;;  %14902 = vmatpush3.bf16.msra.mxu1 %v15643_v23  ;;  %v15686_v23 = vld [vmem:[#allocation3 + $0xd24] ss:$20 sps:$4 sm:$0xff]  }
 0x78d   :  { %11485 = vmatprep.subr.bf16.mxu0 %v15646_v54  ;;  %14903 = vmatprep.subr.bf16.mxu1 %v21504_v57  ;;  %v15687_v54 = vld [vmem:[#allocation3 + $0xc90] ss:$20 sps:$4 sm:$0xff]  }
 0x790   :  { %11486 = vmatpush1.bf16.msra.mxu0 %v15644_v60  ;;  %14904 = vmatpush3.bf16.msra.mxu1 %v15647_v36  ;;  %v11823_v60 = vrot.slane %v20073_v22, 2  ;;  %v15690_v36 = vld [vmem:[#allocation3 + $0xda4] ss:$20 sps:$4 sm:$0xff]  }
 0x791   :  { %11702 = vmatprep.subr.bf16.mxu0 %v15650_v21  ;;  %11743 = vmatprep.subr.bf16.mxu1 %v15653_v35  ;;  %v15688_v35 = vld [vmem:[#allocation3 + $0xda0] ss:$20 sps:$4 sm:$0xff]  }
 0x792   :  { %v11825_v21 = vsel %vm20078_vm8, %v11821_v58, %v11823_v60 }
 0x793   :  { %v9391_v15 = vpop.f32.mrf.mxu0  ;;  %v9432_v56 = vpop.f32.mrf.mxu1  ;;  %13584 = vmatmul.mubr.msk.bf16.vlgmr.msra.gmra.mxu0 %vm333_vm3, %v11297_v59  ;;  %14906 = vmatmul.mubr.msk.bf16.vlgmr.msra.gmra.mxu1 %vm333_vm3, %v11297_v59 }
 0x794   :  { %v9440_v11 = vadd.f32 %v9391_v15, %v20444_v39  ;;  %v20476_v4 = vadd.f32 %v9432_v56, %v9178_v17  ;;  %11703 = vmatpush1.bf16.msra.mxu0 %v15648_v29  ;;  %11744 = vmatpush1.bf16.msra.mxu1 %v15651_v38  ;;  %v15691_v29 = vld [vmem:[#allocation3 + $0xda8] ss:$20 sps:$4 sm:$0xff]   ;;  %v15692_v15 = vld [vmem:[#allocation3 + $0xd78] ss:$20 sps:$4 sm:$0xff]   ;;  %v15695_v56 = vld [vmem:[#allocation3 + $0xd80] ss:$20 sps:$4 sm:$0xff]  }
 0x795   :  { %v9393_v62 = vpop.f32.mrf.mxu0  ;;  %11704 = vmatprep.subr.bf16.mxu0 %v15656_v18  ;;  %11745 = vmatprep.subr.bf16.mxu1 %v15659_v6  ;;  %v14811_v47 = vpop.f32.mrf.mxu1  ;;  %v15694_v38 = vld [vmem:[#allocation3 + $0xd7c] ss:$20 sps:$4 sm:$0xff]  }
 0x796   :  { %v9441_v33 = vadd.f32 %v9393_v62, %v20448_v25  ;;  %11726 = vmatprep.mubr.bf16.mxu0 %v21501_v2  ;;  %11767 = vmatprep.mubr.bf16.mxu1 %v21501_v2  ;;  %v15669_v25 = vld [vmem:[#allocation3 + $0xc88] ss:$20 sps:$4 sm:$0xff]   ;;  %v15699_v47 = vld [vmem:[#allocation3 + $0xd58] ss:$20 sps:$4 sm:$0xff]  }
 0x797   :  { %v9395_v44 = vpop.f32.mrf.mxu0  ;;  %v9435_v39 = vpop.f32.mrf.mxu1 }
 0x798   :  { %11705 = vmatpush1.bf16.msra.mxu0 %v15654_v16  ;;  %11746 = vmatpush1.bf16.msra.mxu1 %v15657_v1  ;;  %v15698_v1 = vld [vmem:[#allocation3 + $0xd54] ss:$20 sps:$4 sm:$0xff]   ;;  %v15702_v44 = vld [vmem:[#allocation3 + $0xd2c] ss:$20 sps:$4 sm:$0xff]  }
 0x799   :  { %v9396_v45 = vpop.f32.mrf.mxu0  ;;  %11706 = vmatprep.subr.bf16.mxu0 %v15662_v43  ;;  %11747 = vmatprep.subr.bf16.mxu1 %v15665_v37  ;;  %v14812_v13 = vpop.f32.mrf.mxu1  ;;  %v15696_v37 = vld [vmem:[#allocation3 + $0xd50] ss:$20 sps:$4 sm:$0xff]  }
 0x79a   :  { %v15706_v45 = vld [vmem:[#allocation3 + $0xe3c] ss:$20 sps:$4 sm:$0xff]   ;;  %v15707_v13 = vld [vmem:[#allocation3 + $0xe40] ss:$20 sps:$4 sm:$0xff]  }
 0x79c   :  { %11707 = vmatpush1.bf16.msra.mxu0 %v15660_v10  ;;  %11748 = vmatpush1.bf16.msra.mxu1 %v15663_v27  ;;  %v15700_v10 = vld [vmem:[#allocation3 + $0xd28] ss:$20 sps:$4 sm:$0xff]   ;;  %v15703_v27 = vld [vmem:[#allocation3 + $0xd30] ss:$20 sps:$4 sm:$0xff]  }
 0x79d   :  { %11708 = vmatprep.subr.bf16.mxu0 %v15668_v5  ;;  %11749 = vmatprep.subr.bf16.mxu1 %v15671_v46  ;;  %v15709_v5 = vld [vmem:[#allocation3 + $0xe44] ss:$20 sps:$4 sm:$0xff]  }
 0x79e   :  { %v15704_v46 = vld [vmem:[#allocation3 + $0xe38] ss:$20 sps:$4 sm:$0xff]  }
 0x7a0   :  { %11709 = vmatpush1.bf16.msra.mxu0 %v15666_v49  ;;  %11750 = vmatpush1.bf16.msra.mxu1 %v15669_v25  ;;  %v15712_v49 = vld [vmem:[#allocation3 + $0xe14] ss:$20 sps:$4 sm:$0xff]   ;;  %v15715_v25 = vld [vmem:[#allocation3 + $0xe1c] ss:$20 sps:$4 sm:$0xff]  }
 0x7a1   :  { %14909 = vmatprep.subr.bf16.mxu0 %v21504_v57  ;;  %11966 = vmatprep.subr.bf16.mxu1 %v15674_v41 }
 0x7a3   :  { %v9614_v59 = vpop.f32.mrf.mxu0  ;;  %v9655_v53 = vpop.f32.mrf.mxu1  ;;  %13606 = vmatmul.mubr.msk.bf16.vlgmr.msra.gmra.mxu0 %vm333_vm3, %v11561_v55  ;;  %13607 = vmatmul.mubr.msk.bf16.vlgmr.msra.gmra.mxu1 %vm333_vm3, %v11561_v55 }
 0x7a4   :  { %v9702_v19 = vadd.f32 %v9614_v59, %v20463_v26  ;;  %v20489_v31 = vadd.f32 %v9655_v53, %v9440_v11  ;;  %14910 = vmatpush3.bf16.msra.mxu0 %v15675_v34  ;;  %11967 = vmatpush1.bf16.msra.mxu1 %v15672_v9  ;;  %v15710_v9 = vld [vmem:[#allocation3 + $0xe10] ss:$20 sps:$4 sm:$0xff]   ;;  %v15713_v34 = vld [vmem:[#allocation3 + $0xe18] ss:$20 sps:$4 sm:$0xff]   ;;  %v15721_v53 = vld [vmem:[#allocation3 + $0xdf4] ss:$20 sps:$4 sm:$0xff]  }
 0x7a5   :  { %v9616_v17 = vpop.f32.mrf.mxu0  ;;  %v9657_v30 = vpop.f32.mrf.mxu1  ;;  %14911 = vmatprep.subr.bf16.mxu0 %v21504_v57  ;;  %11968 = vmatprep.subr.bf16.mxu1 %v15678_v61  ;;  %v15718_v59 = vld [vmem:[#allocation3 + $0xdec] ss:$20 sps:$4 sm:$0xff]  }
 0x7a6   :  { %v9703_v28 = vadd.f32 %v9616_v17, %v20466_v0  ;;  %v20493_v50 = vadd.f32 %v9657_v30, %v9441_v33  ;;  %14917 = vmatprep.mubr.msk.bf16.mxu0 %vm15960_vm2, %v21504_v57  ;;  %11990 = vmatprep.mubr.bf16.mxu1 %v21501_v2  ;;  %v15684_v0 = vld [vmem:[#allocation3 + $0xd20] ss:$20 sps:$4 sm:$0xff]   ;;  %v15716_v17 = vld [vmem:[#allocation3 + $0xde8] ss:$20 sps:$4 sm:$0xff]   ;;  %v15719_v30 = vld [vmem:[#allocation3 + $0xdf0] ss:$20 sps:$4 sm:$0xff]  }
 0x7a7   :  { %v9618_v26 = vpop.f32.mrf.mxu0  ;;  %v9659_v48 = vpop.f32.mrf.mxu1 }
 0x7a8   :  { %14912 = vmatpush3.bf16.msra.mxu0 %v15679_v63  ;;  %11969 = vmatpush1.bf16.msra.mxu1 %v15676_v52  ;;  %v15727_v26 = vld [vmem:[#allocation3 + $0xdcc] ss:$20 sps:$4 sm:$0xff]  }
 0x7a9   :  { %v9619_v3 = vpop.f32.mrf.mxu0  ;;  %14913 = vmatprep.subr.bf16.mxu0 %v21504_v57  ;;  %11970 = vmatprep.subr.bf16.mxu1 %v15682_v14  ;;  %v9660_v42 = vpop.f32.mrf.mxu1 }
 0x7ac   :  { %14914 = vmatpush3.bf16.msra.mxu0 %v15683_v7  ;;  %11971 = vmatpush1.bf16.msra.mxu1 %v15680_v40  ;;  %v15722_v40 = vld [vmem:[#allocation3 + $0xdc0] ss:$20 sps:$4 sm:$0xff]   ;;  %v12085_v7 = vrot.slane %v20066_v12, 3 }
 0x7ad   :  { %14915 = vmatprep.subr.bf16.mxu0 %v21504_v57  ;;  %11972 = vmatprep.subr.bf16.mxu1 %v15686_v23  ;;  %v15728_v23 = vld [vmem:[#allocation3 + $0xe48] ss:$20 sps:$4 sm:$0xff]  }
 0x7b0   :  { %14916 = vmatpush3.bf16.msra.mxu0 %v15687_v54  ;;  %11973 = vmatpush1.bf16.msra.mxu1 %v15684_v0 }
 0x7b1   :  { %12007 = vmatprep.subr.bf16.mxu0 %v15690_v36  ;;  %14921 = vmatprep.subr.bf16.mxu1 %v21504_v57 }
 0x7b3   :  { %v9696_v18 = vpop.f32.mrf.mxu0  ;;  %v9878_v6 = vpop.f32.mrf.mxu1  ;;  %14918 = vmatmul.mubr.msk.bf16.vlgmr.msra.gmra.mxu0 %vm333_vm3, %v11561_v55  ;;  %13629 = vmatmul.mubr.msk.bf16.vlgmr.msra.gmra.mxu1 %vm333_vm3, %v11825_v21 }
 0x7b4   :  { %v9706_v22 = vadd.f32 %v9696_v18, %v20476_v4  ;;  %v20508_v24 = vadd.f32 %v9878_v6, %v9702_v19  ;;  %12008 = vmatpush1.bf16.msra.mxu0 %v15688_v35  ;;  %14922 = vmatpush3.bf16.msra.mxu1 %v15691_v29  ;;  %v15730_v29 = vld [vmem:[#allocation3 + $0xdf8] ss:$20 sps:$4 sm:$0xff]   ;;  %v15731_v6 = vld [vmem:[#allocation3 + $0xdd0] ss:$20 sps:$4 sm:$0xff]  }
 0x7b5   :  { %v14823_v11 = vpop.f32.mrf.mxu0  ;;  %v9880_v16 = vpop.f32.mrf.mxu1  ;;  %12009 = vmatprep.subr.bf16.mxu0 %v15694_v38  ;;  %14923 = vmatprep.subr.bf16.mxu1 %v21504_v57 }
 0x7b6   :  { %v20511_v62 = vadd.f32 %v9880_v16, %v9703_v28  ;;  %12031 = vmatprep.mubr.bf16.mxu0 %v21501_v2  ;;  %14929 = vmatprep.mubr.msk.bf16.mxu1 %vm15960_vm2, %v21504_v57  ;;  %v15724_v28 = vld [vmem:[#allocation3 + $0xdc4] ss:$20 sps:$4 sm:$0xff]  }
 0x7b7   :  { %v9699_v4 = vpop.f32.mrf.mxu0  ;;  %v9882_v43 = vpop.f32.mrf.mxu1 }
 0x7b8   :  { %12010 = vmatpush1.bf16.msra.mxu0 %v15692_v15  ;;  %14924 = vmatpush3.bf16.msra.mxu1 %v15695_v56 }
 0x7b9   :  { %v14824_v33 = vpop.f32.mrf.mxu0  ;;  %12011 = vmatprep.subr.bf16.mxu0 %v15698_v1  ;;  %14925 = vmatprep.subr.bf16.mxu1 %v21504_v57  ;;  %v9883_v39 = vpop.f32.mrf.mxu1 }
 0x7bc   :  { %12012 = vmatpush1.bf16.msra.mxu0 %v15696_v37  ;;  %14926 = vmatpush3.bf16.msra.mxu1 %v15699_v47 }
 0x7bd   :  { %12013 = vmatprep.subr.bf16.mxu0 %v15702_v44  ;;  %14927 = vmatprep.subr.bf16.mxu1 %v21504_v57 }
 0x7c0   :  { %12014 = vmatpush1.bf16.msra.mxu0 %v15700_v10  ;;  %14928 = vmatpush3.bf16.msra.mxu1 %v15703_v27 }
 0x7c1   :  { %12230 = vmatprep.subr.bf16.mxu0 %v15706_v45  ;;  %12271 = vmatprep.subr.bf16.mxu1 %v15709_v5 }
 0x7c3   :  { %v9919_v20 = vpop.f32.mrf.mxu0  ;;  %v9960_v32 = vpop.f32.mrf.mxu1  ;;  %13630 = vmatmul.mubr.msk.bf16.vlgmr.msra.gmra.mxu0 %vm333_vm3, %v11825_v21  ;;  %14930 = vmatmul.mubr.msk.bf16.vlgmr.msra.gmra.mxu1 %vm333_vm3, %v11825_v21 }
 0x7c4   :  { %v9968_v41 = vadd.f32 %v9919_v20, %v20489_v31  ;;  %v20521_v55 = vadd.f32 %v9960_v32, %v9706_v22  ;;  %12231 = vmatpush1.bf16.msra.mxu0 %v15704_v46  ;;  %12272 = vmatpush1.bf16.msra.mxu1 %v15707_v13  ;;  %v15733_v20 = vld [vmem:[%s20717_s7 + $0x38] sm:$0xff]  }
 0x7c5   :  { %v9921_v61 = vpop.f32.mrf.mxu0  ;;  %12232 = vmatprep.subr.bf16.mxu0 %v15712_v49  ;;  %12273 = vmatprep.subr.bf16.mxu1 %v15715_v25  ;;  %v14835_v19 = vpop.f32.mrf.mxu1  ;;  %v15732_v25 = vld [vmem:[%s20717_s7 + $0x78] sm:$0xff]  }
 0x7c6   :  { %v9969_v52 = vadd.f32 %v9921_v61, %v20493_v50  ;;  %12254 = vmatprep.mubr.bf16.mxu0 %v21501_v2  ;;  %12295 = vmatprep.mubr.bf16.mxu1 %v21501_v2  ;;  %v15725_v50 = vld [vmem:[#allocation3 + $0xdc8] ss:$20 sps:$4 sm:$0xff]   ;;  %v12087_v2 = vrot.slane %v20386_v51, 3  ;;  %v15729_v51 = vld [vmem:[#allocation3 + $0xe20] ss:$20 sps:$4 sm:$0xff]  }
 0x7c7   :  { %v9923_v63 = vpop.f32.mrf.mxu0  ;;  %v9963_v31 = vpop.f32.mrf.mxu1  ;;  %v15734_v32 = vld [vmem:[%s20717_s7 + $0xf8] sm:$0xff]   ;;  %v15739_v61 = vld [vmem:[%s20717_s7 + $0xb0] sm:$0xff]  }
 0x7c8   :  { %12233 = vmatpush1.bf16.msra.mxu0 %v15710_v9  ;;  %12274 = vmatpush1.bf16.msra.mxu1 %v15713_v34  ;;  %v12089_v3 = vsel %vm20078_vm8, %v12085_v7, %v12087_v2  ;;  %v15737_v9 = vld [vmem:[%s20717_s7 + $0x30] sm:$0xff]   ;;  %v15740_v63 = vld [vmem:[%s20717_s7 + $0x68] sm:$0xff]   ;;  %v15744_v7 = vld [vmem:[%s20717_s7 + $0x60] sm:$0xff]  }
 0x7c9   :  { %v9924_v14 = vpop.f32.mrf.mxu0  ;;  %12234 = vmatprep.subr.bf16.mxu0 %v15718_v59  ;;  %12275 = vmatprep.subr.bf16.mxu1 %v15721_v53  ;;  %v14836_v48 = vpop.f32.mrf.mxu1  ;;  %v15738_v34 = vld [vmem:[%s20717_s7 + $0xf0] sm:$0xff]  }
 0x7ca   :  { %v15742_v14 = vld [vmem:[%s20717_s7 + $0xe8] sm:$0xff]  }
 0x7cb   :  { %v15743_v48 = vld [vmem:[%s20717_s7 + $0xa8] sm:$0xff]  }
 0x7cc   :  { %12235 = vmatpush1.bf16.msra.mxu0 %v15716_v17  ;;  %12276 = vmatpush1.bf16.msra.mxu1 %v15719_v30  ;;  %v15741_v30 = vld [vmem:[%s20717_s7 + $0x28] sm:$0xff]  }
 0x7cd   :  { %12236 = vmatprep.subr.bf16.mxu0 %v15724_v28  ;;  %12277 = vmatprep.subr.bf16.mxu1 %v15727_v26 }
 0x7d0   :  { %12237 = vmatpush1.bf16.msra.mxu0 %v15722_v40  ;;  %12278 = vmatpush1.bf16.msra.mxu1 %v15725_v50 }
 0x7d1   :  { %14933 = vmatprep.subr.bf16.mxu0 %v21504_v57  ;;  %13992 = vmatprep.subr.bf16.mxu1 %v15732_v25 }
 0x7d3   :  { %v10142_v42 = vpop.f32.mrf.mxu0  ;;  %v10183_v0 = vpop.f32.mrf.mxu1  ;;  %13652 = vmatmul.mubr.msk.bf16.vlgmr.msra.gmra.mxu0 %vm333_vm3, %v12089_v3  ;;  %13653 = vmatmul.mubr.msk.bf16.vlgmr.msra.gmra.mxu1 %vm333_vm3, %v12089_v3 }
 0x7d4   :  { %v10230_v12 = vadd.f32 %v10142_v42, %v20508_v24  ;;  %v10232_v54 = vadd.f32 %v10183_v0, %v9968_v41  ;;  %14934 = vmatpush3.bf16.msra.mxu0 %v15728_v23  ;;  %14941 = vmatprep.mubr.msk.bf16.mxu0 %vm15960_vm2, %v21504_v57  ;;  %v15735_v41 = vld [vmem:[%s20717_s7 + $0xb8] sm:$0xff]   ;;  %v15745_v23 = vld [vmem:[%s20717_s7 + $0x20] sm:$0xff]  }
 0x7d5   :  { %v10144_v58 = vpop.f32.mrf.mxu0  ;;  %v10185_v8 = vpop.f32.mrf.mxu1  ;;  %14935 = vmatprep.subr.bf16.mxu0 %v21504_v57  ;;  %13993 = vmatpush3.bf16.msra.mxu1 %v15733_v20  ;;  %v15746_v42 = vld [vmem:[%s20717_s7 + $0xe0] sm:$0xff]  }
 0x7d6   :  { %v10231_v60 = vadd.f32 %v10144_v58, %v20511_v62  ;;  %v10233_v36 = vadd.f32 %v10185_v8, %v9969_v52  ;;  %v15747_v0 = vld [vmem:[%s20717_s7 + $0xa0] sm:$0xff]   ;;  %v15751_v58 = vld [vmem:[%s20717_s7 + $0x98] sm:$0xff]   ;;  %v15752_v8 = vld [vmem:[%s20717_s7 + $0x50] sm:$0xff]  }
 0x7d7   :  { %v10146_v21 = vpop.f32.mrf.mxu0  ;;  %v10187_v35 = vpop.f32.mrf.mxu1 }
 0x7d8   :  { %14936 = vmatpush3.bf16.msra.mxu0 %v15729_v51  ;;  %v15749_v51 = vld [vmem:[%s20717_s7 + $0x18] sm:$0xff]   ;;  %v15755_v21 = vld [vmem:[%s20717_s7 + $0x90] sm:$0xff]  }
 0x7d9   :  { %v10147_v38 = vpop.f32.mrf.mxu0  ;;  %14937 = vmatprep.subr.bf16.mxu0 %v21504_v57  ;;  %v10188_v18 = vpop.f32.mrf.mxu1 }
 0x7dc   :  { %14938 = vmatpush3.bf16.msra.mxu0 %v15730_v29 }
 0x7dd   :  { %14939 = vmatprep.subr.bf16.mxu0 %v21504_v57 }
 0x7e0   :  { %14940 = vmatpush3.bf16.msra.mxu0 %v15731_v6  ;;  %v15756_v6 = vld [vmem:[%s20717_s7 + $0x48] sm:$0xff]  }
 0x7e1   :  { %14014 = vmatprep.subr.bf16.mxu0 %v15734_v32 }
 0x7e3   :  { %v10224_v22 = vpop.f32.mrf.mxu0  ;;  %v10406_v24 = vpop.f32.mrf.mxu1  ;;  %14942 = vmatmul.mubr.msk.bf16.vlgmr.msra.gmra.mxu0 %vm333_vm3, %v12089_v3 }
 0x7e4   :  { %v10234_v15 = vadd.f32 %v10224_v22, %v20521_v55  ;;  %v10494_v56 = vadd.f32 %v10406_v24, %v10230_v12  ;;  %v15736_v55 = vld [vmem:[%s20717_s7 + $0x70] sm:$0xff]   ;;  %14015 = vmatpush3.bf16.msra.mxu0 %v15735_v41  ;;  %v15748_v12 = vld [vmem:[%s20717_s7 + $0x58] sm:$0xff]  }
 0x7e5   :  { %v14847_v11 = vpop.f32.mrf.mxu0  ;;  %v10408_v16 = vpop.f32.mrf.mxu1  ;;  %13994 = vmatprep.subr.bf16.mxu1 %v15736_v55  ;;  %14016 = vmatprep.subr.bf16.mxu0 %v15738_v34 }
 0x7e6   :  { %v10495_v1 = vadd.f32 %v10408_v16, %v10231_v60  ;;  %13995 = vmatpush3.bf16.msra.mxu1 %v15737_v9  ;;  %v15753_v60 = vld [vmem:[%s20717_s7 + $0x10] sm:$0xff]   ;;  %v15759_v16 = vld [vmem:[%s20717_s7 + $0x88] sm:$0xff]  }
 0x7e7   :  { %v10227_v62 = vpop.f32.mrf.mxu0  ;;  %v10410_v4 = vpop.f32.mrf.mxu1  ;;  %13996 = vmatprep.subr.bf16.mxu1 %v15740_v63 }
 0x7e8   :  { %14017 = vmatpush3.bf16.msra.mxu0 %v15739_v61  ;;  %v15760_v4 = vld [vmem:[%s20717_s7 + $0x40] sm:$0xff]  }
 0x7e9   :  { %v14848_v43 = vpop.f32.mrf.mxu0  ;;  %v10411_v37 = vpop.f32.mrf.mxu1  ;;  %14018 = vmatprep.subr.bf16.mxu0 %v15742_v14 }
 0x7ea   :  { %13997 = vmatpush3.bf16.msra.mxu1 %v15741_v30 }
 0x7eb   :  { %13998 = vmatprep.subr.bf16.mxu1 %v15744_v7 }
 0x7ec   :  { %14019 = vmatpush3.bf16.msra.mxu0 %v15743_v48 }
 0x7ed   :  { %14020 = vmatprep.subr.bf16.mxu0 %v15746_v42 }
 0x7ee   :  { %13999 = vmatpush3.bf16.msra.mxu1 %v15745_v23 }
 0x7ef   :  { %14000 = vmatprep.subr.bf16.mxu1 %v15748_v12 }
 0x7f0   :  { %14021 = vmatpush3.bf16.msra.mxu0 %v15747_v0 }
 0x7f2   :  { %14001 = vmatpush3.bf16.msra.mxu1 %v15749_v51 }
 0x7f3   :  { %v10447_v47 = vpop.f32.mrf.mxu0  ;;  %v10488_v33 = vpop.f32.mrf.mxu1  ;;  %14002 = vmatprep.subr.bf16.mxu1 %v15752_v8 }
 0x7f4   :  { %v10496_v44 = vadd.f32 %v10447_v47, %v10232_v54  ;;  %v20542_v39 = vadd.f32 %v10488_v33, %v10234_v15  ;;  %v15750_v54 = vld [vmem:[%s20717_s7 + $0xd8] sm:$0xff]   ;;  %v15757_v15 = vld [vmem:[%s20717_s7 + $0x8] sm:$0xff]   ;;  %v15761_v47 = vld [vmem:[%s20717_s7] sm:$0xff]  }
 0x7f5   :  { %v10449_v10 = vpop.f32.mrf.mxu0  ;;  %v14859_v27 = vpop.f32.mrf.mxu1  ;;  %14022 = vmatprep.subr.bf16.mxu0 %v15750_v54  ;;  %v15762_v33 = vld [vmem:[%s20717_s7 + $0xc0] sm:$0xff]  }
 0x7f6   :  { %v10497_v45 = vadd.f32 %v10449_v10, %v10233_v36  ;;  %14023 = vmatpush3.bf16.msra.mxu0 %v15751_v58  ;;  %v15754_v36 = vld [vmem:[%s20717_s7 + $0xd0] sm:$0xff]   ;;  %14003 = vmatpush3.bf16.msra.mxu1 %v15753_v60 }
 0x7f7   :  { %v10451_v5 = vpop.f32.mrf.mxu0  ;;  %v10491_v46 = vpop.f32.mrf.mxu1  ;;  %14024 = vmatprep.subr.bf16.mxu0 %v15754_v36  ;;  %14004 = vmatprep.subr.bf16.mxu1 %v15756_v6 }
 0x7f9   :  { %v10452_v13 = vpop.f32.mrf.mxu0  ;;  %v14860_v49 = vpop.f32.mrf.mxu1 }
 0x7fa   :  { %14025 = vmatpush3.bf16.msra.mxu0 %v15755_v21  ;;  %14005 = vmatpush3.bf16.msra.mxu1 %v15757_v15 }
 0x7fb   :  { %14006 = vmatprep.subr.bf16.mxu1 %v15760_v4 }
 0x7fe   :  { %14007 = vmatpush3.bf16.msra.mxu1 %v15761_v47 }
 0x7ff   :  { %14945 = vmatprep.subr.bf16.mxu1 %v21504_v57 }
 0x803   :  { %v10670_v59 = vpop.f32.mrf.mxu0  ;;  %v10711_v53 = vpop.f32.mrf.mxu1 }
 0x804   :  { %v10758_v19 = vadd.f32 %v10670_v59, %v10494_v56  ;;  %v20568_v52 = vadd.f32 %v10711_v53, %v10496_v44  ;;  %v15758_v56 = vld [vmem:[%s20717_s7 + $0xc8] sm:$0xff]   ;;  %v15763_v44 = vld [vmem:[%s20717_s7 + $0x80] sm:$0xff]  }
 0x805   :  { %v10672_v31 = vpop.f32.mrf.mxu0  ;;  %v10713_v17 = vpop.f32.mrf.mxu1  ;;  %14026 = vmatprep.subr.bf16.mxu0 %v15758_v56 }
 0x806   :  { %v10759_v28 = vadd.f32 %v10672_v31, %v10495_v1  ;;  %v20579_v26 = vadd.f32 %v10713_v17, %v10497_v45  ;;  %14027 = vmatpush3.bf16.msra.mxu0 %v15759_v16 }
 0x807   :  { %v10674_v40 = vpop.f32.mrf.mxu0  ;;  %v10715_v50 = vpop.f32.mrf.mxu1  ;;  %14028 = vmatprep.subr.bf16.mxu0 %v15762_v33 }
 0x809   :  { %v10675_v2 = vpop.f32.mrf.mxu0  ;;  %v10716_v3 = vpop.f32.mrf.mxu1 }
 0x80a   :  { %14029 = vmatpush3.bf16.msra.mxu0 %v15763_v44 }
 0x813   :  { %v10752_v35 = vpop.f32.mrf.mxu0  ;;  %v10934_v29 = vpop.f32.mrf.mxu1 }
 0x814   :  { %v10762_v38 = vadd.f32 %v10752_v35, %v20542_v39  ;;  %v11022_v18 = vadd.f32 %v10934_v29, %v10758_v19 }
 0x815   :  { %v14871_v22 = vpop.f32.mrf.mxu0  ;;  %v10936_v24 = vpop.f32.mrf.mxu1 }
 0x816   :  { %v11023_v11 = vadd.f32 %v10936_v24, %v10759_v28 }
 0x817   :  { %v10755_v1 = vpop.f32.mrf.mxu0  ;;  %v10938_v62 = vpop.f32.mrf.mxu1 }
 0x819   :  { %v14872_v43 = vpop.f32.mrf.mxu0  ;;  %v10939_v37 = vpop.f32.mrf.mxu1 }
 0x823   :  { %v10975_v39 = vpop.f32.mrf.mxu0  ;;  %v11016_v10 = vpop.f32.mrf.mxu1 }
 0x824   :  { %v11024_v27 = vadd.f32 %v10975_v39, %v20568_v52  ;;  %v11026_v45 = vadd.f32 %v11016_v10, %v10762_v38  ;;  %v12351_v39 = vlaneseq }
 0x825   :  { %v10977_v5 = vpop.f32.mrf.mxu0  ;;  %v14883_v46 = vpop.f32.mrf.mxu1 }
 0x826   :  { %v11025_v13 = vadd.f32 %v10977_v5, %v20579_v26  ;;  %v20654_v46 = vshrl.u32 %v12351_v39, 7 }
 0x827   :  { %v10979_v49 = vpop.f32.mrf.mxu0  ;;  %v11019_v25 = vpop.f32.mrf.mxu1 }
 0x828   :  { %v12361_v49 = vsub.s32 2, %v20654_v46 }
 0x829   :  { %v10980_v20 = vpop.f32.mrf.mxu0  ;;  %v14884_v32 = vpop.f32.mrf.mxu1 }
 0x82a   :  { %v20658_v20 = vld [vmem:[#allocation13] sm:$0x1f]  ;;  %v12357_v32 = vsub.s32 1, %v20654_v46 }
 0x833   :  { %v11199_v41 = vpop.f32.mrf.mxu0  ;;  %v11240_v55 = vpop.f32.mrf.mxu1 }
 0x834   :  { %v11287_v9 = vadd.f32 %v11199_v41, %v11022_v18  ;;  %v11289_v34 = vadd.f32 %v11240_v55, %v11024_v27  ;;  %v12365_v41 = vsub.s32 3, %v20654_v46 }
 0x835   :  { %v11201_v61 = vpop.f32.mrf.mxu0  ;;  %v11242_v59 = vpop.f32.mrf.mxu1 }
 0x836   :  { %v11288_v53 = vadd.f32 %v11201_v61, %v11023_v11  ;;  %v11290_v19 = vadd.f32 %v11242_v59, %v11025_v13  ;;  %v12353_v13 = vsub.s32 0, %v20654_v46 }
 0x837   :  { %v11203_v63 = vpop.f32.mrf.mxu0  ;;  %v11244_v31 = vpop.f32.mrf.mxu1 }
 0x838   :  { %v12354_v59 = vrot.slane %v20658_v20, %v12353_v13 }
 0x839   :  { %v11204_v52 = vpop.f32.mrf.mxu0  ;;  %v11245_v17 = vpop.f32.mrf.mxu1 }
 0x843   :  { %v11281_v30 = vpop.f32.mrf.mxu0  ;;  %v11464_v14 = vpop.f32.mrf.mxu1 }
 0x844   :  { %v11291_v28 = vadd.f32 %v11281_v30, %v11026_v45  ;;  %v11552_v26 = vadd.f32 %v11464_v14, %v11287_v9 }
 0x845   :  { %v14895_v48 = vpop.f32.mrf.mxu0  ;;  %v11466_v40 = vpop.f32.mrf.mxu1 }
 0x846   :  { %v11553_v50 = vadd.f32 %v11466_v40, %v11288_v53  ;;  %v12362_v53 = vrot.slane %v20658_v20, %v12361_v49 }
 0x847   :  { %v11284_v7 = vpop.f32.mrf.mxu0  ;;  %v11468_v2 = vpop.f32.mrf.mxu1 }
 0x849   :  { %v14896_v3 = vpop.f32.mrf.mxu0  ;;  %v11469_v23 = vpop.f32.mrf.mxu1 }
 0x853   :  { %v11505_v42 = vpop.f32.mrf.mxu0  ;;  %v11546_v0 = vpop.f32.mrf.mxu1 }
 0x854   :  { %v20648_v12 = vadd.f32 %v11546_v0, %v11291_v28  ;;  %v11554_v25 = vadd.f32 %v11505_v42, %v11289_v34  ;;  %v12358_v34 = vrot.slane %v20658_v20, %v12357_v32  ;;  %v12366_v28 = vrot.slane %v20658_v20, %v12365_v41 }
 0x855   :  { %v11507_v54 = vpop.f32.mrf.mxu0  ;;  %v14907_v51 = vpop.f32.mrf.mxu1 }
 0x856   :  { %v11555_v55 = vadd.f32 %v11507_v54, %v11290_v19 }
 0x857   :  { %v11509_v58 = vpop.f32.mrf.mxu0  ;;  %v11549_v8 = vpop.f32.mrf.mxu1 }
 0x859   :  { %v11510_v60 = vpop.f32.mrf.mxu0  ;;  %v14908_v36 = vpop.f32.mrf.mxu1 }
 0x863   :  { %v11728_v21 = vpop.f32.mrf.mxu0  ;;  %v11769_v35 = vpop.f32.mrf.mxu1 }
 0x864   :  { %v11816_v9 = vadd.f32 %v11728_v21, %v11552_v26  ;;  %v11818_v61 = vadd.f32 %v11769_v35, %v11554_v25 }
 0x865   :  { %v11730_v29 = vpop.f32.mrf.mxu0  ;;  %v11771_v38 = vpop.f32.mrf.mxu1 }
 0x866   :  { %v11817_v63 = vadd.f32 %v11730_v29, %v11553_v50  ;;  %v11819_v31 = vadd.f32 %v11771_v38, %v11555_v55 }
 0x867   :  { %v11732_v18 = vpop.f32.mrf.mxu0  ;;  %v11773_v6 = vpop.f32.mrf.mxu1 }
 0x868   :  { %v15764_v6 = vld [vmem:[%s20717_s7 + $0x138] sm:$0xff]  }
 0x869   :  { %v11733_v22 = vpop.f32.mrf.mxu0  ;;  %v11774_v24 = vpop.f32.mrf.mxu1 }
 0x873   :  { %v20650_v15 = vpop.f32.mrf.mxu0  ;;  %v11992_v56 = vpop.f32.mrf.mxu1 }
 0x874   :  { %v12080_v52 = vadd.f32 %v11992_v56, %v11816_v9  ;;  %v15765_v56 = vld [vmem:[%s20717_s7 + $0x130] sm:$0xff]  }
 0x875   :  { %v14919_v11 = vpop.f32.mrf.mxu0  ;;  %v11994_v16 = vpop.f32.mrf.mxu1 }
 0x876   :  { %v12081_v48 = vadd.f32 %v11994_v16, %v11817_v63  ;;  %v15766_v16 = vld [vmem:[%s20717_s7 + $0x128] sm:$0xff]  }
 0x877   :  { %v11813_v1 = vpop.f32.mrf.mxu0  ;;  %v11996_v62 = vpop.f32.mrf.mxu1 }
 0x879   :  { %v14920_v4 = vpop.f32.mrf.mxu0  ;;  %v11997_v43 = vpop.f32.mrf.mxu1 }
 0x87a   :  { %v15767_v4 = vld [vmem:[%s20717_s7 + $0x120] sm:$0xff]  }
 0x883   :  { %v12033_v37 = vpop.f32.mrf.mxu0  ;;  %v20652_v47 = vpop.f32.mrf.mxu1 }
 0x884   :  { %v12082_v17 = vadd.f32 %v12033_v37, %v11818_v61  ;;  %v15768_v37 = vld [vmem:[%s20717_s7 + $0x118] sm:$0xff]  }
 0x885   :  { %v12035_v33 = vpop.f32.mrf.mxu0  ;;  %v14931_v44 = vpop.f32.mrf.mxu1 }
 0x886   :  { %v12083_v40 = vadd.f32 %v12035_v33, %v11819_v31  ;;  %v11820_v33 = vadd.f32 %v20650_v15, %v20648_v12  ;;  %v12369_v44 = vsub.s32 4, %v20654_v46  ;;  %v15770_v12 = vld [vmem:[%s20717_s7 + $0x108] sm:$0xff]  }
 0x887   :  { %v12037_v10 = vpop.f32.mrf.mxu0  ;;  %v12077_v27 = vpop.f32.mrf.mxu1 }
 0x888   :  { %v12084_v39 = vadd.f32 %v20652_v47, %v11820_v33  ;;  %v15769_v10 = vld [vmem:[%s20717_s7 + $0x110] sm:$0xff]   ;;  %v15771_v47 = vld [vmem:[%s20717_s7 + $0x100] sm:$0xff]   ;;  %s15964_s7 = smov [#allocation16]  }
 0x889   :  { %v12038_v45 = vpop.f32.mrf.mxu0  ;;  %v14932_v5 = vpop.f32.mrf.mxu1  ;;  %s12858_s0 = sshll.u32 %s15964_s7, 4  ;;  %s12859_s0 = int_to_ptr.vmem [resolvable:$true] %s12858_s0 }
 0x88a   :  { %v12370_v45 = vrot.slane %v20658_v20, %v12369_v44  ;;  %s15916_s25 = scalar_lea.vmem %s12859_s0, 32  ;;  %p15921_p8 = scmp.lt.s32.totalorder %s12859_s0, %s12859_s0 }
 0x88b   :  { %p15917_p7 = scmp.ne.s32.totalorder %s12859_s0, %s15916_s25  ;;  %p15922_p9 = scmp.lt.s32.totalorder %s15916_s25, %s15916_s25 }
 0x88d   :  { %p15923_p10 = por %p15922_p9, %p15921_p8 }
 0x88f   :  { %p15924_p11 = pnand %p15923_p10, %p15917_p7 }
 0x893   :  { %v12256_v30 = vpop.f32.mrf.mxu0  ;;  %v12297_v14 = vpop.f32.mrf.mxu1 }
 0x894   :  { %v12344_v7 = vadd.f32 %v12256_v30, %v12080_v52  ;;  %v12346_v19 = vadd.f32 %v12297_v14, %v12082_v17 }
 0x895   :  { %v12258_v26 = vpop.f32.mrf.mxu0  ;;  %v12299_v2 = vpop.f32.mrf.mxu1 }
 0x896   :  { %v12376_v3 = vadd.f32 %v12354_v59, %v12344_v7  ;;  %v12378_v23 = vadd.f32 %v12362_v53, %v12346_v19  ;;  %v12345_v42 = vadd.f32 %v12258_v26, %v12081_v48  ;;  %v12347_v0 = vadd.f32 %v12299_v2, %v12083_v40  ;;  %v13655_v59 = vld [vmem:[#allocation14] ss:$0 sm:$0xff] }
 0x897   :  { %v12260_v50 = vpop.f32.mrf.mxu0  ;;  %v12301_v54 = vpop.f32.mrf.mxu1 }
 0x898   :  { %v12377_v51 = vadd.f32 %v12358_v34, %v12345_v42  ;;  %v12379_v58 = vadd.f32 %v12366_v28, %v12347_v0  ;;  %v12381_v8 = vmax.f32 %v12376_v3, 0.0  ;;  %v12383_v60 = vmax.f32 %v12378_v23, 0.0 }
 0x899   :  { %v12261_v36 = vpop.f32.mrf.mxu0  ;;  %v12302_v21 = vpop.f32.mrf.mxu1 }
 0x89a   :  { %v12382_v35 = vmax.f32 %v12377_v51, 0.0  ;;  %v12384_v29 = vmax.f32 %v12379_v58, 0.0  ;;  %v12386_v22 = vpack.c.bf16 %v12381_v8, %v12381_v8  ;;  %v12388_v24 = vpack.c.bf16 %v12383_v60, %v12383_v60 }
 0x89c   :  { %v12387_v38 = vpack.c.bf16 %v12382_v35, %v12382_v35  ;;  %v12389_v18 = vpack.c.bf16 %v12384_v29, %v12384_v29 }
 0x89e   :  { %12750 = vmatprep.mubr.bf16.mxu1 %v12387_v38  ;;  %12790 = vmatprep.mubr.bf16.mxu0 %v12389_v18 }
 0x89f   :  { %12751 = vmatmul.mubr.bf16.vlgmr.msra.gmra.mxu1 %v12386_v22  ;;  %12791 = vmatmul.mubr.bf16.vlgmr.msra.gmra.mxu0 %v12388_v24 }
 0x8a0   :  { %14946 = vmatpush3.bf16.msra.mxu1 %v15764_v6  ;;  %14961 = vmatprep.mubr.msk.bf16.mxu1 %vm15960_vm2, %v21504_v57 }
 0x8a1   :  { %14947 = vmatprep.subr.bf16.mxu1 %v21504_v57 }
 0x8a3   :  { %v12338_v11 = vpop.f32.mrf.mxu0 }
 0x8a4   :  { %14948 = vmatpush3.bf16.msra.mxu1 %v15765_v56  ;;  %v12348_v27 = vadd.f32 %v12338_v11, %v12084_v39 }
 0x8a5   :  { %14949 = vmatprep.subr.bf16.mxu1 %v21504_v57  ;;  %v14943_v1 = vpop.f32.mrf.mxu0 }
 0x8a6   :  { %v12380_v15 = vadd.f32 %v12370_v45, %v12348_v27 }
 0x8a7   :  { %v12341_v62 = vpop.f32.mrf.mxu0 }
 0x8a8   :  { %14950 = vmatpush3.bf16.msra.mxu1 %v15766_v16  ;;  %v12385_v5 = vmax.f32 %v12380_v15, 0.0 }
 0x8a9   :  { %14951 = vmatprep.subr.bf16.mxu1 %v21504_v57  ;;  %v14944_v43 = vpop.f32.mrf.mxu0 }
 0x8aa   :  { %v12390_v46 = vpack.c.bf16 %v12385_v5, %v12385_v5 }
 0x8ac   :  { %14952 = vmatpush3.bf16.msra.mxu1 %v15767_v4 }
 0x8ad   :  { %14953 = vmatprep.subr.bf16.mxu1 %v21504_v57 }
 0x8b0   :  { %14954 = vmatpush3.bf16.msra.mxu1 %v15768_v37 }
 0x8b1   :  { %14955 = vmatprep.subr.bf16.mxu1 %v21504_v57 }
 0x8b4   :  { %14956 = vmatpush3.bf16.msra.mxu1 %v15769_v10 }
 0x8b5   :  { %14957 = vmatprep.subr.bf16.mxu1 %v21504_v57 }
 0x8b8   :  { %14958 = vmatpush3.bf16.msra.mxu1 %v15770_v12 }
 0x8b9   :  { %14959 = vmatprep.subr.bf16.mxu1 %v21504_v57 }
 0x8bc   :  { %14960 = vmatpush3.bf16.msra.mxu1 %v15771_v47 }
 0x8bf   :  { %14962 = vmatmul.mubr.bf16.vlgmr.msra.gmra.mxu1 %v12390_v46 }
 0x95f   :  { %v14008_v13 = vpop.f32.mrf.mxu1  ;;  %v14030_v49 = vpop.f32.mrf.mxu0 }
 0x961   :  { %v14009_v25 = vpop.f32.mrf.mxu1  ;;  %v14031_v20 = vpop.f32.mrf.mxu0 }
 0x962   :  { %v14010_v61 = vadd.f32 %v14009_v25, %v14008_v13  ;;  %v14032_v63 = vadd.f32 %v14031_v20, %v14030_v49 }
 0x963   :  { %v14011_v32 = vpop.f32.mrf.mxu1  ;;  %v14033_v41 = vpop.f32.mrf.mxu0 }
 0x964   :  { %v12753_v53 = vadd.f32 %v14010_v61, %v13655_v59 }
 0x965   :  { %v14012_v55 = vpop.f32.mrf.mxu1  ;;  %v14034_v9 = vpop.f32.mrf.mxu0 }
 0x966   :  { %v12793_v31 = vadd.f32 %v14032_v63, %v12753_v53 }
 0x97f   :  { %v12832_v52 = vpop.f32.mrf.mxu1 }
 0x980   :  { %v12833_v17 = vadd.f32 %v12832_v52, %v12793_v31 }
 0x981   :  { %v14963_v57 = vpop.f32.mrf.mxu1 }
 0x982   :  { %v12839_v30 = vsel %vm12838_vm9, %v12833_v17, -inf }
 0x983   :  { %v12835_v14 = vpop.f32.mrf.mxu1  ;;  %12840 = vmax.xlane.f32.xlu0 %v12839_v30 }
 0x985   :  { %v14964_v34 = vpop.f32.mrf.mxu1 }
 0xa0c   :  { %v12841_v28 = vpop.xlane.xlu0 %12840 }
 0xa0d   :  { %v12842_v48 = vsub.f32 %v12833_v17, %v12841_v28 }
 0xa0f   :  { %v12843_v40 = vmul.f32 1.442695, %v12842_v48 }
 0xa11   :  { %15772 = vpow2.f32 %v12843_v40 }
 0xa1e   :  { %v15773_v7 = vpop.eup %15772 }
 0xa1f   :  { %v12845_v19 = vsel %vm12838_vm9, %v15773_v7, 0.0 }
 0xa20   :  { %12846 = vadd.xlane.f32.xlu0 %v12845_v19 }
 0xaa9   :  { %v12847_v26 = vpop.xlane.xlu0 %12846 }
 0xaaa   :  { %15774 = vlog2.f32 %v12847_v26 }
 0xab7   :  { %v15775_v2 = vpop.eup %15774 }
 0xab8   :  { %v12849_v3 = vmul.f32 0.6931472, %v15775_v2 }
 0xaba   :  { %v12850_v23 = vsub.f32 %v12842_v48, %v12849_v3 }
 0xabc   :  { %12851 = vst.msk [vmem:[#allocation16] sm:$0x3] %vm12838_vm9, %v12850_v23 }
 0xabd   :  { %15927 = shalt.err (!%p15924_p11)
}
 0xabe   :  { %12861 = dma.vmem_to_hbm [thread:$0]  %s12859_s0, 32, %s20719_s9, [#allocation7]  }
 0xabf   :  { %15946 = dma.done.wait [#allocation7], 32  }
 0xac0   :  { %15947 = vsyncadd [#allocation7], 4294967264 }
 0xac1   :  { %12865 = vsyncpa [#allocation6], 1 }
 0xac2   :  { %12866 = vsyncpa [#allocation9], 1 }
 0xac3   :  { %12867 = vsyncpa [#allocation12], 1 }
 0xac4   :  { %12868 = vsyncpa [#allocation15], 1 }
 0xac5   :  { %12869 = vsyncpa [#allocation7], 1 }
 0xac6   :  { %12870 = vsyncmov [#allocation4] }
 0xac9   :  { %s12871_s27 = vpop.sfrf %12870 }
 0xaca   :  { %p13696_p12 = scmp.ne.s32.totalorder %s12871_s27, 0 }
 0xacc   :  { %12875 = shalt.err (%p13696_p12)  }

</bundles_post_ra>
